<compile_context>
chip_gen: v7x
topology: tpu7x:2x2x1
jax: 0.10.0
libtpu: 0.0.40
codegen_flags: <defaults>
</compile_context>

<pallas_src>
import jax
import jax.numpy as jnp
from jax.experimental import pallas as pl
from jax.experimental.pallas import tpu as pltpu

LANE = 128                  # every matmul output is padded to this lane width
ROW_GRANULE = 16            # sublane granule (covers bf16 (16,128) packing)
TILE_M = 2048               # row tile for the conv1 matmul grid
MAX_BATCH_TILE = 64         # samples per grid step for the fused conv2+fc kernel
VMEM_LIMIT = 32 * 1024 * 1024   # explicit scoped-VMEM cap (safe on v5e/v6e/v7x)


def _round_up(x, m):
    return ((x + m - 1) // m) * m


def _pad_rows(x, rows):
    pad = rows - x.shape[0]
    if pad:
        x = jnp.pad(x, ((0, pad), (0, 0)))
    return x


# ---------------------------------------------------------------------------
# Kernel 1: conv1 (as matmul) + bias + ReLU + fused 2x2 max-pool.
# The 4 inputs are the im2col patch matrices of the 4 pool-window corners.
# Running max keeps at most two full MXU results live at once.
# ---------------------------------------------------------------------------
def _conv_pool_kernel(a0_ref, a1_ref, a2_ref, a3_ref, w_ref, b_ref, o_ref):
    w = w_ref[...]
    m = jnp.dot(a0_ref[...], w, preferred_element_type=jnp.float32)
    m = jnp.maximum(m, jnp.dot(a1_ref[...], w, preferred_element_type=jnp.float32))
    m = jnp.maximum(m, jnp.dot(a2_ref[...], w, preferred_element_type=jnp.float32))
    m = jnp.maximum(m, jnp.dot(a3_ref[...], w, preferred_element_type=jnp.float32))
    o_ref[...] = jnp.maximum(m + b_ref[...], 0.0).astype(o_ref.dtype)


def conv_relu_pool(corners, w_pad, b_pad):
    """corners: 4 x (M, K) pool-corner patch matrices (rows = b-major positions).
    w_pad: (K, 128) bf16, b_pad: (1, 128) f32.  Returns (Mp, 128) bf16."""
    m_rows, k = corners[0].shape
    n = w_pad.shape[1]
    # Tile so the grid has >= 2 steps even at tiny batch (v7x: both TCs busy).
    half = _round_up(-(-m_rows // 2), ROW_GRANULE)
    tm = max(ROW_GRANULE, min(TILE_M, half))
    mp = _round_up(max(m_rows, 2 * tm), tm)
    corners = [_pad_rows(c, mp).astype(jnp.bfloat16) for c in corners]

    a_spec = pl.BlockSpec((tm, k), lambda i: (i, 0))
    return pl.pallas_call(
        _conv_pool_kernel,
        out_shape=jax.ShapeDtypeStruct((mp, n), jnp.bfloat16),
        grid=(mp // tm,),
        in_specs=[a_spec, a_spec, a_spec, a_spec,
                  pl.BlockSpec((k, n), lambda i: (0, 0)),
                  pl.BlockSpec((1, n), lambda i: (0, 0))],
        out_specs=pl.BlockSpec((tm, n), lambda i: (i, 0)),
        compiler_params=pltpu.CompilerParams(
            dimension_semantics=("parallel",),
            vmem_limit_bytes=VMEM_LIMIT),
    )(*corners, w_pad, b_pad)


# ---------------------------------------------------------------------------
# Kernel 2: fused conv2 + ReLU + 2x2 maxpool + fc1 + ReLU + fc2 + ReLU + fc3
# + log_softmax, gridded over batch chunks.  The conv2 pool-corner patches
# arrive as (S=25, B, 150) tensors (spatial-position major); for each spatial
# position the pooled/ReLU'd conv2 row block (BB, 128) is contracted straight
# into the fc1 accumulator, so the conv2 activations never touch HBM.
# ---------------------------------------------------------------------------
def _conv2_fc_kernel(c0_ref, c1_ref, c2_ref, c3_ref,
                     w2_ref, b2_ref, wf1_ref, bf1_ref,
                     wf2_ref, bf2_ref, wf3_ref, bf3_ref, o_ref):
    bb = c0_ref.shape[1]
    w2 = w2_ref[...]
    b2 = b2_ref[...]
    acc = jnp.zeros((bb, wf1_ref.shape[2]), jnp.float32)
    for s in range(c0_ref.shape[0]):
        # conv2 at the 4 pool-window corners of pooled position s: running max.
        m = jnp.dot(c0_ref[s], w2, preferred_element_type=jnp.float32)
        m = jnp.maximum(m, jnp.dot(c1_ref[s], w2, preferred_element_type=jnp.float32))
        m = jnp.maximum(m, jnp.dot(c2_ref[s], w2, preferred_element_type=jnp.float32))
        m = jnp.maximum(m, jnp.dot(c3_ref[s], w2, preferred_element_type=jnp.float32))
        h2 = jnp.maximum(m + b2, 0.0)                          # (BB, 128)
        # fc1 contribution of this spatial position (stays in vregs/VMEM).
        acc = acc + jnp.dot(h2.astype(jnp.bfloat16), wf1_ref[s],
                            preferred_element_type=jnp.float32)
    h = jnp.maximum(acc + bf1_ref[...], 0.0)                   # fc1 + ReLU
    h = jnp.dot(h.astype(jnp.bfloat16), wf2_ref[...],
                preferred_element_type=jnp.float32)
    h = jnp.maximum(h + bf2_ref[...], 0.0)                     # fc2 + ReLU
    h = jnp.dot(h.astype(jnp.bfloat16), wf3_ref[...],
                preferred_element_type=jnp.float32)
    logits = h + bf3_ref[...]          # padded lanes carry the -1e9 sentinel
    mx = jnp.max(logits, axis=-1, keepdims=True)
    sh = logits - mx
    lse = jnp.log(jnp.sum(jnp.exp(sh), axis=-1, keepdims=True))
    # Output stays f32: the -1e9 padded-logit trick does not survive a bf16
    # cast; only lanes [:10] are consumed by the caller.
    o_ref[...] = (sh - lse).astype(o_ref.dtype)


def conv2_fc_head(corners, prep, bb):
    """corners: 4 x (25, Bp, 150) bf16 conv2 pool-corner patch tensors."""
    s_pos, bp, k = corners[0].shape

    c_spec = pl.BlockSpec((s_pos, bb, k), lambda i: (0, i, 0))

    def wspec(arr):
        return pl.BlockSpec(arr.shape, lambda i: (0,) * arr.ndim)

    return pl.pallas_call(
        _conv2_fc_kernel,
        out_shape=jax.ShapeDtypeStruct((bp, LANE), jnp.float32),
        grid=(bp // bb,),
        in_specs=[c_spec, c_spec, c_spec, c_spec,
                  wspec(prep["w2"]), wspec(prep["b2"]),
                  wspec(prep["wf1"]), wspec(prep["bf1"]),
                  wspec(prep["wf2"]), wspec(prep["bf2"]),
                  wspec(prep["wf3"]), wspec(prep["bf3"])],
        out_specs=pl.BlockSpec((bb, LANE), lambda i: (i, 0)),
        compiler_params=pltpu.CompilerParams(
            dimension_semantics=("parallel",),
            vmem_limit_bytes=VMEM_LIMIT),
    )(*corners, prep["w2"], prep["b2"], prep["wf1"], prep["bf1"],
      prep["wf2"], prep["bf2"], prep["wf3"], prep["bf3"])


# ---------------------------------------------------------------------------
# Plain-JAX glue: pool-corner im2col (one patch tensor per 2x2 pool corner).
# ---------------------------------------------------------------------------
def _corner_patch_tensors(x_nhwc, k, pool):
    """Returns pool*pool tensors of shape (B, Ho2*Wo2, C*k*k); column order is
    (c, ky, kx), matching PyTorch Conv2d weight flattening."""
    b, h, w, c = x_nhwc.shape
    ho, wo = h - k + 1, w - k + 1
    ho2, wo2 = ho // pool, wo // pool
    mats = []
    for dy in range(pool):
        for dx in range(pool):
            cols = []
            for cc in range(c):
                for ky in range(k):
                    for kx in range(k):
                        cols.append(
                            x_nhwc[:,
                                   dy + ky: dy + ky + pool * ho2: pool,
                                   dx + kx: dx + kx + pool * wo2: pool,
                                   cc])
            patches = jnp.stack(cols, axis=-1)        # (B, ho2, wo2, C*k*k)
            mats.append(patches.reshape(b, ho2 * wo2, c * k * k))
    return mats, (ho2, wo2)


# ---------------------------------------------------------------------------
# Parameters: PyTorch-layout init + one-time (outside jit) re-layout.
# ---------------------------------------------------------------------------
def init_params(key):
    ks = jax.random.split(key, 10)

    def w(k, shape, fan_in):
        return jax.random.normal(k, shape, jnp.float32) / jnp.sqrt(fan_in)

    return {
        "conv1_w": w(ks[0], (6, 1, 5, 5), 25),
        "conv1_b": w(ks[1], (6,), 25),
        "conv2_w": w(ks[2], (16, 6, 5, 5), 150),
        "conv2_b": w(ks[3], (16,), 150),
        "fc1_w": w(ks[4], (120, 400), 400),
        "fc1_b": w(ks[5], (120,), 400),
        "fc2_w": w(ks[6], (84, 120), 120),
        "fc2_b": w(ks[7], (84,), 120),
        "fc3_w": w(ks[8], (10, 84), 84),
        "fc3_b": w(ks[9], (10,), 84),
    }


def prepare_params(p):
    """One-time weight re-layout: transpose, zero-pad to 128 lanes, express fc1
    as 25 per-spatial-position (128,128) blocks, -1e9 bias on padded fc3 lanes."""
    f32, bf16 = jnp.float32, jnp.bfloat16

    def pad_cols(mat, rows, cols):
        out = jnp.zeros((rows, cols), f32)
        return out.at[:mat.shape[0], :mat.shape[1]].set(mat)

    w1 = p["conv1_w"].reshape(6, 25).T                       # (25, 6)
    w2 = p["conv2_w"].reshape(16, 150).T                     # (150, 16)

    # fc1 consumes the pooled conv2 output per spatial position s in its
    # 128-lane channel layout: wf1[s, c, o] = fc1_w[o, c*25 + s].
    w_fc1 = p["fc1_w"].T.reshape(16, 25, 120)                # [c, s, o]
    w_fc1 = jnp.transpose(w_fc1, (1, 0, 2))                  # [s, c, o]
    wf1 = jnp.zeros((25, LANE, LANE), f32).at[:, :16, :120].set(w_fc1)

    b3 = jnp.full((1, LANE), -1e9, f32).at[0, :10].set(p["fc3_b"])

    return {
        "w1": pad_cols(w1, 25, LANE).astype(bf16),
        "b1": pad_cols(p["conv1_b"][None, :], 1, LANE),
        "w2": pad_cols(w2, 150, LANE).astype(bf16),
        "b2": pad_cols(p["conv2_b"][None, :], 1, LANE),
        "wf1": wf1.astype(bf16),
        "bf1": pad_cols(p["fc1_b"][None, :], 1, LANE),
        "wf2": pad_cols(p["fc2_w"].T, LANE, LANE).astype(bf16),
        "bf2": pad_cols(p["fc2_b"][None, :], 1, LANE),
        "wf3": pad_cols(p["fc3_w"].T, LANE, LANE).astype(bf16),
        "bf3": b3,
    }


# ---------------------------------------------------------------------------
# Forward pass (2 pallas_calls)
# ---------------------------------------------------------------------------
def lenet5_forward(prep, x_nchw):
    b = x_nchw.shape[0]

    # conv1 uses 2-pixel zero padding (PyTorch padding=2); C_in == 1.
    x = x_nchw[:, 0, :, :]
    x = jnp.pad(x, ((0, 0), (2, 2), (2, 2)))[..., None].astype(jnp.bfloat16)

    # conv1 + ReLU + 2x2 maxpool                                -> (B,14,14,6)
    mats1, (h2, w2) = _corner_patch_tensors(x, 5, 2)
    c1 = [m.reshape(b * h2 * w2, m.shape[-1]) for m in mats1]
    o1 = conv_relu_pool(c1, prep["w1"], prep["b1"])
    h1 = o1[:b * h2 * w2, :6].reshape(b, h2, w2, 6)

    # Batch tiling for the fused conv2+fc kernel: >= 2 grid steps (v7x 2 TCs),
    # chunk size a multiple of 16 (bf16 sublane granule).
    bb = max(16, min(MAX_BATCH_TILE, _round_up(-(-b // 2), 16)))
    bp = _round_up(max(b, 2 * bb), bb)
    if bp > b:
        h1 = jnp.pad(h1, ((0, bp - b), (0, 0), (0, 0), (0, 0)))

    # conv2 + ReLU + pool + fc1 + ReLU + fc2 + ReLU + fc3 + log_softmax
    mats2, _ = _corner_patch_tensors(h1, 5, 2)
    c2 = [jnp.transpose(m, (1, 0, 2)).astype(jnp.bfloat16) for m in mats2]
    out = conv2_fc_head(c2, prep, bb)
    return out[:b, :10]


# Pure-XLA reference (f32) mirroring the PyTorch module, for validation.
def lenet5_reference(params, x):
    def conv(h, w, bias, pad):
        y = jax.lax.conv_general_dilated(
            h, w, (1, 1), [(pad, pad), (pad, pad)],
            dimension_numbers=("NCHW", "OIHW", "NCHW"))
        return jax.nn.relu(y + bias[None, :, None, None])

    def pool(h):
        return jax.lax.reduce_window(h, -jnp.inf, jax.lax.max,
                                     (1, 1, 2, 2), (1, 1, 2, 2), "VALID")

    h = pool(conv(x, params["conv1_w"], params["conv1_b"], 2))
    h = pool(conv(h, params["conv2_w"], params["conv2_b"], 0))
    h = h.reshape(x.shape[0], -1)
    h = jax.nn.relu(h @ params["fc1_w"].T + params["fc1_b"])
    h = jax.nn.relu(h @ params["fc2_w"].T + params["fc2_b"])
    h = h @ params["fc3_w"].T + params["fc3_b"]
    return jax.nn.log_softmax(h, axis=-1)


if __name__ == "__main__":
    key = jax.random.PRNGKey(0)
    k_params, k_x = jax.random.split(key)
    params = init_params(k_params)
    prep = prepare_params(params)      # one-time weight re-layout, outside jit

    # LeNet5 geometry fixes the spatial input at 28x28; small batch.
    x = jax.random.normal(k_x, (2, 1, 28, 28), jnp.float32)

    out = jax.jit(lenet5_forward)(prep, x)
    out = jax.block_until_ready(out)

    assert out.shape == (2, 10)
    # rows are log-probabilities
    assert jnp.allclose(jnp.sum(jnp.exp(out), axis=1), 1.0, atol=1e-3)
    # matches the plain-XLA f32 reference up to bf16 matmul error
    ref = jax.jit(lenet5_reference)(params, x)
    max_diff = float(jnp.max(jnp.abs(out - ref)))
    assert max_diff < 0.2, max_diff

    print("KERNEL_OK")
</pallas_src>

<mosaic_0001>
module attributes {stable_mosaic.version = 11 : i64} {
  func.func @_conv_pool_kernel(%arg0: i32, %arg1: memref<208x25xbf16, #tpu.memory_space<vmem>>, %arg2: memref<208x25xbf16, #tpu.memory_space<vmem>>, %arg3: memref<208x25xbf16, #tpu.memory_space<vmem>>, %arg4: memref<208x25xbf16, #tpu.memory_space<vmem>>, %arg5: memref<25x128xbf16, #tpu.memory_space<vmem>>, %arg6: memref<1x128xf32, #tpu.memory_space<vmem>>, %arg7: memref<208x128xbf16, #tpu.memory_space<vmem>>) attributes {dimension_semantics = [#tpu.dimension_semantics<parallel>], iteration_bounds = array<i64: 2>, scalar_prefetch = 0 : i64, scratch_operands = 0 : i64, tpu.core_type = #tpu.core_type<tc>, window_params = [{transform_indices = @transform_0, window_bounds = array<i64: 208, 25>}, {transform_indices = @transform_1, window_bounds = array<i64: 208, 25>}, {transform_indices = @transform_2, window_bounds = array<i64: 208, 25>}, {transform_indices = @transform_3, window_bounds = array<i64: 208, 25>}, {pipeline_mode = #tpu.pipeline_mode<synchronous>, transform_indices = @transform_4, window_bounds = array<i64: 25, 128>}, {pipeline_mode = #tpu.pipeline_mode<synchronous>, transform_indices = @transform_5, window_bounds = array<i64: 1, 128>}, {transform_indices = @transform_6, window_bounds = array<i64: 208, 128>}]} {
    %c0 = arith.constant 0 : index
    %c0_0 = arith.constant 0 : index
    %0 = vector.load %arg5[%c0, %c0_0] : memref<25x128xbf16, #tpu.memory_space<vmem>>, vector<25x128xbf16>
    %c0_1 = arith.constant 0 : index
    %c0_2 = arith.constant 0 : index
    %1 = vector.load %arg1[%c0_1, %c0_2] : memref<208x25xbf16, #tpu.memory_space<vmem>>, vector<208x25xbf16>
    %cst = arith.constant dense<0.000000e+00> : vector<208x128xf32>
    %2 = tpu.matmul %1, %0, %cst {dimension_numbers = #tpu.dot_dimension_numbers<[1], [0], [0], [1], [0, 0, 1, 1], [], []>} : vector<208x25xbf16>, vector<25x128xbf16>, vector<208x128xf32> -> vector<208x128xf32>
    %c0_3 = arith.constant 0 : index
    %c0_4 = arith.constant 0 : index
    %3 = vector.load %arg2[%c0_3, %c0_4] : memref<208x25xbf16, #tpu.memory_space<vmem>>, vector<208x25xbf16>
    %cst_5 = arith.constant dense<0.000000e+00> : vector<208x128xf32>
    %4 = tpu.matmul %3, %0, %cst_5 {dimension_numbers = #tpu.dot_dimension_numbers<[1], [0], [0], [1], [0, 0, 1, 1], [], []>} : vector<208x25xbf16>, vector<25x128xbf16>, vector<208x128xf32> -> vector<208x128xf32>
    %5 = arith.maximumf %2, %4 : vector<208x128xf32>
    %c0_6 = arith.constant 0 : index
    %c0_7 = arith.constant 0 : index
    %6 = vector.load %arg3[%c0_6, %c0_7] : memref<208x25xbf16, #tpu.memory_space<vmem>>, vector<208x25xbf16>
    %cst_8 = arith.constant dense<0.000000e+00> : vector<208x128xf32>
    %7 = tpu.matmul %6, %0, %cst_8 {dimension_numbers = #tpu.dot_dimension_numbers<[1], [0], [0], [1], [0, 0, 1, 1], [], []>} : vector<208x25xbf16>, vector<25x128xbf16>, vector<208x128xf32> -> vector<208x128xf32>
    %8 = arith.maximumf %5, %7 : vector<208x128xf32>
    %c0_9 = arith.constant 0 : index
    %c0_10 = arith.constant 0 : index
    %9 = vector.load %arg4[%c0_9, %c0_10] : memref<208x25xbf16, #tpu.memory_space<vmem>>, vector<208x25xbf16>
    %cst_11 = arith.constant dense<0.000000e+00> : vector<208x128xf32>
    %10 = tpu.matmul %9, %0, %cst_11 {dimension_numbers = #tpu.dot_dimension_numbers<[1], [0], [0], [1], [0, 0, 1, 1], [], []>} : vector<208x25xbf16>, vector<25x128xbf16>, vector<208x128xf32> -> vector<208x128xf32>
    %11 = arith.maximumf %8, %10 : vector<208x128xf32>
    %c0_12 = arith.constant 0 : index
    %c0_13 = arith.constant 0 : index
    %12 = vector.load %arg6[%c0_12, %c0_13] : memref<1x128xf32, #tpu.memory_space<vmem>>, vector<1x128xf32>
    %13 = vector.broadcast %12 : vector<1x128xf32> to vector<208x128xf32>
    %14 = arith.addf %11, %13 : vector<208x128xf32>
    %cst_14 = arith.constant 0.000000e+00 : f32
    %15 = vector.broadcast %cst_14 : f32 to vector<208x128xf32>
    %16 = arith.maximumf %14, %15 : vector<208x128xf32>
    %17 = arith.truncf %16 : vector<208x128xf32> to vector<208x128xbf16>
    %c0_15 = arith.constant 0 : index
    %c0_16 = arith.constant 0 : index
    %18 = vector.load %arg7[%c0_15, %c0_16] : memref<208x128xbf16, #tpu.memory_space<vmem>>, vector<208x128xbf16>
    tpu.vector_store %arg7[%c0_15, %c0_16], %17 {strides = array<i32>} : memref<208x128xbf16, #tpu.memory_space<vmem>>, vector<208x128xbf16>,
    return
  }
  func.func @transform_0(%arg0: i32) -> (i32, i32) {
    %c0_i32 = arith.constant 0 : i32
    %c0_i32_0 = arith.constant 0 : i32
    return %arg0, %c0_i32 : i32, i32
  }
  func.func @transform_1(%arg0: i32) -> (i32, i32) {
    %c0_i32 = arith.constant 0 : i32
    %c0_i32_0 = arith.constant 0 : i32
    return %arg0, %c0_i32 : i32, i32
  }
  func.func @transform_2(%arg0: i32) -> (i32, i32) {
    %c0_i32 = arith.constant 0 : i32
    %c0_i32_0 = arith.constant 0 : i32
    return %arg0, %c0_i32 : i32, i32
  }
  func.func @transform_3(%arg0: i32) -> (i32, i32) {
    %c0_i32 = arith.constant 0 : i32
    %c0_i32_0 = arith.constant 0 : i32
    return %arg0, %c0_i32 : i32, i32
  }
  func.func @transform_4(%arg0: i32) -> (i32, i32) {
    %c0_i32 = arith.constant 0 : i32
    %c0_i32_0 = arith.constant 0 : i32
    %c0_i32_1 = arith.constant 0 : i32
    return %c0_i32, %c0_i32_0 : i32, i32
  }
  func.func @transform_5(%arg0: i32) -> (i32, i32) {
    %c0_i32 = arith.constant 0 : i32
    %c0_i32_0 = arith.constant 0 : i32
    %c0_i32_1 = arith.constant 0 : i32
    return %c0_i32, %c0_i32_0 : i32, i32
  }
  func.func @transform_6(%arg0: i32) -> (i32, i32) {
    %c0_i32 = arith.constant 0 : i32
    %c0_i32_0 = arith.constant 0 : i32
    return %arg0, %c0_i32 : i32, i32
  }
}

module attributes {stable_mosaic.version = 11 : i64} {
  func.func @_conv2_fc_kernel(%arg0: i32, %arg1: memref<25x16x150xbf16, #tpu.memory_space<vmem>>, %arg2: memref<25x16x150xbf16, #tpu.memory_space<vmem>>, %arg3: memref<25x16x150xbf16, #tpu.memory_space<vmem>>, %arg4: memref<25x16x150xbf16, #tpu.memory_space<vmem>>, %arg5: memref<150x128xbf16, #tpu.memory_space<vmem>>, %arg6: memref<1x128xf32, #tpu.memory_space<vmem>>, %arg7: memref<25x128x128xbf16, #tpu.memory_space<vmem>>, %arg8: memref<1x128xf32, #tpu.memory_space<vmem>>, %arg9: memref<128x128xbf16, #tpu.memory_space<vmem>>, %arg10: memref<1x128xf32, #tpu.memory_space<vmem>>, %arg11: memref<128x128xbf16, #tpu.memory_space<vmem>>, %arg12: memref<1x128xf32, #tpu.memory_space<vmem>>, %arg13: memref<16x128xf32, #tpu.memory_space<vmem>>) attributes {dimension_semantics = [#tpu.dimension_semantics<parallel>], iteration_bounds = array<i64: 2>, scalar_prefetch = 0 : i64, scratch_operands = 0 : i64, tpu.core_type = #tpu.core_type<tc>, window_params = [{transform_indices = @transform_0, window_bounds = array<i64: 25, 16, 150>}, {transform_indices = @transform_1, window_bounds = array<i64: 25, 16, 150>}, {transform_indices = @transform_2, window_bounds = array<i64: 25, 16, 150>}, {transform_indices = @transform_3, window_bounds = array<i64: 25, 16, 150>}, {pipeline_mode = #tpu.pipeline_mode<synchronous>, transform_indices = @transform_4, window_bounds = array<i64: 150, 128>}, {pipeline_mode = #tpu.pipeline_mode<synchronous>, transform_indices = @transform_5, window_bounds = array<i64: 1, 128>}, {pipeline_mode = #tpu.pipeline_mode<synchronous>, transform_indices = @transform_6, window_bounds = array<i64: 25, 128, 128>}, {pipeline_mode = #tpu.pipeline_mode<synchronous>, transform_indices = @transform_7, window_bounds = array<i64: 1, 128>}, {pipeline_mode = #tpu.pipeline_mode<synchronous>, transform_indices = @transform_8, window_bounds = array<i64: 128, 128>}, {pipeline_mode = #tpu.pipeline_mode<synchronous>, transform_indices = @transform_9, window_bounds = array<i64: 1, 128>}, {pipeline_mode = #tpu.pipeline_mode<synchronous>, transform_indices = @transform_10, window_bounds = array<i64: 128, 128>}, {pipeline_mode = #tpu.pipeline_mode<synchronous>, transform_indices = @transform_11, window_bounds = array<i64: 1, 128>}, {transform_indices = @transform_12, window_bounds = array<i64: 16, 128>}]} {
    %c0 = arith.constant 0 : index
    %c0_0 = arith.constant 0 : index
    %0 = vector.load %arg5[%c0, %c0_0] : memref<150x128xbf16, #tpu.memory_space<vmem>>, vector<150x128xbf16>
    %c0_1 = arith.constant 0 : index
    %c0_2 = arith.constant 0 : index
    %1 = vector.load %arg6[%c0_1, %c0_2] : memref<1x128xf32, #tpu.memory_space<vmem>>, vector<1x128xf32>
    %cst = arith.constant 0.000000e+00 : f32
    %2 = vector.broadcast %cst : f32 to vector<16x128xf32>
    %c0_3 = arith.constant 0 : index
    %c0_4 = arith.constant 0 : index
    %c0_5 = arith.constant 0 : index
    %3 = vector.load %arg1[%c0_3, %c0_4, %c0_5] : memref<25x16x150xbf16, #tpu.memory_space<vmem>>, vector<1x16x150xbf16>
    %4 = vector.shape_cast %3 : vector<1x16x150xbf16> to vector<16x150xbf16>
    %cst_6 = arith.constant dense<0.000000e+00> : vector<16x128xf32>
    %5 = tpu.matmul %4, %0, %cst_6 {dimension_numbers = #tpu.dot_dimension_numbers<[1], [0], [0], [1], [0, 0, 1, 1], [], []>} : vector<16x150xbf16>, vector<150x128xbf16>, vector<16x128xf32> -> vector<16x128xf32>
    %c0_7 = arith.constant 0 : index
    %c0_8 = arith.constant 0 : index
    %c0_9 = arith.constant 0 : index
    %6 = vector.load %arg2[%c0_7, %c0_8, %c0_9] : memref<25x16x150xbf16, #tpu.memory_space<vmem>>, vector<1x16x150xbf16>
    %7 = vector.shape_cast %6 : vector<1x16x150xbf16> to vector<16x150xbf16>
    %cst_10 = arith.constant dense<0.000000e+00> : vector<16x128xf32>
    %8 = tpu.matmul %7, %0, %cst_10 {dimension_numbers = #tpu.dot_dimension_numbers<[1], [0], [0], [1], [0, 0, 1, 1], [], []>} : vector<16x150xbf16>, vector<150x128xbf16>, vector<16x128xf32> -> vector<16x128xf32>
    %9 = arith.maximumf %5, %8 : vector<16x128xf32>
    %c0_11 = arith.constant 0 : index
    %c0_12 = arith.constant 0 : index
    %c0_13 = arith.constant 0 : index
    %10 = vector.load %arg3[%c0_11, %c0_12, %c0_13] : memref<25x16x150xbf16, #tpu.memory_space<vmem>>, vector<1x16x150xbf16>
    %11 = vector.shape_cast %10 : vector<1x16x150xbf16> to vector<16x150xbf16>
    %cst_14 = arith.constant dense<0.000000e+00> : vector<16x128xf32>
    %12 = tpu.matmul %11, %0, %cst_14 {dimension_numbers = #tpu.dot_dimension_numbers<[1], [0], [0], [1], [0, 0, 1, 1], [], []>} : vector<16x150xbf16>, vector<150x128xbf16>, vector<16x128xf32> -> vector<16x128xf32>
    %13 = arith.maximumf %9, %12 : vector<16x128xf32>
    %c0_15 = arith.constant 0 : index
    %c0_16 = arith.constant 0 : index
    %c0_17 = arith.constant 0 : index
    %14 = vector.load %arg4[%c0_15, %c0_16, %c0_17] : memref<25x16x150xbf16, #tpu.memory_space<vmem>>, vector<1x16x150xbf16>
    %15 = vector.shape_cast %14 : vector<1x16x150xbf16> to vector<16x150xbf16>
    %cst_18 = arith.constant dense<0.000000e+00> : vector<16x128xf32>
    %16 = tpu.matmul %15, %0, %cst_18 {dimension_numbers = #tpu.dot_dimension_numbers<[1], [0], [0], [1], [0, 0, 1, 1], [], []>} : vector<16x150xbf16>, vector<150x128xbf16>, vector<16x128xf32> -> vector<16x128xf32>
    %17 = arith.maximumf %13, %16 : vector<16x128xf32>
    %18 = vector.broadcast %1 : vector<1x128xf32> to vector<16x128xf32>
    %19 = arith.addf %17, %18 : vector<16x128xf32>
    %cst_19 = arith.constant 0.000000e+00 : f32
    %20 = vector.broadcast %cst_19 : f32 to vector<16x128xf32>
    %21 = arith.maximumf %19, %20 : vector<16x128xf32>
    %22 = arith.truncf %21 : vector<16x128xf32> to vector<16x128xbf16>
    %c0_20 = arith.constant 0 : index
    %c0_21 = arith.constant 0 : index
    %c0_22 = arith.constant 0 : index
    %23 = vector.load %arg7[%c0_20, %c0_21, %c0_22] : memref<25x128x128xbf16, #tpu.memory_space<vmem>>, vector<1x128x128xbf16>
    %24 = vector.shape_cast %23 : vector<1x128x128xbf16> to vector<128x128xbf16>
    %cst_23 = arith.constant dense<0.000000e+00> : vector<16x128xf32>
    %25 = tpu.matmul %22, %24, %cst_23 {dimension_numbers = #tpu.dot_dimension_numbers<[1], [0], [0], [1], [0, 0, 1, 1], [], []>} : vector<16x128xbf16>, vector<128x128xbf16>, vector<16x128xf32> -> vector<16x128xf32>
    %26 = arith.addf %2, %25 : vector<16x128xf32>
    %c1 = arith.constant 1 : index
    %c0_24 = arith.constant 0 : index
    %c0_25 = arith.constant 0 : index
    %27 = vector.load %arg1[%c1, %c0_24, %c0_25] : memref<25x16x150xbf16, #tpu.memory_space<vmem>>, vector<1x16x150xbf16>
    %28 = vector.shape_cast %27 : vector<1x16x150xbf16> to vector<16x150xbf16>
    %cst_26 = arith.constant dense<0.000000e+00> : vector<16x128xf32>
    %29 = tpu.matmul %28, %0, %cst_26 {dimension_numbers = #tpu.dot_dimension_numbers<[1], [0], [0], [1], [0, 0, 1, 1], [], []>} : vector<16x150xbf16>, vector<150x128xbf16>, vector<16x128xf32> -> vector<16x128xf32>
    %c1_27 = arith.constant 1 : index
    %c0_28 = arith.constant 0 : index
    %c0_29 = arith.constant 0 : index
    %30 = vector.load %arg2[%c1_27, %c0_28, %c0_29] : memref<25x16x150xbf16, #tpu.memory_space<vmem>>, vector<1x16x150xbf16>
    %31 = vector.shape_cast %30 : vector<1x16x150xbf16> to vector<16x150xbf16>
    %cst_30 = arith.constant dense<0.000000e+00> : vector<16x128xf32>
    %32 = tpu.matmul %31, %0, %cst_30 {dimension_numbers = #tpu.dot_dimension_numbers<[1], [0], [0], [1], [0, 0, 1, 1], [], []>} : vector<16x150xbf16>, vector<150x128xbf16>, vector<16x128xf32> -> vector<16x128xf32>
    %33 = arith.maximumf %29, %32 : vector<16x128xf32>
    %c1_31 = arith.constant 1 : index
    %c0_32 = arith.constant 0 : index
    %c0_33 = arith.constant 0 : index
    %34 = vector.load %arg3[%c1_31, %c0_32, %c0_33] : memref<25x16x150xbf16, #tpu.memory_space<vmem>>, vector<1x16x150xbf16>
    %35 = vector.shape_cast %34 : vector<1x16x150xbf16> to vector<16x150xbf16>
    %cst_34 = arith.constant dense<0.000000e+00> : vector<16x128xf32>
    %36 = tpu.matmul %35, %0, %cst_34 {dimension_numbers = #tpu.dot_dimension_numbers<[1], [0], [0], [1], [0, 0, 1, 1], [], []>} : vector<16x150xbf16>, vector<150x128xbf16>, vector<16x128xf32> -> vector<16x128xf32>
    %37 = arith.maximumf %33, %36 : vector<16x128xf32>
    %c1_35 = arith.constant 1 : index
    %c0_36 = arith.constant 0 : index
    %c0_37 = arith.constant 0 : index
    %38 = vector.load %arg4[%c1_35, %c0_36, %c0_37] : memref<25x16x150xbf16, #tpu.memory_space<vmem>>, vector<1x16x150xbf16>
    %39 = vector.shape_cast %38 : vector<1x16x150xbf16> to vector<16x150xbf16>
    %cst_38 = arith.constant dense<0.000000e+00> : vector<16x128xf32>
    %40 = tpu.matmul %39, %0, %cst_38 {dimension_numbers = #tpu.dot_dimension_numbers<[1], [0], [0], [1], [0, 0, 1, 1], [], []>} : vector<16x150xbf16>, vector<150x128xbf16>, vector<16x128xf32> -> vector<16x128xf32>
    %41 = arith.maximumf %37, %40 : vector<16x128xf32>
    %42 = vector.broadcast %1 : vector<1x128xf32> to vector<16x128xf32>
    %43 = arith.addf %41, %42 : vector<16x128xf32>
    %cst_39 = arith.constant 0.000000e+00 : f32
    %44 = vector.broadcast %cst_39 : f32 to vector<16x128xf32>
    %45 = arith.maximumf %43, %44 : vector<16x128xf32>
    %46 = arith.truncf %45 : vector<16x128xf32> to vector<16x128xbf16>
    %c1_40 = arith.constant 1 : index
    %c0_41 = arith.constant 0 : index
    %c0_42 = arith.constant 0 : index
    %47 = vector.load %arg7[%c1_40, %c0_41, %c0_42] : memref<25x128x128xbf16, #tpu.memory_space<vmem>>, vector<1x128x128xbf16>
    %48 = vector.shape_cast %47 : vector<1x128x128xbf16> to vector<128x128xbf16>
    %cst_43 = arith.constant dense<0.000000e+00> : vector<16x128xf32>
    %49 = tpu.matmul %46, %48, %cst_43 {dimension_numbers = #tpu.dot_dimension_numbers<[1], [0], [0], [1], [0, 0, 1, 1], [], []>} : vector<16x128xbf16>, vector<128x128xbf16>, vector<16x128xf32> -> vector<16x128xf32>
    %50 = arith.addf %26, %49 : vector<16x128xf32>
    %c2 = arith.constant 2 : index
    %c0_44 = arith.constant 0 : index
    %c0_45 = arith.constant 0 : index
    %51 = vector.load %arg1[%c2, %c0_44, %c0_45] : memref<25x16x150xbf16, #tpu.memory_space<vmem>>, vector<1x16x150xbf16>
    %52 = vector.shape_cast %51 : vector<1x16x150xbf16> to vector<16x150xbf16>
    %cst_46 = arith.constant dense<0.000000e+00> : vector<16x128xf32>
    %53 = tpu.matmul %52, %0, %cst_46 {dimension_numbers = #tpu.dot_dimension_numbers<[1], [0], [0], [1], [0, 0, 1, 1], [], []>} : vector<16x150xbf16>, vector<150x128xbf16>, vector<16x128xf32> -> vector<16x128xf32>
    %c2_47 = arith.constant 2 : index
    %c0_48 = arith.constant 0 : index
    %c0_49 = arith.constant 0 : index
    %54 = vector.load %arg2[%c2_47, %c0_48, %c0_49] : memref<25x16x150xbf16, #tpu.memory_space<vmem>>, vector<1x16x150xbf16>
    %55 = vector.shape_cast %54 : vector<1x16x150xbf16> to vector<16x150xbf16>
    %cst_50 = arith.constant dense<0.000000e+00> : vector<16x128xf32>
    %56 = tpu.matmul %55, %0, %cst_50 {dimension_numbers = #tpu.dot_dimension_numbers<[1], [0], [0], [1], [0, 0, 1, 1], [], []>} : vector<16x150xbf16>, vector<150x128xbf16>, vector<16x128xf32> -> vector<16x128xf32>
    %57 = arith.maximumf %53, %56 : vector<16x128xf32>
    %c2_51 = arith.constant 2 : index
    %c0_52 = arith.constant 0 : index
    %c0_53 = arith.constant 0 : index
    %58 = vector.load %arg3[%c2_51, %c0_52, %c0_53] : memref<25x16x150xbf16, #tpu.memory_space<vmem>>, vector<1x16x150xbf16>
    %59 = vector.shape_cast %58 : vector<1x16x150xbf16> to vector<16x150xbf16>
    %cst_54 = arith.constant dense<0.000000e+00> : vector<16x128xf32>
    %60 = tpu.matmul %59, %0, %cst_54 {dimension_numbers = #tpu.dot_dimension_numbers<[1], [0], [0], [1], [0, 0, 1, 1], [], []>} : vector<16x150xbf16>, vector<150x128xbf16>, vector<16x128xf32> -> vector<16x128xf32>
    %61 = arith.maximumf %57, %60 : vector<16x128xf32>
    %c2_55 = arith.constant 2 : index
    %c0_56 = arith.constant 0 : index
    %c0_57 = arith.constant 0 : index
    %62 = vector.load %arg4[%c2_55, %c0_56, %c0_57] : memref<25x16x150xbf16, #tpu.memory_space<vmem>>, vector<1x16x150xbf16>
    %63 = vector.shape_cast %62 : vector<1x16x150xbf16> to vector<16x150xbf16>
    %cst_58 = arith.constant dense<0.000000e+00> : vector<16x128xf32>
    %64 = tpu.matmul %63, %0, %cst_58 {dimension_numbers = #tpu.dot_dimension_numbers<[1], [0], [0], [1], [0, 0, 1, 1], [], []>} : vector<16x150xbf16>, vector<150x128xbf16>, vector<16x128xf32> -> vector<16x128xf32>
    %65 = arith.maximumf %61, %64 : vector<16x128xf32>
    %66 = vector.broadcast %1 : vector<1x128xf32> to vector<16x128xf32>
    %67 = arith.addf %65, %66 : vector<16x128xf32>
    %cst_59 = arith.constant 0.000000e+00 : f32
    %68 = vector.broadcast %cst_59 : f32 to vector<16x128xf32>
    %69 = arith.maximumf %67, %68 : vector<16x128xf32>
    %70 = arith.truncf %69 : vector<16x128xf32> to vector<16x128xbf16>
    %c2_60 = arith.constant 2 : index
    %c0_61 = arith.constant 0 : index
    %c0_62 = arith.constant 0 : index
    %71 = vector.load %arg7[%c2_60, %c0_61, %c0_62] : memref<25x128x128xbf16, #tpu.memory_space<vmem>>, vector<1x128x128xbf16>
    %72 = vector.shape_cast %71 : vector<1x128x128xbf16> to vector<128x128xbf16>
    %cst_63 = arith.constant dense<0.000000e+00> : vector<16x128xf32>
    %73 = tpu.matmul %70, %72, %cst_63 {dimension_numbers = #tpu.dot_dimension_numbers<[1], [0], [0], [1], [0, 0, 1, 1], [], []>} : vector<16x128xbf16>, vector<128x128xbf16>, vector<16x128xf32> -> vector<16x128xf32>
    %74 = arith.addf %50, %73 : vector<16x128xf32>
    %c3 = arith.constant 3 : index
    %c0_64 = arith.constant 0 : index
    %c0_65 = arith.constant 0 : index
    %75 = vector.load %arg1[%c3, %c0_64, %c0_65] : memref<25x16x150xbf16, #tpu.memory_space<vmem>>, vector<1x16x150xbf16>
    %76 = vector.shape_cast %75 : vector<1x16x150xbf16> to vector<16x150xbf16>
    %cst_66 = arith.constant dense<0.000000e+00> : vector<16x128xf32>
    %77 = tpu.matmul %76, %0, %cst_66 {dimension_numbers = #tpu.dot_dimension_numbers<[1], [0], [0], [1], [0, 0, 1, 1], [], []>} : vector<16x150xbf16>, vector<150x128xbf16>, vector<16x128xf32> -> vector<16x128xf32>
    %c3_67 = arith.constant 3 : index
    %c0_68 = arith.constant 0 : index
    %c0_69 = arith.constant 0 : index
    %78 = vector.load %arg2[%c3_67, %c0_68, %c0_69] : memref<25x16x150xbf16, #tpu.memory_space<vmem>>, vector<1x16x150xbf16>
    %79 = vector.shape_cast %78 : vector<1x16x150xbf16> to vector<16x150xbf16>
    %cst_70 = arith.constant dense<0.000000e+00> : vector<16x128xf32>
    %80 = tpu.matmul %79, %0, %cst_70 {dimension_numbers = #tpu.dot_dimension_numbers<[1], [0], [0], [1], [0, 0, 1, 1], [], []>} : vector<16x150xbf16>, vector<150x128xbf16>, vector<16x128xf32> -> vector<16x128xf32>
    %81 = arith.maximumf %77, %80 : vector<16x128xf32>
    %c3_71 = arith.constant 3 : index
    %c0_72 = arith.constant 0 : index
    %c0_73 = arith.constant 0 : index
    %82 = vector.load %arg3[%c3_71, %c0_72, %c0_73] : memref<25x16x150xbf16, #tpu.memory_space<vmem>>, vector<1x16x150xbf16>
    %83 = vector.shape_cast %82 : vector<1x16x150xbf16> to vector<16x150xbf16>
    %cst_74 = arith.constant dense<0.000000e+00> : vector<16x128xf32>
    %84 = tpu.matmul %83, %0, %cst_74 {dimension_numbers = #tpu.dot_dimension_numbers<[1], [0], [0], [1], [0, 0, 1, 1], [], []>} : vector<16x150xbf16>, vector<150x128xbf16>, vector<16x128xf32> -> vector<16x128xf32>
    %85 = arith.maximumf %81, %84 : vector<16x128xf32>
    %c3_75 = arith.constant 3 : index
    %c0_76 = arith.constant 0 : index
    %c0_77 = arith.constant 0 : index
    %86 = vector.load %arg4[%c3_75, %c0_76, %c0_77] : memref<25x16x150xbf16, #tpu.memory_space<vmem>>, vector<1x16x150xbf16>
    %87 = vector.shape_cast %86 : vector<1x16x150xbf16> to vector<16x150xbf16>
    %cst_78 = arith.constant dense<0.000000e+00> : vector<16x128xf32>
    %88 = tpu.matmul %87, %0, %cst_78 {dimension_numbers = #tpu.dot_dimension_numbers<[1], [0], [0], [1], [0, 0, 1, 1], [], []>} : vector<16x150xbf16>, vector<150x128xbf16>, vector<16x128xf32> -> vector<16x128xf32>
    %89 = arith.maximumf %85, %88 : vector<16x128xf32>
    %90 = vector.broadcast %1 : vector<1x128xf32> to vector<16x128xf32>
    %91 = arith.addf %89, %90 : vector<16x128xf32>
    %cst_79 = arith.constant 0.000000e+00 : f32
    %92 = vector.broadcast %cst_79 : f32 to vector<16x128xf32>
    %93 = arith.maximumf %91, %92 : vector<16x128xf32>
    %94 = arith.truncf %93 : vector<16x128xf32> to vector<16x128xbf16>
    %c3_80 = arith.constant 3 : index
    %c0_81 = arith.constant 0 : index
    %c0_82 = arith.constant 0 : index
    %95 = vector.load %arg7[%c3_80, %c0_81, %c0_82] : memref<25x128x128xbf16, #tpu.memory_space<vmem>>, vector<1x128x128xbf16>
    %96 = vector.shape_cast %95 : vector<1x128x128xbf16> to vector<128x128xbf16>
    %cst_83 = arith.constant dense<0.000000e+00> : vector<16x128xf32>
    %97 = tpu.matmul %94, %96, %cst_83 {dimension_numbers = #tpu.dot_dimension_numbers<[1], [0], [0], [1], [0, 0, 1, 1], [], []>} : vector<16x128xbf16>, vector<128x128xbf16>, vector<16x128xf32> -> vector<16x128xf32>
    %98 = arith.addf %74, %97 : vector<16x128xf32>
    %c4 = arith.constant 4 : index
    %c0_84 = arith.constant 0 : index
    %c0_85 = arith.constant 0 : index
    %99 = vector.load %arg1[%c4, %c0_84, %c0_85] : memref<25x16x150xbf16, #tpu.memory_space<vmem>>, vector<1x16x150xbf16>
    %100 = vector.shape_cast %99 : vector<1x16x150xbf16> to vector<16x150xbf16>
    %cst_86 = arith.constant dense<0.000000e+00> : vector<16x128xf32>
    %101 = tpu.matmul %100, %0, %cst_86 {dimension_numbers = #tpu.dot_dimension_numbers<[1], [0], [0], [1], [0, 0, 1, 1], [], []>} : vector<16x150xbf16>, vector<150x128xbf16>, vector<16x128xf32> -> vector<16x128xf32>
    %c4_87 = arith.constant 4 : index
    %c0_88 = arith.constant 0 : index
    %c0_89 = arith.constant 0 : index
    %102 = vector.load %arg2[%c4_87, %c0_88, %c0_89] : memref<25x16x150xbf16, #tpu.memory_space<vmem>>, vector<1x16x150xbf16>
    %103 = vector.shape_cast %102 : vector<1x16x150xbf16> to vector<16x150xbf16>
    %cst_90 = arith.constant dense<0.000000e+00> : vector<16x128xf32>
    %104 = tpu.matmul %103, %0, %cst_90 {dimension_numbers = #tpu.dot_dimension_numbers<[1], [0], [0], [1], [0, 0, 1, 1], [], []>} : vector<16x150xbf16>, vector<150x128xbf16>, vector<16x128xf32> -> vector<16x128xf32>
    %105 = arith.maximumf %101, %104 : vector<16x128xf32>
    %c4_91 = arith.constant 4 : index
    %c0_92 = arith.constant 0 : index
    %c0_93 = arith.constant 0 : index
    %106 = vector.load %arg3[%c4_91, %c0_92, %c0_93] : memref<25x16x150xbf16, #tpu.memory_space<vmem>>, vector<1x16x150xbf16>
    %107 = vector.shape_cast %106 : vector<1x16x150xbf16> to vector<16x150xbf16>
    %cst_94 = arith.constant dense<0.000000e+00> : vector<16x128xf32>
    %108 = tpu.matmul %107, %0, %cst_94 {dimension_numbers = #tpu.dot_dimension_numbers<[1], [0], [0], [1], [0, 0, 1, 1], [], []>} : vector<16x150xbf16>, vector<150x128xbf16>, vector<16x128xf32> -> vector<16x128xf32>
    %109 = arith.maximumf %105, %108 : vector<16x128xf32>
    %c4_95 = arith.constant 4 : index
    %c0_96 = arith.constant 0 : index
    %c0_97 = arith.constant 0 : index
    %110 = vector.load %arg4[%c4_95, %c0_96, %c0_97] : memref<25x16x150xbf16, #tpu.memory_space<vmem>>, vector<1x16x150xbf16>
    %111 = vector.shape_cast %110 : vector<1x16x150xbf16> to vector<16x150xbf16>
    %cst_98 = arith.constant dense<0.000000e+00> : vector<16x128xf32>
    %112 = tpu.matmul %111, %0, %cst_98 {dimension_numbers = #tpu.dot_dimension_numbers<[1], [0], [0], [1], [0, 0, 1, 1], [], []>} : vector<16x150xbf16>, vector<150x128xbf16>, vector<16x128xf32> -> vector<16x128xf32>
    %113 = arith.maximumf %109, %112 : vector<16x128xf32>
    %114 = vector.broadcast %1 : vector<1x128xf32> to vector<16x128xf32>
    %115 = arith.addf %113, %114 : vector<16x128xf32>
    %cst_99 = arith.constant 0.000000e+00 : f32
    %116 = vector.broadcast %cst_99 : f32 to vector<16x128xf32>
    %117 = arith.maximumf %115, %116 : vector<16x128xf32>
    %118 = arith.truncf %117 : vector<16x128xf32> to vector<16x128xbf16>
    %c4_100 = arith.constant 4 : index
    %c0_101 = arith.constant 0 : index
    %c0_102 = arith.constant 0 : index
    %119 = vector.load %arg7[%c4_100, %c0_101, %c0_102] : memref<25x128x128xbf16, #tpu.memory_space<vmem>>, vector<1x128x128xbf16>
    %120 = vector.shape_cast %119 : vector<1x128x128xbf16> to vector<128x128xbf16>
    %cst_103 = arith.constant dense<0.000000e+00> : vector<16x128xf32>
    %121 = tpu.matmul %118, %120, %cst_103 {dimension_numbers = #tpu.dot_dimension_numbers<[1], [0], [0], [1], [0, 0, 1, 1], [], []>} : vector<16x128xbf16>, vector<128x128xbf16>, vector<16x128xf32> -> vector<16x128xf32>
    %122 = arith.addf %98, %121 : vector<16x128xf32>
    %c5 = arith.constant 5 : index
    %c0_104 = arith.constant 0 : index
    %c0_105 = arith.constant 0 : index
    %123 = vector.load %arg1[%c5, %c0_104, %c0_105] : memref<25x16x150xbf16, #tpu.memory_space<vmem>>, vector<1x16x150xbf16>
    %124 = vector.shape_cast %123 : vector<1x16x150xbf16> to vector<16x150xbf16>
    %cst_106 = arith.constant dense<0.000000e+00> : vector<16x128xf32>
    %125 = tpu.matmul %124, %0, %cst_106 {dimension_numbers = #tpu.dot_dimension_numbers<[1], [0], [0], [1], [0, 0, 1, 1], [], []>} : vector<16x150xbf16>, vector<150x128xbf16>, vector<16x128xf32> -> vector<16x128xf32>
    %c5_107 = arith.constant 5 : index
    %c0_108 = arith.constant 0 : index
    %c0_109 = arith.constant 0 : index
    %126 = vector.load %arg2[%c5_107, %c0_108, %c0_109] : memref<25x16x150xbf16, #tpu.memory_space<vmem>>, vector<1x16x150xbf16>
    %127 = vector.shape_cast %126 : vector<1x16x150xbf16> to vector<16x150xbf16>
    %cst_110 = arith.constant dense<0.000000e+00> : vector<16x128xf32>
    %128 = tpu.matmul %127, %0, %cst_110 {dimension_numbers = #tpu.dot_dimension_numbers<[1], [0], [0], [1], [0, 0, 1, 1], [], []>} : vector<16x150xbf16>, vector<150x128xbf16>, vector<16x128xf32> -> vector<16x128xf32>
    %129 = arith.maximumf %125, %128 : vector<16x128xf32>
    %c5_111 = arith.constant 5 : index
    %c0_112 = arith.constant 0 : index
    %c0_113 = arith.constant 0 : index
    %130 = vector.load %arg3[%c5_111, %c0_112, %c0_113] : memref<25x16x150xbf16, #tpu.memory_space<vmem>>, vector<1x16x150xbf16>
    %131 = vector.shape_cast %130 : vector<1x16x150xbf16> to vector<16x150xbf16>
    %cst_114 = arith.constant dense<0.000000e+00> : vector<16x128xf32>
    %132 = tpu.matmul %131, %0, %cst_114 {dimension_numbers = #tpu.dot_dimension_numbers<[1], [0], [0], [1], [0, 0, 1, 1], [], []>} : vector<16x150xbf16>, vector<150x128xbf16>, vector<16x128xf32> -> vector<16x128xf32>
    %133 = arith.maximumf %129, %132 : vector<16x128xf32>
    %c5_115 = arith.constant 5 : index
    %c0_116 = arith.constant 0 : index
    %c0_117 = arith.constant 0 : index
    %134 = vector.load %arg4[%c5_115, %c0_116, %c0_117] : memref<25x16x150xbf16, #tpu.memory_space<vmem>>, vector<1x16x150xbf16>
    %135 = vector.shape_cast %134 : vector<1x16x150xbf16> to vector<16x150xbf16>
    %cst_118 = arith.constant dense<0.000000e+00> : vector<16x128xf32>
    %136 = tpu.matmul %135, %0, %cst_118 {dimension_numbers = #tpu.dot_dimension_numbers<[1], [0], [0], [1], [0, 0, 1, 1], [], []>} : vector<16x150xbf16>, vector<150x128xbf16>, vector<16x128xf32> -> vector<16x128xf32>
    %137 = arith.maximumf %133, %136 : vector<16x128xf32>
    %138 = vector.broadcast %1 : vector<1x128xf32> to vector<16x128xf32>
    %139 = arith.addf %137, %138 : vector<16x128xf32>
    %cst_119 = arith.constant 0.000000e+00 : f32
    %140 = vector.broadcast %cst_119 : f32 to vector<16x128xf32>
    %141 = arith.maximumf %139, %140 : vector<16x128xf32>
    %142 = arith.truncf %141 : vector<16x128xf32> to vector<16x128xbf16>
    %c5_120 = arith.constant 5 : index
    %c0_121 = arith.constant 0 : index
    %c0_122 = arith.constant 0 : index
    %143 = vector.load %arg7[%c5_120, %c0_121, %c0_122] : memref<25x128x128xbf16, #tpu.memory_space<vmem>>, vector<1x128x128xbf16>
    %144 = vector.shape_cast %143 : vector<1x128x128xbf16> to vector<128x128xbf16>
    %cst_123 = arith.constant dense<0.000000e+00> : vector<16x128xf32>
    %145 = tpu.matmul %142, %144, %cst_123 {dimension_numbers = #tpu.dot_dimension_numbers<[1], [0], [0], [1], [0, 0, 1, 1], [], []>} : vector<16x128xbf16>, vector<128x128xbf16>, vector<16x128xf32> -> vector<16x128xf32>
    %146 = arith.addf %122, %145 : vector<16x128xf32>
    %c6 = arith.constant 6 : index
    %c0_124 = arith.constant 0 : index
    %c0_125 = arith.constant 0 : index
    %147 = vector.load %arg1[%c6, %c0_124, %c0_125] : memref<25x16x150xbf16, #tpu.memory_space<vmem>>, vector<1x16x150xbf16>
    %148 = vector.shape_cast %147 : vector<1x16x150xbf16> to vector<16x150xbf16>
    %cst_126 = arith.constant dense<0.000000e+00> : vector<16x128xf32>
    %149 = tpu.matmul %148, %0, %cst_126 {dimension_numbers = #tpu.dot_dimension_numbers<[1], [0], [0], [1], [0, 0, 1, 1], [], []>} : vector<16x150xbf16>, vector<150x128xbf16>, vector<16x128xf32> -> vector<16x128xf32>
    %c6_127 = arith.constant 6 : index
    %c0_128 = arith.constant 0 : index
    %c0_129 = arith.constant 0 : index
    %150 = vector.load %arg2[%c6_127, %c0_128, %c0_129] : memref<25x16x150xbf16, #tpu.memory_space<vmem>>, vector<1x16x150xbf16>
    %151 = vector.shape_cast %150 : vector<1x16x150xbf16> to vector<16x150xbf16>
    %cst_130 = arith.constant dense<0.000000e+00> : vector<16x128xf32>
    %152 = tpu.matmul %151, %0, %cst_130 {dimension_numbers = #tpu.dot_dimension_numbers<[1], [0], [0], [1], [0, 0, 1, 1], [], []>} : vector<16x150xbf16>, vector<150x128xbf16>, vector<16x128xf32> -> vector<16x128xf32>
    %153 = arith.maximumf %149, %152 : vector<16x128xf32>
    %c6_131 = arith.constant 6 : index
    %c0_132 = arith.constant 0 : index
    %c0_133 = arith.constant 0 : index
    %154 = vector.load %arg3[%c6_131, %c0_132, %c0_133] : memref<25x16x150xbf16, #tpu.memory_space<vmem>>, vector<1x16x150xbf16>
    %155 = vector.shape_cast %154 : vector<1x16x150xbf16> to vector<16x150xbf16>
    %cst_134 = arith.constant dense<0.000000e+00> : vector<16x128xf32>
    %156 = tpu.matmul %155, %0, %cst_134 {dimension_numbers = #tpu.dot_dimension_numbers<[1], [0], [0], [1], [0, 0, 1, 1], [], []>} : vector<16x150xbf16>, vector<150x128xbf16>, vector<16x128xf32> -> vector<16x128xf32>
    %157 = arith.maximumf %153, %156 : vector<16x128xf32>
    %c6_135 = arith.constant 6 : index
    %c0_136 = arith.constant 0 : index
    %c0_137 = arith.constant 0 : index
    %158 = vector.load %arg4[%c6_135, %c0_136, %c0_137] : memref<25x16x150xbf16, #tpu.memory_space<vmem>>, vector<1x16x150xbf16>
    %159 = vector.shape_cast %158 : vector<1x16x150xbf16> to vector<16x150xbf16>
    %cst_138 = arith.constant dense<0.000000e+00> : vector<16x128xf32>
    %160 = tpu.matmul %159, %0, %cst_138 {dimension_numbers = #tpu.dot_dimension_numbers<[1], [0], [0], [1], [0, 0, 1, 1], [], []>} : vector<16x150xbf16>, vector<150x128xbf16>, vector<16x128xf32> -> vector<16x128xf32>
    %161 = arith.maximumf %157, %160 : vector<16x128xf32>
    %162 = vector.broadcast %1 : vector<1x128xf32> to vector<16x128xf32>
    %163 = arith.addf %161, %162 : vector<16x128xf32>
    %cst_139 = arith.constant 0.000000e+00 : f32
    %164 = vector.broadcast %cst_139 : f32 to vector<16x128xf32>
    %165 = arith.maximumf %163, %164 : vector<16x128xf32>
    %166 = arith.truncf %165 : vector<16x128xf32> to vector<16x128xbf16>
    %c6_140 = arith.constant 6 : index
    %c0_141 = arith.constant 0 : index
    %c0_142 = arith.constant 0 : index
    %167 = vector.load %arg7[%c6_140, %c0_141, %c0_142] : memref<25x128x128xbf16, #tpu.memory_space<vmem>>, vector<1x128x128xbf16>
    %168 = vector.shape_cast %167 : vector<1x128x128xbf16> to vector<128x128xbf16>
    %cst_143 = arith.constant dense<0.000000e+00> : vector<16x128xf32>
    %169 = tpu.matmul %166, %168, %cst_143 {dimension_numbers = #tpu.dot_dimension_numbers<[1], [0], [0], [1], [0, 0, 1, 1], [], []>} : vector<16x128xbf16>, vector<128x128xbf16>, vector<16x128xf32> -> vector<16x128xf32>
    %170 = arith.addf %146, %169 : vector<16x128xf32>
    %c7 = arith.constant 7 : index
    %c0_144 = arith.constant 0 : index
    %c0_145 = arith.constant 0 : index
    %171 = vector.load %arg1[%c7, %c0_144, %c0_145] : memref<25x16x150xbf16, #tpu.memory_space<vmem>>, vector<1x16x150xbf16>
    %172 = vector.shape_cast %171 : vector<1x16x150xbf16> to vector<16x150xbf16>
    %cst_146 = arith.constant dense<0.000000e+00> : vector<16x128xf32>
    %173 = tpu.matmul %172, %0, %cst_146 {dimension_numbers = #tpu.dot_dimension_numbers<[1], [0], [0], [1], [0, 0, 1, 1], [], []>} : vector<16x150xbf16>, vector<150x128xbf16>, vector<16x128xf32> -> vector<16x128xf32>
    %c7_147 = arith.constant 7 : index
    %c0_148 = arith.constant 0 : index
    %c0_149 = arith.constant 0 : index
    %174 = vector.load %arg2[%c7_147, %c0_148, %c0_149] : memref<25x16x150xbf16, #tpu.memory_space<vmem>>, vector<1x16x150xbf16>
    %175 = vector.shape_cast %174 : vector<1x16x150xbf16> to vector<16x150xbf16>
    %cst_150 = arith.constant dense<0.000000e+00> : vector<16x128xf32>
    %176 = tpu.matmul %175, %0, %cst_150 {dimension_numbers = #tpu.dot_dimension_numbers<[1], [0], [0], [1], [0, 0, 1, 1], [], []>} : vector<16x150xbf16>, vector<150x128xbf16>, vector<16x128xf32> -> vector<16x128xf32>
    %177 = arith.maximumf %173, %176 : vector<16x128xf32>
    %c7_151 = arith.constant 7 : index
    %c0_152 = arith.constant 0 : index
    %c0_153 = arith.constant 0 : index
    %178 = vector.load %arg3[%c7_151, %c0_152, %c0_153] : memref<25x16x150xbf16, #tpu.memory_space<vmem>>, vector<1x16x150xbf16>
    %179 = vector.shape_cast %178 : vector<1x16x150xbf16> to vector<16x150xbf16>
    %cst_154 = arith.constant dense<0.000000e+00> : vector<16x128xf32>
    %180 = tpu.matmul %179, %0, %cst_154 {dimension_numbers = #tpu.dot_dimension_numbers<[1], [0], [0], [1], [0, 0, 1, 1], [], []>} : vector<16x150xbf16>, vector<150x128xbf16>, vector<16x128xf32> -> vector<16x128xf32>
    %181 = arith.maximumf %177, %180 : vector<16x128xf32>
    %c7_155 = arith.constant 7 : index
    %c0_156 = arith.constant 0 : index
    %c0_157 = arith.constant 0 : index
    %182 = vector.load %arg4[%c7_155, %c0_156, %c0_157] : memref<25x16x150xbf16, #tpu.memory_space<vmem>>, vector<1x16x150xbf16>
    %183 = vector.shape_cast %182 : vector<1x16x150xbf16> to vector<16x150xbf16>
    %cst_158 = arith.constant dense<0.000000e+00> : vector<16x128xf32>
    %184 = tpu.matmul %183, %0, %cst_158 {dimension_numbers = #tpu.dot_dimension_numbers<[1], [0], [0], [1], [0, 0, 1, 1], [], []>} : vector<16x150xbf16>, vector<150x128xbf16>, vector<16x128xf32> -> vector<16x128xf32>
    %185 = arith.maximumf %181, %184 : vector<16x128xf32>
    %186 = vector.broadcast %1 : vector<1x128xf32> to vector<16x128xf32>
    %187 = arith.addf %185, %186 : vector<16x128xf32>
    %cst_159 = arith.constant 0.000000e+00 : f32
    %188 = vector.broadcast %cst_159 : f32 to vector<16x128xf32>
    %189 = arith.maximumf %187, %188 : vector<16x128xf32>
    %190 = arith.truncf %189 : vector<16x128xf32> to vector<16x128xbf16>
    %c7_160 = arith.constant 7 : index
    %c0_161 = arith.constant 0 : index
    %c0_162 = arith.constant 0 : index
    %191 = vector.load %arg7[%c7_160, %c0_161, %c0_162] : memref<25x128x128xbf16, #tpu.memory_space<vmem>>, vector<1x128x128xbf16>
    %192 = vector.shape_cast %191 : vector<1x128x128xbf16> to vector<128x128xbf16>
    %cst_163 = arith.constant dense<0.000000e+00> : vector<16x128xf32>
    %193 = tpu.matmul %190, %192, %cst_163 {dimension_numbers = #tpu.dot_dimension_numbers<[1], [0], [0], [1], [0, 0, 1, 1], [], []>} : vector<16x128xbf16>, vector<128x128xbf16>, vector<16x128xf32> -> vector<16x128xf32>
    %194 = arith.addf %170, %193 : vector<16x128xf32>
    %c8 = arith.constant 8 : index
    %c0_164 = arith.constant 0 : index
    %c0_165 = arith.constant 0 : index
    %195 = vector.load %arg1[%c8, %c0_164, %c0_165] : memref<25x16x150xbf16, #tpu.memory_space<vmem>>, vector<1x16x150xbf16>
    %196 = vector.shape_cast %195 : vector<1x16x150xbf16> to vector<16x150xbf16>
    %cst_166 = arith.constant dense<0.000000e+00> : vector<16x128xf32>
    %197 = tpu.matmul %196, %0, %cst_166 {dimension_numbers = #tpu.dot_dimension_numbers<[1], [0], [0], [1], [0, 0, 1, 1], [], []>} : vector<16x150xbf16>, vector<150x128xbf16>, vector<16x128xf32> -> vector<16x128xf32>
    %c8_167 = arith.constant 8 : index
    %c0_168 = arith.constant 0 : index
    %c0_169 = arith.constant 0 : index
    %198 = vector.load %arg2[%c8_167, %c0_168, %c0_169] : memref<25x16x150xbf16, #tpu.memory_space<vmem>>, vector<1x16x150xbf16>
    %199 = vector.shape_cast %198 : vector<1x16x150xbf16> to vector<16x150xbf16>
    %cst_170 = arith.constant dense<0.000000e+00> : vector<16x128xf32>
    %200 = tpu.matmul %199, %0, %cst_170 {dimension_numbers = #tpu.dot_dimension_numbers<[1], [0], [0], [1], [0, 0, 1, 1], [], []>} : vector<16x150xbf16>, vector<150x128xbf16>, vector<16x128xf32> -> vector<16x128xf32>
    %201 = arith.maximumf %197, %200 : vector<16x128xf32>
    %c8_171 = arith.constant 8 : index
    %c0_172 = arith.constant 0 : index
    %c0_173 = arith.constant 0 : index
    %202 = vector.load %arg3[%c8_171, %c0_172, %c0_173] : memref<25x16x150xbf16, #tpu.memory_space<vmem>>, vector<1x16x150xbf16>
    %203 = vector.shape_cast %202 : vector<1x16x150xbf16> to vector<16x150xbf16>
    %cst_174 = arith.constant dense<0.000000e+00> : vector<16x128xf32>
    %204 = tpu.matmul %203, %0, %cst_174 {dimension_numbers = #tpu.dot_dimension_numbers<[1], [0], [0], [1], [0, 0, 1, 1], [], []>} : vector<16x150xbf16>, vector<150x128xbf16>, vector<16x128xf32> -> vector<16x128xf32>
    %205 = arith.maximumf %201, %204 : vector<16x128xf32>
    %c8_175 = arith.constant 8 : index
    %c0_176 = arith.constant 0 : index
    %c0_177 = arith.constant 0 : index
    %206 = vector.load %arg4[%c8_175, %c0_176, %c0_177] : memref<25x16x150xbf16, #tpu.memory_space<vmem>>, vector<1x16x150xbf16>
    %207 = vector.shape_cast %206 : vector<1x16x150xbf16> to vector<16x150xbf16>
    %cst_178 = arith.constant dense<0.000000e+00> : vector<16x128xf32>
    %208 = tpu.matmul %207, %0, %cst_178 {dimension_numbers = #tpu.dot_dimension_numbers<[1], [0], [0], [1], [0, 0, 1, 1], [], []>} : vector<16x150xbf16>, vector<150x128xbf16>, vector<16x128xf32> -> vector<16x128xf32>
    %209 = arith.maximumf %205, %208 : vector<16x128xf32>
    %210 = vector.broadcast %1 : vector<1x128xf32> to vector<16x128xf32>
    %211 = arith.addf %209, %210 : vector<16x128xf32>
    %cst_179 = arith.constant 0.000000e+00 : f32
    %212 = vector.broadcast %cst_179 : f32 to vector<16x128xf32>
    %213 = arith.maximumf %211, %212 : vector<16x128xf32>
    %214 = arith.truncf %213 : vector<16x128xf32> to vector<16x128xbf16>
    %c8_180 = arith.constant 8 : index
    %c0_181 = arith.constant 0 : index
    %c0_182 = arith.constant 0 : index
    %215 = vector.load %arg7[%c8_180, %c0_181, %c0_182] : memref<25x128x128xbf16, #tpu.memory_space<vmem>>, vector<1x128x128xbf16>
    %216 = vector.shape_cast %215 : vector<1x128x128xbf16> to vector<128x128xbf16>
    %cst_183 = arith.constant dense<0.000000e+00> : vector<16x128xf32>
    %217 = tpu.matmul %214, %216, %cst_183 {dimension_numbers = #tpu.dot_dimension_numbers<[1], [0], [0], [1], [0, 0, 1, 1], [], []>} : vector<16x128xbf16>, vector<128x128xbf16>, vector<16x128xf32> -> vector<16x128xf32>
    %218 = arith.addf %194, %217 : vector<16x128xf32>
    %c9 = arith.constant 9 : index
    %c0_184 = arith.constant 0 : index
    %c0_185 = arith.constant 0 : index
    %219 = vector.load %arg1[%c9, %c0_184, %c0_185] : memref<25x16x150xbf16, #tpu.memory_space<vmem>>, vector<1x16x150xbf16>
    %220 = vector.shape_cast %219 : vector<1x16x150xbf16> to vector<16x150xbf16>
    %cst_186 = arith.constant dense<0.000000e+00> : vector<16x128xf32>
    %221 = tpu.matmul %220, %0, %cst_186 {dimension_numbers = #tpu.dot_dimension_numbers<[1], [0], [0], [1], [0, 0, 1, 1], [], []>} : vector<16x150xbf16>, vector<150x128xbf16>, vector<16x128xf32> -> vector<16x128xf32>
    %c9_187 = arith.constant 9 : index
    %c0_188 = arith.constant 0 : index
    %c0_189 = arith.constant 0 : index
    %222 = vector.load %arg2[%c9_187, %c0_188, %c0_189] : memref<25x16x150xbf16, #tpu.memory_space<vmem>>, vector<1x16x150xbf16>
    %223 = vector.shape_cast %222 : vector<1x16x150xbf16> to vector<16x150xbf16>
    %cst_190 = arith.constant dense<0.000000e+00> : vector<16x128xf32>
    %224 = tpu.matmul %223, %0, %cst_190 {dimension_numbers = #tpu.dot_dimension_numbers<[1], [0], [0], [1], [0, 0, 1, 1], [], []>} : vector<16x150xbf16>, vector<150x128xbf16>, vector<16x128xf32> -> vector<16x128xf32>
    %225 = arith.maximumf %221, %224 : vector<16x128xf32>
    %c9_191 = arith.constant 9 : index
    %c0_192 = arith.constant 0 : index
    %c0_193 = arith.constant 0 : index
    %226 = vector.load %arg3[%c9_191, %c0_192, %c0_193] : memref<25x16x150xbf16, #tpu.memory_space<vmem>>, vector<1x16x150xbf16>
    %227 = vector.shape_cast %226 : vector<1x16x150xbf16> to vector<16x150xbf16>
    %cst_194 = arith.constant dense<0.000000e+00> : vector<16x128xf32>
    %228 = tpu.matmul %227, %0, %cst_194 {dimension_numbers = #tpu.dot_dimension_numbers<[1], [0], [0], [1], [0, 0, 1, 1], [], []>} : vector<16x150xbf16>, vector<150x128xbf16>, vector<16x128xf32> -> vector<16x128xf32>
    %229 = arith.maximumf %225, %228 : vector<16x128xf32>
    %c9_195 = arith.constant 9 : index
    %c0_196 = arith.constant 0 : index
    %c0_197 = arith.constant 0 : index
    %230 = vector.load %arg4[%c9_195, %c0_196, %c0_197] : memref<25x16x150xbf16, #tpu.memory_space<vmem>>, vector<1x16x150xbf16>
    %231 = vector.shape_cast %230 : vector<1x16x150xbf16> to vector<16x150xbf16>
    %cst_198 = arith.constant dense<0.000000e+00> : vector<16x128xf32>
    %232 = tpu.matmul %231, %0, %cst_198 {dimension_numbers = #tpu.dot_dimension_numbers<[1], [0], [0], [1], [0, 0, 1, 1], [], []>} : vector<16x150xbf16>, vector<150x128xbf16>, vector<16x128xf32> -> vector<16x128xf32>
    %233 = arith.maximumf %229, %232 : vector<16x128xf32>
    %234 = vector.broadcast %1 : vector<1x128xf32> to vector<16x128xf32>
    %235 = arith.addf %233, %234 : vector<16x128xf32>
    %cst_199 = arith.constant 0.000000e+00 : f32
    %236 = vector.broadcast %cst_199 : f32 to vector<16x128xf32>
    %237 = arith.maximumf %235, %236 : vector<16x128xf32>
    %238 = arith.truncf %237 : vector<16x128xf32> to vector<16x128xbf16>
    %c9_200 = arith.constant 9 : index
    %c0_201 = arith.constant 0 : index
    %c0_202 = arith.constant 0 : index
    %239 = vector.load %arg7[%c9_200, %c0_201, %c0_202] : memref<25x128x128xbf16, #tpu.memory_space<vmem>>, vector<1x128x128xbf16>
    %240 = vector.shape_cast %239 : vector<1x128x128xbf16> to vector<128x128xbf16>
    %cst_203 = arith.constant dense<0.000000e+00> : vector<16x128xf32>
    %241 = tpu.matmul %238, %240, %cst_203 {dimension_numbers = #tpu.dot_dimension_numbers<[1], [0], [0], [1], [0, 0, 1, 1], [], []>} : vector<16x128xbf16>, vector<128x128xbf16>, vector<16x128xf32> -> vector<16x128xf32>
    %242 = arith.addf %218, %241 : vector<16x128xf32>
    %c10 = arith.constant 10 : index
    %c0_204 = arith.constant 0 : index
    %c0_205 = arith.constant 0 : index
    %243 = vector.load %arg1[%c10, %c0_204, %c0_205] : memref<25x16x150xbf16, #tpu.memory_space<vmem>>, vector<1x16x150xbf16>
    %244 = vector.shape_cast %243 : vector<1x16x150xbf16> to vector<16x150xbf16>
    %cst_206 = arith.constant dense<0.000000e+00> : vector<16x128xf32>
    %245 = tpu.matmul %244, %0, %cst_206 {dimension_numbers = #tpu.dot_dimension_numbers<[1], [0], [0], [1], [0, 0, 1, 1], [], []>} : vector<16x150xbf16>, vector<150x128xbf16>, vector<16x128xf32> -> vector<16x128xf32>
    %c10_207 = arith.constant 10 : index
    %c0_208 = arith.constant 0 : index
    %c0_209 = arith.constant 0 : index
    %246 = vector.load %arg2[%c10_207, %c0_208, %c0_209] : memref<25x16x150xbf16, #tpu.memory_space<vmem>>, vector<1x16x150xbf16>
    %247 = vector.shape_cast %246 : vector<1x16x150xbf16> to vector<16x150xbf16>
    %cst_210 = arith.constant dense<0.000000e+00> : vector<16x128xf32>
    %248 = tpu.matmul %247, %0, %cst_210 {dimension_numbers = #tpu.dot_dimension_numbers<[1], [0], [0], [1], [0, 0, 1, 1], [], []>} : vector<16x150xbf16>, vector<150x128xbf16>, vector<16x128xf32> -> vector<16x128xf32>
    %249 = arith.maximumf %245, %248 : vector<16x128xf32>
    %c10_211 = arith.constant 10 : index
    %c0_212 = arith.constant 0 : index
    %c0_213 = arith.constant 0 : index
    %250 = vector.load %arg3[%c10_211, %c0_212, %c0_213] : memref<25x16x150xbf16, #tpu.memory_space<vmem>>, vector<1x16x150xbf16>
    %251 = vector.shape_cast %250 : vector<1x16x150xbf16> to vector<16x150xbf16>
    %cst_214 = arith.constant dense<0.000000e+00> : vector<16x128xf32>
    %252 = tpu.matmul %251, %0, %cst_214 {dimension_numbers = #tpu.dot_dimension_numbers<[1], [0], [0], [1], [0, 0, 1, 1], [], []>} : vector<16x150xbf16>, vector<150x128xbf16>, vector<16x128xf32> -> vector<16x128xf32>
    %253 = arith.maximumf %249, %252 : vector<16x128xf32>
    %c10_215 = arith.constant 10 : index
    %c0_216 = arith.constant 0 : index
    %c0_217 = arith.constant 0 : index
    %254 = vector.load %arg4[%c10_215, %c0_216, %c0_217] : memref<25x16x150xbf16, #tpu.memory_space<vmem>>, vector<1x16x150xbf16>
    %255 = vector.shape_cast %254 : vector<1x16x150xbf16> to vector<16x150xbf16>
    %cst_218 = arith.constant dense<0.000000e+00> : vector<16x128xf32>
    %256 = tpu.matmul %255, %0, %cst_218 {dimension_numbers = #tpu.dot_dimension_numbers<[1], [0], [0], [1], [0, 0, 1, 1], [], []>} : vector<16x150xbf16>, vector<150x128xbf16>, vector<16x128xf32> -> vector<16x128xf32>
    %257 = arith.maximumf %253, %256 : vector<16x128xf32>
    %258 = vector.broadcast %1 : vector<1x128xf32> to vector<16x128xf32>
    %259 = arith.addf %257, %258 : vector<16x128xf32>
    %cst_219 = arith.constant 0.000000e+00 : f32
    %260 = vector.broadcast %cst_219 : f32 to vector<16x128xf32>
    %261 = arith.maximumf %259, %260 : vector<16x128xf32>
    %262 = arith.truncf %261 : vector<16x128xf32> to vector<16x128xbf16>
    %c10_220 = arith.constant 10 : index
    %c0_221 = arith.constant 0 : index
    %c0_222 = arith.constant 0 : index
    %263 = vector.load %arg7[%c10_220, %c0_221, %c0_222] : memref<25x128x128xbf16, #tpu.memory_space<vmem>>, vector<1x128x128xbf16>
    %264 = vector.shape_cast %263 : vector<1x128x128xbf16> to vector<128x128xbf16>
    %cst_223 = arith.constant dense<0.000000e+00> : vector<16x128xf32>
    %265 = tpu.matmul %262, %264, %cst_223 {dimension_numbers = #tpu.dot_dimension_numbers<[1], [0], [0], [1], [0, 0, 1, 1], [], []>} : vector<16x128xbf16>, vector<128x128xbf16>, vector<16x128xf32> -> vector<16x128xf32>
    %266 = arith.addf %242, %265 : vector<16x128xf32>
    %c11 = arith.constant 11 : index
    %c0_224 = arith.constant 0 : index
    %c0_225 = arith.constant 0 : index
    %267 = vector.load %arg1[%c11, %c0_224, %c0_225] : memref<25x16x150xbf16, #tpu.memory_space<vmem>>, vector<1x16x150xbf16>
    %268 = vector.shape_cast %267 : vector<1x16x150xbf16> to vector<16x150xbf16>
    %cst_226 = arith.constant dense<0.000000e+00> : vector<16x128xf32>
    %269 = tpu.matmul %268, %0, %cst_226 {dimension_numbers = #tpu.dot_dimension_numbers<[1], [0], [0], [1], [0, 0, 1, 1], [], []>} : vector<16x150xbf16>, vector<150x128xbf16>, vector<16x128xf32> -> vector<16x128xf32>
    %c11_227 = arith.constant 11 : index
    %c0_228 = arith.constant 0 : index
    %c0_229 = arith.constant 0 : index
    %270 = vector.load %arg2[%c11_227, %c0_228, %c0_229] : memref<25x16x150xbf16, #tpu.memory_space<vmem>>, vector<1x16x150xbf16>
    %271 = vector.shape_cast %270 : vector<1x16x150xbf16> to vector<16x150xbf16>
    %cst_230 = arith.constant dense<0.000000e+00> : vector<16x128xf32>
    %272 = tpu.matmul %271, %0, %cst_230 {dimension_numbers = #tpu.dot_dimension_numbers<[1], [0], [0], [1], [0, 0, 1, 1], [], []>} : vector<16x150xbf16>, vector<150x128xbf16>, vector<16x128xf32> -> vector<16x128xf32>
    %273 = arith.maximumf %269, %272 : vector<16x128xf32>
    %c11_231 = arith.constant 11 : index
    %c0_232 = arith.constant 0 : index
    %c0_233 = arith.constant 0 : index
    %274 = vector.load %arg3[%c11_231, %c0_232, %c0_233] : memref<25x16x150xbf16, #tpu.memory_space<vmem>>, vector<1x16x150xbf16>
    %275 = vector.shape_cast %274 : vector<1x16x150xbf16> to vector<16x150xbf16>
    %cst_234 = arith.constant dense<0.000000e+00> : vector<16x128xf32>
    %276 = tpu.matmul %275, %0, %cst_234 {dimension_numbers = #tpu.dot_dimension_numbers<[1], [0], [0], [1], [0, 0, 1, 1], [], []>} : vector<16x150xbf16>, vector<150x128xbf16>, vector<16x128xf32> -> vector<16x128xf32>
    %277 = arith.maximumf %273, %276 : vector<16x128xf32>
    %c11_235 = arith.constant 11 : index
    %c0_236 = arith.constant 0 : index
    %c0_237 = arith.constant 0 : index
    %278 = vector.load %arg4[%c11_235, %c0_236, %c0_237] : memref<25x16x150xbf16, #tpu.memory_space<vmem>>, vector<1x16x150xbf16>
    %279 = vector.shape_cast %278 : vector<1x16x150xbf16> to vector<16x150xbf16>
    %cst_238 = arith.constant dense<0.000000e+00> : vector<16x128xf32>
    %280 = tpu.matmul %279, %0, %cst_238 {dimension_numbers = #tpu.dot_dimension_numbers<[1], [0], [0], [1], [0, 0, 1, 1], [], []>} : vector<16x150xbf16>, vector<150x128xbf16>, vector<16x128xf32> -> vector<16x128xf32>
    %281 = arith.maximumf %277, %280 : vector<16x128xf32>
    %282 = vector.broadcast %1 : vector<1x128xf32> to vector<16x128xf32>
    %283 = arith.addf %281, %282 : vector<16x128xf32>
    %cst_239 = arith.constant 0.000000e+00 : f32
    %284 = vector.broadcast %cst_239 : f32 to vector<16x128xf32>
    %285 = arith.maximumf %283, %284 : vector<16x128xf32>
    %286 = arith.truncf %285 : vector<16x128xf32> to vector<16x128xbf16>
    %c11_240 = arith.constant 11 : index
    %c0_241 = arith.constant 0 : index
    %c0_242 = arith.constant 0 : index
    %287 = vector.load %arg7[%c11_240, %c0_241, %c0_242] : memref<25x128x128xbf16, #tpu.memory_space<vmem>>, vector<1x128x128xbf16>
    %288 = vector.shape_cast %287 : vector<1x128x128xbf16> to vector<128x128xbf16>
    %cst_243 = arith.constant dense<0.000000e+00> : vector<16x128xf32>
    %289 = tpu.matmul %286, %288, %cst_243 {dimension_numbers = #tpu.dot_dimension_numbers<[1], [0], [0], [1], [0, 0, 1, 1], [], []>} : vector<16x128xbf16>, vector<128x128xbf16>, vector<16x128xf32> -> vector<16x128xf32>
    %290 = arith.addf %266, %289 : vector<16x128xf32>
    %c12 = arith.constant 12 : index
    %c0_244 = arith.constant 0 : index
    %c0_245 = arith.constant 0 : index
    %291 = vector.load %arg1[%c12, %c0_244, %c0_245] : memref<25x16x150xbf16, #tpu.memory_space<vmem>>, vector<1x16x150xbf16>
    %292 = vector.shape_cast %291 : vector<1x16x150xbf16> to vector<16x150xbf16>
    %cst_246 = arith.constant dense<0.000000e+00> : vector<16x128xf32>
    %293 = tpu.matmul %292, %0, %cst_246 {dimension_numbers = #tpu.dot_dimension_numbers<[1], [0], [0], [1], [0, 0, 1, 1], [], []>} : vector<16x150xbf16>, vector<150x128xbf16>, vector<16x128xf32> -> vector<16x128xf32>
    %c12_247 = arith.constant 12 : index
    %c0_248 = arith.constant 0 : index
    %c0_249 = arith.constant 0 : index
    %294 = vector.load %arg2[%c12_247, %c0_248, %c0_249] : memref<25x16x150xbf16, #tpu.memory_space<vmem>>, vector<1x16x150xbf16>
    %295 = vector.shape_cast %294 : vector<1x16x150xbf16> to vector<16x150xbf16>
    %cst_250 = arith.constant dense<0.000000e+00> : vector<16x128xf32>
    %296 = tpu.matmul %295, %0, %cst_250 {dimension_numbers = #tpu.dot_dimension_numbers<[1], [0], [0], [1], [0, 0, 1, 1], [], []>} : vector<16x150xbf16>, vector<150x128xbf16>, vector<16x128xf32> -> vector<16x128xf32>
    %297 = arith.maximumf %293, %296 : vector<16x128xf32>
    %c12_251 = arith.constant 12 : index
    %c0_252 = arith.constant 0 : index
    %c0_253 = arith.constant 0 : index
    %298 = vector.load %arg3[%c12_251, %c0_252, %c0_253] : memref<25x16x150xbf16, #tpu.memory_space<vmem>>, vector<1x16x150xbf16>
    %299 = vector.shape_cast %298 : vector<1x16x150xbf16> to vector<16x150xbf16>
    %cst_254 = arith.constant dense<0.000000e+00> : vector<16x128xf32>
    %300 = tpu.matmul %299, %0, %cst_254 {dimension_numbers = #tpu.dot_dimension_numbers<[1], [0], [0], [1], [0, 0, 1, 1], [], []>} : vector<16x150xbf16>, vector<150x128xbf16>, vector<16x128xf32> -> vector<16x128xf32>
    %301 = arith.maximumf %297, %300 : vector<16x128xf32>
    %c12_255 = arith.constant 12 : index
    %c0_256 = arith.constant 0 : index
    %c0_257 = arith.constant 0 : index
    %302 = vector.load %arg4[%c12_255, %c0_256, %c0_257] : memref<25x16x150xbf16, #tpu.memory_space<vmem>>, vector<1x16x150xbf16>
    %303 = vector.shape_cast %302 : vector<1x16x150xbf16> to vector<16x150xbf16>
    %cst_258 = arith.constant dense<0.000000e+00> : vector<16x128xf32>
    %304 = tpu.matmul %303, %0, %cst_258 {dimension_numbers = #tpu.dot_dimension_numbers<[1], [0], [0], [1], [0, 0, 1, 1], [], []>} : vector<16x150xbf16>, vector<150x128xbf16>, vector<16x128xf32> -> vector<16x128xf32>
    %305 = arith.maximumf %301, %304 : vector<16x128xf32>
    %306 = vector.broadcast %1 : vector<1x128xf32> to vector<16x128xf32>
    %307 = arith.addf %305, %306 : vector<16x128xf32>
    %cst_259 = arith.constant 0.000000e+00 : f32
    %308 = vector.broadcast %cst_259 : f32 to vector<16x128xf32>
    %309 = arith.maximumf %307, %308 : vector<16x128xf32>
    %310 = arith.truncf %309 : vector<16x128xf32> to vector<16x128xbf16>
    %c12_260 = arith.constant 12 : index
    %c0_261 = arith.constant 0 : index
    %c0_262 = arith.constant 0 : index
    %311 = vector.load %arg7[%c12_260, %c0_261, %c0_262] : memref<25x128x128xbf16, #tpu.memory_space<vmem>>, vector<1x128x128xbf16>
    %312 = vector.shape_cast %311 : vector<1x128x128xbf16> to vector<128x128xbf16>
    %cst_263 = arith.constant dense<0.000000e+00> : vector<16x128xf32>
    %313 = tpu.matmul %310, %312, %cst_263 {dimension_numbers = #tpu.dot_dimension_numbers<[1], [0], [0], [1], [0, 0, 1, 1], [], []>} : vector<16x128xbf16>, vector<128x128xbf16>, vector<16x128xf32> -> vector<16x128xf32>
    %314 = arith.addf %290, %313 : vector<16x128xf32>
    %c13 = arith.constant 13 : index
    %c0_264 = arith.constant 0 : index
    %c0_265 = arith.constant 0 : index
    %315 = vector.load %arg1[%c13, %c0_264, %c0_265] : memref<25x16x150xbf16, #tpu.memory_space<vmem>>, vector<1x16x150xbf16>
    %316 = vector.shape_cast %315 : vector<1x16x150xbf16> to vector<16x150xbf16>
    %cst_266 = arith.constant dense<0.000000e+00> : vector<16x128xf32>
    %317 = tpu.matmul %316, %0, %cst_266 {dimension_numbers = #tpu.dot_dimension_numbers<[1], [0], [0], [1], [0, 0, 1, 1], [], []>} : vector<16x150xbf16>, vector<150x128xbf16>, vector<16x128xf32> -> vector<16x128xf32>
    %c13_267 = arith.constant 13 : index
    %c0_268 = arith.constant 0 : index
    %c0_269 = arith.constant 0 : index
    %318 = vector.load %arg2[%c13_267, %c0_268, %c0_269] : memref<25x16x150xbf16, #tpu.memory_space<vmem>>, vector<1x16x150xbf16>
    %319 = vector.shape_cast %318 : vector<1x16x150xbf16> to vector<16x150xbf16>
    %cst_270 = arith.constant dense<0.000000e+00> : vector<16x128xf32>
    %320 = tpu.matmul %319, %0, %cst_270 {dimension_numbers = #tpu.dot_dimension_numbers<[1], [0], [0], [1], [0, 0, 1, 1], [], []>} : vector<16x150xbf16>, vector<150x128xbf16>, vector<16x128xf32> -> vector<16x128xf32>
    %321 = arith.maximumf %317, %320 : vector<16x128xf32>
    %c13_271 = arith.constant 13 : index
    %c0_272 = arith.constant 0 : index
    %c0_273 = arith.constant 0 : index
    %322 = vector.load %arg3[%c13_271, %c0_272, %c0_273] : memref<25x16x150xbf16, #tpu.memory_space<vmem>>, vector<1x16x150xbf16>
    %323 = vector.shape_cast %322 : vector<1x16x150xbf16> to vector<16x150xbf16>
    %cst_274 = arith.constant dense<0.000000e+00> : vector<16x128xf32>
    %324 = tpu.matmul %323, %0, %cst_274 {dimension_numbers = #tpu.dot_dimension_numbers<[1], [0], [0], [1], [0, 0, 1, 1], [], []>} : vector<16x150xbf16>, vector<150x128xbf16>, vector<16x128xf32> -> vector<16x128xf32>
    %325 = arith.maximumf %321, %324 : vector<16x128xf32>
    %c13_275 = arith.constant 13 : index
    %c0_276 = arith.constant 0 : index
    %c0_277 = arith.constant 0 : index
    %326 = vector.load %arg4[%c13_275, %c0_276, %c0_277] : memref<25x16x150xbf16, #tpu.memory_space<vmem>>, vector<1x16x150xbf16>
    %327 = vector.shape_cast %326 : vector<1x16x150xbf16> to vector<16x150xbf16>
    %cst_278 = arith.constant dense<0.000000e+00> : vector<16x128xf32>
    %328 = tpu.matmul %327, %0, %cst_278 {dimension_numbers = #tpu.dot_dimension_numbers<[1], [0], [0], [1], [0, 0, 1, 1], [], []>} : vector<16x150xbf16>, vector<150x128xbf16>, vector<16x128xf32> -> vector<16x128xf32>
    %329 = arith.maximumf %325, %328 : vector<16x128xf32>
    %330 = vector.broadcast %1 : vector<1x128xf32> to vector<16x128xf32>
    %331 = arith.addf %329, %330 : vector<16x128xf32>
    %cst_279 = arith.constant 0.000000e+00 : f32
    %332 = vector.broadcast %cst_279 : f32 to vector<16x128xf32>
    %333 = arith.maximumf %331, %332 : vector<16x128xf32>
    %334 = arith.truncf %333 : vector<16x128xf32> to vector<16x128xbf16>
    %c13_280 = arith.constant 13 : index
    %c0_281 = arith.constant 0 : index
    %c0_282 = arith.constant 0 : index
    %335 = vector.load %arg7[%c13_280, %c0_281, %c0_282] : memref<25x128x128xbf16, #tpu.memory_space<vmem>>, vector<1x128x128xbf16>
    %336 = vector.shape_cast %335 : vector<1x128x128xbf16> to vector<128x128xbf16>
    %cst_283 = arith.constant dense<0.000000e+00> : vector<16x128xf32>
    %337 = tpu.matmul %334, %336, %cst_283 {dimension_numbers = #tpu.dot_dimension_numbers<[1], [0], [0], [1], [0, 0, 1, 1], [], []>} : vector<16x128xbf16>, vector<128x128xbf16>, vector<16x128xf32> -> vector<16x128xf32>
    %338 = arith.addf %314, %337 : vector<16x128xf32>
    %c14 = arith.constant 14 : index
    %c0_284 = arith.constant 0 : index
    %c0_285 = arith.constant 0 : index
    %339 = vector.load %arg1[%c14, %c0_284, %c0_285] : memref<25x16x150xbf16, #tpu.memory_space<vmem>>, vector<1x16x150xbf16>
    %340 = vector.shape_cast %339 : vector<1x16x150xbf16> to vector<16x150xbf16>
    %cst_286 = arith.constant dense<0.000000e+00> : vector<16x128xf32>
    %341 = tpu.matmul %340, %0, %cst_286 {dimension_numbers = #tpu.dot_dimension_numbers<[1], [0], [0], [1], [0, 0, 1, 1], [], []>} : vector<16x150xbf16>, vector<150x128xbf16>, vector<16x128xf32> -> vector<16x128xf32>
    %c14_287 = arith.constant 14 : index
    %c0_288 = arith.constant 0 : index
    %c0_289 = arith.constant 0 : index
    %342 = vector.load %arg2[%c14_287, %c0_288, %c0_289] : memref<25x16x150xbf16, #tpu.memory_space<vmem>>, vector<1x16x150xbf16>
    %343 = vector.shape_cast %342 : vector<1x16x150xbf16> to vector<16x150xbf16>
    %cst_290 = arith.constant dense<0.000000e+00> : vector<16x128xf32>
    %344 = tpu.matmul %343, %0, %cst_290 {dimension_numbers = #tpu.dot_dimension_numbers<[1], [0], [0], [1], [0, 0, 1, 1], [], []>} : vector<16x150xbf16>, vector<150x128xbf16>, vector<16x128xf32> -> vector<16x128xf32>
    %345 = arith.maximumf %341, %344 : vector<16x128xf32>
    %c14_291 = arith.constant 14 : index
    %c0_292 = arith.constant 0 : index
    %c0_293 = arith.constant 0 : index
    %346 = vector.load %arg3[%c14_291, %c0_292, %c0_293] : memref<25x16x150xbf16, #tpu.memory_space<vmem>>, vector<1x16x150xbf16>
    %347 = vector.shape_cast %346 : vector<1x16x150xbf16> to vector<16x150xbf16>
    %cst_294 = arith.constant dense<0.000000e+00> : vector<16x128xf32>
    %348 = tpu.matmul %347, %0, %cst_294 {dimension_numbers = #tpu.dot_dimension_numbers<[1], [0], [0], [1], [0, 0, 1, 1], [], []>} : vector<16x150xbf16>, vector<150x128xbf16>, vector<16x128xf32> -> vector<16x128xf32>
    %349 = arith.maximumf %345, %348 : vector<16x128xf32>
    %c14_295 = arith.constant 14 : index
    %c0_296 = arith.constant 0 : index
    %c0_297 = arith.constant 0 : index
    %350 = vector.load %arg4[%c14_295, %c0_296, %c0_297] : memref<25x16x150xbf16, #tpu.memory_space<vmem>>, vector<1x16x150xbf16>
    %351 = vector.shape_cast %350 : vector<1x16x150xbf16> to vector<16x150xbf16>
    %cst_298 = arith.constant dense<0.000000e+00> : vector<16x128xf32>
    %352 = tpu.matmul %351, %0, %cst_298 {dimension_numbers = #tpu.dot_dimension_numbers<[1], [0], [0], [1], [0, 0, 1, 1], [], []>} : vector<16x150xbf16>, vector<150x128xbf16>, vector<16x128xf32> -> vector<16x128xf32>
    %353 = arith.maximumf %349, %352 : vector<16x128xf32>
    %354 = vector.broadcast %1 : vector<1x128xf32> to vector<16x128xf32>
    %355 = arith.addf %353, %354 : vector<16x128xf32>
    %cst_299 = arith.constant 0.000000e+00 : f32
    %356 = vector.broadcast %cst_299 : f32 to vector<16x128xf32>
    %357 = arith.maximumf %355, %356 : vector<16x128xf32>
    %358 = arith.truncf %357 : vector<16x128xf32> to vector<16x128xbf16>
    %c14_300 = arith.constant 14 : index
    %c0_301 = arith.constant 0 : index
    %c0_302 = arith.constant 0 : index
    %359 = vector.load %arg7[%c14_300, %c0_301, %c0_302] : memref<25x128x128xbf16, #tpu.memory_space<vmem>>, vector<1x128x128xbf16>
    %360 = vector.shape_cast %359 : vector<1x128x128xbf16> to vector<128x128xbf16>
    %cst_303 = arith.constant dense<0.000000e+00> : vector<16x128xf32>
    %361 = tpu.matmul %358, %360, %cst_303 {dimension_numbers = #tpu.dot_dimension_numbers<[1], [0], [0], [1], [0, 0, 1, 1], [], []>} : vector<16x128xbf16>, vector<128x128xbf16>, vector<16x128xf32> -> vector<16x128xf32>
    %362 = arith.addf %338, %361 : vector<16x128xf32>
    %c15 = arith.constant 15 : index
    %c0_304 = arith.constant 0 : index
    %c0_305 = arith.constant 0 : index
    %363 = vector.load %arg1[%c15, %c0_304, %c0_305] : memref<25x16x150xbf16, #tpu.memory_space<vmem>>, vector<1x16x150xbf16>
    %364 = vector.shape_cast %363 : vector<1x16x150xbf16> to vector<16x150xbf16>
    %cst_306 = arith.constant dense<0.000000e+00> : vector<16x128xf32>
    %365 = tpu.matmul %364, %0, %cst_306 {dimension_numbers = #tpu.dot_dimension_numbers<[1], [0], [0], [1], [0, 0, 1, 1], [], []>} : vector<16x150xbf16>, vector<150x128xbf16>, vector<16x128xf32> -> vector<16x128xf32>
    %c15_307 = arith.constant 15 : index
    %c0_308 = arith.constant 0 : index
    %c0_309 = arith.constant 0 : index
    %366 = vector.load %arg2[%c15_307, %c0_308, %c0_309] : memref<25x16x150xbf16, #tpu.memory_space<vmem>>, vector<1x16x150xbf16>
    %367 = vector.shape_cast %366 : vector<1x16x150xbf16> to vector<16x150xbf16>
    %cst_310 = arith.constant dense<0.000000e+00> : vector<16x128xf32>
    %368 = tpu.matmul %367, %0, %cst_310 {dimension_numbers = #tpu.dot_dimension_numbers<[1], [0], [0], [1], [0, 0, 1, 1], [], []>} : vector<16x150xbf16>, vector<150x128xbf16>, vector<16x128xf32> -> vector<16x128xf32>
    %369 = arith.maximumf %365, %368 : vector<16x128xf32>
    %c15_311 = arith.constant 15 : index
    %c0_312 = arith.constant 0 : index
    %c0_313 = arith.constant 0 : index
    %370 = vector.load %arg3[%c15_311, %c0_312, %c0_313] : memref<25x16x150xbf16, #tpu.memory_space<vmem>>, vector<1x16x150xbf16>
    %371 = vector.shape_cast %370 : vector<1x16x150xbf16> to vector<16x150xbf16>
    %cst_314 = arith.constant dense<0.000000e+00> : vector<16x128xf32>
    %372 = tpu.matmul %371, %0, %cst_314 {dimension_numbers = #tpu.dot_dimension_numbers<[1], [0], [0], [1], [0, 0, 1, 1], [], []>} : vector<16x150xbf16>, vector<150x128xbf16>, vector<16x128xf32> -> vector<16x128xf32>
    %373 = arith.maximumf %369, %372 : vector<16x128xf32>
    %c15_315 = arith.constant 15 : index
    %c0_316 = arith.constant 0 : index
    %c0_317 = arith.constant 0 : index
    %374 = vector.load %arg4[%c15_315, %c0_316, %c0_317] : memref<25x16x150xbf16, #tpu.memory_space<vmem>>, vector<1x16x150xbf16>
    %375 = vector.shape_cast %374 : vector<1x16x150xbf16> to vector<16x150xbf16>
    %cst_318 = arith.constant dense<0.000000e+00> : vector<16x128xf32>
    %376 = tpu.matmul %375, %0, %cst_318 {dimension_numbers = #tpu.dot_dimension_numbers<[1], [0], [0], [1], [0, 0, 1, 1], [], []>} : vector<16x150xbf16>, vector<150x128xbf16>, vector<16x128xf32> -> vector<16x128xf32>
    %377 = arith.maximumf %373, %376 : vector<16x128xf32>
    %378 = vector.broadcast %1 : vector<1x128xf32> to vector<16x128xf32>
    %379 = arith.addf %377, %378 : vector<16x128xf32>
    %cst_319 = arith.constant 0.000000e+00 : f32
    %380 = vector.broadcast %cst_319 : f32 to vector<16x128xf32>
    %381 = arith.maximumf %379, %380 : vector<16x128xf32>
    %382 = arith.truncf %381 : vector<16x128xf32> to vector<16x128xbf16>
    %c15_320 = arith.constant 15 : index
    %c0_321 = arith.constant 0 : index
    %c0_322 = arith.constant 0 : index
    %383 = vector.load %arg7[%c15_320, %c0_321, %c0_322] : memref<25x128x128xbf16, #tpu.memory_space<vmem>>, vector<1x128x128xbf16>
    %384 = vector.shape_cast %383 : vector<1x128x128xbf16> to vector<128x128xbf16>
    %cst_323 = arith.constant dense<0.000000e+00> : vector<16x128xf32>
    %385 = tpu.matmul %382, %384, %cst_323 {dimension_numbers = #tpu.dot_dimension_numbers<[1], [0], [0], [1], [0, 0, 1, 1], [], []>} : vector<16x128xbf16>, vector<128x128xbf16>, vector<16x128xf32> -> vector<16x128xf32>
    %386 = arith.addf %362, %385 : vector<16x128xf32>
    %c16 = arith.constant 16 : index
    %c0_324 = arith.constant 0 : index
    %c0_325 = arith.constant 0 : index
    %387 = vector.load %arg1[%c16, %c0_324, %c0_325] : memref<25x16x150xbf16, #tpu.memory_space<vmem>>, vector<1x16x150xbf16>
    %388 = vector.shape_cast %387 : vector<1x16x150xbf16> to vector<16x150xbf16>
    %cst_326 = arith.constant dense<0.000000e+00> : vector<16x128xf32>
    %389 = tpu.matmul %388, %0, %cst_326 {dimension_numbers = #tpu.dot_dimension_numbers<[1], [0], [0], [1], [0, 0, 1, 1], [], []>} : vector<16x150xbf16>, vector<150x128xbf16>, vector<16x128xf32> -> vector<16x128xf32>
    %c16_327 = arith.constant 16 : index
    %c0_328 = arith.constant 0 : index
    %c0_329 = arith.constant 0 : index
    %390 = vector.load %arg2[%c16_327, %c0_328, %c0_329] : memref<25x16x150xbf16, #tpu.memory_space<vmem>>, vector<1x16x150xbf16>
    %391 = vector.shape_cast %390 : vector<1x16x150xbf16> to vector<16x150xbf16>
    %cst_330 = arith.constant dense<0.000000e+00> : vector<16x128xf32>
    %392 = tpu.matmul %391, %0, %cst_330 {dimension_numbers = #tpu.dot_dimension_numbers<[1], [0], [0], [1], [0, 0, 1, 1], [], []>} : vector<16x150xbf16>, vector<150x128xbf16>, vector<16x128xf32> -> vector<16x128xf32>
    %393 = arith.maximumf %389, %392 : vector<16x128xf32>
    %c16_331 = arith.constant 16 : index
    %c0_332 = arith.constant 0 : index
    %c0_333 = arith.constant 0 : index
    %394 = vector.load %arg3[%c16_331, %c0_332, %c0_333] : memref<25x16x150xbf16, #tpu.memory_space<vmem>>, vector<1x16x150xbf16>
    %395 = vector.shape_cast %394 : vector<1x16x150xbf16> to vector<16x150xbf16>
    %cst_334 = arith.constant dense<0.000000e+00> : vector<16x128xf32>
    %396 = tpu.matmul %395, %0, %cst_334 {dimension_numbers = #tpu.dot_dimension_numbers<[1], [0], [0], [1], [0, 0, 1, 1], [], []>} : vector<16x150xbf16>, vector<150x128xbf16>, vector<16x128xf32> -> vector<16x128xf32>
    %397 = arith.maximumf %393, %396 : vector<16x128xf32>
    %c16_335 = arith.constant 16 : index
    %c0_336 = arith.constant 0 : index
    %c0_337 = arith.constant 0 : index
    %398 = vector.load %arg4[%c16_335, %c0_336, %c0_337] : memref<25x16x150xbf16, #tpu.memory_space<vmem>>, vector<1x16x150xbf16>
    %399 = vector.shape_cast %398 : vector<1x16x150xbf16> to vector<16x150xbf16>
    %cst_338 = arith.constant dense<0.000000e+00> : vector<16x128xf32>
    %400 = tpu.matmul %399, %0, %cst_338 {dimension_numbers = #tpu.dot_dimension_numbers<[1], [0], [0], [1], [0, 0, 1, 1], [], []>} : vector<16x150xbf16>, vector<150x128xbf16>, vector<16x128xf32> -> vector<16x128xf32>
    %401 = arith.maximumf %397, %400 : vector<16x128xf32>
    %402 = vector.broadcast %1 : vector<1x128xf32> to vector<16x128xf32>
    %403 = arith.addf %401, %402 : vector<16x128xf32>
    %cst_339 = arith.constant 0.000000e+00 : f32
    %404 = vector.broadcast %cst_339 : f32 to vector<16x128xf32>
    %405 = arith.maximumf %403, %404 : vector<16x128xf32>
    %406 = arith.truncf %405 : vector<16x128xf32> to vector<16x128xbf16>
    %c16_340 = arith.constant 16 : index
    %c0_341 = arith.constant 0 : index
    %c0_342 = arith.constant 0 : index
    %407 = vector.load %arg7[%c16_340, %c0_341, %c0_342] : memref<25x128x128xbf16, #tpu.memory_space<vmem>>, vector<1x128x128xbf16>
    %408 = vector.shape_cast %407 : vector<1x128x128xbf16> to vector<128x128xbf16>
    %cst_343 = arith.constant dense<0.000000e+00> : vector<16x128xf32>
    %409 = tpu.matmul %406, %408, %cst_343 {dimension_numbers = #tpu.dot_dimension_numbers<[1], [0], [0], [1], [0, 0, 1, 1], [], []>} : vector<16x128xbf16>, vector<128x128xbf16>, vector<16x128xf32> -> vector<16x128xf32>
    %410 = arith.addf %386, %409 : vector<16x128xf32>
    %c17 = arith.constant 17 : index
    %c0_344 = arith.constant 0 : index
    %c0_345 = arith.constant 0 : index
    %411 = vector.load %arg1[%c17, %c0_344, %c0_345] : memref<25x16x150xbf16, #tpu.memory_space<vmem>>, vector<1x16x150xbf16>
    %412 = vector.shape_cast %411 : vector<1x16x150xbf16> to vector<16x150xbf16>
    %cst_346 = arith.constant dense<0.000000e+00> : vector<16x128xf32>
    %413 = tpu.matmul %412, %0, %cst_346 {dimension_numbers = #tpu.dot_dimension_numbers<[1], [0], [0], [1], [0, 0, 1, 1], [], []>} : vector<16x150xbf16>, vector<150x128xbf16>, vector<16x128xf32> -> vector<16x128xf32>
    %c17_347 = arith.constant 17 : index
    %c0_348 = arith.constant 0 : index
    %c0_349 = arith.constant 0 : index
    %414 = vector.load %arg2[%c17_347, %c0_348, %c0_349] : memref<25x16x150xbf16, #tpu.memory_space<vmem>>, vector<1x16x150xbf16>
    %415 = vector.shape_cast %414 : vector<1x16x150xbf16> to vector<16x150xbf16>
    %cst_350 = arith.constant dense<0.000000e+00> : vector<16x128xf32>
    %416 = tpu.matmul %415, %0, %cst_350 {dimension_numbers = #tpu.dot_dimension_numbers<[1], [0], [0], [1], [0, 0, 1, 1], [], []>} : vector<16x150xbf16>, vector<150x128xbf16>, vector<16x128xf32> -> vector<16x128xf32>
    %417 = arith.maximumf %413, %416 : vector<16x128xf32>
    %c17_351 = arith.constant 17 : index
    %c0_352 = arith.constant 0 : index
    %c0_353 = arith.constant 0 : index
    %418 = vector.load %arg3[%c17_351, %c0_352, %c0_353] : memref<25x16x150xbf16, #tpu.memory_space<vmem>>, vector<1x16x150xbf16>
    %419 = vector.shape_cast %418 : vector<1x16x150xbf16> to vector<16x150xbf16>
    %cst_354 = arith.constant dense<0.000000e+00> : vector<16x128xf32>
    %420 = tpu.matmul %419, %0, %cst_354 {dimension_numbers = #tpu.dot_dimension_numbers<[1], [0], [0], [1], [0, 0, 1, 1], [], []>} : vector<16x150xbf16>, vector<150x128xbf16>, vector<16x128xf32> -> vector<16x128xf32>
    %421 = arith.maximumf %417, %420 : vector<16x128xf32>
    %c17_355 = arith.constant 17 : index
    %c0_356 = arith.constant 0 : index
    %c0_357 = arith.constant 0 : index
    %422 = vector.load %arg4[%c17_355, %c0_356, %c0_357] : memref<25x16x150xbf16, #tpu.memory_space<vmem>>, vector<1x16x150xbf16>
    %423 = vector.shape_cast %422 : vector<1x16x150xbf16> to vector<16x150xbf16>
    %cst_358 = arith.constant dense<0.000000e+00> : vector<16x128xf32>
    %424 = tpu.matmul %423, %0, %cst_358 {dimension_numbers = #tpu.dot_dimension_numbers<[1], [0], [0], [1], [0, 0, 1, 1], [], []>} : vector<16x150xbf16>, vector<150x128xbf16>, vector<16x128xf32> -> vector<16x128xf32>
    %425 = arith.maximumf %421, %424 : vector<16x128xf32>
    %426 = vector.broadcast %1 : vector<1x128xf32> to vector<16x128xf32>
    %427 = arith.addf %425, %426 : vector<16x128xf32>
    %cst_359 = arith.constant 0.000000e+00 : f32
    %428 = vector.broadcast %cst_359 : f32 to vector<16x128xf32>
    %429 = arith.maximumf %427, %428 : vector<16x128xf32>
    %430 = arith.truncf %429 : vector<16x128xf32> to vector<16x128xbf16>
    %c17_360 = arith.constant 17 : index
    %c0_361 = arith.constant 0 : index
    %c0_362 = arith.constant 0 : index
    %431 = vector.load %arg7[%c17_360, %c0_361, %c0_362] : memref<25x128x128xbf16, #tpu.memory_space<vmem>>, vector<1x128x128xbf16>
    %432 = vector.shape_cast %431 : vector<1x128x128xbf16> to vector<128x128xbf16>
    %cst_363 = arith.constant dense<0.000000e+00> : vector<16x128xf32>
    %433 = tpu.matmul %430, %432, %cst_363 {dimension_numbers = #tpu.dot_dimension_numbers<[1], [0], [0], [1], [0, 0, 1, 1], [], []>} : vector<16x128xbf16>, vector<128x128xbf16>, vector<16x128xf32> -> vector<16x128xf32>
    %434 = arith.addf %410, %433 : vector<16x128xf32>
    %c18 = arith.constant 18 : index
    %c0_364 = arith.constant 0 : index
    %c0_365 = arith.constant 0 : index
    %435 = vector.load %arg1[%c18, %c0_364, %c0_365] : memref<25x16x150xbf16, #tpu.memory_space<vmem>>, vector<1x16x150xbf16>
    %436 = vector.shape_cast %435 : vector<1x16x150xbf16> to vector<16x150xbf16>
    %cst_366 = arith.constant dense<0.000000e+00> : vector<16x128xf32>
    %437 = tpu.matmul %436, %0, %cst_366 {dimension_numbers = #tpu.dot_dimension_numbers<[1], [0], [0], [1], [0, 0, 1, 1], [], []>} : vector<16x150xbf16>, vector<150x128xbf16>, vector<16x128xf32> -> vector<16x128xf32>
    %c18_367 = arith.constant 18 : index
    %c0_368 = arith.constant 0 : index
    %c0_369 = arith.constant 0 : index
    %438 = vector.load %arg2[%c18_367, %c0_368, %c0_369] : memref<25x16x150xbf16, #tpu.memory_space<vmem>>, vector<1x16x150xbf16>
    %439 = vector.shape_cast %438 : vector<1x16x150xbf16> to vector<16x150xbf16>
    %cst_370 = arith.constant dense<0.000000e+00> : vector<16x128xf32>
    %440 = tpu.matmul %439, %0, %cst_370 {dimension_numbers = #tpu.dot_dimension_numbers<[1], [0], [0], [1], [0, 0, 1, 1], [], []>} : vector<16x150xbf16>, vector<150x128xbf16>, vector<16x128xf32> -> vector<16x128xf32>
    %441 = arith.maximumf %437, %440 : vector<16x128xf32>
    %c18_371 = arith.constant 18 : index
    %c0_372 = arith.constant 0 : index
    %c0_373 = arith.constant 0 : index
    %442 = vector.load %arg3[%c18_371, %c0_372, %c0_373] : memref<25x16x150xbf16, #tpu.memory_space<vmem>>, vector<1x16x150xbf16>
    %443 = vector.shape_cast %442 : vector<1x16x150xbf16> to vector<16x150xbf16>
    %cst_374 = arith.constant dense<0.000000e+00> : vector<16x128xf32>
    %444 = tpu.matmul %443, %0, %cst_374 {dimension_numbers = #tpu.dot_dimension_numbers<[1], [0], [0], [1], [0, 0, 1, 1], [], []>} : vector<16x150xbf16>, vector<150x128xbf16>, vector<16x128xf32> -> vector<16x128xf32>
    %445 = arith.maximumf %441, %444 : vector<16x128xf32>
    %c18_375 = arith.constant 18 : index
    %c0_376 = arith.constant 0 : index
    %c0_377 = arith.constant 0 : index
    %446 = vector.load %arg4[%c18_375, %c0_376, %c0_377] : memref<25x16x150xbf16, #tpu.memory_space<vmem>>, vector<1x16x150xbf16>
    %447 = vector.shape_cast %446 : vector<1x16x150xbf16> to vector<16x150xbf16>
    %cst_378 = arith.constant dense<0.000000e+00> : vector<16x128xf32>
    %448 = tpu.matmul %447, %0, %cst_378 {dimension_numbers = #tpu.dot_dimension_numbers<[1], [0], [0], [1], [0, 0, 1, 1], [], []>} : vector<16x150xbf16>, vector<150x128xbf16>, vector<16x128xf32> -> vector<16x128xf32>
    %449 = arith.maximumf %445, %448 : vector<16x128xf32>
    %450 = vector.broadcast %1 : vector<1x128xf32> to vector<16x128xf32>
    %451 = arith.addf %449, %450 : vector<16x128xf32>
    %cst_379 = arith.constant 0.000000e+00 : f32
    %452 = vector.broadcast %cst_379 : f32 to vector<16x128xf32>
    %453 = arith.maximumf %451, %452 : vector<16x128xf32>
    %454 = arith.truncf %453 : vector<16x128xf32> to vector<16x128xbf16>
    %c18_380 = arith.constant 18 : index
    %c0_381 = arith.constant 0 : index
    %c0_382 = arith.constant 0 : index
    %455 = vector.load %arg7[%c18_380, %c0_381, %c0_382] : memref<25x128x128xbf16, #tpu.memory_space<vmem>>, vector<1x128x128xbf16>
    %456 = vector.shape_cast %455 : vector<1x128x128xbf16> to vector<128x128xbf16>
    %cst_383 = arith.constant dense<0.000000e+00> : vector<16x128xf32>
    %457 = tpu.matmul %454, %456, %cst_383 {dimension_numbers = #tpu.dot_dimension_numbers<[1], [0], [0], [1], [0, 0, 1, 1], [], []>} : vector<16x128xbf16>, vector<128x128xbf16>, vector<16x128xf32> -> vector<16x128xf32>
    %458 = arith.addf %434, %457 : vector<16x128xf32>
    %c19 = arith.constant 19 : index
    %c0_384 = arith.constant 0 : index
    %c0_385 = arith.constant 0 : index
    %459 = vector.load %arg1[%c19, %c0_384, %c0_385] : memref<25x16x150xbf16, #tpu.memory_space<vmem>>, vector<1x16x150xbf16>
    %460 = vector.shape_cast %459 : vector<1x16x150xbf16> to vector<16x150xbf16>
    %cst_386 = arith.constant dense<0.000000e+00> : vector<16x128xf32>
    %461 = tpu.matmul %460, %0, %cst_386 {dimension_numbers = #tpu.dot_dimension_numbers<[1], [0], [0], [1], [0, 0, 1, 1], [], []>} : vector<16x150xbf16>, vector<150x128xbf16>, vector<16x128xf32> -> vector<16x128xf32>
    %c19_387 = arith.constant 19 : index
    %c0_388 = arith.constant 0 : index
    %c0_389 = arith.constant 0 : index
    %462 = vector.load %arg2[%c19_387, %c0_388, %c0_389] : memref<25x16x150xbf16, #tpu.memory_space<vmem>>, vector<1x16x150xbf16>
    %463 = vector.shape_cast %462 : vector<1x16x150xbf16> to vector<16x150xbf16>
    %cst_390 = arith.constant dense<0.000000e+00> : vector<16x128xf32>
    %464 = tpu.matmul %463, %0, %cst_390 {dimension_numbers = #tpu.dot_dimension_numbers<[1], [0], [0], [1], [0, 0, 1, 1], [], []>} : vector<16x150xbf16>, vector<150x128xbf16>, vector<16x128xf32> -> vector<16x128xf32>
    %465 = arith.maximumf %461, %464 : vector<16x128xf32>
    %c19_391 = arith.constant 19 : index
    %c0_392 = arith.constant 0 : index
    %c0_393 = arith.constant 0 : index
    %466 = vector.load %arg3[%c19_391, %c0_392, %c0_393] : memref<25x16x150xbf16, #tpu.memory_space<vmem>>, vector<1x16x150xbf16>
    %467 = vector.shape_cast %466 : vector<1x16x150xbf16> to vector<16x150xbf16>
    %cst_394 = arith.constant dense<0.000000e+00> : vector<16x128xf32>
    %468 = tpu.matmul %467, %0, %cst_394 {dimension_numbers = #tpu.dot_dimension_numbers<[1], [0], [0], [1], [0, 0, 1, 1], [], []>} : vector<16x150xbf16>, vector<150x128xbf16>, vector<16x128xf32> -> vector<16x128xf32>
    %469 = arith.maximumf %465, %468 : vector<16x128xf32>
    %c19_395 = arith.constant 19 : index
    %c0_396 = arith.constant 0 : index
    %c0_397 = arith.constant 0 : index
    %470 = vector.load %arg4[%c19_395, %c0_396, %c0_397] : memref<25x16x150xbf16, #tpu.memory_space<vmem>>, vector<1x16x150xbf16>
    %471 = vector.shape_cast %470 : vector<1x16x150xbf16> to vector<16x150xbf16>
    %cst_398 = arith.constant dense<0.000000e+00> : vector<16x128xf32>
    %472 = tpu.matmul %471, %0, %cst_398 {dimension_numbers = #tpu.dot_dimension_numbers<[1], [0], [0], [1], [0, 0, 1, 1], [], []>} : vector<16x150xbf16>, vector<150x128xbf16>, vector<16x128xf32> -> vector<16x128xf32>
    %473 = arith.maximumf %469, %472 : vector<16x128xf32>
    %474 = vector.broadcast %1 : vector<1x128xf32> to vector<16x128xf32>
    %475 = arith.addf %473, %474 : vector<16x128xf32>
    %cst_399 = arith.constant 0.000000e+00 : f32
    %476 = vector.broadcast %cst_399 : f32 to vector<16x128xf32>
    %477 = arith.maximumf %475, %476 : vector<16x128xf32>
    %478 = arith.truncf %477 : vector<16x128xf32> to vector<16x128xbf16>
    %c19_400 = arith.constant 19 : index
    %c0_401 = arith.constant 0 : index
    %c0_402 = arith.constant 0 : index
    %479 = vector.load %arg7[%c19_400, %c0_401, %c0_402] : memref<25x128x128xbf16, #tpu.memory_space<vmem>>, vector<1x128x128xbf16>
    %480 = vector.shape_cast %479 : vector<1x128x128xbf16> to vector<128x128xbf16>
    %cst_403 = arith.constant dense<0.000000e+00> : vector<16x128xf32>
    %481 = tpu.matmul %478, %480, %cst_403 {dimension_numbers = #tpu.dot_dimension_numbers<[1], [0], [0], [1], [0, 0, 1, 1], [], []>} : vector<16x128xbf16>, vector<128x128xbf16>, vector<16x128xf32> -> vector<16x128xf32>
    %482 = arith.addf %458, %481 : vector<16x128xf32>
    %c20 = arith.constant 20 : index
    %c0_404 = arith.constant 0 : index
    %c0_405 = arith.constant 0 : index
    %483 = vector.load %arg1[%c20, %c0_404, %c0_405] : memref<25x16x150xbf16, #tpu.memory_space<vmem>>, vector<1x16x150xbf16>
    %484 = vector.shape_cast %483 : vector<1x16x150xbf16> to vector<16x150xbf16>
    %cst_406 = arith.constant dense<0.000000e+00> : vector<16x128xf32>
    %485 = tpu.matmul %484, %0, %cst_406 {dimension_numbers = #tpu.dot_dimension_numbers<[1], [0], [0], [1], [0, 0, 1, 1], [], []>} : vector<16x150xbf16>, vector<150x128xbf16>, vector<16x128xf32> -> vector<16x128xf32>
    %c20_407 = arith.constant 20 : index
    %c0_408 = arith.constant 0 : index
    %c0_409 = arith.constant 0 : index
    %486 = vector.load %arg2[%c20_407, %c0_408, %c0_409] : memref<25x16x150xbf16, #tpu.memory_space<vmem>>, vector<1x16x150xbf16>
    %487 = vector.shape_cast %486 : vector<1x16x150xbf16> to vector<16x150xbf16>
    %cst_410 = arith.constant dense<0.000000e+00> : vector<16x128xf32>
    %488 = tpu.matmul %487, %0, %cst_410 {dimension_numbers = #tpu.dot_dimension_numbers<[1], [0], [0], [1], [0, 0, 1, 1], [], []>} : vector<16x150xbf16>, vector<150x128xbf16>, vector<16x128xf32> -> vector<16x128xf32>
    %489 = arith.maximumf %485, %488 : vector<16x128xf32>
    %c20_411 = arith.constant 20 : index
    %c0_412 = arith.constant 0 : index
    %c0_413 = arith.constant 0 : index
    %490 = vector.load %arg3[%c20_411, %c0_412, %c0_413] : memref<25x16x150xbf16, #tpu.memory_space<vmem>>, vector<1x16x150xbf16>
    %491 = vector.shape_cast %490 : vector<1x16x150xbf16> to vector<16x150xbf16>
    %cst_414 = arith.constant dense<0.000000e+00> : vector<16x128xf32>
    %492 = tpu.matmul %491, %0, %cst_414 {dimension_numbers = #tpu.dot_dimension_numbers<[1], [0], [0], [1], [0, 0, 1, 1], [], []>} : vector<16x150xbf16>, vector<150x128xbf16>, vector<16x128xf32> -> vector<16x128xf32>
    %493 = arith.maximumf %489, %492 : vector<16x128xf32>
    %c20_415 = arith.constant 20 : index
    %c0_416 = arith.constant 0 : index
    %c0_417 = arith.constant 0 : index
    %494 = vector.load %arg4[%c20_415, %c0_416, %c0_417] : memref<25x16x150xbf16, #tpu.memory_space<vmem>>, vector<1x16x150xbf16>
    %495 = vector.shape_cast %494 : vector<1x16x150xbf16> to vector<16x150xbf16>
    %cst_418 = arith.constant dense<0.000000e+00> : vector<16x128xf32>
    %496 = tpu.matmul %495, %0, %cst_418 {dimension_numbers = #tpu.dot_dimension_numbers<[1], [0], [0], [1], [0, 0, 1, 1], [], []>} : vector<16x150xbf16>, vector<150x128xbf16>, vector<16x128xf32> -> vector<16x128xf32>
    %497 = arith.maximumf %493, %496 : vector<16x128xf32>
    %498 = vector.broadcast %1 : vector<1x128xf32> to vector<16x128xf32>
    %499 = arith.addf %497, %498 : vector<16x128xf32>
    %cst_419 = arith.constant 0.000000e+00 : f32
    %500 = vector.broadcast %cst_419 : f32 to vector<16x128xf32>
    %501 = arith.maximumf %499, %500 : vector<16x128xf32>
    %502 = arith.truncf %501 : vector<16x128xf32> to vector<16x128xbf16>
    %c20_420 = arith.constant 20 : index
    %c0_421 = arith.constant 0 : index
    %c0_422 = arith.constant 0 : index
    %503 = vector.load %arg7[%c20_420, %c0_421, %c0_422] : memref<25x128x128xbf16, #tpu.memory_space<vmem>>, vector<1x128x128xbf16>
    %504 = vector.shape_cast %503 : vector<1x128x128xbf16> to vector<128x128xbf16>
    %cst_423 = arith.constant dense<0.000000e+00> : vector<16x128xf32>
    %505 = tpu.matmul %502, %504, %cst_423 {dimension_numbers = #tpu.dot_dimension_numbers<[1], [0], [0], [1], [0, 0, 1, 1], [], []>} : vector<16x128xbf16>, vector<128x128xbf16>, vector<16x128xf32> -> vector<16x128xf32>
    %506 = arith.addf %482, %505 : vector<16x128xf32>
    %c21 = arith.constant 21 : index
    %c0_424 = arith.constant 0 : index
    %c0_425 = arith.constant 0 : index
    %507 = vector.load %arg1[%c21, %c0_424, %c0_425] : memref<25x16x150xbf16, #tpu.memory_space<vmem>>, vector<1x16x150xbf16>
    %508 = vector.shape_cast %507 : vector<1x16x150xbf16> to vector<16x150xbf16>
    %cst_426 = arith.constant dense<0.000000e+00> : vector<16x128xf32>
    %509 = tpu.matmul %508, %0, %cst_426 {dimension_numbers = #tpu.dot_dimension_numbers<[1], [0], [0], [1], [0, 0, 1, 1], [], []>} : vector<16x150xbf16>, vector<150x128xbf16>, vector<16x128xf32> -> vector<16x128xf32>
    %c21_427 = arith.constant 21 : index
    %c0_428 = arith.constant 0 : index
    %c0_429 = arith.constant 0 : index
    %510 = vector.load %arg2[%c21_427, %c0_428, %c0_429] : memref<25x16x150xbf16, #tpu.memory_space<vmem>>, vector<1x16x150xbf16>
    %511 = vector.shape_cast %510 : vector<1x16x150xbf16> to vector<16x150xbf16>
    %cst_430 = arith.constant dense<0.000000e+00> : vector<16x128xf32>
    %512 = tpu.matmul %511, %0, %cst_430 {dimension_numbers = #tpu.dot_dimension_numbers<[1], [0], [0], [1], [0, 0, 1, 1], [], []>} : vector<16x150xbf16>, vector<150x128xbf16>, vector<16x128xf32> -> vector<16x128xf32>
    %513 = arith.maximumf %509, %512 : vector<16x128xf32>
    %c21_431 = arith.constant 21 : index
    %c0_432 = arith.constant 0 : index
    %c0_433 = arith.constant 0 : index
    %514 = vector.load %arg3[%c21_431, %c0_432, %c0_433] : memref<25x16x150xbf16, #tpu.memory_space<vmem>>, vector<1x16x150xbf16>
    %515 = vector.shape_cast %514 : vector<1x16x150xbf16> to vector<16x150xbf16>
    %cst_434 = arith.constant dense<0.000000e+00> : vector<16x128xf32>
    %516 = tpu.matmul %515, %0, %cst_434 {dimension_numbers = #tpu.dot_dimension_numbers<[1], [0], [0], [1], [0, 0, 1, 1], [], []>} : vector<16x150xbf16>, vector<150x128xbf16>, vector<16x128xf32> -> vector<16x128xf32>
    %517 = arith.maximumf %513, %516 : vector<16x128xf32>
    %c21_435 = arith.constant 21 : index
    %c0_436 = arith.constant 0 : index
    %c0_437 = arith.constant 0 : index
    %518 = vector.load %arg4[%c21_435, %c0_436, %c0_437] : memref<25x16x150xbf16, #tpu.memory_space<vmem>>, vector<1x16x150xbf16>
    %519 = vector.shape_cast %518 : vector<1x16x150xbf16> to vector<16x150xbf16>
    %cst_438 = arith.constant dense<0.000000e+00> : vector<16x128xf32>
    %520 = tpu.matmul %519, %0, %cst_438 {dimension_numbers = #tpu.dot_dimension_numbers<[1], [0], [0], [1], [0, 0, 1, 1], [], []>} : vector<16x150xbf16>, vector<150x128xbf16>, vector<16x128xf32> -> vector<16x128xf32>
    %521 = arith.maximumf %517, %520 : vector<16x128xf32>
    %522 = vector.broadcast %1 : vector<1x128xf32> to vector<16x128xf32>
    %523 = arith.addf %521, %522 : vector<16x128xf32>
    %cst_439 = arith.constant 0.000000e+00 : f32
    %524 = vector.broadcast %cst_439 : f32 to vector<16x128xf32>
    %525 = arith.maximumf %523, %524 : vector<16x128xf32>
    %526 = arith.truncf %525 : vector<16x128xf32> to vector<16x128xbf16>
    %c21_440 = arith.constant 21 : index
    %c0_441 = arith.constant 0 : index
    %c0_442 = arith.constant 0 : index
    %527 = vector.load %arg7[%c21_440, %c0_441, %c0_442] : memref<25x128x128xbf16, #tpu.memory_space<vmem>>, vector<1x128x128xbf16>
    %528 = vector.shape_cast %527 : vector<1x128x128xbf16> to vector<128x128xbf16>
    %cst_443 = arith.constant dense<0.000000e+00> : vector<16x128xf32>
    %529 = tpu.matmul %526, %528, %cst_443 {dimension_numbers = #tpu.dot_dimension_numbers<[1], [0], [0], [1], [0, 0, 1, 1], [], []>} : vector<16x128xbf16>, vector<128x128xbf16>, vector<16x128xf32> -> vector<16x128xf32>
    %530 = arith.addf %506, %529 : vector<16x128xf32>
    %c22 = arith.constant 22 : index
    %c0_444 = arith.constant 0 : index
    %c0_445 = arith.constant 0 : index
    %531 = vector.load %arg1[%c22, %c0_444, %c0_445] : memref<25x16x150xbf16, #tpu.memory_space<vmem>>, vector<1x16x150xbf16>
    %532 = vector.shape_cast %531 : vector<1x16x150xbf16> to vector<16x150xbf16>
    %cst_446 = arith.constant dense<0.000000e+00> : vector<16x128xf32>
    %533 = tpu.matmul %532, %0, %cst_446 {dimension_numbers = #tpu.dot_dimension_numbers<[1], [0], [0], [1], [0, 0, 1, 1], [], []>} : vector<16x150xbf16>, vector<150x128xbf16>, vector<16x128xf32> -> vector<16x128xf32>
    %c22_447 = arith.constant 22 : index
    %c0_448 = arith.constant 0 : index
    %c0_449 = arith.constant 0 : index
    %534 = vector.load %arg2[%c22_447, %c0_448, %c0_449] : memref<25x16x150xbf16, #tpu.memory_space<vmem>>, vector<1x16x150xbf16>
    %535 = vector.shape_cast %534 : vector<1x16x150xbf16> to vector<16x150xbf16>
    %cst_450 = arith.constant dense<0.000000e+00> : vector<16x128xf32>
    %536 = tpu.matmul %535, %0, %cst_450 {dimension_numbers = #tpu.dot_dimension_numbers<[1], [0], [0], [1], [0, 0, 1, 1], [], []>} : vector<16x150xbf16>, vector<150x128xbf16>, vector<16x128xf32> -> vector<16x128xf32>
    %537 = arith.maximumf %533, %536 : vector<16x128xf32>
    %c22_451 = arith.constant 22 : index
    %c0_452 = arith.constant 0 : index
    %c0_453 = arith.constant 0 : index
    %538 = vector.load %arg3[%c22_451, %c0_452, %c0_453] : memref<25x16x150xbf16, #tpu.memory_space<vmem>>, vector<1x16x150xbf16>
    %539 = vector.shape_cast %538 : vector<1x16x150xbf16> to vector<16x150xbf16>
    %cst_454 = arith.constant dense<0.000000e+00> : vector<16x128xf32>
    %540 = tpu.matmul %539, %0, %cst_454 {dimension_numbers = #tpu.dot_dimension_numbers<[1], [0], [0], [1], [0, 0, 1, 1], [], []>} : vector<16x150xbf16>, vector<150x128xbf16>, vector<16x128xf32> -> vector<16x128xf32>
    %541 = arith.maximumf %537, %540 : vector<16x128xf32>
    %c22_455 = arith.constant 22 : index
    %c0_456 = arith.constant 0 : index
    %c0_457 = arith.constant 0 : index
    %542 = vector.load %arg4[%c22_455, %c0_456, %c0_457] : memref<25x16x150xbf16, #tpu.memory_space<vmem>>, vector<1x16x150xbf16>
    %543 = vector.shape_cast %542 : vector<1x16x150xbf16> to vector<16x150xbf16>
    %cst_458 = arith.constant dense<0.000000e+00> : vector<16x128xf32>
    %544 = tpu.matmul %543, %0, %cst_458 {dimension_numbers = #tpu.dot_dimension_numbers<[1], [0], [0], [1], [0, 0, 1, 1], [], []>} : vector<16x150xbf16>, vector<150x128xbf16>, vector<16x128xf32> -> vector<16x128xf32>
    %545 = arith.maximumf %541, %544 : vector<16x128xf32>
    %546 = vector.broadcast %1 : vector<1x128xf32> to vector<16x128xf32>
    %547 = arith.addf %545, %546 : vector<16x128xf32>
    %cst_459 = arith.constant 0.000000e+00 : f32
    %548 = vector.broadcast %cst_459 : f32 to vector<16x128xf32>
    %549 = arith.maximumf %547, %548 : vector<16x128xf32>
    %550 = arith.truncf %549 : vector<16x128xf32> to vector<16x128xbf16>
    %c22_460 = arith.constant 22 : index
    %c0_461 = arith.constant 0 : index
    %c0_462 = arith.constant 0 : index
    %551 = vector.load %arg7[%c22_460, %c0_461, %c0_462] : memref<25x128x128xbf16, #tpu.memory_space<vmem>>, vector<1x128x128xbf16>
    %552 = vector.shape_cast %551 : vector<1x128x128xbf16> to vector<128x128xbf16>
    %cst_463 = arith.constant dense<0.000000e+00> : vector<16x128xf32>
    %553 = tpu.matmul %550, %552, %cst_463 {dimension_numbers = #tpu.dot_dimension_numbers<[1], [0], [0], [1], [0, 0, 1, 1], [], []>} : vector<16x128xbf16>, vector<128x128xbf16>, vector<16x128xf32> -> vector<16x128xf32>
    %554 = arith.addf %530, %553 : vector<16x128xf32>
    %c23 = arith.constant 23 : index
    %c0_464 = arith.constant 0 : index
    %c0_465 = arith.constant 0 : index
    %555 = vector.load %arg1[%c23, %c0_464, %c0_465] : memref<25x16x150xbf16, #tpu.memory_space<vmem>>, vector<1x16x150xbf16>
    %556 = vector.shape_cast %555 : vector<1x16x150xbf16> to vector<16x150xbf16>
    %cst_466 = arith.constant dense<0.000000e+00> : vector<16x128xf32>
    %557 = tpu.matmul %556, %0, %cst_466 {dimension_numbers = #tpu.dot_dimension_numbers<[1], [0], [0], [1], [0, 0, 1, 1], [], []>} : vector<16x150xbf16>, vector<150x128xbf16>, vector<16x128xf32> -> vector<16x128xf32>
    %c23_467 = arith.constant 23 : index
    %c0_468 = arith.constant 0 : index
    %c0_469 = arith.constant 0 : index
    %558 = vector.load %arg2[%c23_467, %c0_468, %c0_469] : memref<25x16x150xbf16, #tpu.memory_space<vmem>>, vector<1x16x150xbf16>
    %559 = vector.shape_cast %558 : vector<1x16x150xbf16> to vector<16x150xbf16>
    %cst_470 = arith.constant dense<0.000000e+00> : vector<16x128xf32>
    %560 = tpu.matmul %559, %0, %cst_470 {dimension_numbers = #tpu.dot_dimension_numbers<[1], [0], [0], [1], [0, 0, 1, 1], [], []>} : vector<16x150xbf16>, vector<150x128xbf16>, vector<16x128xf32> -> vector<16x128xf32>
    %561 = arith.maximumf %557, %560 : vector<16x128xf32>
    %c23_471 = arith.constant 23 : index
    %c0_472 = arith.constant 0 : index
    %c0_473 = arith.constant 0 : index
    %562 = vector.load %arg3[%c23_471, %c0_472, %c0_473] : memref<25x16x150xbf16, #tpu.memory_space<vmem>>, vector<1x16x150xbf16>
    %563 = vector.shape_cast %562 : vector<1x16x150xbf16> to vector<16x150xbf16>
    %cst_474 = arith.constant dense<0.000000e+00> : vector<16x128xf32>
    %564 = tpu.matmul %563, %0, %cst_474 {dimension_numbers = #tpu.dot_dimension_numbers<[1], [0], [0], [1], [0, 0, 1, 1], [], []>} : vector<16x150xbf16>, vector<150x128xbf16>, vector<16x128xf32> -> vector<16x128xf32>
    %565 = arith.maximumf %561, %564 : vector<16x128xf32>
    %c23_475 = arith.constant 23 : index
    %c0_476 = arith.constant 0 : index
    %c0_477 = arith.constant 0 : index
    %566 = vector.load %arg4[%c23_475, %c0_476, %c0_477] : memref<25x16x150xbf16, #tpu.memory_space<vmem>>, vector<1x16x150xbf16>
    %567 = vector.shape_cast %566 : vector<1x16x150xbf16> to vector<16x150xbf16>
    %cst_478 = arith.constant dense<0.000000e+00> : vector<16x128xf32>
    %568 = tpu.matmul %567, %0, %cst_478 {dimension_numbers = #tpu.dot_dimension_numbers<[1], [0], [0], [1], [0, 0, 1, 1], [], []>} : vector<16x150xbf16>, vector<150x128xbf16>, vector<16x128xf32> -> vector<16x128xf32>
    %569 = arith.maximumf %565, %568 : vector<16x128xf32>
    %570 = vector.broadcast %1 : vector<1x128xf32> to vector<16x128xf32>
    %571 = arith.addf %569, %570 : vector<16x128xf32>
    %cst_479 = arith.constant 0.000000e+00 : f32
    %572 = vector.broadcast %cst_479 : f32 to vector<16x128xf32>
    %573 = arith.maximumf %571, %572 : vector<16x128xf32>
    %574 = arith.truncf %573 : vector<16x128xf32> to vector<16x128xbf16>
    %c23_480 = arith.constant 23 : index
    %c0_481 = arith.constant 0 : index
    %c0_482 = arith.constant 0 : index
    %575 = vector.load %arg7[%c23_480, %c0_481, %c0_482] : memref<25x128x128xbf16, #tpu.memory_space<vmem>>, vector<1x128x128xbf16>
    %576 = vector.shape_cast %575 : vector<1x128x128xbf16> to vector<128x128xbf16>
    %cst_483 = arith.constant dense<0.000000e+00> : vector<16x128xf32>
    %577 = tpu.matmul %574, %576, %cst_483 {dimension_numbers = #tpu.dot_dimension_numbers<[1], [0], [0], [1], [0, 0, 1, 1], [], []>} : vector<16x128xbf16>, vector<128x128xbf16>, vector<16x128xf32> -> vector<16x128xf32>
    %578 = arith.addf %554, %577 : vector<16x128xf32>
    %c24 = arith.constant 24 : index
    %c0_484 = arith.constant 0 : index
    %c0_485 = arith.constant 0 : index
    %579 = vector.load %arg1[%c24, %c0_484, %c0_485] : memref<25x16x150xbf16, #tpu.memory_space<vmem>>, vector<1x16x150xbf16>
    %580 = vector.shape_cast %579 : vector<1x16x150xbf16> to vector<16x150xbf16>
    %cst_486 = arith.constant dense<0.000000e+00> : vector<16x128xf32>
    %581 = tpu.matmul %580, %0, %cst_486 {dimension_numbers = #tpu.dot_dimension_numbers<[1], [0], [0], [1], [0, 0, 1, 1], [], []>} : vector<16x150xbf16>, vector<150x128xbf16>, vector<16x128xf32> -> vector<16x128xf32>
    %c24_487 = arith.constant 24 : index
    %c0_488 = arith.constant 0 : index
    %c0_489 = arith.constant 0 : index
    %582 = vector.load %arg2[%c24_487, %c0_488, %c0_489] : memref<25x16x150xbf16, #tpu.memory_space<vmem>>, vector<1x16x150xbf16>
    %583 = vector.shape_cast %582 : vector<1x16x150xbf16> to vector<16x150xbf16>
    %cst_490 = arith.constant dense<0.000000e+00> : vector<16x128xf32>
    %584 = tpu.matmul %583, %0, %cst_490 {dimension_numbers = #tpu.dot_dimension_numbers<[1], [0], [0], [1], [0, 0, 1, 1], [], []>} : vector<16x150xbf16>, vector<150x128xbf16>, vector<16x128xf32> -> vector<16x128xf32>
    %585 = arith.maximumf %581, %584 : vector<16x128xf32>
    %c24_491 = arith.constant 24 : index
    %c0_492 = arith.constant 0 : index
    %c0_493 = arith.constant 0 : index
    %586 = vector.load %arg3[%c24_491, %c0_492, %c0_493] : memref<25x16x150xbf16, #tpu.memory_space<vmem>>, vector<1x16x150xbf16>
    %587 = vector.shape_cast %586 : vector<1x16x150xbf16> to vector<16x150xbf16>
    %cst_494 = arith.constant dense<0.000000e+00> : vector<16x128xf32>
    %588 = tpu.matmul %587, %0, %cst_494 {dimension_numbers = #tpu.dot_dimension_numbers<[1], [0], [0], [1], [0, 0, 1, 1], [], []>} : vector<16x150xbf16>, vector<150x128xbf16>, vector<16x128xf32> -> vector<16x128xf32>
    %589 = arith.maximumf %585, %588 : vector<16x128xf32>
    %c24_495 = arith.constant 24 : index
    %c0_496 = arith.constant 0 : index
    %c0_497 = arith.constant 0 : index
    %590 = vector.load %arg4[%c24_495, %c0_496, %c0_497] : memref<25x16x150xbf16, #tpu.memory_space<vmem>>, vector<1x16x150xbf16>
    %591 = vector.shape_cast %590 : vector<1x16x150xbf16> to vector<16x150xbf16>
    %cst_498 = arith.constant dense<0.000000e+00> : vector<16x128xf32>
    %592 = tpu.matmul %591, %0, %cst_498 {dimension_numbers = #tpu.dot_dimension_numbers<[1], [0], [0], [1], [0, 0, 1, 1], [], []>} : vector<16x150xbf16>, vector<150x128xbf16>, vector<16x128xf32> -> vector<16x128xf32>
    %593 = arith.maximumf %589, %592 : vector<16x128xf32>
    %594 = vector.broadcast %1 : vector<1x128xf32> to vector<16x128xf32>
    %595 = arith.addf %593, %594 : vector<16x128xf32>
    %cst_499 = arith.constant 0.000000e+00 : f32
    %596 = vector.broadcast %cst_499 : f32 to vector<16x128xf32>
    %597 = arith.maximumf %595, %596 : vector<16x128xf32>
    %598 = arith.truncf %597 : vector<16x128xf32> to vector<16x128xbf16>
    %c24_500 = arith.constant 24 : index
    %c0_501 = arith.constant 0 : index
    %c0_502 = arith.constant 0 : index
    %599 = vector.load %arg7[%c24_500, %c0_501, %c0_502] : memref<25x128x128xbf16, #tpu.memory_space<vmem>>, vector<1x128x128xbf16>
    %600 = vector.shape_cast %599 : vector<1x128x128xbf16> to vector<128x128xbf16>
    %cst_503 = arith.constant dense<0.000000e+00> : vector<16x128xf32>
    %601 = tpu.matmul %598, %600, %cst_503 {dimension_numbers = #tpu.dot_dimension_numbers<[1], [0], [0], [1], [0, 0, 1, 1], [], []>} : vector<16x128xbf16>, vector<128x128xbf16>, vector<16x128xf32> -> vector<16x128xf32>
    %602 = arith.addf %578, %601 : vector<16x128xf32>
    %c0_504 = arith.constant 0 : index
    %c0_505 = arith.constant 0 : index
    %603 = vector.load %arg8[%c0_504, %c0_505] : memref<1x128xf32, #tpu.memory_space<vmem>>, vector<1x128xf32>
    %604 = vector.broadcast %603 : vector<1x128xf32> to vector<16x128xf32>
    %605 = arith.addf %602, %604 : vector<16x128xf32>
    %cst_506 = arith.constant 0.000000e+00 : f32
    %606 = vector.broadcast %cst_506 : f32 to vector<16x128xf32>
    %607 = arith.maximumf %605, %606 : vector<16x128xf32>
    %608 = arith.truncf %607 : vector<16x128xf32> to vector<16x128xbf16>
    %c0_507 = arith.constant 0 : index
    %c0_508 = arith.constant 0 : index
    %609 = vector.load %arg9[%c0_507, %c0_508] : memref<128x128xbf16, #tpu.memory_space<vmem>>, vector<128x128xbf16>
    %cst_509 = arith.constant dense<0.000000e+00> : vector<16x128xf32>
    %610 = tpu.matmul %608, %609, %cst_509 {dimension_numbers = #tpu.dot_dimension_numbers<[1], [0], [0], [1], [0, 0, 1, 1], [], []>} : vector<16x128xbf16>, vector<128x128xbf16>, vector<16x128xf32> -> vector<16x128xf32>
    %c0_510 = arith.constant 0 : index
    %c0_511 = arith.constant 0 : index
    %611 = vector.load %arg10[%c0_510, %c0_511] : memref<1x128xf32, #tpu.memory_space<vmem>>, vector<1x128xf32>
    %612 = vector.broadcast %611 : vector<1x128xf32> to vector<16x128xf32>
    %613 = arith.addf %610, %612 : vector<16x128xf32>
    %cst_512 = arith.constant 0.000000e+00 : f32
    %614 = vector.broadcast %cst_512 : f32 to vector<16x128xf32>
    %615 = arith.maximumf %613, %614 : vector<16x128xf32>
    %616 = arith.truncf %615 : vector<16x128xf32> to vector<16x128xbf16>
    %c0_513 = arith.constant 0 : index
    %c0_514 = arith.constant 0 : index
    %617 = vector.load %arg11[%c0_513, %c0_514] : memref<128x128xbf16, #tpu.memory_space<vmem>>, vector<128x128xbf16>
    %cst_515 = arith.constant dense<0.000000e+00> : vector<16x128xf32>
    %618 = tpu.matmul %616, %617, %cst_515 {dimension_numbers = #tpu.dot_dimension_numbers<[1], [0], [0], [1], [0, 0, 1, 1], [], []>} : vector<16x128xbf16>, vector<128x128xbf16>, vector<16x128xf32> -> vector<16x128xf32>
    %c0_516 = arith.constant 0 : index
    %c0_517 = arith.constant 0 : index
    %619 = vector.load %arg12[%c0_516, %c0_517] : memref<1x128xf32, #tpu.memory_space<vmem>>, vector<1x128xf32>
    %620 = vector.broadcast %619 : vector<1x128xf32> to vector<16x128xf32>
    %621 = arith.addf %618, %620 : vector<16x128xf32>
    %cst_518 = arith.constant dense<0xFF800000> : vector<16xf32>
    %622 = vector.multi_reduction <maximumf>, %621, %cst_518 [1] : vector<16x128xf32> to vector<16xf32>
    %623 = vector.shape_cast %622 : vector<16xf32> to vector<16x1xf32>
    %624 = vector.broadcast %623 : vector<16x1xf32> to vector<16x128xf32>
    %625 = arith.subf %621, %624 : vector<16x128xf32>
    %626 = math.exp %625 : vector<16x128xf32>
    %cst_519 = arith.constant dense<0.000000e+00> : vector<16xf32>
    %627 = vector.multi_reduction <add>, %626, %cst_519 [1] : vector<16x128xf32> to vector<16xf32>
    %628 = vector.shape_cast %627 : vector<16xf32> to vector<16x1xf32>
    %629 = math.log %628 : vector<16x1xf32>
    %630 = vector.broadcast %629 : vector<16x1xf32> to vector<16x128xf32>
    %631 = arith.subf %625, %630 : vector<16x128xf32>
    %c0_520 = arith.constant 0 : index
    %c0_521 = arith.constant 0 : index
    %632 = vector.load %arg13[%c0_520, %c0_521] : memref<16x128xf32, #tpu.memory_space<vmem>>, vector<16x128xf32>
    tpu.vector_store %arg13[%c0_520, %c0_521], %631 {strides = array<i32>} : memref<16x128xf32, #tpu.memory_space<vmem>>, vector<16x128xf32>,
    return
  }
  func.func @transform_0(%arg0: i32) -> (i32, i32, i32) {
    %c0_i32 = arith.constant 0 : i32
    %c0_i32_0 = arith.constant 0 : i32
    %c0_i32_1 = arith.constant 0 : i32
    return %c0_i32, %arg0, %c0_i32_0 : i32, i32, i32
  }
  func.func @transform_1(%arg0: i32) -> (i32, i32, i32) {
    %c0_i32 = arith.constant 0 : i32
    %c0_i32_0 = arith.constant 0 : i32
    %c0_i32_1 = arith.constant 0 : i32
    return %c0_i32, %arg0, %c0_i32_0 : i32, i32, i32
  }
  func.func @transform_2(%arg0: i32) -> (i32, i32, i32) {
    %c0_i32 = arith.constant 0 : i32
    %c0_i32_0 = arith.constant 0 : i32
    %c0_i32_1 = arith.constant 0 : i32
    return %c0_i32, %arg0, %c0_i32_0 : i32, i32, i32
  }
  func.func @transform_3(%arg0: i32) -> (i32, i32, i32) {
    %c0_i32 = arith.constant 0 : i32
    %c0_i32_0 = arith.constant 0 : i32
    %c0_i32_1 = arith.constant 0 : i32
    return %c0_i32, %arg0, %c0_i32_0 : i32, i32, i32
  }
  func.func @transform_4(%arg0: i32) -> (i32, i32) {
    %c0_i32 = arith.constant 0 : i32
    %c0_i32_0 = arith.constant 0 : i32
    %c0_i32_1 = arith.constant 0 : i32
    return %c0_i32, %c0_i32_0 : i32, i32
  }
  func.func @transform_5(%arg0: i32) -> (i32, i32) {
    %c0_i32 = arith.constant 0 : i32
    %c0_i32_0 = arith.constant 0 : i32
    %c0_i32_1 = arith.constant 0 : i32
    return %c0_i32, %c0_i32_0 : i32, i32
  }
  func.func @transform_6(%arg0: i32) -> (i32, i32, i32) {
    %c0_i32 = arith.constant 0 : i32
    %c0_i32_0 = arith.constant 0 : i32
    %c0_i32_1 = arith.constant 0 : i32
    %c0_i32_2 = arith.constant 0 : i32
    return %c0_i32, %c0_i32_0, %c0_i32_1 : i32, i32, i32
  }
  func.func @transform_7(%arg0: i32) -> (i32, i32) {
    %c0_i32 = arith.constant 0 : i32
    %c0_i32_0 = arith.constant 0 : i32
    %c0_i32_1 = arith.constant 0 : i32
    return %c0_i32, %c0_i32_0 : i32, i32
  }
  func.func @transform_8(%arg0: i32) -> (i32, i32) {
    %c0_i32 = arith.constant 0 : i32
    %c0_i32_0 = arith.constant 0 : i32
    %c0_i32_1 = arith.constant 0 : i32
    return %c0_i32, %c0_i32_0 : i32, i32
  }
  func.func @transform_9(%arg0: i32) -> (i32, i32) {
    %c0_i32 = arith.constant 0 : i32
    %c0_i32_0 = arith.constant 0 : i32
    %c0_i32_1 = arith.constant 0 : i32
    return %c0_i32, %c0_i32_0 : i32, i32
  }
  func.func @transform_10(%arg0: i32) -> (i32, i32) {
    %c0_i32 = arith.constant 0 : i32
    %c0_i32_0 = arith.constant 0 : i32
    %c0_i32_1 = arith.constant 0 : i32
    return %c0_i32, %c0_i32_0 : i32, i32
  }
  func.func @transform_11(%arg0: i32) -> (i32, i32) {
    %c0_i32 = arith.constant 0 : i32
    %c0_i32_0 = arith.constant 0 : i32
    %c0_i32_1 = arith.constant 0 : i32
    return %c0_i32, %c0_i32_0 : i32, i32
  }
  func.func @transform_12(%arg0: i32) -> (i32, i32) {
    %c0_i32 = arith.constant 0 : i32
    %c0_i32_0 = arith.constant 0 : i32
    return %arg0, %c0_i32 : i32, i32
  }
}

</mosaic_0001>

<bundles_post_ra>
// kernel: lenet5_forward.2
= control target key start
LH: loop header
LB: loop body
LE: loop exit
PB: predicated region body
PF: predicated region fallthrough
CT: control target
= control target key end

     0   :  { %s2415_s21 = smov 0   ;;  %s2958_s0 = inlined_call_operand.vmem [shape: bf16[416,25], index: 0, kind: input, shape index: {}]   ;;  %s2959_s1 = inlined_call_operand.vmem [shape: bf16[416,25], index: 1, kind: input, shape index: {}]   ;;  %s2960_s2 = inlined_call_operand.vmem [shape: bf16[416,25], index: 2, kind: input, shape index: {}]   ;;  %s2961_s3 = inlined_call_operand.vmem [shape: bf16[416,25], index: 3, kind: input, shape index: {}]   ;;  %s2962_s4 = inlined_call_operand.vmem [shape: bf16[25,128], index: 4, kind: input, shape index: {}]   ;;  %s2963_s5 = inlined_call_operand.vmem [shape: f32[1,128], index: 5, kind: input, shape index: {}]   ;;  %s2964_s6 = inlined_call_operand.vmem [shape: bf16[416,128], index: 6, kind: output, shape index: {}]  }
   0x1 LB: > { %s1772_s22 = sadd.s32 4294967295, %s2375_s21   ;;  %p1776_p0 = scmp.ge.s32.totalorder %s2375_s21, 1  ;;  %s2375_s21 = sphi %s2415_s21, %s16_s21  }
   0x2   : > { %p246_p1 = scmp.lt.s32.totalorder %s2375_s21, 3 }
   0x4   : > { %p247_p2 = pnand %p1776_p0, %p246_p1 }
   0x6   : > { %250 = sbr.rel (%p247_p2) target bundleno = 447 (0x1bf), region = 44 }
   0xd   : > { %v2315_v0 = vld [vmem:[%s2962_s4] sm:$0xff]   ;;  %v2377_v1 = vmov 0.0   ;;  %v2316_v2 = vld [vmem:[%s2962_s4 + $0x8] sm:$0x1f]   ;;  %vm468_vm0 = vcmask 1043456   ;;  %vm469_vm1 = vcmask 1044480  }
   0xe   : > { %2080 = vmatprep.subr.bf16.mxu0 %v2377_v1  ;;  %2136 = vmatprep.subr.bf16.mxu1 %v2377_v1  ;;  %s291_s27 = smul.u32 26, %s1772_s22  ;;  %v2378_v3 = vmov 65535   ;;  %vm2379_vm2 = vmmov 0   ;;  %vm428_vm3 = vcmask 203776  }
   0xf   : > { %2081 = vmatpush3.bf16.msra.mxu0 %v2315_v0  ;;  %2137 = vmatpush3.bf16.msra.mxu1 %v2315_v0  ;;  %v470_v4 = vsel %vm468_vm0, 4294967295, %v2378_v3 }
  0x10   : > { %2082 = vmatprep.subr.bf16.mxu0 %v2377_v1  ;;  %2138 = vmatprep.subr.bf16.mxu1 %v2377_v1  ;;  %v471_v5 = vsel %vm469_vm1, %v470_v4, 0  ;;  %p292_p3 = scmp.lt.s32.totalorder %s291_s27, 51 }
  0x11   : > { %2084 = vmatprep.mubr.msk.bf16.mxu0 %vm2379_vm2, %v2377_v1  ;;  %2140 = vmatprep.mubr.msk.bf16.mxu1 %vm2379_vm2, %v2377_v1  ;;  %v473_v6 = vand.u32 %v2316_v2, %v471_v5 }
  0x12   : > { %s3002_s27 = smov (!%p292_p3, %s291_s27), 51 }
  0x13   : > { %2083 = vmatpush3.bf16.msra.mxu0 %v473_v6  ;;  %2139 = vmatpush3.bf16.msra.mxu1 %v473_v6  ;;  %s2438_s28 = sshll.u32 %s3002_s27, 2 }
  0x14   : > { %2192 = vmatprep.subr.bf16.mxu0 %v2377_v1  ;;  %2248 = vmatprep.subr.bf16.mxu1 %v2377_v1  ;;  %s2445_s7 = scalar_lea.vmem %s2958_s0, %s2438_s28  ;;  %s2451_s10 = scalar_lea.vmem %s2959_s1, %s2438_s28 }
  0x15   : > { %v2317_v7 = vld [vmem:[%s2445_s7] sm:$0xff]   ;;  %v2319_v9 = vld [vmem:[%s2445_s7 + $0x8] sm:$0xff]   ;;  %v2321_v11 = vld [vmem:[%s2445_s7 + $0x10] sm:$0xff]   ;;  %s2485_s13 = scalar_lea.vmem %s2960_s2, %s2438_s28  ;;  %s2492_s16 = scalar_lea.vmem %s2961_s3, %s2438_s28 }
  0x16   : > { %v2318_v8 = vld [vmem:[%s2451_s10] sm:$0xff]   ;;  %2085 = vmatmul.mubr.msk.bf16.vlgmr.msra.gmra.mrb[0].mxu0 %vm428_vm3, %v2317_v7  ;;  %v2320_v10 = vld [vmem:[%s2451_s10 + $0x8] sm:$0xff]   ;;  %v2322_v12 = vld [vmem:[%s2451_s10 + $0x10] sm:$0xff]   ;;  %s2847_s22 = scalar_lea.vmem %s2964_s6, %s2438_s28 }
  0x17   : > { %2141 = vmatmul.mubr.msk.bf16.vlgmr.msra.gmra.mrb[0].mxu1 %vm428_vm3, %v2318_v8  ;;  %2193 = vmatpush3.bf16.msra.mxu0 %v2315_v0  ;;  %v2323_v13 = vld [vmem:[%s2445_s7 + $0x18] sm:$0xff]   ;;  %v2325_v15 = vld [vmem:[%s2445_s7 + $0x20] sm:$0xff]   ;;  %v2327_v17 = vld [vmem:[%s2445_s7 + $0x28] sm:$0xff]  }
  0x18   : > { %2249 = vmatpush3.bf16.msra.mxu1 %v2315_v0  ;;  %2088 = vmatprep.mubr.msk.bf16.mxu0 %vm2379_vm2, %v2377_v1  ;;  %v2324_v14 = vld [vmem:[%s2451_s10 + $0x18] sm:$0xff]   ;;  %v2326_v16 = vld [vmem:[%s2451_s10 + $0x20] sm:$0xff]   ;;  %v2328_v18 = vld [vmem:[%s2451_s10 + $0x28] sm:$0xff]  }
  0x19   : > { %2144 = vmatprep.mubr.msk.bf16.mxu1 %vm2379_vm2, %v2377_v1  ;;  %2194 = vmatprep.subr.bf16.mxu0 %v2377_v1  ;;  %v2329_v19 = vld [vmem:[%s2445_s7 + $0x30] sm:$0xff]   ;;  %v2331_v21 = vld [vmem:[%s2445_s7 + $0x38] sm:$0xff]   ;;  %v2333_v23 = vld [vmem:[%s2445_s7 + $0x40] sm:$0xff]  }
  0x1a   : > { %2250 = vmatprep.subr.bf16.mxu1 %v2377_v1  ;;  %v2330_v20 = vld [vmem:[%s2451_s10 + $0x30] sm:$0xff]   ;;  %v2332_v22 = vld [vmem:[%s2451_s10 + $0x38] sm:$0xff]   ;;  %v2334_v24 = vld [vmem:[%s2451_s10 + $0x40] sm:$0xff]  }
  0x1b   : > { %2195 = vmatpush3.bf16.msra.mxu0 %v473_v6  ;;  %v2335_v25 = vld [vmem:[%s2445_s7 + $0x48] sm:$0xff]   ;;  %v2337_v27 = vld [vmem:[%s2445_s7 + $0x50] sm:$0xff]   ;;  %v2339_v29 = vld [vmem:[%s2445_s7 + $0x58] sm:$0xff]  }
  0x1c   : > { %2251 = vmatpush3.bf16.msra.mxu1 %v473_v6  ;;  %v2336_v26 = vld [vmem:[%s2451_s10 + $0x48] sm:$0xff]   ;;  %v2338_v28 = vld [vmem:[%s2451_s10 + $0x50] sm:$0xff]   ;;  %v2340_v30 = vld [vmem:[%s2451_s10 + $0x58] sm:$0xff]  }
  0x1d   : > { %v2341_v31 = vld [vmem:[%s2445_s7 + $0x60] sm:$0xff]   ;;  %v2345_v35 = vld [vmem:[%s2485_s13 + $0x8] sm:$0xff]   ;;  %v2347_v37 = vld [vmem:[%s2485_s13 + $0x10] sm:$0xff]  }
  0x1e   : > { %2089 = vmatmul.mubr.msk.bf16.gmra.mrb[4].mxu0 %vm428_vm3, %v2319_v9  ;;  %v2342_v32 = vld [vmem:[%s2451_s10 + $0x60] sm:$0xff]   ;;  %v2346_v36 = vld [vmem:[%s2492_s16 + $0x8] sm:$0xff]   ;;  %v2348_v38 = vld [vmem:[%s2492_s16 + $0x10] sm:$0xff]  }
  0x1f   : > { %2145 = vmatmul.mubr.msk.bf16.gmra.mrb[4].mxu1 %vm428_vm3, %v2320_v10  ;;  %2092 = vmatprep.mubr.msk.bf16.mxu0 %vm2379_vm2, %v2377_v1  ;;  %v2343_v33 = vld [vmem:[%s2485_s13] sm:$0xff]   ;;  %v2349_v39 = vld [vmem:[%s2485_s13 + $0x18] sm:$0xff]   ;;  %v2353_v43 = vld [vmem:[%s2485_s13 + $0x28] sm:$0xff]  }
  0x20   : > { %2148 = vmatprep.mubr.msk.bf16.mxu1 %vm2379_vm2, %v2377_v1  ;;  %v2344_v34 = vld [vmem:[%s2492_s16] sm:$0xff]   ;;  %v2350_v40 = vld [vmem:[%s2492_s16 + $0x18] sm:$0xff]   ;;  %v2354_v44 = vld [vmem:[%s2492_s16 + $0x28] sm:$0xff]  }
  0x21   : > { %v2351_v41 = vld [vmem:[%s2485_s13 + $0x20] sm:$0xff]   ;;  %v2355_v45 = vld [vmem:[%s2485_s13 + $0x30] sm:$0xff]   ;;  %v2357_v47 = vld [vmem:[%s2485_s13 + $0x38] sm:$0xff]  }
  0x22   : > { %v2352_v42 = vld [vmem:[%s2492_s16 + $0x20] sm:$0xff]   ;;  %v2356_v46 = vld [vmem:[%s2492_s16 + $0x30] sm:$0xff]   ;;  %v2358_v48 = vld [vmem:[%s2492_s16 + $0x38] sm:$0xff]  }
  0x23   : > { %v2359_v49 = vld [vmem:[%s2485_s13 + $0x40] sm:$0xff]   ;;  %v2361_v51 = vld [vmem:[%s2485_s13 + $0x48] sm:$0xff]   ;;  %v2363_v53 = vld [vmem:[%s2485_s13 + $0x50] sm:$0xff]  }
  0x24   : > { %v2360_v50 = vld [vmem:[%s2492_s16 + $0x40] sm:$0xff]   ;;  %v2362_v52 = vld [vmem:[%s2492_s16 + $0x48] sm:$0xff]   ;;  %v2364_v54 = vld [vmem:[%s2492_s16 + $0x50] sm:$0xff]  }
  0x25   : > { %v2365_v55 = vld [vmem:[%s2485_s13 + $0x58] sm:$0xff]   ;;  %v2367_v57 = vld [vmem:[%s2485_s13 + $0x60] sm:$0xff]  }
  0x26   : > { %2093 = vmatmul.mubr.msk.bf16.gmra.mrb[8].mxu0 %vm428_vm3, %v2321_v11  ;;  %v2366_v56 = vld [vmem:[%s2492_s16 + $0x58] sm:$0xff]   ;;  %v2368_v58 = vld [vmem:[%s2492_s16 + $0x60] sm:$0xff]  }
  0x27   : > { %2149 = vmatmul.mubr.msk.bf16.gmra.mrb[8].mxu1 %vm428_vm3, %v2322_v12  ;;  %2096 = vmatprep.mubr.msk.bf16.mxu0 %vm2379_vm2, %v2377_v1 }
  0x28   : > { %2152 = vmatprep.mubr.msk.bf16.mxu1 %vm2379_vm2, %v2377_v1 }
  0x2e   : > { %2097 = vmatmul.mubr.msk.bf16.gmra.mrb[12].mxu0 %vm428_vm3, %v2323_v13 }
  0x2f   : > { %2153 = vmatmul.mubr.msk.bf16.gmra.mrb[12].mxu1 %vm428_vm3, %v2324_v14  ;;  %2100 = vmatprep.mubr.msk.bf16.mxu0 %vm2379_vm2, %v2377_v1 }
  0x30   : > { %2156 = vmatprep.mubr.msk.bf16.mxu1 %vm2379_vm2, %v2377_v1 }
  0x36   : > { %2101 = vmatmul.mubr.msk.bf16.gmra.mrb[16].mxu0 %vm428_vm3, %v2325_v15 }
  0x37   : > { %2157 = vmatmul.mubr.msk.bf16.gmra.mrb[16].mxu1 %vm428_vm3, %v2326_v16  ;;  %2104 = vmatprep.mubr.msk.bf16.mxu0 %vm2379_vm2, %v2377_v1 }
  0x38   : > { %2160 = vmatprep.mubr.msk.bf16.mxu1 %vm2379_vm2, %v2377_v1 }
  0x3e   : > { %2105 = vmatmul.mubr.msk.bf16.gmra.mrb[20].mxu0 %vm428_vm3, %v2327_v17 }
  0x3f   : > { %2161 = vmatmul.mubr.msk.bf16.gmra.mrb[20].mxu1 %vm428_vm3, %v2328_v18  ;;  %2108 = vmatprep.mubr.msk.bf16.mxu0 %vm2379_vm2, %v2377_v1 }
  0x40   : > { %2164 = vmatprep.mubr.msk.bf16.mxu1 %vm2379_vm2, %v2377_v1 }
  0x46   : > { %2109 = vmatmul.mubr.msk.bf16.gmra.mrb[24].mxu0 %vm428_vm3, %v2329_v19 }
  0x47   : > { %2165 = vmatmul.mubr.msk.bf16.gmra.mrb[24].mxu1 %vm428_vm3, %v2330_v20  ;;  %2112 = vmatprep.mubr.msk.bf16.mxu0 %vm2379_vm2, %v2377_v1 }
  0x48   : > { %2168 = vmatprep.mubr.msk.bf16.mxu1 %vm2379_vm2, %v2377_v1 }
  0x4e   : > { %2113 = vmatmul.mubr.msk.bf16.gmra.mrb[28].mxu0 %vm428_vm3, %v2331_v21 }
  0x4f   : > { %2169 = vmatmul.mubr.msk.bf16.gmra.mrb[28].mxu1 %vm428_vm3, %v2332_v22  ;;  %2116 = vmatprep.mubr.msk.bf16.mxu0 %vm2379_vm2, %v2377_v1 }
  0x50   : > { %2172 = vmatprep.mubr.msk.bf16.mxu1 %vm2379_vm2, %v2377_v1 }
  0x56   : > { %2117 = vmatmul.mubr.msk.bf16.gmra.mrb[32].mxu0 %vm428_vm3, %v2333_v23 }
  0x57   : > { %2173 = vmatmul.mubr.msk.bf16.gmra.mrb[32].mxu1 %vm428_vm3, %v2334_v24  ;;  %2120 = vmatprep.mubr.msk.bf16.mxu0 %vm2379_vm2, %v2377_v1 }
  0x58   : > { %2176 = vmatprep.mubr.msk.bf16.mxu1 %vm2379_vm2, %v2377_v1 }
  0x5e   : > { %2121 = vmatmul.mubr.msk.bf16.gmra.mrb[36].mxu0 %vm428_vm3, %v2335_v25 }
  0x5f   : > { %2177 = vmatmul.mubr.msk.bf16.gmra.mrb[36].mxu1 %vm428_vm3, %v2336_v26  ;;  %2124 = vmatprep.mubr.msk.bf16.mxu0 %vm2379_vm2, %v2377_v1 }
  0x60   : > { %2180 = vmatprep.mubr.msk.bf16.mxu1 %vm2379_vm2, %v2377_v1 }
  0x66   : > { %2125 = vmatmul.mubr.msk.bf16.gmra.mrb[40].mxu0 %vm428_vm3, %v2337_v27 }
  0x67   : > { %2181 = vmatmul.mubr.msk.bf16.gmra.mrb[40].mxu1 %vm428_vm3, %v2338_v28  ;;  %2128 = vmatprep.mubr.msk.bf16.mxu0 %vm2379_vm2, %v2377_v1 }
  0x68   : > { %2184 = vmatprep.mubr.msk.bf16.mxu1 %vm2379_vm2, %v2377_v1 }
  0x6e   : > { %2129 = vmatmul.mubr.msk.bf16.gmra.mrb[44].mxu0 %vm428_vm3, %v2339_v29 }
  0x6f   : > { %2185 = vmatmul.mubr.msk.bf16.gmra.mrb[44].mxu1 %vm428_vm3, %v2340_v30  ;;  %2132 = vmatprep.mubr.msk.bf16.mxu0 %vm2379_vm2, %v2377_v1 }
  0x70   : > { %2188 = vmatprep.mubr.msk.bf16.mxu1 %vm2379_vm2, %v2377_v1 }
  0x76   : > { %2133 = vmatmul.mubr.msk.bf16.gmra.mrb[48].mxu0 %vm428_vm3, %v2341_v31 }
  0x77   : > { %2189 = vmatmul.mubr.msk.bf16.gmra.mrb[48].mxu1 %vm428_vm3, %v2342_v32  ;;  %2196 = vmatprep.mubr.msk.bf16.mxu0 %vm2379_vm2, %v2377_v1 }
  0x78   : > { %2252 = vmatprep.mubr.msk.bf16.mxu1 %vm2379_vm2, %v2377_v1 }
  0x7e   : > { %2197 = vmatmul.mubr.msk.bf16.vlgmr.msra.gmra.mrb[52].mxu0 %vm428_vm3, %v2343_v33 }
  0x7f   : > { %2253 = vmatmul.mubr.msk.bf16.vlgmr.msra.gmra.mrb[52].mxu1 %vm428_vm3, %v2344_v34  ;;  %2200 = vmatprep.mubr.msk.bf16.mxu0 %vm2379_vm2, %v2377_v1 }
  0x80   : > { %2256 = vmatprep.mubr.msk.bf16.mxu1 %vm2379_vm2, %v2377_v1 }
  0x86   : > { %2201 = vmatmul.mubr.msk.bf16.gmra.mrb[56].mxu0 %vm428_vm3, %v2345_v35 }
  0x87   : > { %2257 = vmatmul.mubr.msk.bf16.gmra.mrb[56].mxu1 %vm428_vm3, %v2346_v36  ;;  %2204 = vmatprep.mubr.msk.bf16.mxu0 %vm2379_vm2, %v2377_v1 }
  0x88   : > { %2260 = vmatprep.mubr.msk.bf16.mxu1 %vm2379_vm2, %v2377_v1 }
  0x8e   : > { %2205 = vmatmul.mubr.msk.bf16.gmra.mrb[60].mxu0 %vm428_vm3, %v2347_v37 }
  0x8f   : > { %2261 = vmatmul.mubr.msk.bf16.gmra.mrb[60].mxu1 %vm428_vm3, %v2348_v38  ;;  %2208 = vmatprep.mubr.msk.bf16.mxu0 %vm2379_vm2, %v2377_v1 }
  0x90   : > { %2264 = vmatprep.mubr.msk.bf16.mxu1 %vm2379_vm2, %v2377_v1 }
  0x96   : > { %2209 = vmatmul.mubr.msk.bf16.gmra.mrb[64].mxu0 %vm428_vm3, %v2349_v39 }
  0x97   : > { %2265 = vmatmul.mubr.msk.bf16.gmra.mrb[64].mxu1 %vm428_vm3, %v2350_v40  ;;  %2212 = vmatprep.mubr.msk.bf16.mxu0 %vm2379_vm2, %v2377_v1 }
  0x98   : > { %2268 = vmatprep.mubr.msk.bf16.mxu1 %vm2379_vm2, %v2377_v1 }
  0x9e   : > { %2213 = vmatmul.mubr.msk.bf16.gmra.mrb[68].mxu0 %vm428_vm3, %v2351_v41 }
  0x9f   : > { %2269 = vmatmul.mubr.msk.bf16.gmra.mrb[68].mxu1 %vm428_vm3, %v2352_v42  ;;  %2216 = vmatprep.mubr.msk.bf16.mxu0 %vm2379_vm2, %v2377_v1 }
  0xa0   : > { %2272 = vmatprep.mubr.msk.bf16.mxu1 %vm2379_vm2, %v2377_v1 }
  0xa6   : > { %2217 = vmatmul.mubr.msk.bf16.gmra.mrb[72].mxu0 %vm428_vm3, %v2353_v43 }
  0xa7   : > { %2273 = vmatmul.mubr.msk.bf16.gmra.mrb[72].mxu1 %vm428_vm3, %v2354_v44  ;;  %2220 = vmatprep.mubr.msk.bf16.mxu0 %vm2379_vm2, %v2377_v1 }
  0xa8   : > { %2276 = vmatprep.mubr.msk.bf16.mxu1 %vm2379_vm2, %v2377_v1 }
  0xae   : > { %2221 = vmatmul.mubr.msk.bf16.gmra.mrb[76].mxu0 %vm428_vm3, %v2355_v45 }
  0xaf   : > { %2277 = vmatmul.mubr.msk.bf16.gmra.mrb[76].mxu1 %vm428_vm3, %v2356_v46  ;;  %2224 = vmatprep.mubr.msk.bf16.mxu0 %vm2379_vm2, %v2377_v1 }
  0xb0   : > { %2280 = vmatprep.mubr.msk.bf16.mxu1 %vm2379_vm2, %v2377_v1 }
  0xb6   : > { %2225 = vmatmul.mubr.msk.bf16.gmra.mrb[80].mxu0 %vm428_vm3, %v2357_v47 }
  0xb7   : > { %2281 = vmatmul.mubr.msk.bf16.gmra.mrb[80].mxu1 %vm428_vm3, %v2358_v48  ;;  %2228 = vmatprep.mubr.msk.bf16.mxu0 %vm2379_vm2, %v2377_v1 }
  0xb8   : > { %2284 = vmatprep.mubr.msk.bf16.mxu1 %vm2379_vm2, %v2377_v1 }
  0xbe   : > { %2229 = vmatmul.mubr.msk.bf16.gmra.mrb[84].mxu0 %vm428_vm3, %v2359_v49 }
  0xbf   : > { %2285 = vmatmul.mubr.msk.bf16.gmra.mrb[84].mxu1 %vm428_vm3, %v2360_v50  ;;  %2232 = vmatprep.mubr.msk.bf16.mxu0 %vm2379_vm2, %v2377_v1 }
  0xc0   : > { %2288 = vmatprep.mubr.msk.bf16.mxu1 %vm2379_vm2, %v2377_v1 }
  0xc6   : > { %2233 = vmatmul.mubr.msk.bf16.gmra.mrb[88].mxu0 %vm428_vm3, %v2361_v51 }
  0xc7   : > { %2289 = vmatmul.mubr.msk.bf16.gmra.mrb[88].mxu1 %vm428_vm3, %v2362_v52  ;;  %2236 = vmatprep.mubr.msk.bf16.mxu0 %vm2379_vm2, %v2377_v1 }
  0xc8   : > { %2292 = vmatprep.mubr.msk.bf16.mxu1 %vm2379_vm2, %v2377_v1 }
  0xce   : > { %2237 = vmatmul.mubr.msk.bf16.gmra.mrb[92].mxu0 %vm428_vm3, %v2363_v53 }
  0xcf   : > { %2293 = vmatmul.mubr.msk.bf16.gmra.mrb[92].mxu1 %vm428_vm3, %v2364_v54  ;;  %2240 = vmatprep.mubr.msk.bf16.mxu0 %vm2379_vm2, %v2377_v1 }
  0xd0   : > { %2296 = vmatprep.mubr.msk.bf16.mxu1 %vm2379_vm2, %v2377_v1 }
  0xd6   : > { %2241 = vmatmul.mubr.msk.bf16.gmra.mrb[96].mxu0 %vm428_vm3, %v2365_v55 }
  0xd7   : > { %2297 = vmatmul.mubr.msk.bf16.gmra.mrb[96].mxu1 %vm428_vm3, %v2366_v56  ;;  %2244 = vmatprep.mubr.msk.bf16.mxu0 %vm2379_vm2, %v2377_v1 }
  0xd8   : > { %2300 = vmatprep.mubr.msk.bf16.mxu1 %vm2379_vm2, %v2377_v1 }
  0xde   : > { %2245 = vmatmul.mubr.msk.bf16.gmra.mrb[100].mxu0 %vm428_vm3, %v2367_v57 }
  0xdf   : > { %2301 = vmatmul.mubr.msk.bf16.gmra.mrb[100].mxu1 %vm428_vm3, %v2368_v58 }
  0xe9   : > { %v2671_v59 = vpop.f32.mrb[0].mxu0 }
  0xea   : > { %v2673_v60 = vpop.f32.mrb[0].mxu1  ;;  %v2086_v61 = vpop.f32.mrb[1].mxu0 }
  0xeb   : > { %v879_v62 = vmax.f32 %v2671_v59, %v2673_v60  ;;  %v2142_v63 = vpop.f32.mrb[1].mxu1  ;;  %v2677_v0 = vpop.f32.mrb[2].mxu0 }
  0xec   : > { %v2679_v2 = vpop.f32.mrb[2].mxu1  ;;  %v2087_v1 = vpop.f32.mrb[3].mxu0 }
  0xed   : > { %v880_v3 = vmax.f32 %v2677_v0, %v2679_v2  ;;  %v2143_v4 = vpop.f32.mrb[3].mxu1 }
  0xf1   : > { %v2683_v5 = vpop.f32.mrb[4].mxu0 }
  0xf2   : > { %v2685_v6 = vpop.f32.mrb[4].mxu1  ;;  %v2090_v7 = vpop.f32.mrb[5].mxu0 }
  0xf3   : > { %v2146_v9 = vpop.f32.mrb[5].mxu1  ;;  %v2689_v10 = vpop.f32.mrb[6].mxu0 }
  0xf4   : > { %v2691_v11 = vpop.f32.mrb[6].mxu1  ;;  %v2091_v12 = vpop.f32.mrb[7].mxu0 }
  0xf5   : > { %v2147_v14 = vpop.f32.mrb[7].mxu1 }
  0xf9   : > { %v2695_v15 = vpop.f32.mrb[8].mxu0 }
  0xfa   : > { %v2697_v16 = vpop.f32.mrb[8].mxu1  ;;  %v2094_v17 = vpop.f32.mrb[9].mxu0 }
  0xfb   : > { %v2150_v19 = vpop.f32.mrb[9].mxu1  ;;  %v2701_v20 = vpop.f32.mrb[10].mxu0 }
  0xfc   : > { %v2703_v21 = vpop.f32.mrb[10].mxu1  ;;  %v2095_v22 = vpop.f32.mrb[11].mxu0 }
  0xfd   : > { %v2151_v24 = vpop.f32.mrb[11].mxu1 }
 0x101   : > { %v2707_v25 = vpop.f32.mrb[12].mxu0 }
 0x102   : > { %v2709_v26 = vpop.f32.mrb[12].mxu1  ;;  %v2098_v27 = vpop.f32.mrb[13].mxu0 }
 0x103   : > { %v2154_v29 = vpop.f32.mrb[13].mxu1  ;;  %v2713_v30 = vpop.f32.mrb[14].mxu0 }
 0x104   : > { %v2715_v31 = vpop.f32.mrb[14].mxu1  ;;  %v2099_v32 = vpop.f32.mrb[15].mxu0 }
 0x105   : > { %v2155_v34 = vpop.f32.mrb[15].mxu1 }
 0x109   : > { %v2719_v35 = vpop.f32.mrb[16].mxu0 }
 0x10a   : > { %v2721_v36 = vpop.f32.mrb[16].mxu1  ;;  %v2102_v37 = vpop.f32.mrb[17].mxu0 }
 0x10b   : > { %v2158_v39 = vpop.f32.mrb[17].mxu1  ;;  %v2725_v40 = vpop.f32.mrb[18].mxu0 }
 0x10c   : > { %v2727_v41 = vpop.f32.mrb[18].mxu1  ;;  %v2103_v42 = vpop.f32.mrb[19].mxu0 }
 0x10d   : > { %v2159_v44 = vpop.f32.mrb[19].mxu1 }
 0x111   : > { %v2731_v45 = vpop.f32.mrb[20].mxu0 }
 0x112   : > { %v2733_v46 = vpop.f32.mrb[20].mxu1  ;;  %v2106_v47 = vpop.f32.mrb[21].mxu0 }
 0x113   : > { %v2162_v49 = vpop.f32.mrb[21].mxu1  ;;  %v2737_v50 = vpop.f32.mrb[22].mxu0 }
 0x114   : > { %v2739_v51 = vpop.f32.mrb[22].mxu1  ;;  %v2107_v52 = vpop.f32.mrb[23].mxu0 }
 0x115   : > { %v2163_v54 = vpop.f32.mrb[23].mxu1 }
 0x119   : > { %v2743_v55 = vpop.f32.mrb[24].mxu0 }
 0x11a   : > { %v2745_v56 = vpop.f32.mrb[24].mxu1  ;;  %v2110_v57 = vpop.f32.mrb[25].mxu0 }
 0x11b   : > { %v2166_v61 = vpop.f32.mrb[25].mxu1  ;;  %v2749_v63 = vpop.f32.mrb[26].mxu0 }
 0x11c   : > { %v2751_v1 = vpop.f32.mrb[26].mxu1  ;;  %v2111_v4 = vpop.f32.mrb[27].mxu0 }
 0x11d   : > { %v2167_v9 = vpop.f32.mrb[27].mxu1 }
 0x121   : > { %v2755_v12 = vpop.f32.mrb[28].mxu0 }
 0x122   : > { %v2757_v14 = vpop.f32.mrb[28].mxu1  ;;  %v2114_v17 = vpop.f32.mrb[29].mxu0 }
 0x123   : > { %v2170_v22 = vpop.f32.mrb[29].mxu1  ;;  %v2761_v24 = vpop.f32.mrb[30].mxu0 }
 0x124   : > { %v2763_v27 = vpop.f32.mrb[30].mxu1  ;;  %v2115_v29 = vpop.f32.mrb[31].mxu0 }
 0x125   : > { %v2171_v34 = vpop.f32.mrb[31].mxu1 }
 0x129   : > { %v2767_v37 = vpop.f32.mrb[32].mxu0 }
 0x12a   : > { %v2769_v39 = vpop.f32.mrb[32].mxu1  ;;  %v2118_v42 = vpop.f32.mrb[33].mxu0 }
 0x12b   : > { %v2174_v47 = vpop.f32.mrb[33].mxu1  ;;  %v2773_v49 = vpop.f32.mrb[34].mxu0 }
 0x12c   : > { %v2775_v52 = vpop.f32.mrb[34].mxu1  ;;  %v2119_v54 = vpop.f32.mrb[35].mxu0 }
 0x12d   : > { %v2175_v61 = vpop.f32.mrb[35].mxu1 }
 0x131   : > { %v2779_v4 = vpop.f32.mrb[36].mxu0 }
 0x132   : > { %v2781_v9 = vpop.f32.mrb[36].mxu1  ;;  %v2122_v17 = vpop.f32.mrb[37].mxu0 }
 0x133   : > { %v2178_v29 = vpop.f32.mrb[37].mxu1  ;;  %v2785_v34 = vpop.f32.mrb[38].mxu0 }
 0x134   : > { %v2787_v42 = vpop.f32.mrb[38].mxu1  ;;  %v2123_v47 = vpop.f32.mrb[39].mxu0 }
 0x135   : > { %v2179_v44 = vpop.f32.mrb[39].mxu1 }
 0x139   : > { %v2791_v57 = vpop.f32.mrb[40].mxu0 }
 0x13a   : > { %v2793_v61 = vpop.f32.mrb[40].mxu1  ;;  %v2126_v32 = vpop.f32.mrb[41].mxu0 }
 0x13b   : > { %v2182_v19 = vpop.f32.mrb[41].mxu1  ;;  %v2797_v22 = vpop.f32.mrb[42].mxu0 }
 0x13c   : > { %v2799_v29 = vpop.f32.mrb[42].mxu1  ;;  %v2127_v7 = vpop.f32.mrb[43].mxu0 }
 0x13d   : > { %v2183_v58 = vpop.f32.mrb[43].mxu1 }
 0x141   : > { %v2803_v54 = vpop.f32.mrb[44].mxu0 }
 0x142   : > { %v2805_v44 = vpop.f32.mrb[44].mxu1  ;;  %v2130_v53 = vpop.f32.mrb[45].mxu0 }
 0x143   : > { %v2186_v48 = vpop.f32.mrb[45].mxu1  ;;  %v2809_v17 = vpop.f32.mrb[46].mxu0 }
 0x144   : > { %v2811_v19 = vpop.f32.mrb[46].mxu1  ;;  %v2131_v43 = vpop.f32.mrb[47].mxu0 }
 0x145   : > { %v2187_v38 = vpop.f32.mrb[47].mxu1 }
 0x149   : > { %v2815_v47 = vpop.f32.mrb[48].mxu0 }
 0x14a   : > { %2969 = vst [vmem:[#allocation2_spill] sm:$0xff] %v2815_v47  ;;  %v2817_v58 = vpop.f32.mrb[48].mxu1  ;;  %v2134_v33 = vpop.f32.mrb[49].mxu0 }
 0x14b   : > { %2970 = vst [vmem:[#allocation3_spill] sm:$0xff] %v2817_v58  ;;  %v2190_v28 = vpop.f32.mrb[49].mxu1  ;;  %v2821_v32 = vpop.f32.mrb[50].mxu0 }
 0x14c   : > { %2971 = vst [vmem:[#allocation4_spill] sm:$0xff] %v2821_v32  ;;  %v2823_v48 = vpop.f32.mrb[50].mxu1  ;;  %v2135_v23 = vpop.f32.mrb[51].mxu0  ;;  %v2833_v28 = vld [vmem:[%s2963_s5] ss:$0 sm:$0xff] }
 0x14d   : > { %2972 = vst [vmem:[#allocation5_spill] sm:$0xff] %v2823_v48  ;;  %v2191_v18 = vpop.f32.mrb[51].mxu1 }
 0x151   : > { %v1069_v7 = vpop.f32.mrb[52].mxu0 }
 0x152   : > { %v1172_v38 = vmax.f32 %v879_v62, %v1069_v7  ;;  %v1362_v13 = vpop.f32.mrb[52].mxu1  ;;  %v2198_v33 = vpop.f32.mrb[53].mxu0 }
 0x153   : > { %v2254_v53 = vpop.f32.mrb[53].mxu1  ;;  %v1072_v8 = vpop.f32.mrb[54].mxu0 }
 0x154   : > { %v1465_v23 = vmax.f32 %v1172_v38, %v1362_v13  ;;  %v1173_v18 = vmax.f32 %v880_v3, %v1072_v8  ;;  %v1365_v43 = vpop.f32.mrb[54].mxu1  ;;  %v2199_v48 = vpop.f32.mrb[55].mxu0  ;;  %v2973_v53 = vmax.f32 %v2683_v5, %v2685_v6 }
 0x155   : > { %v2255_v32 = vpop.f32.mrb[55].mxu1 }
 0x156   : > { %v1498_v59 = vadd.f32 %v2833_v28, %v1465_v23  ;;  %v1466_v60 = vmax.f32 %v1173_v18, %v1365_v43  ;;  %v2974_v32 = vmax.f32 %v2689_v10, %v2691_v11 }
 0x158   : > { %v1499_v62 = vadd.f32 %v2833_v28, %v1466_v60  ;;  %v1524_v33 = vmax.f32 %v1498_v59, 0.0 }
 0x159   : > { %v1077_v7 = vpop.f32.mrb[56].mxu0 }
 0x15a   : > { %v1525_v58 = vmax.f32 %v1499_v62, 0.0  ;;  %v1174_v47 = vmax.f32 %v2973_v53, %v1077_v7  ;;  %v1370_v13 = vpop.f32.mrb[56].mxu1  ;;  %v2202_v38 = vpop.f32.mrb[57].mxu0 }
 0x15b   : > { %v2258_v0 = vpop.f32.mrb[57].mxu1  ;;  %v1080_v2 = vpop.f32.mrb[58].mxu0 }
 0x15c   : > { %v1946_v3 = vpack.c.bf16 %v1525_v58, %v1524_v33  ;;  %v1467_v8 = vmax.f32 %v1174_v47, %v1370_v13  ;;  %v1175_v48 = vmax.f32 %v2974_v32, %v1080_v2  ;;  %v1373_v43 = vpop.f32.mrb[58].mxu1  ;;  %v2203_v23 = vpop.f32.mrb[59].mxu0  ;;  %v2975_v47 = vmax.f32 %v2695_v15, %v2697_v16 }
 0x15d   : > { %v2259_v5 = vpop.f32.mrb[59].mxu1  ;;  %v2976_v0 = vmax.f32 %v2701_v20, %v2703_v21 }
 0x15e   : > { %1947 = vst [vmem:[%s2847_s22] sm:$0xff] %v1946_v3   ;;  %v1500_v6 = vadd.f32 %v2833_v28, %v1467_v8  ;;  %v1468_v18 = vmax.f32 %v1175_v48, %v1373_v43 }
 0x160   : > { %v1501_v59 = vadd.f32 %v2833_v28, %v1468_v18  ;;  %v1526_v62 = vmax.f32 %v1500_v6, 0.0  ;;  %v2977_v6 = vmax.f32 %v2707_v25, %v2709_v26 }
 0x161   : > { %v1085_v60 = vpop.f32.mrb[60].mxu0 }
 0x162   : > { %v1527_v7 = vmax.f32 %v1501_v59, 0.0  ;;  %v1176_v58 = vmax.f32 %v2975_v47, %v1085_v60  ;;  %v1378_v33 = vpop.f32.mrb[60].mxu1  ;;  %v2206_v10 = vpop.f32.mrb[61].mxu0  ;;  %v2978_v47 = vmax.f32 %v2713_v30, %v2715_v31 }
 0x163   : > { %v2262_v11 = vpop.f32.mrb[61].mxu1  ;;  %v1088_v53 = vpop.f32.mrb[62].mxu0 }
 0x164   : > { %v1951_v13 = vpack.c.bf16 %v1527_v7, %v1526_v62  ;;  %v1469_v38 = vmax.f32 %v1176_v58, %v1378_v33  ;;  %v1177_v2 = vmax.f32 %v2976_v0, %v1088_v53  ;;  %v1381_v3 = vpop.f32.mrb[62].mxu1  ;;  %v2207_v8 = vpop.f32.mrb[63].mxu0 }
 0x165   : > { %v2263_v32 = vpop.f32.mrb[63].mxu1 }
 0x166   : > { %2008 = vst [vmem:[%s2847_s22 + $0x8] sm:$0xff] %v1951_v13   ;;  %v1502_v48 = vadd.f32 %v2833_v28, %v1469_v38  ;;  %v1470_v43 = vmax.f32 %v1177_v2, %v1381_v3  ;;  %v2979_v2 = vmax.f32 %v2719_v35, %v2721_v36 }
 0x168   : > { %v1503_v15 = vadd.f32 %v2833_v28, %v1470_v43  ;;  %v1528_v23 = vmax.f32 %v1502_v48, 0.0 }
 0x169   : > { %v1093_v16 = vpop.f32.mrb[64].mxu0 }
 0x16a   : > { %v1529_v5 = vmax.f32 %v1503_v15, 0.0  ;;  %v1178_v18 = vmax.f32 %v2977_v6, %v1093_v16  ;;  %v1386_v59 = vpop.f32.mrb[64].mxu1  ;;  %v2210_v20 = vpop.f32.mrb[65].mxu0  ;;  %v2980_v15 = vmax.f32 %v2725_v40, %v2727_v41 }
 0x16b   : > { %v2266_v21 = vpop.f32.mrb[65].mxu1  ;;  %v1096_v60 = vpop.f32.mrb[66].mxu0 }
 0x16c   : > { %v1956_v62 = vpack.c.bf16 %v1529_v5, %v1528_v23  ;;  %v1471_v7 = vmax.f32 %v1178_v18, %v1386_v59  ;;  %v1179_v58 = vmax.f32 %v2978_v47, %v1096_v60  ;;  %v1389_v33 = vpop.f32.mrb[66].mxu1  ;;  %v2211_v10 = vpop.f32.mrb[67].mxu0  ;;  %v2981_v60 = vmax.f32 %v2731_v45, %v2733_v46 }
 0x16d   : > { %v2267_v11 = vpop.f32.mrb[67].mxu1  ;;  %v2982_v10 = vmax.f32 %v2737_v50, %v2739_v51 }
 0x16e   : > { %2009 = vst [vmem:[%s2847_s22 + $0x10] sm:$0xff] %v1956_v62   ;;  %v1504_v53 = vadd.f32 %v2833_v28, %v1471_v7  ;;  %v1472_v13 = vmax.f32 %v1179_v58, %v1389_v33 }
 0x170   : > { %v1505_v25 = vadd.f32 %v2833_v28, %v1472_v13  ;;  %v1530_v38 = vmax.f32 %v1504_v53, 0.0 }
 0x171   : > { %v1101_v26 = vpop.f32.mrb[68].mxu0 }
 0x172   : > { %v1531_v0 = vmax.f32 %v1505_v25, 0.0  ;;  %v1180_v3 = vmax.f32 %v2979_v2, %v1101_v26  ;;  %v1394_v8 = vpop.f32.mrb[68].mxu1  ;;  %v2214_v30 = vpop.f32.mrb[69].mxu0 }
 0x173   : > { %v2270_v31 = vpop.f32.mrb[69].mxu1  ;;  %v1104_v32 = vpop.f32.mrb[70].mxu0 }
 0x174   : > { %v1961_v48 = vpack.c.bf16 %v1531_v0, %v1530_v38  ;;  %v1473_v43 = vmax.f32 %v1180_v3, %v1394_v8  ;;  %v1181_v16 = vmax.f32 %v2980_v15, %v1104_v32  ;;  %v1397_v23 = vpop.f32.mrb[70].mxu1  ;;  %v2215_v5 = vpop.f32.mrb[71].mxu0  ;;  %v2983_v3 = vmax.f32 %v2743_v55, %v2745_v56 }
 0x175   : > { %v2271_v6 = vpop.f32.mrb[71].mxu1 }
 0x176   : > { %2010 = vst [vmem:[%s2847_s22 + $0x18] sm:$0xff] %v1961_v48   ;;  %v1506_v18 = vadd.f32 %v2833_v28, %v1473_v43  ;;  %v1474_v59 = vmax.f32 %v1181_v16, %v1397_v23  ;;  %v2984_v43 = vmax.f32 %v2749_v63, %v2751_v1 }
 0x178   : > { %v1507_v35 = vadd.f32 %v2833_v28, %v1474_v59  ;;  %v1532_v20 = vmax.f32 %v1506_v18, 0.0 }
 0x179   : > { %v1109_v36 = vpop.f32.mrb[72].mxu0 }
 0x17a   : > { %v1533_v21 = vmax.f32 %v1507_v35, 0.0  ;;  %v1182_v62 = vmax.f32 %v2981_v60, %v1109_v36  ;;  %v1402_v7 = vpop.f32.mrb[72].mxu1  ;;  %v2218_v40 = vpop.f32.mrb[73].mxu0  ;;  %v2985_v36 = vmax.f32 %v2755_v12, %v2757_v14 }
 0x17b   : > { %v2274_v41 = vpop.f32.mrb[73].mxu1  ;;  %v1112_v47 = vpop.f32.mrb[74].mxu0  ;;  %v2986_v40 = vmax.f32 %v2761_v24, %v2763_v27 }
 0x17c   : > { %v1966_v58 = vpack.c.bf16 %v1533_v21, %v1532_v20  ;;  %v1475_v33 = vmax.f32 %v1182_v62, %v1402_v7  ;;  %v1183_v11 = vmax.f32 %v2982_v10, %v1112_v47  ;;  %v1405_v53 = vpop.f32.mrb[74].mxu1  ;;  %v2219_v13 = vpop.f32.mrb[75].mxu0 }
 0x17d   : > { %v2275_v25 = vpop.f32.mrb[75].mxu1 }
 0x17e   : > { %2011 = vst [vmem:[%s2847_s22 + $0x20] sm:$0xff] %v1966_v58   ;;  %v1508_v26 = vadd.f32 %v2833_v28, %v1475_v33  ;;  %v1476_v38 = vmax.f32 %v1183_v11, %v1405_v53  ;;  %v2987_v25 = vmax.f32 %v2767_v37, %v2769_v39 }
 0x180   : > { %v1509_v45 = vadd.f32 %v2833_v28, %v1476_v38  ;;  %v1534_v0 = vmax.f32 %v1508_v26, 0.0 }
 0x181   : > { %v1117_v46 = vpop.f32.mrb[76].mxu0 }
 0x182   : > { %v1535_v2 = vmax.f32 %v1509_v45, 0.0  ;;  %v1184_v8 = vmax.f32 %v2983_v3, %v1117_v46  ;;  %v1410_v30 = vpop.f32.mrb[76].mxu1  ;;  %v2222_v50 = vpop.f32.mrb[77].mxu0 }
 0x183   : > { %v2278_v51 = vpop.f32.mrb[77].mxu1  ;;  %v1120_v31 = vpop.f32.mrb[78].mxu0 }
 0x184   : > { %v1971_v32 = vpack.c.bf16 %v1535_v2, %v1534_v0  ;;  %v1477_v48 = vmax.f32 %v1184_v8, %v1410_v30  ;;  %v1185_v15 = vmax.f32 %v2984_v43, %v1120_v31  ;;  %v1413_v16 = vpop.f32.mrb[78].mxu1  ;;  %v2223_v23 = vpop.f32.mrb[79].mxu0  ;;  %v2988_v2 = vmax.f32 %v2773_v49, %v2775_v52 }
 0x185   : > { %v2279_v5 = vpop.f32.mrb[79].mxu1  ;;  %v2989_v43 = vmax.f32 %v2779_v4, %v2781_v9 }
 0x186   : > { %2012 = vst [vmem:[%s2847_s22 + $0x28] sm:$0xff] %v1971_v32   ;;  %v1510_v6 = vadd.f32 %v2833_v28, %v1477_v48  ;;  %v1478_v18 = vmax.f32 %v1185_v15, %v1413_v16 }
 0x188   : > { %v1511_v55 = vadd.f32 %v2833_v28, %v1478_v18  ;;  %v1536_v59 = vmax.f32 %v1510_v6, 0.0  ;;  %v2990_v18 = vmax.f32 %v2785_v34, %v2787_v42 }
 0x189   : > { %v1125_v56 = vpop.f32.mrb[80].mxu0 }
 0x18a   : > { %v1537_v35 = vmax.f32 %v1511_v55, 0.0  ;;  %v1186_v20 = vmax.f32 %v2985_v36, %v1125_v56  ;;  %v1418_v21 = vpop.f32.mrb[80].mxu1  ;;  %v2226_v63 = vpop.f32.mrb[81].mxu0 }
 0x18b   : > { %v2282_v1 = vpop.f32.mrb[81].mxu1  ;;  %v1128_v60 = vpop.f32.mrb[82].mxu0 }
 0x18c   : > { %v1976_v62 = vpack.c.bf16 %v1537_v35, %v1536_v59  ;;  %v1479_v7 = vmax.f32 %v1186_v20, %v1418_v21  ;;  %v1187_v41 = vmax.f32 %v2986_v40, %v1128_v60  ;;  %v1421_v47 = vpop.f32.mrb[82].mxu1  ;;  %v2227_v58 = vpop.f32.mrb[83].mxu0  ;;  %v2991_v1 = vmax.f32 %v2791_v57, %v2793_v61 }
 0x18d   : > { %v2283_v33 = vpop.f32.mrb[83].mxu1 }
 0x18e   : > { %2013 = vst [vmem:[%s2847_s22 + $0x30] sm:$0xff] %v1976_v62   ;;  %v1512_v10 = vadd.f32 %v2833_v28, %v1479_v7  ;;  %v1480_v11 = vmax.f32 %v1187_v41, %v1421_v47  ;;  %v2992_v47 = vmax.f32 %v2797_v22, %v2799_v29 }
 0x190   : > { %v1513_v12 = vadd.f32 %v2833_v28, %v1480_v11  ;;  %v1538_v53 = vmax.f32 %v1512_v10, 0.0 }
 0x191   : > { %v1133_v14 = vpop.f32.mrb[84].mxu0 }
 0x192   : > { %v1539_v13 = vmax.f32 %v1513_v12, 0.0  ;;  %v1188_v26 = vmax.f32 %v2987_v25, %v1133_v14  ;;  %v1426_v38 = vpop.f32.mrb[84].mxu1  ;;  %v2230_v24 = vpop.f32.mrb[85].mxu0  ;;  %v2993_v25 = vmax.f32 %v2803_v54, %v2805_v44 }
 0x193   : > { %v2286_v27 = vpop.f32.mrb[85].mxu1  ;;  %v1136_v45 = vpop.f32.mrb[86].mxu0 }
 0x194   : > { %v1981_v46 = vpack.c.bf16 %v1539_v13, %v1538_v53  ;;  %v1481_v0 = vmax.f32 %v1188_v26, %v1426_v38  ;;  %v1189_v3 = vmax.f32 %v2988_v2, %v1136_v45  ;;  %v1429_v8 = vpop.f32.mrb[86].mxu1  ;;  %v2231_v30 = vpop.f32.mrb[87].mxu0 }
 0x195   : > { %v2287_v50 = vpop.f32.mrb[87].mxu1 }
 0x196   : > { %2014 = vst [vmem:[%s2847_s22 + $0x38] sm:$0xff] %v1981_v46   ;;  %v1514_v51 = vadd.f32 %v2833_v28, %v1481_v0  ;;  %v1482_v31 = vmax.f32 %v1189_v3, %v1429_v8  ;;  %v2994_v46 = vmax.f32 %v2809_v17, %v2811_v19 }
 0x198   : > { %v1515_v37 = vadd.f32 %v2833_v28, %v1482_v31  ;;  %v1540_v32 = vmax.f32 %v1514_v51, 0.0 }
 0x199   : > { %v1141_v39 = vpop.f32.mrb[88].mxu0 }
 0x19a   : > { %v1541_v48 = vmax.f32 %v1515_v37, 0.0  ;;  %v1190_v15 = vmax.f32 %v2989_v43, %v1141_v39  ;;  %v1434_v16 = vpop.f32.mrb[88].mxu1  ;;  %v2234_v49 = vpop.f32.mrb[89].mxu0  ;;  %v2995_v37 = vld [vmem:[#allocation2_spill] sm:$0xff]  ;;  %v2996_v39 = vld [vmem:[#allocation3_spill] sm:$0xff] }
 0x19b   : > { %v2290_v52 = vpop.f32.mrb[89].mxu1  ;;  %v1144_v23 = vpop.f32.mrb[90].mxu0 }
 0x19c   : > { %v1986_v5 = vpack.c.bf16 %v1541_v48, %v1540_v32  ;;  %v1483_v6 = vmax.f32 %v1190_v15, %v1434_v16  ;;  %v1191_v55 = vmax.f32 %v2990_v18, %v1144_v23  ;;  %v1437_v56 = vpop.f32.mrb[90].mxu1  ;;  %v2235_v59 = vpop.f32.mrb[91].mxu0  ;;  %v2997_v32 = vmax.f32 %v2995_v37, %v2996_v39  ;;  %v2998_v52 = vld [vmem:[#allocation4_spill] sm:$0xff]  ;;  %v2999_v23 = vld [vmem:[#allocation5_spill] sm:$0xff] }
 0x19d   : > { %v2291_v35 = vpop.f32.mrb[91].mxu1 }
 0x19e   : > { %2015 = vst [vmem:[%s2847_s22 + $0x40] sm:$0xff] %v1986_v5   ;;  %v1516_v36 = vadd.f32 %v2833_v28, %v1483_v6  ;;  %v1484_v20 = vmax.f32 %v1191_v55, %v1437_v56  ;;  %v3000_v5 = vmax.f32 %v2998_v52, %v2999_v23 }
 0x1a0   : > { %v1517_v4 = vadd.f32 %v2833_v28, %v1484_v20  ;;  %v1542_v21 = vmax.f32 %v1516_v36, 0.0 }
 0x1a1   : > { %v1149_v9 = vpop.f32.mrb[92].mxu0 }
 0x1a2   : > { %v1543_v63 = vmax.f32 %v1517_v4, 0.0  ;;  %v1192_v60 = vmax.f32 %v2991_v1, %v1149_v9  ;;  %v1442_v62 = vpop.f32.mrb[92].mxu1  ;;  %v2238_v34 = vpop.f32.mrb[93].mxu0 }
 0x1a3   : > { %v2294_v42 = vpop.f32.mrb[93].mxu1  ;;  %v1152_v7 = vpop.f32.mrb[94].mxu0 }
 0x1a4   : > { %v1991_v40 = vpack.c.bf16 %v1543_v63, %v1542_v21  ;;  %v1485_v41 = vmax.f32 %v1192_v60, %v1442_v62  ;;  %v1193_v58 = vmax.f32 %v2992_v47, %v1152_v7  ;;  %v1445_v33 = vpop.f32.mrb[94].mxu1  ;;  %v2239_v10 = vpop.f32.mrb[95].mxu0 }
 0x1a5   : > { %v2295_v11 = vpop.f32.mrb[95].mxu1 }
 0x1a6   : > { %2016 = vst [vmem:[%s2847_s22 + $0x48] sm:$0xff] %v1991_v40   ;;  %v1518_v12 = vadd.f32 %v2833_v28, %v1485_v41  ;;  %v1486_v14 = vmax.f32 %v1193_v58, %v1445_v33 }
 0x1a8   : > { %v1519_v57 = vadd.f32 %v2833_v28, %v1486_v14  ;;  %v1544_v53 = vmax.f32 %v1518_v12, 0.0 }
 0x1a9   : > { %v1157_v61 = vpop.f32.mrb[96].mxu0 }
 0x1aa   : > { %v1545_v13 = vmax.f32 %v1519_v57, 0.0  ;;  %v1194_v26 = vmax.f32 %v2993_v25, %v1157_v61  ;;  %v1450_v38 = vpop.f32.mrb[96].mxu1  ;;  %v2242_v22 = vpop.f32.mrb[97].mxu0 }
 0x1ab   : > { %v2298_v29 = vpop.f32.mrb[97].mxu1  ;;  %v1160_v24 = vpop.f32.mrb[98].mxu0 }
 0x1ac   : > { %v1996_v27 = vpack.c.bf16 %v1545_v13, %v1544_v53  ;;  %v1487_v45 = vmax.f32 %v1194_v26, %v1450_v38  ;;  %v1195_v0 = vmax.f32 %v2994_v46, %v1160_v24  ;;  %v1453_v2 = vpop.f32.mrb[98].mxu1  ;;  %v2243_v3 = vpop.f32.mrb[99].mxu0 }
 0x1ad   : > { %v2299_v8 = vpop.f32.mrb[99].mxu1 }
 0x1ae   : > { %2017 = vst [vmem:[%s2847_s22 + $0x50] sm:$0xff] %v1996_v27   ;;  %v1520_v30 = vadd.f32 %v2833_v28, %v1487_v45  ;;  %v1488_v50 = vmax.f32 %v1195_v0, %v1453_v2 }
 0x1b0   : > { %v1521_v54 = vadd.f32 %v2833_v28, %v1488_v50  ;;  %v1546_v51 = vmax.f32 %v1520_v30, 0.0 }
 0x1b1   : > { %v1165_v44 = vpop.f32.mrb[100].mxu0 }
 0x1b2   : > { %v1547_v31 = vmax.f32 %v1521_v54, 0.0  ;;  %v1196_v48 = vmax.f32 %v2997_v32, %v1165_v44  ;;  %v1458_v43 = vpop.f32.mrb[100].mxu1  ;;  %v2246_v17 = vpop.f32.mrb[101].mxu0 }
 0x1b3   : > { %v2302_v19 = vpop.f32.mrb[101].mxu1  ;;  %v1168_v15 = vpop.f32.mrb[102].mxu0 }
 0x1b4   : > { %v2001_v16 = vpack.c.bf16 %v1547_v31, %v1546_v51  ;;  %v1489_v49 = vmax.f32 %v1196_v48, %v1458_v43  ;;  %v1197_v6 = vmax.f32 %v3000_v5, %v1168_v15  ;;  %v1461_v18 = vpop.f32.mrb[102].mxu1  ;;  %v2247_v55 = vpop.f32.mrb[103].mxu0 }
 0x1b5   : > { %v2303_v56 = vpop.f32.mrb[103].mxu1 }
 0x1b6   : > { %2018 = vst [vmem:[%s2847_s22 + $0x58] sm:$0xff] %v2001_v16   ;;  %v1522_v59 = vadd.f32 %v2833_v28, %v1489_v49  ;;  %v1490_v35 = vmax.f32 %v1197_v6, %v1461_v18 }
 0x1b8   : > { %v1523_v36 = vadd.f32 %v2833_v28, %v1490_v35  ;;  %v1548_v20 = vmax.f32 %v1522_v59, 0.0 }
 0x1ba   : > { %v1549_v4 = vmax.f32 %v1523_v36, 0.0 }
 0x1bc   : > { %v2006_v9 = vpack.c.bf16 %v1549_v4, %v1548_v20 }
 0x1be   : > { %2019 = vst [vmem:[%s2847_s22 + $0x60] sm:$0xff] %v2006_v9  }
 0x1bf PF: > { %s16_s21 = sadd.s32 1, %s2375_s21  }
 0x1c0   : > { %p13_p4 = scmp.ge.s32.totalorder %s16_s21, 4  }
 0x1c2   :  { %15 = sbr.rel (!%p13_p4) target bundleno = 1 (0x1), region = 83 }

// kernel: lenet5_forward.3
= control target key start
LH: loop header
LB: loop body
LE: loop exit
PB: predicated region body
PF: predicated region fallthrough
CT: control target
= control target key end

     0   :  { %s13092_s21 = smov 0   ;;  %s13094_s22 = smov 0   ;;  %s17692_s0 = inlined_call_operand.vmem [shape: bf16[25,32,150], index: 0, kind: input, shape index: {}]   ;;  %s17693_s1 = inlined_call_operand.vmem [shape: bf16[25,32,150], index: 1, kind: input, shape index: {}]   ;;  %s17694_s2 = inlined_call_operand.vmem [shape: bf16[25,32,150], index: 2, kind: input, shape index: {}]   ;;  %s17695_s3 = inlined_call_operand.vmem [shape: bf16[25,32,150], index: 3, kind: input, shape index: {}]   ;;  %s17696_s4 = inlined_call_operand.vmem [shape: bf16[150,128], index: 4, kind: input, shape index: {}]   ;;  %s17697_s5 = inlined_call_operand.vmem [shape: f32[1,128], index: 5, kind: input, shape index: {}]   ;;  %s17698_s6 = inlined_call_operand.vmem [shape: bf16[25,128,128], index: 6, kind: input, shape index: {}]   ;;  %s17699_s7 = inlined_call_operand.vmem [shape: f32[1,128], index: 7, kind: input, shape index: {}]   ;;  %s17700_s8 = inlined_call_operand.vmem [shape: bf16[128,128], index: 8, kind: input, shape index: {}]   ;;  %s17701_s9 = inlined_call_operand.vmem [shape: f32[1,128], index: 9, kind: input, shape index: {}]   ;;  %s17702_s10 = inlined_call_operand.vmem [shape: bf16[128,128], index: 10, kind: input, shape index: {}]   ;;  %s17703_s11 = inlined_call_operand.vmem [shape: f32[1,128], index: 11, kind: input, shape index: {}]   ;;  %s17704_s12 = inlined_call_operand.vmem [shape: f32[32,128], index: 12, kind: output, shape index: {}]  }
   0x1   :  { %s13096_s23 = smov 0  }
   0x2 LB: > { %s10439_s24 = sadd.s32 4294967295, %s13022_s23   ;;  %s13109_s25 = sadd.s32 1, %s13022_s23   ;;  %s13022_s23 = sphi %s13096_s23, %s17708_s23   ;;  %s13018_s22 = sphi %s13094_s22, %s17707_s22   ;;  %s13014_s21 = sphi %s13092_s21, %s17706_s21  }
   0x3   : > { %s26_s26 = ssub.s32 %s13022_s23, %s13109_s25  ;;  %s29_s27 = sadd.s32 1, %s13018_s22 }
   0x4   : > { %p27_p0 = scmp.eq.s32.totalorder %s26_s26, 0  ;;  %p36_p1 = scmp.ne.s32.totalorder %s13018_s22, %s13014_s21 }
   0x5   : > { %p37_p2 = scmp.eq.s32.totalorder %s13022_s23, 0  ;;  %p10442_p4 = scmp.ge.s32.totalorder %s13022_s23, 2 }
   0x6   : > { %s13118_s28 = scalar_select %p27_p0, %s13018_s22, %s29_s27  }
   0x7   : > { %p13120_p3 = por %p37_p2, %p36_p1  ;;  %358 = sbr.rel (%p10442_p4) target bundleno = 130 (0x82), region = 48 }
   0xe   : > { %361 = sbr.rel (!%p13120_p3) target bundleno = 43 (0x2b), region = 52  ;;  %s363_s30 = sand.u32 (%p13120_p3), 1, %s13018_s22  }
   0xf   : > { %s11567_s13 = sshll.u32 (%p13120_p3), %s13022_s23, 4  ;;  %s12357_s14 = smul.u32 (%p13120_p3), 400, %s363_s30 }
  0x10   : > { %s13132_s17 = scalar_lea.vmem (%p13120_p3), %s17692_s0, %s11567_s13 }
  0x11   : > { %v495_v0 = vld [vmem:[%s13132_s17] sm:$0xff] (%p13120_p3)  ;;  %v497_v1 = vld [vmem:[%s13132_s17 + $0x8] sm:$0xff] (%p13120_p3)  ;;  %s13140_s18 = scalar_lea.vmem (%p13120_p3), [#allocation2], %s12357_s14 }
  0x12   : > { %v499_v2 = vld [vmem:[%s13132_s17 + $0x20] sm:$0xff] (%p13120_p3)  ;;  %v501_v3 = vld [vmem:[%s13132_s17 + $0x28] sm:$0xff] (%p13120_p3)  ;;  %496 = vst [vmem:[%s13140_s18] sm:$0xff] (%p13120_p3), %v495_v0  ;;  %498 = vst [vmem:[%s13140_s18 + $0x8] sm:$0xff] (%p13120_p3), %v497_v1 }
  0x13   : > { %v503_v4 = vld [vmem:[%s13132_s17 + $0x40] sm:$0xff] (%p13120_p3)  ;;  %v505_v5 = vld [vmem:[%s13132_s17 + $0x48] sm:$0xff] (%p13120_p3)  ;;  %500 = vst [vmem:[%s13140_s18 + $0x10] sm:$0xff] (%p13120_p3), %v499_v2  ;;  %502 = vst [vmem:[%s13140_s18 + $0x18] sm:$0xff] (%p13120_p3), %v501_v3 }
  0x14   : > { %504 = vst [vmem:[%s13140_s18 + $0x20] sm:$0xff] (%p13120_p3), %v503_v4  ;;  %506 = vst [vmem:[%s13140_s18 + $0x28] sm:$0xff] (%p13120_p3), %v505_v5  ;;  %v507_v6 = vld [vmem:[%s13132_s17 + $0x60] sm:$0xff] (%p13120_p3)  ;;  %v509_v7 = vld [vmem:[%s13132_s17 + $0x68] sm:$0xff] (%p13120_p3) }
  0x15   : > { %v511_v8 = vld [vmem:[%s13132_s17 + $0x80] sm:$0xff]  ;;  %508 = vst [vmem:[%s13140_s18 + $0x30] sm:$0xff] %v507_v6  ;;  %510 = vst [vmem:[%s13140_s18 + $0x38] sm:$0xff] %v509_v7  ;;  %v513_v9 = vld [vmem:[%s13132_s17 + $0x88] sm:$0xff] }
  0x16   : > { %512 = vst [vmem:[%s13140_s18 + $0x40] sm:$0xff] %v511_v8  ;;  %v515_v10 = vld [vmem:[%s13132_s17 + $0xa0] sm:$0xff]  ;;  %v517_v11 = vld [vmem:[%s13132_s17 + $0xa8] sm:$0xff]  ;;  %514 = vst [vmem:[%s13140_s18 + $0x48] sm:$0xff] %v513_v9 }
  0x17   : > { %516 = vst [vmem:[%s13140_s18 + $0x50] sm:$0xff] %v515_v10  ;;  %518 = vst [vmem:[%s13140_s18 + $0x58] sm:$0xff] %v517_v11  ;;  %v519_v12 = vld [vmem:[%s13132_s17 + $0xc0] sm:$0xff]  ;;  %v521_v13 = vld [vmem:[%s13132_s17 + $0xc8] sm:$0xff] }
  0x18   : > { %v523_v14 = vld [vmem:[%s13132_s17 + $0xe0] sm:$0xff]  ;;  %520 = vst [vmem:[%s13140_s18 + $0x60] sm:$0xff] %v519_v12  ;;  %522 = vst [vmem:[%s13140_s18 + $0x68] sm:$0xff] %v521_v13  ;;  %v525_v15 = vld [vmem:[%s13132_s17 + $0xe8] sm:$0xff] }
  0x19   : > { %524 = vst [vmem:[%s13140_s18 + $0x70] sm:$0xff] %v523_v14  ;;  %v527_v16 = vld [vmem:[%s13132_s17 + $0x100] sm:$0xff]  ;;  %v529_v17 = vld [vmem:[%s13132_s17 + $0x108] sm:$0xff]  ;;  %526 = vst [vmem:[%s13140_s18 + $0x78] sm:$0xff] %v525_v15 }
  0x1a   : > { %528 = vst [vmem:[%s13140_s18 + $0x80] sm:$0xff] %v527_v16  ;;  %530 = vst [vmem:[%s13140_s18 + $0x88] sm:$0xff] %v529_v17  ;;  %v531_v18 = vld [vmem:[%s13132_s17 + $0x120] sm:$0xff]  ;;  %v533_v19 = vld [vmem:[%s13132_s17 + $0x128] sm:$0xff] }
  0x1b   : > { %v535_v20 = vld [vmem:[%s13132_s17 + $0x140] sm:$0xff]  ;;  %532 = vst [vmem:[%s13140_s18 + $0x90] sm:$0xff] %v531_v18  ;;  %534 = vst [vmem:[%s13140_s18 + $0x98] sm:$0xff] %v533_v19  ;;  %v537_v21 = vld [vmem:[%s13132_s17 + $0x148] sm:$0xff] }
  0x1c   : > { %536 = vst [vmem:[%s13140_s18 + $0xa0] sm:$0xff] %v535_v20  ;;  %v539_v22 = vld [vmem:[%s13132_s17 + $0x160] sm:$0xff]  ;;  %v541_v23 = vld [vmem:[%s13132_s17 + $0x168] sm:$0xff]  ;;  %538 = vst [vmem:[%s13140_s18 + $0xa8] sm:$0xff] %v537_v21 }
  0x1d   : > { %540 = vst [vmem:[%s13140_s18 + $0xb0] sm:$0xff] %v539_v22  ;;  %542 = vst [vmem:[%s13140_s18 + $0xb8] sm:$0xff] %v541_v23  ;;  %v543_v24 = vld [vmem:[%s13132_s17 + $0x180] sm:$0xff]  ;;  %v545_v25 = vld [vmem:[%s13132_s17 + $0x188] sm:$0xff] }
  0x1e   : > { %v547_v26 = vld [vmem:[%s13132_s17 + $0x1a0] sm:$0xff]  ;;  %544 = vst [vmem:[%s13140_s18 + $0xc0] sm:$0xff] %v543_v24  ;;  %546 = vst [vmem:[%s13140_s18 + $0xc8] sm:$0xff] %v545_v25  ;;  %v549_v27 = vld [vmem:[%s13132_s17 + $0x1a8] sm:$0xff] }
  0x1f   : > { %548 = vst [vmem:[%s13140_s18 + $0xd0] sm:$0xff] %v547_v26  ;;  %v551_v28 = vld [vmem:[%s13132_s17 + $0x1c0] sm:$0xff]  ;;  %v553_v29 = vld [vmem:[%s13132_s17 + $0x1c8] sm:$0xff]  ;;  %550 = vst [vmem:[%s13140_s18 + $0xd8] sm:$0xff] %v549_v27 }
  0x20   : > { %552 = vst [vmem:[%s13140_s18 + $0xe0] sm:$0xff] %v551_v28  ;;  %554 = vst [vmem:[%s13140_s18 + $0xe8] sm:$0xff] %v553_v29  ;;  %v555_v30 = vld [vmem:[%s13132_s17 + $0x1e0] sm:$0xff]  ;;  %v557_v31 = vld [vmem:[%s13132_s17 + $0x1e8] sm:$0xff] }
  0x21   : > { %v559_v32 = vld [vmem:[%s13132_s17 + $0x200] sm:$0xff]  ;;  %556 = vst [vmem:[%s13140_s18 + $0xf0] sm:$0xff] %v555_v30  ;;  %558 = vst [vmem:[%s13140_s18 + $0xf8] sm:$0xff] %v557_v31  ;;  %v561_v33 = vld [vmem:[%s13132_s17 + $0x208] sm:$0xff] }
  0x22   : > { %560 = vst [vmem:[%s13140_s18 + $0x100] sm:$0xff] %v559_v32  ;;  %v563_v34 = vld [vmem:[%s13132_s17 + $0x220] sm:$0xff]  ;;  %v565_v35 = vld [vmem:[%s13132_s17 + $0x228] sm:$0xff]  ;;  %562 = vst [vmem:[%s13140_s18 + $0x108] sm:$0xff] %v561_v33 }
  0x23   : > { %564 = vst [vmem:[%s13140_s18 + $0x110] sm:$0xff] %v563_v34  ;;  %566 = vst [vmem:[%s13140_s18 + $0x118] sm:$0xff] %v565_v35  ;;  %v567_v36 = vld [vmem:[%s13132_s17 + $0x240] sm:$0xff]  ;;  %v569_v37 = vld [vmem:[%s13132_s17 + $0x248] sm:$0xff] }
  0x24   : > { %v571_v38 = vld [vmem:[%s13132_s17 + $0x260] sm:$0xff]  ;;  %568 = vst [vmem:[%s13140_s18 + $0x120] sm:$0xff] %v567_v36  ;;  %570 = vst [vmem:[%s13140_s18 + $0x128] sm:$0xff] %v569_v37  ;;  %v573_v39 = vld [vmem:[%s13132_s17 + $0x268] sm:$0xff] }
  0x25   : > { %572 = vst [vmem:[%s13140_s18 + $0x130] sm:$0xff] %v571_v38  ;;  %v575_v40 = vld [vmem:[%s13132_s17 + $0x280] sm:$0xff]  ;;  %v577_v41 = vld [vmem:[%s13132_s17 + $0x288] sm:$0xff]  ;;  %574 = vst [vmem:[%s13140_s18 + $0x138] sm:$0xff] %v573_v39 }
  0x26   : > { %576 = vst [vmem:[%s13140_s18 + $0x140] sm:$0xff] %v575_v40  ;;  %578 = vst [vmem:[%s13140_s18 + $0x148] sm:$0xff] %v577_v41  ;;  %v579_v42 = vld [vmem:[%s13132_s17 + $0x2a0] sm:$0xff]  ;;  %v581_v43 = vld [vmem:[%s13132_s17 + $0x2a8] sm:$0xff] }
  0x27   : > { %v583_v44 = vld [vmem:[%s13132_s17 + $0x2c0] sm:$0xff]  ;;  %580 = vst [vmem:[%s13140_s18 + $0x150] sm:$0xff] %v579_v42  ;;  %582 = vst [vmem:[%s13140_s18 + $0x158] sm:$0xff] %v581_v43  ;;  %v585_v45 = vld [vmem:[%s13132_s17 + $0x2c8] sm:$0xff] }
  0x28   : > { %584 = vst [vmem:[%s13140_s18 + $0x160] sm:$0xff] %v583_v44  ;;  %v587_v46 = vld [vmem:[%s13132_s17 + $0x2e0] sm:$0xff]  ;;  %v589_v47 = vld [vmem:[%s13132_s17 + $0x2e8] sm:$0xff]  ;;  %586 = vst [vmem:[%s13140_s18 + $0x168] sm:$0xff] %v585_v45 }
  0x29   : > { %588 = vst [vmem:[%s13140_s18 + $0x170] sm:$0xff] %v587_v46  ;;  %590 = vst [vmem:[%s13140_s18 + $0x178] sm:$0xff] %v589_v47  ;;  %v591_v48 = vld [vmem:[%s13132_s17 + $0x300] sm:$0xff]  ;;  %v593_v49 = vld [vmem:[%s13132_s17 + $0x308] sm:$0xff] }
  0x2a   : > { %592 = vst [vmem:[%s13140_s18 + $0x180] sm:$0xff] %v591_v48  ;;  %594 = vst [vmem:[%s13140_s18 + $0x188] sm:$0xff] %v593_v49 }
  0x2b PF: > { %600 = sbr.rel (!%p13120_p3) target bundleno = 72 (0x48), region = 90  ;;  %s602_s19 = sand.u32 (%p13120_p3), 1, %s13018_s22  }
  0x2c   : > { %s11569_s20 = sshll.u32 (%p13120_p3), %s13022_s23, 4  ;;  %s12358_s26 = smul.u32 (%p13120_p3), 400, %s602_s19 }
  0x2d   : > { %s13243_s13 = scalar_lea.vmem (%p13120_p3), %s17693_s1, %s11569_s20 }
  0x2e   : > { %v734_v50 = vld [vmem:[%s13243_s13] sm:$0xff] (%p13120_p3)  ;;  %v736_v51 = vld [vmem:[%s13243_s13 + $0x8] sm:$0xff] (%p13120_p3)  ;;  %s13251_s14 = scalar_lea.vmem (%p13120_p3), [#allocation3], %s12358_s26 }
  0x2f   : > { %v738_v52 = vld [vmem:[%s13243_s13 + $0x20] sm:$0xff] (%p13120_p3)  ;;  %v740_v53 = vld [vmem:[%s13243_s13 + $0x28] sm:$0xff] (%p13120_p3)  ;;  %735 = vst [vmem:[%s13251_s14] sm:$0xff] (%p13120_p3), %v734_v50  ;;  %737 = vst [vmem:[%s13251_s14 + $0x8] sm:$0xff] (%p13120_p3), %v736_v51 }
  0x30   : > { %v742_v54 = vld [vmem:[%s13243_s13 + $0x40] sm:$0xff] (%p13120_p3)  ;;  %v744_v55 = vld [vmem:[%s13243_s13 + $0x48] sm:$0xff] (%p13120_p3)  ;;  %739 = vst [vmem:[%s13251_s14 + $0x10] sm:$0xff] (%p13120_p3), %v738_v52  ;;  %741 = vst [vmem:[%s13251_s14 + $0x18] sm:$0xff] (%p13120_p3), %v740_v53 }
  0x31   : > { %743 = vst [vmem:[%s13251_s14 + $0x20] sm:$0xff] (%p13120_p3), %v742_v54  ;;  %745 = vst [vmem:[%s13251_s14 + $0x28] sm:$0xff] (%p13120_p3), %v744_v55  ;;  %v746_v56 = vld [vmem:[%s13243_s13 + $0x60] sm:$0xff] (%p13120_p3)  ;;  %v748_v57 = vld [vmem:[%s13243_s13 + $0x68] sm:$0xff] (%p13120_p3) }
  0x32   : > { %v750_v58 = vld [vmem:[%s13243_s13 + $0x80] sm:$0xff]  ;;  %747 = vst [vmem:[%s13251_s14 + $0x30] sm:$0xff] %v746_v56  ;;  %749 = vst [vmem:[%s13251_s14 + $0x38] sm:$0xff] %v748_v57  ;;  %v752_v59 = vld [vmem:[%s13243_s13 + $0x88] sm:$0xff] }
  0x33   : > { %751 = vst [vmem:[%s13251_s14 + $0x40] sm:$0xff] %v750_v58  ;;  %v754_v60 = vld [vmem:[%s13243_s13 + $0xa0] sm:$0xff]  ;;  %v756_v61 = vld [vmem:[%s13243_s13 + $0xa8] sm:$0xff]  ;;  %753 = vst [vmem:[%s13251_s14 + $0x48] sm:$0xff] %v752_v59 }
  0x34   : > { %755 = vst [vmem:[%s13251_s14 + $0x50] sm:$0xff] %v754_v60  ;;  %757 = vst [vmem:[%s13251_s14 + $0x58] sm:$0xff] %v756_v61  ;;  %v758_v62 = vld [vmem:[%s13243_s13 + $0xc0] sm:$0xff]  ;;  %v760_v63 = vld [vmem:[%s13243_s13 + $0xc8] sm:$0xff] }
  0x35   : > { %v762_v0 = vld [vmem:[%s13243_s13 + $0xe0] sm:$0xff]  ;;  %759 = vst [vmem:[%s13251_s14 + $0x60] sm:$0xff] %v758_v62  ;;  %761 = vst [vmem:[%s13251_s14 + $0x68] sm:$0xff] %v760_v63  ;;  %v764_v1 = vld [vmem:[%s13243_s13 + $0xe8] sm:$0xff] }
  0x36   : > { %763 = vst [vmem:[%s13251_s14 + $0x70] sm:$0xff] %v762_v0  ;;  %v766_v2 = vld [vmem:[%s13243_s13 + $0x100] sm:$0xff]  ;;  %v768_v3 = vld [vmem:[%s13243_s13 + $0x108] sm:$0xff]  ;;  %765 = vst [vmem:[%s13251_s14 + $0x78] sm:$0xff] %v764_v1 }
  0x37   : > { %767 = vst [vmem:[%s13251_s14 + $0x80] sm:$0xff] %v766_v2  ;;  %769 = vst [vmem:[%s13251_s14 + $0x88] sm:$0xff] %v768_v3  ;;  %v770_v4 = vld [vmem:[%s13243_s13 + $0x120] sm:$0xff]  ;;  %v772_v5 = vld [vmem:[%s13243_s13 + $0x128] sm:$0xff] }
  0x38   : > { %v774_v6 = vld [vmem:[%s13243_s13 + $0x140] sm:$0xff]  ;;  %771 = vst [vmem:[%s13251_s14 + $0x90] sm:$0xff] %v770_v4  ;;  %773 = vst [vmem:[%s13251_s14 + $0x98] sm:$0xff] %v772_v5  ;;  %v776_v7 = vld [vmem:[%s13243_s13 + $0x148] sm:$0xff] }
  0x39   : > { %775 = vst [vmem:[%s13251_s14 + $0xa0] sm:$0xff] %v774_v6  ;;  %v778_v8 = vld [vmem:[%s13243_s13 + $0x160] sm:$0xff]  ;;  %v780_v9 = vld [vmem:[%s13243_s13 + $0x168] sm:$0xff]  ;;  %777 = vst [vmem:[%s13251_s14 + $0xa8] sm:$0xff] %v776_v7 }
  0x3a   : > { %779 = vst [vmem:[%s13251_s14 + $0xb0] sm:$0xff] %v778_v8  ;;  %781 = vst [vmem:[%s13251_s14 + $0xb8] sm:$0xff] %v780_v9  ;;  %v782_v10 = vld [vmem:[%s13243_s13 + $0x180] sm:$0xff]  ;;  %v784_v11 = vld [vmem:[%s13243_s13 + $0x188] sm:$0xff] }
  0x3b   : > { %v786_v12 = vld [vmem:[%s13243_s13 + $0x1a0] sm:$0xff]  ;;  %783 = vst [vmem:[%s13251_s14 + $0xc0] sm:$0xff] %v782_v10  ;;  %785 = vst [vmem:[%s13251_s14 + $0xc8] sm:$0xff] %v784_v11  ;;  %v788_v13 = vld [vmem:[%s13243_s13 + $0x1a8] sm:$0xff] }
  0x3c   : > { %787 = vst [vmem:[%s13251_s14 + $0xd0] sm:$0xff] %v786_v12  ;;  %v790_v14 = vld [vmem:[%s13243_s13 + $0x1c0] sm:$0xff]  ;;  %v792_v15 = vld [vmem:[%s13243_s13 + $0x1c8] sm:$0xff]  ;;  %789 = vst [vmem:[%s13251_s14 + $0xd8] sm:$0xff] %v788_v13 }
  0x3d   : > { %791 = vst [vmem:[%s13251_s14 + $0xe0] sm:$0xff] %v790_v14  ;;  %793 = vst [vmem:[%s13251_s14 + $0xe8] sm:$0xff] %v792_v15  ;;  %v794_v16 = vld [vmem:[%s13243_s13 + $0x1e0] sm:$0xff]  ;;  %v796_v17 = vld [vmem:[%s13243_s13 + $0x1e8] sm:$0xff] }
  0x3e   : > { %v798_v18 = vld [vmem:[%s13243_s13 + $0x200] sm:$0xff]  ;;  %795 = vst [vmem:[%s13251_s14 + $0xf0] sm:$0xff] %v794_v16  ;;  %797 = vst [vmem:[%s13251_s14 + $0xf8] sm:$0xff] %v796_v17  ;;  %v800_v19 = vld [vmem:[%s13243_s13 + $0x208] sm:$0xff] }
  0x3f   : > { %799 = vst [vmem:[%s13251_s14 + $0x100] sm:$0xff] %v798_v18  ;;  %v802_v20 = vld [vmem:[%s13243_s13 + $0x220] sm:$0xff]  ;;  %v804_v21 = vld [vmem:[%s13243_s13 + $0x228] sm:$0xff]  ;;  %801 = vst [vmem:[%s13251_s14 + $0x108] sm:$0xff] %v800_v19 }
  0x40   : > { %803 = vst [vmem:[%s13251_s14 + $0x110] sm:$0xff] %v802_v20  ;;  %805 = vst [vmem:[%s13251_s14 + $0x118] sm:$0xff] %v804_v21  ;;  %v806_v22 = vld [vmem:[%s13243_s13 + $0x240] sm:$0xff]  ;;  %v808_v23 = vld [vmem:[%s13243_s13 + $0x248] sm:$0xff] }
  0x41   : > { %v810_v24 = vld [vmem:[%s13243_s13 + $0x260] sm:$0xff]  ;;  %807 = vst [vmem:[%s13251_s14 + $0x120] sm:$0xff] %v806_v22  ;;  %809 = vst [vmem:[%s13251_s14 + $0x128] sm:$0xff] %v808_v23  ;;  %v812_v25 = vld [vmem:[%s13243_s13 + $0x268] sm:$0xff] }
  0x42   : > { %811 = vst [vmem:[%s13251_s14 + $0x130] sm:$0xff] %v810_v24  ;;  %v814_v26 = vld [vmem:[%s13243_s13 + $0x280] sm:$0xff]  ;;  %v816_v27 = vld [vmem:[%s13243_s13 + $0x288] sm:$0xff]  ;;  %813 = vst [vmem:[%s13251_s14 + $0x138] sm:$0xff] %v812_v25 }
  0x43   : > { %815 = vst [vmem:[%s13251_s14 + $0x140] sm:$0xff] %v814_v26  ;;  %817 = vst [vmem:[%s13251_s14 + $0x148] sm:$0xff] %v816_v27  ;;  %v818_v28 = vld [vmem:[%s13243_s13 + $0x2a0] sm:$0xff]  ;;  %v820_v29 = vld [vmem:[%s13243_s13 + $0x2a8] sm:$0xff] }
  0x44   : > { %v822_v30 = vld [vmem:[%s13243_s13 + $0x2c0] sm:$0xff]  ;;  %819 = vst [vmem:[%s13251_s14 + $0x150] sm:$0xff] %v818_v28  ;;  %821 = vst [vmem:[%s13251_s14 + $0x158] sm:$0xff] %v820_v29  ;;  %v824_v31 = vld [vmem:[%s13243_s13 + $0x2c8] sm:$0xff] }
  0x45   : > { %823 = vst [vmem:[%s13251_s14 + $0x160] sm:$0xff] %v822_v30  ;;  %v826_v32 = vld [vmem:[%s13243_s13 + $0x2e0] sm:$0xff]  ;;  %v828_v33 = vld [vmem:[%s13243_s13 + $0x2e8] sm:$0xff]  ;;  %825 = vst [vmem:[%s13251_s14 + $0x168] sm:$0xff] %v824_v31 }
  0x46   : > { %827 = vst [vmem:[%s13251_s14 + $0x170] sm:$0xff] %v826_v32  ;;  %829 = vst [vmem:[%s13251_s14 + $0x178] sm:$0xff] %v828_v33  ;;  %v830_v34 = vld [vmem:[%s13243_s13 + $0x300] sm:$0xff]  ;;  %v832_v35 = vld [vmem:[%s13243_s13 + $0x308] sm:$0xff] }
  0x47   : > { %831 = vst [vmem:[%s13251_s14 + $0x180] sm:$0xff] %v830_v34  ;;  %833 = vst [vmem:[%s13251_s14 + $0x188] sm:$0xff] %v832_v35 }
  0x48 PF: > { %839 = sbr.rel (!%p13120_p3) target bundleno = 101 (0x65), region = 128  ;;  %s841_s15 = sand.u32 (%p13120_p3), 1, %s13018_s22  }
  0x49   : > { %s11571_s16 = sshll.u32 (%p13120_p3), %s13022_s23, 4  ;;  %s12359_s17 = smul.u32 (%p13120_p3), 400, %s841_s15 }
  0x4a   : > { %s13354_s20 = scalar_lea.vmem (%p13120_p3), %s17694_s2, %s11571_s16 }
  0x4b   : > { %v973_v36 = vld [vmem:[%s13354_s20] sm:$0xff] (%p13120_p3)  ;;  %v975_v37 = vld [vmem:[%s13354_s20 + $0x8] sm:$0xff] (%p13120_p3)  ;;  %s13362_s26 = scalar_lea.vmem (%p13120_p3), [#allocation4], %s12359_s17 }
  0x4c   : > { %v977_v38 = vld [vmem:[%s13354_s20 + $0x20] sm:$0xff] (%p13120_p3)  ;;  %v979_v39 = vld [vmem:[%s13354_s20 + $0x28] sm:$0xff] (%p13120_p3)  ;;  %974 = vst [vmem:[%s13362_s26] sm:$0xff] (%p13120_p3), %v973_v36  ;;  %976 = vst [vmem:[%s13362_s26 + $0x8] sm:$0xff] (%p13120_p3), %v975_v37 }
  0x4d   : > { %v981_v40 = vld [vmem:[%s13354_s20 + $0x40] sm:$0xff] (%p13120_p3)  ;;  %v983_v41 = vld [vmem:[%s13354_s20 + $0x48] sm:$0xff] (%p13120_p3)  ;;  %978 = vst [vmem:[%s13362_s26 + $0x10] sm:$0xff] (%p13120_p3), %v977_v38  ;;  %980 = vst [vmem:[%s13362_s26 + $0x18] sm:$0xff] (%p13120_p3), %v979_v39 }
  0x4e   : > { %982 = vst [vmem:[%s13362_s26 + $0x20] sm:$0xff] (%p13120_p3), %v981_v40  ;;  %984 = vst [vmem:[%s13362_s26 + $0x28] sm:$0xff] (%p13120_p3), %v983_v41  ;;  %v985_v42 = vld [vmem:[%s13354_s20 + $0x60] sm:$0xff] (%p13120_p3)  ;;  %v987_v43 = vld [vmem:[%s13354_s20 + $0x68] sm:$0xff] (%p13120_p3) }
  0x4f   : > { %v989_v44 = vld [vmem:[%s13354_s20 + $0x80] sm:$0xff]  ;;  %986 = vst [vmem:[%s13362_s26 + $0x30] sm:$0xff] %v985_v42  ;;  %988 = vst [vmem:[%s13362_s26 + $0x38] sm:$0xff] %v987_v43  ;;  %v991_v45 = vld [vmem:[%s13354_s20 + $0x88] sm:$0xff] }
  0x50   : > { %990 = vst [vmem:[%s13362_s26 + $0x40] sm:$0xff] %v989_v44  ;;  %v993_v46 = vld [vmem:[%s13354_s20 + $0xa0] sm:$0xff]  ;;  %v995_v47 = vld [vmem:[%s13354_s20 + $0xa8] sm:$0xff]  ;;  %992 = vst [vmem:[%s13362_s26 + $0x48] sm:$0xff] %v991_v45 }
  0x51   : > { %994 = vst [vmem:[%s13362_s26 + $0x50] sm:$0xff] %v993_v46  ;;  %996 = vst [vmem:[%s13362_s26 + $0x58] sm:$0xff] %v995_v47  ;;  %v997_v48 = vld [vmem:[%s13354_s20 + $0xc0] sm:$0xff]  ;;  %v999_v49 = vld [vmem:[%s13354_s20 + $0xc8] sm:$0xff] }
  0x52   : > { %v1001_v50 = vld [vmem:[%s13354_s20 + $0xe0] sm:$0xff]  ;;  %998 = vst [vmem:[%s13362_s26 + $0x60] sm:$0xff] %v997_v48  ;;  %1000 = vst [vmem:[%s13362_s26 + $0x68] sm:$0xff] %v999_v49  ;;  %v1003_v51 = vld [vmem:[%s13354_s20 + $0xe8] sm:$0xff] }
  0x53   : > { %1002 = vst [vmem:[%s13362_s26 + $0x70] sm:$0xff] %v1001_v50  ;;  %v1005_v52 = vld [vmem:[%s13354_s20 + $0x100] sm:$0xff]  ;;  %v1007_v53 = vld [vmem:[%s13354_s20 + $0x108] sm:$0xff]  ;;  %1004 = vst [vmem:[%s13362_s26 + $0x78] sm:$0xff] %v1003_v51 }
  0x54   : > { %1006 = vst [vmem:[%s13362_s26 + $0x80] sm:$0xff] %v1005_v52  ;;  %1008 = vst [vmem:[%s13362_s26 + $0x88] sm:$0xff] %v1007_v53  ;;  %v1009_v54 = vld [vmem:[%s13354_s20 + $0x120] sm:$0xff]  ;;  %v1011_v55 = vld [vmem:[%s13354_s20 + $0x128] sm:$0xff] }
  0x55   : > { %v1013_v56 = vld [vmem:[%s13354_s20 + $0x140] sm:$0xff]  ;;  %1010 = vst [vmem:[%s13362_s26 + $0x90] sm:$0xff] %v1009_v54  ;;  %1012 = vst [vmem:[%s13362_s26 + $0x98] sm:$0xff] %v1011_v55  ;;  %v1015_v57 = vld [vmem:[%s13354_s20 + $0x148] sm:$0xff] }
  0x56   : > { %1014 = vst [vmem:[%s13362_s26 + $0xa0] sm:$0xff] %v1013_v56  ;;  %v1017_v58 = vld [vmem:[%s13354_s20 + $0x160] sm:$0xff]  ;;  %v1019_v59 = vld [vmem:[%s13354_s20 + $0x168] sm:$0xff]  ;;  %1016 = vst [vmem:[%s13362_s26 + $0xa8] sm:$0xff] %v1015_v57 }
  0x57   : > { %1018 = vst [vmem:[%s13362_s26 + $0xb0] sm:$0xff] %v1017_v58  ;;  %1020 = vst [vmem:[%s13362_s26 + $0xb8] sm:$0xff] %v1019_v59  ;;  %v1021_v60 = vld [vmem:[%s13354_s20 + $0x180] sm:$0xff]  ;;  %v1023_v61 = vld [vmem:[%s13354_s20 + $0x188] sm:$0xff] }
  0x58   : > { %v1025_v62 = vld [vmem:[%s13354_s20 + $0x1a0] sm:$0xff]  ;;  %1022 = vst [vmem:[%s13362_s26 + $0xc0] sm:$0xff] %v1021_v60  ;;  %1024 = vst [vmem:[%s13362_s26 + $0xc8] sm:$0xff] %v1023_v61  ;;  %v1027_v63 = vld [vmem:[%s13354_s20 + $0x1a8] sm:$0xff] }
  0x59   : > { %1026 = vst [vmem:[%s13362_s26 + $0xd0] sm:$0xff] %v1025_v62  ;;  %v1029_v0 = vld [vmem:[%s13354_s20 + $0x1c0] sm:$0xff]  ;;  %v1031_v1 = vld [vmem:[%s13354_s20 + $0x1c8] sm:$0xff]  ;;  %1028 = vst [vmem:[%s13362_s26 + $0xd8] sm:$0xff] %v1027_v63 }
  0x5a   : > { %1030 = vst [vmem:[%s13362_s26 + $0xe0] sm:$0xff] %v1029_v0  ;;  %1032 = vst [vmem:[%s13362_s26 + $0xe8] sm:$0xff] %v1031_v1  ;;  %v1033_v2 = vld [vmem:[%s13354_s20 + $0x1e0] sm:$0xff]  ;;  %v1035_v3 = vld [vmem:[%s13354_s20 + $0x1e8] sm:$0xff] }
  0x5b   : > { %v1037_v4 = vld [vmem:[%s13354_s20 + $0x200] sm:$0xff]  ;;  %1034 = vst [vmem:[%s13362_s26 + $0xf0] sm:$0xff] %v1033_v2  ;;  %1036 = vst [vmem:[%s13362_s26 + $0xf8] sm:$0xff] %v1035_v3  ;;  %v1039_v5 = vld [vmem:[%s13354_s20 + $0x208] sm:$0xff] }
  0x5c   : > { %1038 = vst [vmem:[%s13362_s26 + $0x100] sm:$0xff] %v1037_v4  ;;  %v1041_v6 = vld [vmem:[%s13354_s20 + $0x220] sm:$0xff]  ;;  %v1043_v7 = vld [vmem:[%s13354_s20 + $0x228] sm:$0xff]  ;;  %1040 = vst [vmem:[%s13362_s26 + $0x108] sm:$0xff] %v1039_v5 }
  0x5d   : > { %1042 = vst [vmem:[%s13362_s26 + $0x110] sm:$0xff] %v1041_v6  ;;  %1044 = vst [vmem:[%s13362_s26 + $0x118] sm:$0xff] %v1043_v7  ;;  %v1045_v8 = vld [vmem:[%s13354_s20 + $0x240] sm:$0xff]  ;;  %v1047_v9 = vld [vmem:[%s13354_s20 + $0x248] sm:$0xff] }
  0x5e   : > { %v1049_v10 = vld [vmem:[%s13354_s20 + $0x260] sm:$0xff]  ;;  %1046 = vst [vmem:[%s13362_s26 + $0x120] sm:$0xff] %v1045_v8  ;;  %1048 = vst [vmem:[%s13362_s26 + $0x128] sm:$0xff] %v1047_v9  ;;  %v1051_v11 = vld [vmem:[%s13354_s20 + $0x268] sm:$0xff] }
  0x5f   : > { %1050 = vst [vmem:[%s13362_s26 + $0x130] sm:$0xff] %v1049_v10  ;;  %v1053_v12 = vld [vmem:[%s13354_s20 + $0x280] sm:$0xff]  ;;  %v1055_v13 = vld [vmem:[%s13354_s20 + $0x288] sm:$0xff]  ;;  %1052 = vst [vmem:[%s13362_s26 + $0x138] sm:$0xff] %v1051_v11 }
  0x60   : > { %1054 = vst [vmem:[%s13362_s26 + $0x140] sm:$0xff] %v1053_v12  ;;  %1056 = vst [vmem:[%s13362_s26 + $0x148] sm:$0xff] %v1055_v13  ;;  %v1057_v14 = vld [vmem:[%s13354_s20 + $0x2a0] sm:$0xff]  ;;  %v1059_v15 = vld [vmem:[%s13354_s20 + $0x2a8] sm:$0xff] }
  0x61   : > { %v1061_v16 = vld [vmem:[%s13354_s20 + $0x2c0] sm:$0xff]  ;;  %1058 = vst [vmem:[%s13362_s26 + $0x150] sm:$0xff] %v1057_v14  ;;  %1060 = vst [vmem:[%s13362_s26 + $0x158] sm:$0xff] %v1059_v15  ;;  %v1063_v17 = vld [vmem:[%s13354_s20 + $0x2c8] sm:$0xff] }
  0x62   : > { %1062 = vst [vmem:[%s13362_s26 + $0x160] sm:$0xff] %v1061_v16  ;;  %v1065_v18 = vld [vmem:[%s13354_s20 + $0x2e0] sm:$0xff]  ;;  %v1067_v19 = vld [vmem:[%s13354_s20 + $0x2e8] sm:$0xff]  ;;  %1064 = vst [vmem:[%s13362_s26 + $0x168] sm:$0xff] %v1063_v17 }
  0x63   : > { %1066 = vst [vmem:[%s13362_s26 + $0x170] sm:$0xff] %v1065_v18  ;;  %1068 = vst [vmem:[%s13362_s26 + $0x178] sm:$0xff] %v1067_v19  ;;  %v1069_v20 = vld [vmem:[%s13354_s20 + $0x300] sm:$0xff]  ;;  %v1071_v21 = vld [vmem:[%s13354_s20 + $0x308] sm:$0xff] }
  0x64   : > { %1070 = vst [vmem:[%s13362_s26 + $0x180] sm:$0xff] %v1069_v20  ;;  %1072 = vst [vmem:[%s13362_s26 + $0x188] sm:$0xff] %v1071_v21 }
  0x65 PF: > { %1078 = sbr.rel (!%p13120_p3) target bundleno = 130 (0x82), region = 166  ;;  %s1080_s27 = sand.u32 (%p13120_p3), 1, %s13018_s22  }
  0x66   : > { %s11573_s30 = sshll.u32 (%p13120_p3), %s13022_s23, 4  ;;  %s12360_s13 = smul.u32 (%p13120_p3), 400, %s1080_s27 }
  0x67   : > { %s13465_s16 = scalar_lea.vmem (%p13120_p3), %s17695_s3, %s11573_s30 }
  0x68   : > { %v1212_v22 = vld [vmem:[%s13465_s16] sm:$0xff] (%p13120_p3)  ;;  %v1214_v23 = vld [vmem:[%s13465_s16 + $0x8] sm:$0xff] (%p13120_p3)  ;;  %s13473_s29 = scalar_lea.vmem (%p13120_p3), [#allocation5], %s12360_s13 }
  0x69   : > { %v1216_v24 = vld [vmem:[%s13465_s16 + $0x20] sm:$0xff] (%p13120_p3)  ;;  %v1218_v25 = vld [vmem:[%s13465_s16 + $0x28] sm:$0xff] (%p13120_p3)  ;;  %1213 = vst [vmem:[%s13473_s29] sm:$0xff] (%p13120_p3), %v1212_v22  ;;  %1215 = vst [vmem:[%s13473_s29 + $0x8] sm:$0xff] (%p13120_p3), %v1214_v23 }
  0x6a   : > { %v1220_v26 = vld [vmem:[%s13465_s16 + $0x40] sm:$0xff] (%p13120_p3)  ;;  %v1222_v27 = vld [vmem:[%s13465_s16 + $0x48] sm:$0xff] (%p13120_p3)  ;;  %1217 = vst [vmem:[%s13473_s29 + $0x10] sm:$0xff] (%p13120_p3), %v1216_v24  ;;  %1219 = vst [vmem:[%s13473_s29 + $0x18] sm:$0xff] (%p13120_p3), %v1218_v25 }
  0x6b   : > { %1221 = vst [vmem:[%s13473_s29 + $0x20] sm:$0xff] (%p13120_p3), %v1220_v26  ;;  %1223 = vst [vmem:[%s13473_s29 + $0x28] sm:$0xff] (%p13120_p3), %v1222_v27  ;;  %v1224_v28 = vld [vmem:[%s13465_s16 + $0x60] sm:$0xff] (%p13120_p3)  ;;  %v1226_v29 = vld [vmem:[%s13465_s16 + $0x68] sm:$0xff] (%p13120_p3) }
  0x6c   : > { %v1228_v30 = vld [vmem:[%s13465_s16 + $0x80] sm:$0xff]  ;;  %1225 = vst [vmem:[%s13473_s29 + $0x30] sm:$0xff] %v1224_v28  ;;  %1227 = vst [vmem:[%s13473_s29 + $0x38] sm:$0xff] %v1226_v29  ;;  %v1230_v31 = vld [vmem:[%s13465_s16 + $0x88] sm:$0xff] }
  0x6d   : > { %1229 = vst [vmem:[%s13473_s29 + $0x40] sm:$0xff] %v1228_v30  ;;  %v1232_v32 = vld [vmem:[%s13465_s16 + $0xa0] sm:$0xff]  ;;  %v1234_v33 = vld [vmem:[%s13465_s16 + $0xa8] sm:$0xff]  ;;  %1231 = vst [vmem:[%s13473_s29 + $0x48] sm:$0xff] %v1230_v31 }
  0x6e   : > { %1233 = vst [vmem:[%s13473_s29 + $0x50] sm:$0xff] %v1232_v32  ;;  %1235 = vst [vmem:[%s13473_s29 + $0x58] sm:$0xff] %v1234_v33  ;;  %v1236_v34 = vld [vmem:[%s13465_s16 + $0xc0] sm:$0xff]  ;;  %v1238_v35 = vld [vmem:[%s13465_s16 + $0xc8] sm:$0xff] }
  0x6f   : > { %v1240_v36 = vld [vmem:[%s13465_s16 + $0xe0] sm:$0xff]  ;;  %1237 = vst [vmem:[%s13473_s29 + $0x60] sm:$0xff] %v1236_v34  ;;  %1239 = vst [vmem:[%s13473_s29 + $0x68] sm:$0xff] %v1238_v35  ;;  %v1242_v37 = vld [vmem:[%s13465_s16 + $0xe8] sm:$0xff] }
  0x70   : > { %1241 = vst [vmem:[%s13473_s29 + $0x70] sm:$0xff] %v1240_v36  ;;  %v1244_v38 = vld [vmem:[%s13465_s16 + $0x100] sm:$0xff]  ;;  %v1246_v39 = vld [vmem:[%s13465_s16 + $0x108] sm:$0xff]  ;;  %1243 = vst [vmem:[%s13473_s29 + $0x78] sm:$0xff] %v1242_v37 }
  0x71   : > { %1245 = vst [vmem:[%s13473_s29 + $0x80] sm:$0xff] %v1244_v38  ;;  %1247 = vst [vmem:[%s13473_s29 + $0x88] sm:$0xff] %v1246_v39  ;;  %v1248_v40 = vld [vmem:[%s13465_s16 + $0x120] sm:$0xff]  ;;  %v1250_v41 = vld [vmem:[%s13465_s16 + $0x128] sm:$0xff] }
  0x72   : > { %v1252_v42 = vld [vmem:[%s13465_s16 + $0x140] sm:$0xff]  ;;  %1249 = vst [vmem:[%s13473_s29 + $0x90] sm:$0xff] %v1248_v40  ;;  %1251 = vst [vmem:[%s13473_s29 + $0x98] sm:$0xff] %v1250_v41  ;;  %v1254_v43 = vld [vmem:[%s13465_s16 + $0x148] sm:$0xff] }
  0x73   : > { %1253 = vst [vmem:[%s13473_s29 + $0xa0] sm:$0xff] %v1252_v42  ;;  %v1256_v44 = vld [vmem:[%s13465_s16 + $0x160] sm:$0xff]  ;;  %v1258_v45 = vld [vmem:[%s13465_s16 + $0x168] sm:$0xff]  ;;  %1255 = vst [vmem:[%s13473_s29 + $0xa8] sm:$0xff] %v1254_v43 }
  0x74   : > { %1257 = vst [vmem:[%s13473_s29 + $0xb0] sm:$0xff] %v1256_v44  ;;  %1259 = vst [vmem:[%s13473_s29 + $0xb8] sm:$0xff] %v1258_v45  ;;  %v1260_v46 = vld [vmem:[%s13465_s16 + $0x180] sm:$0xff]  ;;  %v1262_v47 = vld [vmem:[%s13465_s16 + $0x188] sm:$0xff] }
  0x75   : > { %v1264_v48 = vld [vmem:[%s13465_s16 + $0x1a0] sm:$0xff]  ;;  %1261 = vst [vmem:[%s13473_s29 + $0xc0] sm:$0xff] %v1260_v46  ;;  %1263 = vst [vmem:[%s13473_s29 + $0xc8] sm:$0xff] %v1262_v47  ;;  %v1266_v49 = vld [vmem:[%s13465_s16 + $0x1a8] sm:$0xff] }
  0x76   : > { %1265 = vst [vmem:[%s13473_s29 + $0xd0] sm:$0xff] %v1264_v48  ;;  %v1268_v50 = vld [vmem:[%s13465_s16 + $0x1c0] sm:$0xff]  ;;  %v1270_v51 = vld [vmem:[%s13465_s16 + $0x1c8] sm:$0xff]  ;;  %1267 = vst [vmem:[%s13473_s29 + $0xd8] sm:$0xff] %v1266_v49 }
  0x77   : > { %1269 = vst [vmem:[%s13473_s29 + $0xe0] sm:$0xff] %v1268_v50  ;;  %1271 = vst [vmem:[%s13473_s29 + $0xe8] sm:$0xff] %v1270_v51  ;;  %v1272_v52 = vld [vmem:[%s13465_s16 + $0x1e0] sm:$0xff]  ;;  %v1274_v53 = vld [vmem:[%s13465_s16 + $0x1e8] sm:$0xff] }
  0x78   : > { %v1276_v54 = vld [vmem:[%s13465_s16 + $0x200] sm:$0xff]  ;;  %1273 = vst [vmem:[%s13473_s29 + $0xf0] sm:$0xff] %v1272_v52  ;;  %1275 = vst [vmem:[%s13473_s29 + $0xf8] sm:$0xff] %v1274_v53  ;;  %v1278_v55 = vld [vmem:[%s13465_s16 + $0x208] sm:$0xff] }
  0x79   : > { %1277 = vst [vmem:[%s13473_s29 + $0x100] sm:$0xff] %v1276_v54  ;;  %v1280_v56 = vld [vmem:[%s13465_s16 + $0x220] sm:$0xff]  ;;  %v1282_v57 = vld [vmem:[%s13465_s16 + $0x228] sm:$0xff]  ;;  %1279 = vst [vmem:[%s13473_s29 + $0x108] sm:$0xff] %v1278_v55 }
  0x7a   : > { %1281 = vst [vmem:[%s13473_s29 + $0x110] sm:$0xff] %v1280_v56  ;;  %1283 = vst [vmem:[%s13473_s29 + $0x118] sm:$0xff] %v1282_v57  ;;  %v1284_v58 = vld [vmem:[%s13465_s16 + $0x240] sm:$0xff]  ;;  %v1286_v59 = vld [vmem:[%s13465_s16 + $0x248] sm:$0xff] }
  0x7b   : > { %v1288_v60 = vld [vmem:[%s13465_s16 + $0x260] sm:$0xff]  ;;  %1285 = vst [vmem:[%s13473_s29 + $0x120] sm:$0xff] %v1284_v58  ;;  %1287 = vst [vmem:[%s13473_s29 + $0x128] sm:$0xff] %v1286_v59  ;;  %v1290_v61 = vld [vmem:[%s13465_s16 + $0x268] sm:$0xff] }
  0x7c   : > { %1289 = vst [vmem:[%s13473_s29 + $0x130] sm:$0xff] %v1288_v60  ;;  %v1292_v62 = vld [vmem:[%s13465_s16 + $0x280] sm:$0xff]  ;;  %v1294_v63 = vld [vmem:[%s13465_s16 + $0x288] sm:$0xff]  ;;  %1291 = vst [vmem:[%s13473_s29 + $0x138] sm:$0xff] %v1290_v61 }
  0x7d   : > { %1293 = vst [vmem:[%s13473_s29 + $0x140] sm:$0xff] %v1292_v62  ;;  %1295 = vst [vmem:[%s13473_s29 + $0x148] sm:$0xff] %v1294_v63  ;;  %v1296_v0 = vld [vmem:[%s13465_s16 + $0x2a0] sm:$0xff]  ;;  %v1298_v1 = vld [vmem:[%s13465_s16 + $0x2a8] sm:$0xff] }
  0x7e   : > { %v1300_v2 = vld [vmem:[%s13465_s16 + $0x2c0] sm:$0xff]  ;;  %1297 = vst [vmem:[%s13473_s29 + $0x150] sm:$0xff] %v1296_v0  ;;  %1299 = vst [vmem:[%s13473_s29 + $0x158] sm:$0xff] %v1298_v1  ;;  %v1302_v3 = vld [vmem:[%s13465_s16 + $0x2c8] sm:$0xff] }
  0x7f   : > { %1301 = vst [vmem:[%s13473_s29 + $0x160] sm:$0xff] %v1300_v2  ;;  %v1304_v4 = vld [vmem:[%s13465_s16 + $0x2e0] sm:$0xff]  ;;  %v1306_v5 = vld [vmem:[%s13465_s16 + $0x2e8] sm:$0xff]  ;;  %1303 = vst [vmem:[%s13473_s29 + $0x168] sm:$0xff] %v1302_v3 }
  0x80   : > { %1305 = vst [vmem:[%s13473_s29 + $0x170] sm:$0xff] %v1304_v4  ;;  %1307 = vst [vmem:[%s13473_s29 + $0x178] sm:$0xff] %v1306_v5  ;;  %v1308_v6 = vld [vmem:[%s13465_s16 + $0x300] sm:$0xff]  ;;  %v1310_v7 = vld [vmem:[%s13465_s16 + $0x308] sm:$0xff] }
  0x81   : > { %1309 = vst [vmem:[%s13473_s29 + $0x180] sm:$0xff] %v1308_v6  ;;  %1311 = vst [vmem:[%s13473_s29 + $0x188] sm:$0xff] %v1310_v7 }
  0x82 PF: > { %p10455_p5 = scmp.ge.s32.totalorder %s13022_s23, 1  ;;  %p1316_p6 = scmp.lt.s32.totalorder %s13022_s23, 3 }
  0x84   : > { %p1317_p7 = pnand %p10455_p5, %p1316_p6 }
  0x85   : > { %v13574_v8 = vld [vmem:[%s17696_s4] sm:$0xff] (!%p1317_p7)   ;;  %v13024_v9 = vmov (!%p1317_p7), 0   ;;  %v13583_v10 = vld [vmem:[%s17696_s4 + $0x8] sm:$0xff] (!%p1317_p7)   ;;  %s1323_s26 = sand.u32 (!%p1317_p7), 1, %s13014_s21   ;;  %v13593_v11 = vld [vmem:[%s17696_s4 + $0x10] sm:$0xff] (!%p1317_p7)   ;;  %vm1496_vm0 = vcmask (!%p1317_p7), 179200  }
  0x86   : > { %1320 = sbr.rel (%p1317_p7) target bundleno = 8441 (0x20f9), region = 204  ;;  %1504 = vmatprep.subr.bf16.mxu0 (!%p1317_p7), %v13024_v9  ;;  %1559 = vmatprep.subr.bf16.mxu1 (!%p1317_p7), %v13024_v9  ;;  %v13604_v12 = vld [vmem:[%s17696_s4 + $0x18] sm:$0xff] (!%p1317_p7)   ;;  %v13622_v15 = vld [vmem:[%s17696_s4 + $0x20] sm:$0xff] (!%p1317_p7)   ;;  %v13630_v16 = vld [vmem:[%s17696_s4 + $0x28] sm:$0xff] (!%p1317_p7)   ;;  %vm1500_vm1 = vcmask (!%p1317_p7), 1042432   ;;  %v13025_v45 = vmov (!%p1317_p7), 0.0  }
  0x87   : > { %1505 = vmatpush1.bf16.msra.mxu0 (!%p1317_p7), %v13574_v8  ;;  %1560 = vmatpush1.bf16.msra.mxu1 (!%p1317_p7), %v13574_v8  ;;  %s12361_s27 = smul.u32 (!%p1317_p7), 400, %s1323_s26  ;;  %v13639_v17 = vld [vmem:[%s17696_s4 + $0x30] sm:$0xff] (!%p1317_p7)   ;;  %v13648_v18 = vld [vmem:[%s17696_s4 + $0x38] sm:$0xff] (!%p1317_p7)   ;;  %v12398_v19 = vld [vmem:[%s17696_s4 + $0x48] ss:$0 sps:$4 sm:$0x77] (!%p1317_p7)  }
  0x88   : > { %1506 = vmatprep.subr.bf16.mxu0 (!%p1317_p7), %v13024_v9  ;;  %1561 = vmatprep.subr.bf16.mxu1 (!%p1317_p7), %v13024_v9  ;;  %v13662_v20 = vld [vmem:[%s17696_s4 + $0x40] sm:$0xff] (!%p1317_p7)   ;;  %v13666_v21 = vsel (!%p1317_p7), %vm1500_vm1, %v12398_v19, 0  ;;  %v13781_v34 = vld [vmem:[%s17696_s4 + $0x8] sm:$0xff] (!%p1317_p7)   ;;  %v13790_v35 = vld [vmem:[%s17696_s4 + $0x10] sm:$0xff] (!%p1317_p7)   ;;  %vm13026_vm2 = vmmov (!%p1317_p7), 0   ;;  %s10456_s19 = sshll.u32 (!%p1317_p7), %s10439_s24, 1 }
  0x89   : > { %s13597_s14 = scalar_lea.vmem (!%p1317_p7), [#allocation2], %s12361_s27  ;;  %s13609_s16 = scalar_lea.vmem (!%p1317_p7), [#allocation3], %s12361_s27  ;;  %v13799_v36 = vld [vmem:[%s17696_s4 + $0x18] sm:$0xff] (!%p1317_p7)   ;;  %v13809_v37 = vld [vmem:[%s17696_s4 + $0x20] sm:$0xff] (!%p1317_p7)   ;;  %v13817_v38 = vld [vmem:[%s17696_s4 + $0x28] sm:$0xff] (!%p1317_p7)  }
  0x8a   : > { %v12401_v13 = vld [vmem:[%s13597_s14 + $0x4] ss:$8 sps:$4 sm:$0xff] (!%p1317_p7)   ;;  %s13613_s29 = scalar_lea.vmem (!%p1317_p7), [#allocation4], %s12361_s27  ;;  %s13615_s17 = scalar_lea.vmem (!%p1317_p7), [#allocation5], %s12361_s27  ;;  %v12399_v22 = vld [vmem:[%s13597_s14] ss:$8 sps:$4 sm:$0xff] (!%p1317_p7)  }
  0x8b   : > { %1507 = vmatpush1.bf16.msra.mxu0 (!%p1317_p7), %v13583_v10  ;;  %1562 = vmatpush1.bf16.msra.mxu1 (!%p1317_p7), %v13583_v10  ;;  %v12404_v14 = vld [vmem:[%s13609_s16 + $0x4] ss:$8 sps:$4 sm:$0xff] (!%p1317_p7)   ;;  %v12402_v23 = vld [vmem:[%s13609_s16] ss:$8 sps:$4 sm:$0xff] (!%p1317_p7)   ;;  %v12411_v28 = vld [vmem:[%s13597_s14 + $0x14] ss:$8 sps:$4 sm:$0xff] (!%p1317_p7)  }
  0x8c   : > { %1508 = vmatprep.subr.bf16.mxu0 (!%p1317_p7), %v13024_v9  ;;  %1563 = vmatprep.subr.bf16.mxu1 (!%p1317_p7), %v13024_v9  ;;  %v12405_v24 = vld [vmem:[%s13613_s29 + $0x4] ss:$8 sps:$4 sm:$0xff] (!%p1317_p7)   ;;  %v12409_v26 = vld [vmem:[%s13613_s29] ss:$8 sps:$4 sm:$0xff] (!%p1317_p7)   ;;  %v12413_v29 = vld [vmem:[%s13609_s16 + $0x14] ss:$8 sps:$4 sm:$0xff] (!%p1317_p7)  }
  0x8d   : > { %10470 = vmatprep.mubr.msk.bf16.mxu0 %vm1496_vm0, %v12401_v13  ;;  %10473 = vmatprep.mubr.msk.bf16.mxu1 %vm1496_vm0, %v12404_v14  ;;  %v12407_v25 = vld [vmem:[%s13615_s17 + $0x4] ss:$8 sps:$4 sm:$0xff]   ;;  %v12410_v27 = vld [vmem:[%s13615_s17] ss:$8 sps:$4 sm:$0xff]   ;;  %v12415_v30 = vld [vmem:[%s13597_s14 + $0x10] ss:$8 sps:$4 sm:$0xff]  }
  0x8e   : > { %v12416_v31 = vld [vmem:[%s13609_s16 + $0x10] ss:$8 sps:$4 sm:$0xff]   ;;  %v12417_v32 = vld [vmem:[%s13613_s29 + $0x14] ss:$8 sps:$4 sm:$0xff]   ;;  %p1402_p8 = scmp.lt.s32.totalorder %s10456_s19, 3 }
  0x8f   : > { %1509 = vmatpush1.bf16.msra.mxu0 %v13593_v11  ;;  %1564 = vmatpush1.bf16.msra.mxu1 %v13593_v11  ;;  %v12419_v33 = vld [vmem:[%s13615_s17 + $0x14] ss:$8 sps:$4 sm:$0xff]   ;;  %v12421_v42 = vld [vmem:[%s13613_s29 + $0x10] ss:$8 sps:$4 sm:$0xff]  }
  0x90   : > { %1510 = vmatprep.subr.bf16.mxu0 %v13024_v9  ;;  %1565 = vmatprep.subr.bf16.mxu1 %v13024_v9  ;;  %v13826_v39 = vld [vmem:[%s17696_s4 + $0x30] sm:$0xff]   ;;  %v13835_v40 = vld [vmem:[%s17696_s4 + $0x38] sm:$0xff]   ;;  %v13844_v41 = vld [vmem:[%s17696_s4 + $0x40] sm:$0xff]   ;;  %s17710_s19 = smov (!%p1402_p8, %s10456_s19), 3 }
  0x91   : > { %v12422_v43 = vld [vmem:[%s13615_s17 + $0x10] ss:$8 sps:$4 sm:$0xff]   ;;  %s10457_s20 = sshll.u32 %s17710_s19, 3 }
  0x92   : > { %v12423_v44 = vld [vmem:[%s17698_s6] sm:$0xff]   ;;  %v12424_v46 = vld [vmem:[%s17698_s6 + $0x8] sm:$0xff]   ;;  %v12425_v47 = vld [vmem:[%s17698_s6 + $0x10] sm:$0xff]   ;;  %s1405_s30 = scalar_lea.vmem %s17704_s12, %s10457_s20 }
  0x93   : > { %1511 = vmatpush1.bf16.msra.mxu0 %v13604_v12  ;;  %1566 = vmatpush1.bf16.msra.mxu1 %v13604_v12  ;;  %v12426_v48 = vld [vmem:[%s17698_s6 + $0x18] sm:$0xff]   ;;  %v12427_v49 = vld [vmem:[%s17698_s6 + $0x20] sm:$0xff]   ;;  %v12428_v50 = vld [vmem:[%s17698_s6 + $0x28] sm:$0xff]  }
  0x94   : > { %1512 = vmatprep.subr.bf16.mxu0 %v13024_v9  ;;  %1567 = vmatprep.subr.bf16.mxu1 %v13024_v9  ;;  %v12429_v51 = vld [vmem:[%s17698_s6 + $0x30] sm:$0xff]   ;;  %v12430_v52 = vld [vmem:[%s17698_s6 + $0x38] sm:$0xff]   ;;  %v12431_v53 = vld [vmem:[%s17698_s6 + $0x40] sm:$0xff]  }
  0x95   : > { %v12432_v54 = vld [vmem:[%s17698_s6 + $0x48] sm:$0xff]   ;;  %v12433_v55 = vld [vmem:[%s17698_s6 + $0x50] sm:$0xff]   ;;  %v12434_v56 = vld [vmem:[%s17698_s6 + $0x58] sm:$0xff]  }
  0x96   : > { %v12435_v57 = vld [vmem:[%s17698_s6 + $0x60] sm:$0xff]   ;;  %v12436_v58 = vld [vmem:[%s17698_s6 + $0x68] sm:$0xff]   ;;  %v12437_v59 = vld [vmem:[%s17698_s6 + $0x70] sm:$0xff]  }
  0x97   : > { %1513 = vmatpush1.bf16.msra.mxu0 %v13622_v15  ;;  %1568 = vmatpush1.bf16.msra.mxu1 %v13622_v15  ;;  %v12438_v60 = vld [vmem:[%s17698_s6 + $0x78] sm:$0xff]   ;;  %v13927_v13 = vld [vmem:[%s17697_s5] ss:$0 sm:$0xff] }
  0x98   : > { %1514 = vmatprep.subr.bf16.mxu0 %v13024_v9  ;;  %1569 = vmatprep.subr.bf16.mxu1 %v13024_v9 }
  0x9b   : > { %1515 = vmatpush1.bf16.msra.mxu0 %v13630_v16  ;;  %1570 = vmatpush1.bf16.msra.mxu1 %v13630_v16 }
  0x9c   : > { %1516 = vmatprep.subr.bf16.mxu0 %v13024_v9  ;;  %1571 = vmatprep.subr.bf16.mxu1 %v13024_v9 }
  0x9f   : > { %1517 = vmatpush1.bf16.msra.mxu0 %v13639_v17  ;;  %1572 = vmatpush1.bf16.msra.mxu1 %v13639_v17 }
  0xa0   : > { %1518 = vmatprep.subr.bf16.mxu0 %v13024_v9  ;;  %1573 = vmatprep.subr.bf16.mxu1 %v13024_v9 }
  0xa3   : > { %1519 = vmatpush1.bf16.msra.mxu0 %v13648_v18  ;;  %1574 = vmatpush1.bf16.msra.mxu1 %v13648_v18 }
  0xa4   : > { %1520 = vmatprep.subr.bf16.mxu0 %v13024_v9  ;;  %1575 = vmatprep.subr.bf16.mxu1 %v13024_v9 }
  0xa7   : > { %1521 = vmatpush1.bf16.msra.mxu0 %v13662_v20  ;;  %1576 = vmatpush1.bf16.msra.mxu1 %v13662_v20 }
  0xa8   : > { %1522 = vmatprep.subr.bf16.mxu0 %v13024_v9  ;;  %1577 = vmatprep.subr.bf16.mxu1 %v13024_v9 }
  0xab   : > { %1523 = vmatpush1.bf16.msra.mxu0 %v13666_v21  ;;  %1578 = vmatpush1.bf16.msra.mxu1 %v13666_v21 }
  0xac   : > { %1616 = vmatprep.subr.bf16.mxu0 %v13024_v9  ;;  %1673 = vmatprep.subr.bf16.mxu1 %v13024_v9 }
  0xae   : > { %1537 = vmatmul.mubr.bf16.vlgmr.msra.gmra.mrb[0].mxu0 %v12399_v22  ;;  %1592 = vmatmul.mubr.bf16.vlgmr.msra.gmra.mrb[0].mxu1 %v12402_v23 }
  0xaf   : > { %1617 = vmatpush1.bf16.msra.mxu0 %v13574_v8  ;;  %1674 = vmatpush1.bf16.msra.mxu1 %v13574_v8 }
  0xb0   : > { %1618 = vmatprep.subr.bf16.mxu0 %v13024_v9  ;;  %1675 = vmatprep.subr.bf16.mxu1 %v13024_v9 }
  0xb1   : > { %10476 = vmatprep.mubr.msk.bf16.mxu0 %vm1496_vm0, %v12405_v24  ;;  %10479 = vmatprep.mubr.msk.bf16.mxu1 %vm1496_vm0, %v12407_v25 }
  0xb3   : > { %1619 = vmatpush1.bf16.msra.mxu0 %v13583_v10  ;;  %1676 = vmatpush1.bf16.msra.mxu1 %v13583_v10 }
  0xb4   : > { %1620 = vmatprep.subr.bf16.mxu0 %v13024_v9  ;;  %1677 = vmatprep.subr.bf16.mxu1 %v13024_v9 }
  0xb7   : > { %1621 = vmatpush1.bf16.msra.mxu0 %v13593_v11  ;;  %1678 = vmatpush1.bf16.msra.mxu1 %v13593_v11 }
  0xb8   : > { %1622 = vmatprep.subr.bf16.mxu0 %v13024_v9  ;;  %1679 = vmatprep.subr.bf16.mxu1 %v13024_v9 }
  0xbb   : > { %1623 = vmatpush1.bf16.msra.mxu0 %v13604_v12  ;;  %1680 = vmatpush1.bf16.msra.mxu1 %v13604_v12 }
  0xbc   : > { %1624 = vmatprep.subr.bf16.mxu0 %v13024_v9  ;;  %1681 = vmatprep.subr.bf16.mxu1 %v13024_v9 }
  0xbf   : > { %1625 = vmatpush1.bf16.msra.mxu0 %v13622_v15  ;;  %1682 = vmatpush1.bf16.msra.mxu1 %v13622_v15 }
  0xc0   : > { %1626 = vmatprep.subr.bf16.mxu0 %v13024_v9  ;;  %1683 = vmatprep.subr.bf16.mxu1 %v13024_v9 }
  0xc3   : > { %1627 = vmatpush1.bf16.msra.mxu0 %v13630_v16  ;;  %1684 = vmatpush1.bf16.msra.mxu1 %v13630_v16 }
  0xc4   : > { %1628 = vmatprep.subr.bf16.mxu0 %v13024_v9  ;;  %1685 = vmatprep.subr.bf16.mxu1 %v13024_v9 }
  0xc7   : > { %1629 = vmatpush1.bf16.msra.mxu0 %v13639_v17  ;;  %1686 = vmatpush1.bf16.msra.mxu1 %v13639_v17 }
  0xc8   : > { %1630 = vmatprep.subr.bf16.mxu0 %v13024_v9  ;;  %1687 = vmatprep.subr.bf16.mxu1 %v13024_v9 }
  0xcb   : > { %1631 = vmatpush1.bf16.msra.mxu0 %v13648_v18  ;;  %1688 = vmatpush1.bf16.msra.mxu1 %v13648_v18 }
  0xcc   : > { %1632 = vmatprep.subr.bf16.mxu0 %v13024_v9  ;;  %1689 = vmatprep.subr.bf16.mxu1 %v13024_v9 }
  0xcf   : > { %1633 = vmatpush1.bf16.msra.mxu0 %v13662_v20  ;;  %1690 = vmatpush1.bf16.msra.mxu1 %v13662_v20 }
  0xd0   : > { %1634 = vmatprep.subr.bf16.mxu0 %v13024_v9  ;;  %1691 = vmatprep.subr.bf16.mxu1 %v13024_v9 }
  0xd3   : > { %1635 = vmatpush1.bf16.msra.mxu0 %v13666_v21  ;;  %1692 = vmatpush1.bf16.msra.mxu1 %v13666_v21 }
  0xd4   : > { %1758 = vmatprep.subr.bf16.mxu0 %v13024_v9  ;;  %1814 = vmatprep.subr.bf16.mxu1 %v13024_v9 }
  0xd6   : > { %1649 = vmatmul.mubr.bf16.vlgmr.msra.gmra.mrb[4].mxu0 %v12409_v26  ;;  %1706 = vmatmul.mubr.bf16.vlgmr.msra.gmra.mrb[4].mxu1 %v12410_v27  ;;  %v12441_v26 = vld [vmem:[%s13609_s16 + $0x24] ss:$8 sps:$4 sm:$0xff]  }
  0xd7   : > { %1759 = vmatpush1.bf16.msra.mxu0 %v13574_v8  ;;  %1815 = vmatpush1.bf16.msra.mxu1 %v13574_v8 }
  0xd8   : > { %1760 = vmatprep.subr.bf16.mxu0 %v13024_v9  ;;  %1816 = vmatprep.subr.bf16.mxu1 %v13024_v9 }
  0xd9   : > { %10485 = vmatprep.mubr.msk.bf16.mxu0 %vm1496_vm0, %v12411_v28  ;;  %10490 = vmatprep.mubr.msk.bf16.mxu1 %vm1496_vm0, %v12413_v29  ;;  %v13935_v28 = vld [vmem:[%s17696_s4] sm:$0xff]  }
  0xdb   : > { %1761 = vmatpush1.bf16.msra.mxu0 %v13583_v10  ;;  %1817 = vmatpush1.bf16.msra.mxu1 %v13583_v10 }
  0xdc   : > { %1762 = vmatprep.subr.bf16.mxu0 %v13024_v9  ;;  %1818 = vmatprep.subr.bf16.mxu1 %v13024_v9 }
  0xdf   : > { %1763 = vmatpush1.bf16.msra.mxu0 %v13593_v11  ;;  %1819 = vmatpush1.bf16.msra.mxu1 %v13593_v11 }
  0xe0   : > { %1764 = vmatprep.subr.bf16.mxu0 %v13024_v9  ;;  %1820 = vmatprep.subr.bf16.mxu1 %v13024_v9 }
  0xe3   : > { %1765 = vmatpush1.bf16.msra.mxu0 %v13604_v12  ;;  %1821 = vmatpush1.bf16.msra.mxu1 %v13604_v12 }
  0xe4   : > { %1766 = vmatprep.subr.bf16.mxu0 %v13024_v9  ;;  %1822 = vmatprep.subr.bf16.mxu1 %v13024_v9 }
  0xe7   : > { %1767 = vmatpush1.bf16.msra.mxu0 %v13622_v15  ;;  %1823 = vmatpush1.bf16.msra.mxu1 %v13622_v15 }
  0xe8   : > { %1768 = vmatprep.subr.bf16.mxu0 %v13024_v9  ;;  %1824 = vmatprep.subr.bf16.mxu1 %v13024_v9 }
  0xeb   : > { %1769 = vmatpush1.bf16.msra.mxu0 %v13630_v16  ;;  %1825 = vmatpush1.bf16.msra.mxu1 %v13630_v16 }
  0xec   : > { %1770 = vmatprep.subr.bf16.mxu0 %v13024_v9  ;;  %1826 = vmatprep.subr.bf16.mxu1 %v13024_v9 }
  0xef   : > { %1771 = vmatpush1.bf16.msra.mxu0 %v13639_v17  ;;  %1827 = vmatpush1.bf16.msra.mxu1 %v13639_v17 }
  0xf0   : > { %1772 = vmatprep.subr.bf16.mxu0 %v13024_v9  ;;  %1828 = vmatprep.subr.bf16.mxu1 %v13024_v9 }
  0xf3   : > { %1773 = vmatpush1.bf16.msra.mxu0 %v13648_v18  ;;  %1829 = vmatpush1.bf16.msra.mxu1 %v13648_v18 }
  0xf4   : > { %1774 = vmatprep.subr.bf16.mxu0 %v13024_v9  ;;  %1830 = vmatprep.subr.bf16.mxu1 %v13024_v9 }
  0xf7   : > { %1775 = vmatpush1.bf16.msra.mxu0 %v13662_v20  ;;  %1831 = vmatpush1.bf16.msra.mxu1 %v13662_v20 }
  0xf8   : > { %1776 = vmatprep.subr.bf16.mxu0 %v13024_v9  ;;  %1832 = vmatprep.subr.bf16.mxu1 %v13024_v9 }
  0xfb   : > { %1777 = vmatpush1.bf16.msra.mxu0 %v13666_v21  ;;  %1833 = vmatpush1.bf16.msra.mxu1 %v13666_v21 }
  0xfc   : > { %1872 = vmatprep.subr.bf16.mxu0 %v13024_v9  ;;  %1930 = vmatprep.subr.bf16.mxu1 %v13024_v9 }
  0xfe   : > { %1791 = vmatmul.mubr.bf16.vlgmr.msra.gmra.mrb[8].mxu0 %v12415_v30  ;;  %1847 = vmatmul.mubr.bf16.vlgmr.msra.gmra.mrb[8].mxu1 %v12416_v31 }
  0xff   : > { %1873 = vmatpush1.bf16.msra.mxu0 %v13574_v8  ;;  %1931 = vmatpush1.bf16.msra.mxu1 %v13574_v8 }
 0x100   : > { %1874 = vmatprep.subr.bf16.mxu0 %v13024_v9  ;;  %1932 = vmatprep.subr.bf16.mxu1 %v13024_v9 }
 0x101   : > { %10495 = vmatprep.mubr.msk.bf16.mxu0 %vm1496_vm0, %v12417_v32  ;;  %10500 = vmatprep.mubr.msk.bf16.mxu1 %vm1496_vm0, %v12419_v33 }
 0x103   : > { %1875 = vmatpush1.bf16.msra.mxu0 %v13781_v34  ;;  %1933 = vmatpush1.bf16.msra.mxu1 %v13781_v34 }
 0x104   : > { %1876 = vmatprep.subr.bf16.mxu0 %v13024_v9  ;;  %1934 = vmatprep.subr.bf16.mxu1 %v13024_v9 }
 0x107   : > { %1877 = vmatpush1.bf16.msra.mxu0 %v13790_v35  ;;  %1935 = vmatpush1.bf16.msra.mxu1 %v13790_v35 }
 0x108   : > { %1878 = vmatprep.subr.bf16.mxu0 %v13024_v9  ;;  %1936 = vmatprep.subr.bf16.mxu1 %v13024_v9 }
 0x10b   : > { %1879 = vmatpush1.bf16.msra.mxu0 %v13799_v36  ;;  %1937 = vmatpush1.bf16.msra.mxu1 %v13799_v36 }
 0x10c   : > { %1880 = vmatprep.subr.bf16.mxu0 %v13024_v9  ;;  %1938 = vmatprep.subr.bf16.mxu1 %v13024_v9 }
 0x10f   : > { %1881 = vmatpush1.bf16.msra.mxu0 %v13622_v15  ;;  %1939 = vmatpush1.bf16.msra.mxu1 %v13809_v37 }
 0x110   : > { %1882 = vmatprep.subr.bf16.mxu0 %v13024_v9  ;;  %1940 = vmatprep.subr.bf16.mxu1 %v13024_v9 }
 0x113   : > { %1883 = vmatpush1.bf16.msra.mxu0 %v13817_v38  ;;  %1941 = vmatpush1.bf16.msra.mxu1 %v13817_v38 }
 0x114   : > { %1884 = vmatprep.subr.bf16.mxu0 %v13024_v9  ;;  %1942 = vmatprep.subr.bf16.mxu1 %v13024_v9 }
 0x117   : > { %1885 = vmatpush1.bf16.msra.mxu0 %v13826_v39  ;;  %1943 = vmatpush1.bf16.msra.mxu1 %v13826_v39 }
 0x118   : > { %1886 = vmatprep.subr.bf16.mxu0 %v13024_v9  ;;  %1944 = vmatprep.subr.bf16.mxu1 %v13024_v9 }
 0x11b   : > { %1887 = vmatpush1.bf16.msra.mxu0 %v13835_v40  ;;  %1945 = vmatpush1.bf16.msra.mxu1 %v13835_v40 }
 0x11c   : > { %1888 = vmatprep.subr.bf16.mxu0 %v13024_v9  ;;  %1946 = vmatprep.subr.bf16.mxu1 %v13024_v9 }
 0x11f   : > { %1889 = vmatpush1.bf16.msra.mxu0 %v13844_v41  ;;  %1947 = vmatpush1.bf16.msra.mxu1 %v13844_v41 }
 0x120   : > { %1890 = vmatprep.subr.bf16.mxu0 %v13024_v9  ;;  %1948 = vmatprep.subr.bf16.mxu1 %v13024_v9 }
 0x123   : > { %1891 = vmatpush1.bf16.msra.mxu0 %v13666_v21  ;;  %1949 = vmatpush1.bf16.msra.mxu1 %v13666_v21 }
 0x124   : > { %11837 = vmatprep.subr.bf16.mxu1 %v13025_v45  ;;  %11817 = vmatprep.subr.bf16.mxu0 %v13025_v45 }
 0x126   : > { %1905 = vmatmul.mubr.bf16.vlgmr.msra.gmra.mrb[12].mxu0 %v12421_v42  ;;  %1963 = vmatmul.mubr.bf16.vlgmr.msra.gmra.mrb[12].mxu1 %v12422_v43 }
 0x127   : > { %11838 = vmatpush3.bf16.msra.mxu1 %v12423_v44  ;;  %11853 = vmatprep.mubr.msk.bf16.mxu1 %vm13026_vm2, %v13025_v45 }
 0x128   : > { %11839 = vmatprep.subr.bf16.mxu1 %v13025_v45  ;;  %11833 = vmatprep.mubr.msk.bf16.mxu0 %vm13026_vm2, %v13025_v45 }
 0x129   : > { %11818 = vmatpush3.bf16.msra.mxu0 %v12431_v53 }
 0x12a   : > { %11819 = vmatprep.subr.bf16.mxu0 %v13025_v45 }
 0x12b   : > { %11840 = vmatpush3.bf16.msra.mxu1 %v12424_v46 }
 0x12c   : > { %11841 = vmatprep.subr.bf16.mxu1 %v13025_v45 }
 0x12d   : > { %11820 = vmatpush3.bf16.msra.mxu0 %v12432_v54 }
 0x12e   : > { %11821 = vmatprep.subr.bf16.mxu0 %v13025_v45 }
 0x12f   : > { %11842 = vmatpush3.bf16.msra.mxu1 %v12425_v47 }
 0x130   : > { %11843 = vmatprep.subr.bf16.mxu1 %v13025_v45 }
 0x131   : > { %11822 = vmatpush3.bf16.msra.mxu0 %v12433_v55 }
 0x132   : > { %11823 = vmatprep.subr.bf16.mxu0 %v13025_v45 }
 0x133   : > { %11844 = vmatpush3.bf16.msra.mxu1 %v12426_v48  ;;  %v12444_v48 = vld [vmem:[%s13609_s16 + $0x20] ss:$8 sps:$4 sm:$0xff]  }
 0x134   : > { %11845 = vmatprep.subr.bf16.mxu1 %v13025_v45 }
 0x135   : > { %11824 = vmatpush3.bf16.msra.mxu0 %v12434_v56 }
 0x136   : > { %11825 = vmatprep.subr.bf16.mxu0 %v13025_v45 }
 0x137   : > { %11846 = vmatpush3.bf16.msra.mxu1 %v12427_v49  ;;  %v12445_v49 = vld [vmem:[%s13615_s17 + $0x24] ss:$8 sps:$4 sm:$0xff]  }
 0x138   : > { %11847 = vmatprep.subr.bf16.mxu1 %v13025_v45 }
 0x139   : > { %11826 = vmatpush3.bf16.msra.mxu0 %v12435_v57 }
 0x13a   : > { %11827 = vmatprep.subr.bf16.mxu0 %v13025_v45 }
 0x13b   : > { %11848 = vmatpush3.bf16.msra.mxu1 %v12428_v50 }
 0x13c   : > { %11849 = vmatprep.subr.bf16.mxu1 %v13025_v45 }
 0x13d   : > { %11828 = vmatpush3.bf16.msra.mxu0 %v12436_v58 }
 0x13e   : > { %11829 = vmatprep.subr.bf16.mxu0 %v13025_v45 }
 0x13f   : > { %11850 = vmatpush3.bf16.msra.mxu1 %v12429_v51 }
 0x140   : > { %11851 = vmatprep.subr.bf16.mxu1 %v13025_v45 }
 0x141   : > { %11830 = vmatpush3.bf16.msra.mxu0 %v12437_v59 }
 0x142   : > { %11831 = vmatprep.subr.bf16.mxu0 %v13025_v45 }
 0x143   : > { %11852 = vmatpush3.bf16.msra.mxu1 %v12430_v52 }
 0x144   : > { %2244 = vmatprep.subr.bf16.mxu1 %v13024_v9 }
 0x145   : > { %11832 = vmatpush3.bf16.msra.mxu0 %v12438_v60 }
 0x146   : > { %2188 = vmatprep.subr.bf16.mxu0 %v13024_v9 }
 0x181   : > { %v1538_v61 = vpop.f32.mrb[0].mxu0  ;;  %v1593_v62 = vpop.f32.mrb[0].mxu1 }
 0x182   : > { %v1600_v63 = vmax.f32 %v1538_v61, %v1593_v62  ;;  %v1540_v0 = vpop.f32.mrb[1].mxu0  ;;  %v1595_v1 = vpop.f32.mrb[1].mxu1 }
 0x183   : > { %v1541_v2 = vpop.f32.mrb[2].mxu0  ;;  %v1596_v3 = vpop.f32.mrb[2].mxu1 }
 0x184   : > { %v1601_v4 = vmax.f32 %v1541_v2, %v1596_v3  ;;  %v1543_v5 = vpop.f32.mrb[3].mxu0  ;;  %v1598_v6 = vpop.f32.mrb[3].mxu1  ;;  %v12449_v2 = vld [vmem:[%s13615_s17 + $0x20] ss:$8 sps:$4 sm:$0xff]   ;;  %v12439_v3 = vld [vmem:[%s13597_s14 + $0x24] ss:$8 sps:$4 sm:$0xff]  }
 0x185   : > { %v14041_v5 = vld [vmem:[%s17696_s4 + $0x10] sm:$0xff]   ;;  %v14048_v6 = vld [vmem:[%s17696_s4 + $0x18] sm:$0xff]  }
 0x1a9   : > { %v1650_v7 = vpop.f32.mrb[4].mxu0  ;;  %v1707_v8 = vpop.f32.mrb[4].mxu1 }
 0x1aa   : > { %v1657_v10 = vmax.f32 %v1600_v63, %v1650_v7  ;;  %v1652_v11 = vpop.f32.mrb[5].mxu0  ;;  %v1709_v12 = vpop.f32.mrb[5].mxu1  ;;  %v12450_v7 = vld [vmem:[%s13613_s29 + $0x20] ss:$8 sps:$4 sm:$0xff]  }
 0x1ab   : > { %v1653_v14 = vpop.f32.mrb[6].mxu0  ;;  %v1710_v15 = vpop.f32.mrb[6].mxu1  ;;  %v12454_v11 = vld [vmem:[%s17698_s6 + $0x98] sm:$0xff]   ;;  %v12455_v12 = vld [vmem:[%s17698_s6 + $0xa0] sm:$0xff]  }
 0x1ac   : > { %v1714_v16 = vmax.f32 %v1657_v10, %v1707_v8  ;;  %v1658_v17 = vmax.f32 %v1601_v4, %v1653_v14  ;;  %v1655_v18 = vpop.f32.mrb[7].mxu0  ;;  %v1712_v19 = vpop.f32.mrb[7].mxu1  ;;  %v12456_v14 = vld [vmem:[%s17698_s6 + $0xa8] sm:$0xff]  }
 0x1ae   : > { %v1722_v20 = vadd.f32 %v13927_v13, %v1714_v16  ;;  %v1715_v22 = vmax.f32 %v1658_v17, %v1710_v15  ;;  %v12457_v15 = vld [vmem:[%s17698_s6 + $0xb0] sm:$0xff]   ;;  %v12458_v16 = vld [vmem:[%s17698_s6 + $0xb8] sm:$0xff]  }
 0x1b0   : > { %v1723_v23 = vadd.f32 %v13927_v13, %v1715_v22  ;;  %v1724_v24 = vmax.f32 %v1722_v20, 0.0  ;;  %v12459_v22 = vld [vmem:[%s13597_s14 + $0x34] ss:$8 sps:$4 sm:$0xff]  }
 0x1b2   : > { %v1725_v25 = vmax.f32 %v1723_v23, 0.0  ;;  %v12461_v23 = vld [vmem:[%s13597_s14 + $0x30] ss:$8 sps:$4 sm:$0xff]  }
 0x1b4   : > { %v1726_v27 = vpack.c.bf16 %v1725_v25, %v1724_v24  ;;  %v14113_v24 = vld [vmem:[%s17696_s4 + $0x20] sm:$0xff]   ;;  %v14120_v25 = vld [vmem:[%s17696_s4 + $0x28] sm:$0xff]  }
 0x1b6   : > { %11854 = vmatmul.mubr.bf16.vlgmr.msra.gmra.mrb[16].mxu1 %v1726_v27  ;;  %v14134_v27 = vld [vmem:[%s17696_s4 + $0x38] sm:$0xff]  }
 0x1b7   : > { %2245 = vmatpush1.bf16.msra.mxu1 %v13935_v28  ;;  %10542 = vmatprep.mubr.msk.bf16.mxu1 %vm1496_vm0, %v12441_v26  ;;  %v14127_v26 = vld [vmem:[%s17696_s4 + $0x30] sm:$0xff]  }
 0x1b8   : > { %2246 = vmatprep.subr.bf16.mxu1 %v13024_v9 }
 0x1bb   : > { %2247 = vmatpush1.bf16.msra.mxu1 %v13781_v34 }
 0x1bc   : > { %2248 = vmatprep.subr.bf16.mxu1 %v13024_v9 }
 0x1bf   : > { %2249 = vmatpush1.bf16.msra.mxu1 %v13790_v35 }
 0x1c0   : > { %2250 = vmatprep.subr.bf16.mxu1 %v13024_v9 }
 0x1c3   : > { %2251 = vmatpush1.bf16.msra.mxu1 %v13799_v36 }
 0x1c4   : > { %2252 = vmatprep.subr.bf16.mxu1 %v13024_v9 }
 0x1c7   : > { %2253 = vmatpush1.bf16.msra.mxu1 %v13809_v37 }
 0x1c8   : > { %2254 = vmatprep.subr.bf16.mxu1 %v13024_v9 }
 0x1cb   : > { %2255 = vmatpush1.bf16.msra.mxu1 %v13817_v38 }
 0x1cc   : > { %2256 = vmatprep.subr.bf16.mxu1 %v13024_v9 }
 0x1cf   : > { %2257 = vmatpush1.bf16.msra.mxu1 %v13826_v39 }
 0x1d0   : > { %2258 = vmatprep.subr.bf16.mxu1 %v13024_v9 }
 0x1d1   : > { %v1792_v29 = vpop.f32.mrb[8].mxu0  ;;  %v1848_v30 = vpop.f32.mrb[8].mxu1 }
 0x1d2   : > { %v1855_v31 = vmax.f32 %v1792_v29, %v1848_v30  ;;  %v1794_v32 = vpop.f32.mrb[9].mxu0  ;;  %v1850_v33 = vpop.f32.mrb[9].mxu1 }
 0x1d3   : > { %v1795_v42 = vpop.f32.mrb[10].mxu0  ;;  %v1851_v43 = vpop.f32.mrb[10].mxu1  ;;  %2259 = vmatpush1.bf16.msra.mxu1 %v13835_v40 }
 0x1d4   : > { %v1856_v44 = vmax.f32 %v1795_v42, %v1851_v43  ;;  %v1797_v46 = vpop.f32.mrb[11].mxu0  ;;  %v1853_v47 = vpop.f32.mrb[11].mxu1  ;;  %2260 = vmatprep.subr.bf16.mxu1 %v13024_v9  ;;  %v14143_v42 = vld [vmem:[%s17696_s4 + $0x40] sm:$0xff]  }
 0x1d7   : > { %2261 = vmatpush1.bf16.msra.mxu1 %v13844_v41 }
 0x1d8   : > { %2262 = vmatprep.subr.bf16.mxu1 %v13024_v9 }
 0x1db   : > { %2263 = vmatpush1.bf16.msra.mxu1 %v13666_v21 }
 0x1dc   : > { %2360 = vmatprep.subr.bf16.mxu1 %v13024_v9 }
 0x1de   : > { %2277 = vmatmul.mubr.bf16.vlgmr.msra.gmra.mrb[20].mxu1 %v12444_v48 }
 0x1df   : > { %2361 = vmatpush1.bf16.msra.mxu1 %v13935_v28  ;;  %10552 = vmatprep.mubr.msk.bf16.mxu1 %vm1496_vm0, %v12445_v49  ;;  %v12465_v49 = vld [vmem:[%s13613_s29 + $0x34] ss:$8 sps:$4 sm:$0xff]  }
 0x1e0   : > { %2362 = vmatprep.subr.bf16.mxu1 %v13024_v9 }
 0x1e3   : > { %2363 = vmatpush1.bf16.msra.mxu1 %v13781_v34 }
 0x1e4   : > { %2364 = vmatprep.subr.bf16.mxu1 %v13024_v9 }
 0x1e7   : > { %2365 = vmatpush1.bf16.msra.mxu1 %v13790_v35 }
 0x1e8   : > { %2366 = vmatprep.subr.bf16.mxu1 %v13024_v9 }
 0x1eb   : > { %2367 = vmatpush1.bf16.msra.mxu1 %v13799_v36 }
 0x1ec   : > { %2368 = vmatprep.subr.bf16.mxu1 %v13024_v9 }
 0x1ef   : > { %2369 = vmatpush1.bf16.msra.mxu1 %v13809_v37 }
 0x1f0   : > { %2370 = vmatprep.subr.bf16.mxu1 %v13024_v9 }
 0x1f3   : > { %2371 = vmatpush1.bf16.msra.mxu1 %v13817_v38 }
 0x1f4   : > { %2372 = vmatprep.subr.bf16.mxu1 %v13024_v9 }
 0x1f7   : > { %2373 = vmatpush1.bf16.msra.mxu1 %v13826_v39 }
 0x1f8   : > { %2374 = vmatprep.subr.bf16.mxu1 %v13024_v9 }
 0x1f9   : > { %v1906_v50 = vpop.f32.mrb[12].mxu0  ;;  %v1964_v51 = vpop.f32.mrb[12].mxu1 }
 0x1fa   : > { %v1913_v52 = vmax.f32 %v1855_v31, %v1906_v50  ;;  %v1908_v53 = vpop.f32.mrb[13].mxu0  ;;  %v1966_v54 = vpop.f32.mrb[13].mxu1  ;;  %v12467_v50 = vld [vmem:[%s13613_s29 + $0x30] ss:$8 sps:$4 sm:$0xff]  }
 0x1fb   : > { %v1909_v55 = vpop.f32.mrb[14].mxu0  ;;  %v1967_v56 = vpop.f32.mrb[14].mxu1  ;;  %2375 = vmatpush1.bf16.msra.mxu1 %v13835_v40 }
 0x1fc   : > { %v1971_v57 = vmax.f32 %v1913_v52, %v1964_v51  ;;  %v1914_v58 = vmax.f32 %v1856_v44, %v1909_v55  ;;  %v1911_v59 = vpop.f32.mrb[15].mxu0  ;;  %v1969_v60 = vpop.f32.mrb[15].mxu1  ;;  %2376 = vmatprep.subr.bf16.mxu1 %v13024_v9 }
 0x1fe   : > { %v1973_v61 = vadd.f32 %v13927_v13, %v1971_v57  ;;  %v1972_v62 = vmax.f32 %v1914_v58, %v1967_v56 }
 0x1ff   : > { %2377 = vmatpush1.bf16.msra.mxu1 %v13844_v41 }
 0x200   : > { %v1974_v63 = vadd.f32 %v13927_v13, %v1972_v62  ;;  %2378 = vmatprep.subr.bf16.mxu1 %v13024_v9  ;;  %v1975_v0 = vmax.f32 %v1973_v61, 0.0 }
 0x202   : > { %v1976_v1 = vmax.f32 %v1974_v63, 0.0 }
 0x203   : > { %2379 = vmatpush1.bf16.msra.mxu1 %v13666_v21 }
 0x204   : > { %v1977_v4 = vpack.c.bf16 %v1976_v1, %v1975_v0  ;;  %2531 = vmatprep.subr.bf16.mxu1 %v13024_v9 }
 0x206   : > { %11834 = vmatmul.mubr.bf16.vlgmr.msra.gmra.mrb[16].mxu0 %v1977_v4  ;;  %2393 = vmatmul.mubr.bf16.vlgmr.msra.gmra.mrb[24].mxu1 %v12449_v2 }
 0x207   : > { %2189 = vmatpush1.bf16.msra.mxu0 %v13935_v28  ;;  %10537 = vmatprep.mubr.msk.bf16.mxu0 %vm1496_vm0, %v12439_v3 }
 0x208   : > { %2190 = vmatprep.subr.bf16.mxu0 %v13024_v9  ;;  %2532 = vmatpush1.bf16.msra.mxu1 %v13935_v28 }
 0x209   : > { %2533 = vmatprep.subr.bf16.mxu1 %v13024_v9  ;;  %10581 = vmatprep.mubr.msk.bf16.mxu1 %vm1496_vm0, %v12459_v22  ;;  %v12477_v22 = vld [vmem:[%s17698_s6 + $0xf0] sm:$0xff]  }
 0x20b   : > { %2191 = vmatpush1.bf16.msra.mxu0 %v13781_v34 }
 0x20c   : > { %2192 = vmatprep.subr.bf16.mxu0 %v13024_v9  ;;  %2534 = vmatpush1.bf16.msra.mxu1 %v13781_v34  ;;  %v12443_v34 = vld [vmem:[%s13597_s14 + $0x20] ss:$8 sps:$4 sm:$0xff]  }
 0x20d   : > { %2535 = vmatprep.subr.bf16.mxu1 %v13024_v9 }
 0x20f   : > { %2193 = vmatpush1.bf16.msra.mxu0 %v13790_v35 }
 0x210   : > { %2194 = vmatprep.subr.bf16.mxu0 %v13024_v9  ;;  %2536 = vmatpush1.bf16.msra.mxu1 %v13790_v35  ;;  %v12447_v35 = vld [vmem:[%s13613_s29 + $0x24] ss:$8 sps:$4 sm:$0xff]  }
 0x211   : > { %2537 = vmatprep.subr.bf16.mxu1 %v13024_v9 }
 0x213   : > { %2195 = vmatpush1.bf16.msra.mxu0 %v13799_v36 }
 0x214   : > { %2196 = vmatprep.subr.bf16.mxu0 %v13024_v9  ;;  %2538 = vmatpush1.bf16.msra.mxu1 %v13799_v36  ;;  %v14034_v36 = vld [vmem:[%s17696_s4 + $0x8] sm:$0xff]  }
 0x215   : > { %2539 = vmatprep.subr.bf16.mxu1 %v13024_v9 }
 0x217   : > { %2197 = vmatpush1.bf16.msra.mxu0 %v13809_v37 }
 0x218   : > { %2198 = vmatprep.subr.bf16.mxu0 %v13024_v9  ;;  %2540 = vmatpush1.bf16.msra.mxu1 %v13809_v37 }
 0x219   : > { %2541 = vmatprep.subr.bf16.mxu1 %v13024_v9 }
 0x21b   : > { %2199 = vmatpush1.bf16.msra.mxu0 %v13817_v38 }
 0x21c   : > { %2200 = vmatprep.subr.bf16.mxu0 %v13024_v9  ;;  %2542 = vmatpush1.bf16.msra.mxu1 %v13817_v38 }
 0x21d   : > { %2543 = vmatprep.subr.bf16.mxu1 %v13024_v9 }
 0x21f   : > { %2201 = vmatpush1.bf16.msra.mxu0 %v13826_v39 }
 0x220   : > { %2202 = vmatprep.subr.bf16.mxu0 %v13024_v9  ;;  %2544 = vmatpush1.bf16.msra.mxu1 %v13826_v39 }
 0x221   : > { %2545 = vmatprep.subr.bf16.mxu1 %v13024_v9 }
 0x223   : > { %2203 = vmatpush1.bf16.msra.mxu0 %v13835_v40 }
 0x224   : > { %2204 = vmatprep.subr.bf16.mxu0 %v13024_v9  ;;  %2546 = vmatpush1.bf16.msra.mxu1 %v13835_v40 }
 0x225   : > { %2547 = vmatprep.subr.bf16.mxu1 %v13024_v9 }
 0x227   : > { %2205 = vmatpush1.bf16.msra.mxu0 %v13844_v41 }
 0x228   : > { %2206 = vmatprep.subr.bf16.mxu0 %v13024_v9  ;;  %2548 = vmatpush1.bf16.msra.mxu1 %v13844_v41 }
 0x229   : > { %2549 = vmatprep.subr.bf16.mxu1 %v13024_v9 }
 0x22b   : > { %2207 = vmatpush1.bf16.msra.mxu0 %v13666_v21 }
 0x22c   : > { %2302 = vmatprep.subr.bf16.mxu0 %v13024_v9  ;;  %2550 = vmatpush1.bf16.msra.mxu1 %v13666_v21 }
 0x22d   : > { %2645 = vmatprep.subr.bf16.mxu1 %v13024_v9 }
 0x22e   : > { %2221 = vmatmul.mubr.bf16.vlgmr.msra.gmra.mrb[20].mxu0 %v12443_v34  ;;  %v12462_v34 = vld [vmem:[%s13609_s16 + $0x34] ss:$8 sps:$4 sm:$0xff]  }
 0x22f   : > { %2303 = vmatpush1.bf16.msra.mxu0 %v13935_v28  ;;  %10547 = vmatprep.mubr.msk.bf16.mxu0 %vm1496_vm0, %v12447_v35 }
 0x230   : > { %2304 = vmatprep.subr.bf16.mxu0 %v13024_v9  ;;  %2564 = vmatmul.mubr.bf16.vlgmr.msra.gmra.mrb[28].mxu1 %v12461_v23  ;;  %v12478_v23 = vld [vmem:[%s17698_s6 + $0xf8] sm:$0xff]  }
 0x231   : > { %2646 = vmatpush1.bf16.msra.mxu1 %v13935_v28  ;;  %10591 = vmatprep.mubr.msk.bf16.mxu1 %vm1496_vm0, %v12465_v49 }
 0x232   : > { %2647 = vmatprep.subr.bf16.mxu1 %v13024_v9 }
 0x233   : > { %2305 = vmatpush1.bf16.msra.mxu0 %v14034_v36 }
 0x234   : > { %2306 = vmatprep.subr.bf16.mxu0 %v13024_v9 }
 0x235   : > { %2648 = vmatpush1.bf16.msra.mxu1 %v14034_v36 }
 0x236   : > { %2649 = vmatprep.subr.bf16.mxu1 %v13024_v9 }
 0x237   : > { %2307 = vmatpush1.bf16.msra.mxu0 %v14041_v5 }
 0x238   : > { %2308 = vmatprep.subr.bf16.mxu0 %v13024_v9 }
 0x239   : > { %2650 = vmatpush1.bf16.msra.mxu1 %v14041_v5 }
 0x23a   : > { %2651 = vmatprep.subr.bf16.mxu1 %v13024_v9 }
 0x23b   : > { %2309 = vmatpush1.bf16.msra.mxu0 %v14048_v6 }
 0x23c   : > { %2310 = vmatprep.subr.bf16.mxu0 %v13024_v9 }
 0x23d   : > { %2652 = vmatpush1.bf16.msra.mxu1 %v14048_v6 }
 0x23e   : > { %2653 = vmatprep.subr.bf16.mxu1 %v13024_v9 }
 0x23f   : > { %2311 = vmatpush1.bf16.msra.mxu0 %v13809_v37  ;;  %v12451_v37 = vld [vmem:[%s17698_s6 + $0x80] sm:$0xff]  }
 0x240   : > { %2312 = vmatprep.subr.bf16.mxu0 %v13024_v9 }
 0x241   : > { %2654 = vmatpush1.bf16.msra.mxu1 %v14113_v24 }
 0x242   : > { %2655 = vmatprep.subr.bf16.mxu1 %v13024_v9 }
 0x243   : > { %2313 = vmatpush1.bf16.msra.mxu0 %v13817_v38  ;;  %v12452_v38 = vld [vmem:[%s17698_s6 + $0x88] sm:$0xff]  }
 0x244   : > { %2314 = vmatprep.subr.bf16.mxu0 %v13024_v9 }
 0x245   : > { %2656 = vmatpush1.bf16.msra.mxu1 %v14120_v25 }
 0x246   : > { %2657 = vmatprep.subr.bf16.mxu1 %v13024_v9 }
 0x247   : > { %2315 = vmatpush1.bf16.msra.mxu0 %v13826_v39 }
 0x248   : > { %2316 = vmatprep.subr.bf16.mxu0 %v13024_v9 }
 0x249   : > { %2658 = vmatpush1.bf16.msra.mxu1 %v14127_v26 }
 0x24a   : > { %2659 = vmatprep.subr.bf16.mxu1 %v13024_v9 }
 0x24b   : > { %2317 = vmatpush1.bf16.msra.mxu0 %v13835_v40 }
 0x24c   : > { %2318 = vmatprep.subr.bf16.mxu0 %v13024_v9 }
 0x24d   : > { %2660 = vmatpush1.bf16.msra.mxu1 %v14134_v27 }
 0x24e   : > { %2661 = vmatprep.subr.bf16.mxu1 %v13024_v9 }
 0x24f   : > { %2319 = vmatpush1.bf16.msra.mxu0 %v13844_v41  ;;  %v12453_v41 = vld [vmem:[%s17698_s6 + $0x90] sm:$0xff]  }
 0x250   : > { %2320 = vmatprep.subr.bf16.mxu0 %v13024_v9 }
 0x251   : > { %2662 = vmatpush1.bf16.msra.mxu1 %v14143_v42 }
 0x252   : > { %2663 = vmatprep.subr.bf16.mxu1 %v13024_v9 }
 0x253   : > { %2321 = vmatpush1.bf16.msra.mxu0 %v13666_v21 }
 0x254   : > { %11857 = vmatprep.subr.bf16.mxu0 %v13025_v45 }
 0x255   : > { %2664 = vmatpush1.bf16.msra.mxu1 %v13666_v21 }
 0x256   : > { %2335 = vmatmul.mubr.bf16.vlgmr.msra.gmra.mrb[24].mxu0 %v12450_v7  ;;  %11877 = vmatprep.subr.bf16.mxu1 %v13025_v45  ;;  %v12464_v7 = vld [vmem:[%s13609_s16 + $0x30] ss:$8 sps:$4 sm:$0xff]  }
 0x257   : > { %11873 = vmatprep.mubr.msk.bf16.mxu0 %vm13026_vm2, %v13025_v45  ;;  %11858 = vmatpush3.bf16.msra.mxu0 %v12451_v37  ;;  %v12468_v37 = vld [vmem:[%s13615_s17 + $0x34] ss:$8 sps:$4 sm:$0xff]  }
 0x258   : > { %11859 = vmatprep.subr.bf16.mxu0 %v13025_v45  ;;  %2678 = vmatmul.mubr.bf16.vlgmr.msra.gmra.mrb[32].mxu1 %v12467_v50  ;;  %v12487_v50 = vld [vmem:[%s13613_s29 + $0x40] ss:$8 sps:$4 sm:$0xff]  }
 0x259   : > { %11893 = vmatprep.mubr.msk.bf16.mxu1 %vm13026_vm2, %v13025_v45 }
 0x25b   : > { %11860 = vmatpush3.bf16.msra.mxu0 %v12452_v38  ;;  %v12470_v38 = vld [vmem:[%s13615_s17 + $0x30] ss:$8 sps:$4 sm:$0xff]  }
 0x25c   : > { %11861 = vmatprep.subr.bf16.mxu0 %v13025_v45 }
 0x25f   : > { %11862 = vmatpush3.bf16.msra.mxu0 %v12453_v41 }
 0x260   : > { %11863 = vmatprep.subr.bf16.mxu0 %v13025_v45 }
 0x263   : > { %11864 = vmatpush3.bf16.msra.mxu0 %v12454_v11 }
 0x264   : > { %11865 = vmatprep.subr.bf16.mxu0 %v13025_v45 }
 0x267   : > { %11866 = vmatpush3.bf16.msra.mxu0 %v12455_v12 }
 0x268   : > { %11867 = vmatprep.subr.bf16.mxu0 %v13025_v45 }
 0x26b   : > { %11868 = vmatpush3.bf16.msra.mxu0 %v12456_v14  ;;  %v12471_v14 = vld [vmem:[%s17698_s6 + $0xc0] sm:$0xff]  }
 0x26c   : > { %11869 = vmatprep.subr.bf16.mxu0 %v13025_v45  ;;  %11878 = vmatpush3.bf16.msra.mxu1 %v12471_v14  ;;  %v12493_v14 = vld [vmem:[%s17698_s6 + $0x110] sm:$0xff]  }
 0x26d   : > { %11879 = vmatprep.subr.bf16.mxu1 %v13025_v45 }
 0x26f   : > { %11870 = vmatpush3.bf16.msra.mxu0 %v12457_v15 }
 0x270   : > { %11871 = vmatprep.subr.bf16.mxu0 %v13025_v45 }
 0x273   : > { %11872 = vmatpush3.bf16.msra.mxu0 %v12458_v16  ;;  %v12472_v16 = vld [vmem:[%s17698_s6 + $0xc8] sm:$0xff]  }
 0x274   : > { %2587 = vmatprep.subr.bf16.mxu0 %v13024_v9  ;;  %11880 = vmatpush3.bf16.msra.mxu1 %v12472_v16  ;;  %v12495_v16 = vld [vmem:[%s17698_s6 + $0x120] sm:$0xff]  }
 0x275   : > { %11881 = vmatprep.subr.bf16.mxu1 %v13025_v45 }
 0x289   : > { %v2166_v39 = vpop.f32.mrb[16].mxu1 }
 0x28a   : > { %v11855_v40 = vpop.f32.mrb[17].mxu1 }
 0x28b   : > { %v2169_v8 = vpop.f32.mrb[18].mxu1 }
 0x28c   : > { %v11856_v10 = vpop.f32.mrb[19].mxu1 }
 0x2b1   : > { %v2278_v17 = vpop.f32.mrb[20].mxu1 }
 0x2b2   : > { %v2280_v18 = vpop.f32.mrb[21].mxu1 }
 0x2b3   : > { %v2281_v19 = vpop.f32.mrb[22].mxu1  ;;  %v12474_v18 = vld [vmem:[%s17698_s6 + $0xd8] sm:$0xff]  }
 0x2b4   : > { %v2283_v20 = vpop.f32.mrb[23].mxu1 }
 0x2b5   : > { %v12476_v20 = vld [vmem:[%s17698_s6 + $0xe8] sm:$0xff]  }
 0x2d9   : > { %v2077_v29 = vpop.f32.mrb[16].mxu0  ;;  %v2394_v30 = vpop.f32.mrb[24].mxu1 }
 0x2da   : > { %v14138_v31 = vadd.f32 %v2166_v39, %v2077_v29  ;;  %v11835_v32 = vpop.f32.mrb[17].mxu0  ;;  %v2396_v33 = vpop.f32.mrb[25].mxu1  ;;  %v12479_v29 = vld [vmem:[%s13597_s14 + $0x44] ss:$8 sps:$4 sm:$0xff]  }
 0x2db   : > { %v2080_v43 = vpop.f32.mrb[18].mxu0  ;;  %v2397_v44 = vpop.f32.mrb[26].mxu1 }
 0x2dc   : > { %v14147_v46 = vadd.f32 %v2169_v8, %v2080_v43  ;;  %v11836_v47 = vpop.f32.mrb[19].mxu0  ;;  %v2399_v48 = vpop.f32.mrb[27].mxu1 }
 0x2dd   : > { %v12485_v47 = vld [vmem:[%s13613_s29 + $0x44] ss:$8 sps:$4 sm:$0xff]  }
 0x301   : > { %v2222_v51 = vpop.f32.mrb[20].mxu0 }
 0x302   : > { %v2285_v52 = vmax.f32 %v2222_v51, %v2278_v17  ;;  %v2224_v53 = vpop.f32.mrb[21].mxu0  ;;  %v12473_v17 = vld [vmem:[%s17698_s6 + $0xd0] sm:$0xff]  }
 0x303   : > { %v2225_v54 = vpop.f32.mrb[22].mxu0  ;;  %v14207_v39 = vpop.f32.mrb[28].mxu1  ;;  %11882 = vmatpush3.bf16.msra.mxu1 %v12473_v17  ;;  %v12496_v17 = vld [vmem:[%s17698_s6 + $0x128] sm:$0xff]  }
 0x304   : > { %v2286_v55 = vmax.f32 %v2225_v54, %v2281_v19  ;;  %v2227_v56 = vpop.f32.mrb[23].mxu0  ;;  %v2567_v40 = vpop.f32.mrb[29].mxu1  ;;  %11883 = vmatprep.subr.bf16.mxu1 %v13025_v45  ;;  %v12475_v19 = vld [vmem:[%s17698_s6 + $0xe0] sm:$0xff]  }
 0x305   : > { %v14210_v41 = vpop.f32.mrb[30].mxu1 }
 0x306   : > { %v2570_v8 = vpop.f32.mrb[31].mxu1 }
 0x307   : > { %11884 = vmatpush3.bf16.msra.mxu1 %v12474_v18  ;;  %v12497_v18 = vld [vmem:[%s17698_s6 + $0x130] sm:$0xff]  }
 0x308   : > { %11885 = vmatprep.subr.bf16.mxu1 %v13025_v45 }
 0x30b   : > { %11886 = vmatpush3.bf16.msra.mxu1 %v12475_v19  ;;  %v12498_v19 = vld [vmem:[%s17698_s6 + $0x138] sm:$0xff]  }
 0x30c   : > { %11887 = vmatprep.subr.bf16.mxu1 %v13025_v45 }
 0x30f   : > { %11888 = vmatpush3.bf16.msra.mxu1 %v12476_v20  ;;  %v12499_v20 = vld [vmem:[%s13597_s14 + $0x54] ss:$8 sps:$4 sm:$0xff]  }
 0x310   : > { %11889 = vmatprep.subr.bf16.mxu1 %v13025_v45 }
 0x313   : > { %11890 = vmatpush3.bf16.msra.mxu1 %v12477_v22  ;;  %v12501_v22 = vld [vmem:[%s13597_s14 + $0x50] ss:$8 sps:$4 sm:$0xff]  }
 0x314   : > { %11891 = vmatprep.subr.bf16.mxu1 %v13025_v45 }
 0x317   : > { %11892 = vmatpush3.bf16.msra.mxu1 %v12478_v23 }
 0x318   : > { %2930 = vmatprep.subr.bf16.mxu1 %v13024_v9 }
 0x329   : > { %v2336_v57 = vpop.f32.mrb[24].mxu0 }
 0x32a   : > { %v2343_v58 = vmax.f32 %v2285_v52, %v2336_v57  ;;  %v2338_v59 = vpop.f32.mrb[25].mxu0 }
 0x32b   : > { %v2339_v60 = vpop.f32.mrb[26].mxu0  ;;  %v14228_v10 = vpop.f32.mrb[32].mxu1 }
 0x32c   : > { %v2401_v61 = vmax.f32 %v2343_v58, %v2394_v30  ;;  %v2344_v62 = vmax.f32 %v2286_v55, %v2339_v60  ;;  %v2341_v63 = vpop.f32.mrb[27].mxu0  ;;  %v2681_v11 = vpop.f32.mrb[33].mxu1  ;;  %v12481_v30 = vld [vmem:[%s13597_s14 + $0x40] ss:$8 sps:$4 sm:$0xff]  }
 0x32d   : > { %v14230_v12 = vpop.f32.mrb[34].mxu1 }
 0x32e   : > { %v2403_v0 = vadd.f32 %v13927_v13, %v2401_v61  ;;  %v2402_v1 = vmax.f32 %v2344_v62, %v2397_v44  ;;  %v2684_v15 = vpop.f32.mrb[35].mxu1 }
 0x32f   : > { %v12494_v15 = vld [vmem:[%s17698_s6 + $0x118] sm:$0xff]  }
 0x330   : > { %v2404_v2 = vadd.f32 %v13927_v13, %v2402_v1  ;;  %v2405_v3 = vmax.f32 %v2403_v0, 0.0 }
 0x332   : > { %v2406_v4 = vmax.f32 %v2404_v2, 0.0 }
 0x334   : > { %v2407_v35 = vpack.c.bf16 %v2406_v4, %v2405_v3  ;;  %v12482_v3 = vld [vmem:[%s13609_s16 + $0x44] ss:$8 sps:$4 sm:$0xff]  }
 0x336   : > { %11874 = vmatmul.mubr.bf16.vlgmr.msra.gmra.mrb[28].mxu0 %v2407_v35  ;;  %v12490_v35 = vld [vmem:[%s13615_s17 + $0x40] ss:$8 sps:$4 sm:$0xff]  }
 0x337   : > { %2588 = vmatpush1.bf16.msra.mxu0 %v13935_v28  ;;  %10586 = vmatprep.mubr.msk.bf16.mxu0 %vm1496_vm0, %v12462_v34  ;;  %v12488_v34 = vld [vmem:[%s13615_s17 + $0x44] ss:$8 sps:$4 sm:$0xff]  }
 0x338   : > { %2589 = vmatprep.subr.bf16.mxu0 %v13024_v9 }
 0x33b   : > { %2590 = vmatpush1.bf16.msra.mxu0 %v14034_v36 }
 0x33c   : > { %2591 = vmatprep.subr.bf16.mxu0 %v13024_v9 }
 0x33f   : > { %2592 = vmatpush1.bf16.msra.mxu0 %v14041_v5 }
 0x340   : > { %2593 = vmatprep.subr.bf16.mxu0 %v13024_v9 }
 0x343   : > { %2594 = vmatpush1.bf16.msra.mxu0 %v14048_v6 }
 0x344   : > { %2595 = vmatprep.subr.bf16.mxu0 %v13024_v9 }
 0x347   : > { %2596 = vmatpush1.bf16.msra.mxu0 %v14113_v24 }
 0x348   : > { %2597 = vmatprep.subr.bf16.mxu0 %v13024_v9 }
 0x34b   : > { %2598 = vmatpush1.bf16.msra.mxu0 %v14120_v25 }
 0x34c   : > { %2599 = vmatprep.subr.bf16.mxu0 %v13024_v9 }
 0x34f   : > { %2600 = vmatpush1.bf16.msra.mxu0 %v14127_v26 }
 0x350   : > { %2601 = vmatprep.subr.bf16.mxu0 %v13024_v9 }
 0x353   : > { %2602 = vmatpush1.bf16.msra.mxu0 %v14134_v27 }
 0x354   : > { %2603 = vmatprep.subr.bf16.mxu0 %v13024_v9 }
 0x357   : > { %2604 = vmatpush1.bf16.msra.mxu0 %v14143_v42 }
 0x358   : > { %2605 = vmatprep.subr.bf16.mxu0 %v13024_v9 }
 0x35b   : > { %2606 = vmatpush1.bf16.msra.mxu0 %v13666_v21 }
 0x35c   : > { %2703 = vmatprep.subr.bf16.mxu0 %v13024_v9 }
 0x35e   : > { %2620 = vmatmul.mubr.bf16.vlgmr.msra.gmra.mrb[32].mxu0 %v12464_v7 }
 0x35f   : > { %2704 = vmatpush1.bf16.msra.mxu0 %v13935_v28  ;;  %10596 = vmatprep.mubr.msk.bf16.mxu0 %vm1496_vm0, %v12468_v37 }
 0x360   : > { %2705 = vmatprep.subr.bf16.mxu0 %v13024_v9 }
 0x363   : > { %2706 = vmatpush1.bf16.msra.mxu0 %v14034_v36 }
 0x364   : > { %2707 = vmatprep.subr.bf16.mxu0 %v13024_v9 }
 0x367   : > { %2708 = vmatpush1.bf16.msra.mxu0 %v14041_v5 }
 0x368   : > { %2709 = vmatprep.subr.bf16.mxu0 %v13024_v9 }
 0x36b   : > { %2710 = vmatpush1.bf16.msra.mxu0 %v14048_v6 }
 0x36c   : > { %2711 = vmatprep.subr.bf16.mxu0 %v13024_v9 }
 0x36f   : > { %2712 = vmatpush1.bf16.msra.mxu0 %v14113_v24 }
 0x370   : > { %2713 = vmatprep.subr.bf16.mxu0 %v13024_v9 }
 0x373   : > { %2714 = vmatpush1.bf16.msra.mxu0 %v14120_v25 }
 0x374   : > { %2715 = vmatprep.subr.bf16.mxu0 %v13024_v9 }
 0x377   : > { %2716 = vmatpush1.bf16.msra.mxu0 %v14127_v26 }
 0x378   : > { %2717 = vmatprep.subr.bf16.mxu0 %v13024_v9 }
 0x37b   : > { %2718 = vmatpush1.bf16.msra.mxu0 %v14134_v27 }
 0x37c   : > { %2719 = vmatprep.subr.bf16.mxu0 %v13024_v9 }
 0x37f   : > { %2720 = vmatpush1.bf16.msra.mxu0 %v14143_v42 }
 0x380   : > { %2721 = vmatprep.subr.bf16.mxu0 %v13024_v9 }
 0x383   : > { %2722 = vmatpush1.bf16.msra.mxu0 %v13666_v21 }
 0x384   : > { %2874 = vmatprep.subr.bf16.mxu0 %v13024_v9 }
 0x386   : > { %2736 = vmatmul.mubr.bf16.vlgmr.msra.gmra.mrb[36].mxu0 %v12470_v38 }
 0x387   : > { %2875 = vmatpush1.bf16.msra.mxu0 %v13935_v28  ;;  %10625 = vmatprep.mubr.msk.bf16.mxu0 %vm1496_vm0, %v12479_v29 }
 0x388   : > { %2876 = vmatprep.subr.bf16.mxu0 %v13024_v9 }
 0x38b   : > { %2877 = vmatpush1.bf16.msra.mxu0 %v14034_v36 }
 0x38c   : > { %2878 = vmatprep.subr.bf16.mxu0 %v13024_v9 }
 0x38f   : > { %2879 = vmatpush1.bf16.msra.mxu0 %v14041_v5 }
 0x390   : > { %2880 = vmatprep.subr.bf16.mxu0 %v13024_v9 }
 0x393   : > { %2881 = vmatpush1.bf16.msra.mxu0 %v14048_v6 }
 0x394   : > { %2882 = vmatprep.subr.bf16.mxu0 %v13024_v9 }
 0x397   : > { %2883 = vmatpush1.bf16.msra.mxu0 %v14113_v24 }
 0x398   : > { %2884 = vmatprep.subr.bf16.mxu0 %v13024_v9 }
 0x39b   : > { %2885 = vmatpush1.bf16.msra.mxu0 %v14120_v25 }
 0x39c   : > { %2886 = vmatprep.subr.bf16.mxu0 %v13024_v9 }
 0x39f   : > { %2887 = vmatpush1.bf16.msra.mxu0 %v14127_v26 }
 0x3a0   : > { %2888 = vmatprep.subr.bf16.mxu0 %v13024_v9 }
 0x3a3   : > { %2889 = vmatpush1.bf16.msra.mxu0 %v14134_v27 }
 0x3a4   : > { %2890 = vmatprep.subr.bf16.mxu0 %v13024_v9 }
 0x3a7   : > { %2891 = vmatpush1.bf16.msra.mxu0 %v14143_v42 }
 0x3a8   : > { %2892 = vmatprep.subr.bf16.mxu0 %v13024_v9 }
 0x3ab   : > { %2893 = vmatpush1.bf16.msra.mxu0 %v13666_v21 }
 0x3ac   : > { %2988 = vmatprep.subr.bf16.mxu0 %v13024_v9 }
 0x3ae   : > { %2907 = vmatmul.mubr.bf16.vlgmr.msra.gmra.mrb[40].mxu0 %v12481_v30 }
 0x3af   : > { %2989 = vmatpush1.bf16.msra.mxu0 %v13935_v28  ;;  %10635 = vmatprep.mubr.msk.bf16.mxu0 %vm1496_vm0, %v12485_v47  ;;  %v12507_v47 = vld [vmem:[%s13613_s29 + $0x50] ss:$8 sps:$4 sm:$0xff]  }
 0x3b0   : > { %2990 = vmatprep.subr.bf16.mxu0 %v13024_v9 }
 0x3b3   : > { %2991 = vmatpush1.bf16.msra.mxu0 %v14034_v36 }
 0x3b4   : > { %2992 = vmatprep.subr.bf16.mxu0 %v13024_v9 }
 0x3b7   : > { %2993 = vmatpush1.bf16.msra.mxu0 %v14041_v5 }
 0x3b8   : > { %2994 = vmatprep.subr.bf16.mxu0 %v13024_v9 }
 0x3bb   : > { %2995 = vmatpush1.bf16.msra.mxu0 %v14048_v6 }
 0x3bc   : > { %2996 = vmatprep.subr.bf16.mxu0 %v13024_v9 }
 0x3bf   : > { %2997 = vmatpush1.bf16.msra.mxu0 %v14113_v24 }
 0x3c0   : > { %2998 = vmatprep.subr.bf16.mxu0 %v13024_v9 }
 0x3c3   : > { %2999 = vmatpush1.bf16.msra.mxu0 %v14120_v25 }
 0x3c4   : > { %3000 = vmatprep.subr.bf16.mxu0 %v13024_v9 }
 0x3c7   : > { %3001 = vmatpush1.bf16.msra.mxu0 %v14127_v26 }
 0x3c8   : > { %3002 = vmatprep.subr.bf16.mxu0 %v13024_v9 }
 0x3cb   : > { %3003 = vmatpush1.bf16.msra.mxu0 %v14134_v27 }
 0x3cc   : > { %3004 = vmatprep.subr.bf16.mxu0 %v13024_v9 }
 0x3cf   : > { %3005 = vmatpush1.bf16.msra.mxu0 %v14143_v42 }
 0x3d0   : > { %3006 = vmatprep.subr.bf16.mxu0 %v13024_v9 }
 0x3d3   : > { %3007 = vmatpush1.bf16.msra.mxu0 %v13666_v21 }
 0x3d4   : > { %11897 = vmatprep.subr.bf16.mxu0 %v13025_v45 }
 0x3d6   : > { %3021 = vmatmul.mubr.bf16.vlgmr.msra.gmra.mrb[44].mxu0 %v12487_v50 }
 0x3d7   : > { %11913 = vmatprep.mubr.msk.bf16.mxu0 %vm13026_vm2, %v13025_v45 }
 0x409   : > { %v2507_v32 = vpop.f32.mrb[28].mxu0 }
 0x40a   : > { %v14286_v33 = vadd.f32 %v2507_v32, %v14138_v31  ;;  %v11875_v43 = vpop.f32.mrb[29].mxu0  ;;  %v12505_v32 = vld [vmem:[%s13613_s29 + $0x54] ss:$8 sps:$4 sm:$0xff]  }
 0x40b   : > { %v2510_v44 = vpop.f32.mrb[30].mxu0 }
 0x40c   : > { %v14290_v48 = vadd.f32 %v2510_v44, %v14147_v46  ;;  %v11876_v49 = vpop.f32.mrb[31].mxu0 }
 0x431   : > { %v2621_v31 = vpop.f32.mrb[32].mxu0 }
 0x432   : > { %v2628_v51 = vmax.f32 %v14207_v39, %v2621_v31  ;;  %v2623_v52 = vpop.f32.mrb[33].mxu0 }
 0x433   : > { %v2624_v53 = vpop.f32.mrb[34].mxu0 }
 0x434   : > { %v2629_v46 = vmax.f32 %v14210_v41, %v2624_v53  ;;  %v2686_v54 = vmax.f32 %v2628_v51, %v14228_v10  ;;  %v2626_v55 = vpop.f32.mrb[35].mxu0  ;;  %v12491_v10 = vld [vmem:[%s17698_s6 + $0x100] sm:$0xff]  }
 0x435   : > { %11898 = vmatpush3.bf16.msra.mxu0 %v12491_v10  ;;  %v12515_v10 = vld [vmem:[%s17698_s6 + $0x160] sm:$0xff]  }
 0x436   : > { %v2687_v56 = vmax.f32 %v2629_v46, %v14230_v12  ;;  %v12492_v12 = vld [vmem:[%s17698_s6 + $0x108] sm:$0xff]   ;;  %11899 = vmatprep.subr.bf16.mxu0 %v13025_v45 }
 0x439   : > { %11900 = vmatpush3.bf16.msra.mxu0 %v12492_v12  ;;  %v12517_v12 = vld [vmem:[%s17698_s6 + $0x170] sm:$0xff]  }
 0x43a   : > { %11901 = vmatprep.subr.bf16.mxu0 %v13025_v45 }
 0x43d   : > { %11902 = vmatpush3.bf16.msra.mxu0 %v12493_v14  ;;  %v12518_v14 = vld [vmem:[%s17698_s6 + $0x178] sm:$0xff]  }
 0x43e   : > { %11903 = vmatprep.subr.bf16.mxu0 %v13025_v45 }
 0x441   : > { %11904 = vmatpush3.bf16.msra.mxu0 %v12494_v15  ;;  %v12519_v15 = vld [vmem:[%s13597_s14 + $0x64] ss:$8 sps:$4 sm:$0xff]  }
 0x442   : > { %11905 = vmatprep.subr.bf16.mxu0 %v13025_v45 }
 0x445   : > { %11906 = vmatpush3.bf16.msra.mxu0 %v12495_v16  ;;  %v12521_v16 = vld [vmem:[%s13597_s14 + $0x60] ss:$8 sps:$4 sm:$0xff]  }
 0x446   : > { %11907 = vmatprep.subr.bf16.mxu0 %v13025_v45 }
 0x449   : > { %11908 = vmatpush3.bf16.msra.mxu0 %v12496_v17  ;;  %v14574_v17 = vld [vmem:[%s17696_s4 + $0x8] sm:$0xff]  }
 0x44a   : > { %11909 = vmatprep.subr.bf16.mxu0 %v13025_v45 }
 0x44d   : > { %11910 = vmatpush3.bf16.msra.mxu0 %v12497_v18  ;;  %v14581_v18 = vld [vmem:[%s17696_s4 + $0x10] sm:$0xff]  }
 0x44e   : > { %11911 = vmatprep.subr.bf16.mxu0 %v13025_v45 }
 0x451   : > { %11912 = vmatpush3.bf16.msra.mxu0 %v12498_v19  ;;  %v14588_v19 = vld [vmem:[%s17696_s4 + $0x18] sm:$0xff]  }
 0x452   : > { %3273 = vmatprep.subr.bf16.mxu0 %v13024_v9 }
 0x459   : > { %v2737_v57 = vpop.f32.mrb[36].mxu0 }
 0x45a   : > { %v2744_v58 = vmax.f32 %v2686_v54, %v2737_v57  ;;  %v2739_v59 = vpop.f32.mrb[37].mxu0  ;;  %v14451_v57 = vld [vmem:[%s17697_s5] ss:$0 sm:$0xff] }
 0x45b   : > { %v2740_v60 = vpop.f32.mrb[38].mxu0 }
 0x45c   : > { %v2746_v61 = vadd.f32 %v13927_v13, %v2744_v58  ;;  %v2745_v62 = vmax.f32 %v2687_v56, %v2740_v60  ;;  %v2742_v63 = vpop.f32.mrb[39].mxu0 }
 0x45e   : > { %v2747_v0 = vadd.f32 %v13927_v13, %v2745_v62  ;;  %v2748_v1 = vmax.f32 %v2746_v61, 0.0  ;;  %v12484_v13 = vld [vmem:[%s13609_s16 + $0x40] ss:$8 sps:$4 sm:$0xff]  }
 0x460   : > { %v2749_v2 = vmax.f32 %v2747_v0, 0.0  ;;  %v12502_v0 = vld [vmem:[%s13609_s16 + $0x54] ss:$8 sps:$4 sm:$0xff]  }
 0x462   : > { %v2750_v4 = vpack.c.bf16 %v2749_v2, %v2748_v1  ;;  %v14459_v2 = vld [vmem:[%s17696_s4] sm:$0xff]  }
 0x464   : > { %11894 = vmatmul.mubr.bf16.vlgmr.msra.gmra.mrb[36].mxu1 %v2750_v4  ;;  %v12508_v4 = vld [vmem:[%s13615_s17 + $0x54] ss:$8 sps:$4 sm:$0xff]  }
 0x465   : > { %2931 = vmatpush1.bf16.msra.mxu1 %v13935_v28  ;;  %10630 = vmatprep.mubr.msk.bf16.mxu1 %vm1496_vm0, %v12482_v3  ;;  %v12504_v3 = vld [vmem:[%s13609_s16 + $0x50] ss:$8 sps:$4 sm:$0xff]  }
 0x466   : > { %2932 = vmatprep.subr.bf16.mxu1 %v13024_v9 }
 0x469   : > { %2933 = vmatpush1.bf16.msra.mxu1 %v14034_v36 }
 0x46a   : > { %2934 = vmatprep.subr.bf16.mxu1 %v13024_v9 }
 0x46d   : > { %2935 = vmatpush1.bf16.msra.mxu1 %v14041_v5 }
 0x46e   : > { %2936 = vmatprep.subr.bf16.mxu1 %v13024_v9 }
 0x471   : > { %2937 = vmatpush1.bf16.msra.mxu1 %v14048_v6 }
 0x472   : > { %2938 = vmatprep.subr.bf16.mxu1 %v13024_v9 }
 0x475   : > { %2939 = vmatpush1.bf16.msra.mxu1 %v14113_v24 }
 0x476   : > { %2940 = vmatprep.subr.bf16.mxu1 %v13024_v9 }
 0x479   : > { %2941 = vmatpush1.bf16.msra.mxu1 %v14120_v25 }
 0x47a   : > { %2942 = vmatprep.subr.bf16.mxu1 %v13024_v9 }
 0x47d   : > { %2943 = vmatpush1.bf16.msra.mxu1 %v14127_v26 }
 0x47e   : > { %2944 = vmatprep.subr.bf16.mxu1 %v13024_v9 }
 0x481   : > { %2945 = vmatpush1.bf16.msra.mxu1 %v14134_v27  ;;  %v14353_v7 = vpop.f32.mrb[40].mxu0 }
 0x482   : > { %2946 = vmatprep.subr.bf16.mxu1 %v13024_v9  ;;  %v2910_v37 = vpop.f32.mrb[41].mxu0 }
 0x483   : > { %v14356_v38 = vpop.f32.mrb[42].mxu0 }
 0x484   : > { %v2913_v39 = vpop.f32.mrb[43].mxu0 }
 0x485   : > { %2947 = vmatpush1.bf16.msra.mxu1 %v14143_v42 }
 0x486   : > { %2948 = vmatprep.subr.bf16.mxu1 %v13024_v9 }
 0x489   : > { %2949 = vmatpush1.bf16.msra.mxu1 %v13666_v21 }
 0x48a   : > { %3046 = vmatprep.subr.bf16.mxu1 %v13024_v9 }
 0x48c   : > { %2963 = vmatmul.mubr.bf16.vlgmr.msra.gmra.mrb[40].mxu1 %v12484_v13  ;;  %v12510_v13 = vld [vmem:[%s13615_s17 + $0x50] ss:$8 sps:$4 sm:$0xff]  }
 0x48d   : > { %3047 = vmatpush1.bf16.msra.mxu1 %v13935_v28  ;;  %10640 = vmatprep.mubr.msk.bf16.mxu1 %vm1496_vm0, %v12488_v34 }
 0x48e   : > { %3048 = vmatprep.subr.bf16.mxu1 %v13024_v9 }
 0x491   : > { %3049 = vmatpush1.bf16.msra.mxu1 %v14034_v36 }
 0x492   : > { %3050 = vmatprep.subr.bf16.mxu1 %v13024_v9 }
 0x495   : > { %3051 = vmatpush1.bf16.msra.mxu1 %v14041_v5 }
 0x496   : > { %3052 = vmatprep.subr.bf16.mxu1 %v13024_v9 }
 0x499   : > { %3053 = vmatpush1.bf16.msra.mxu1 %v14048_v6 }
 0x49a   : > { %3054 = vmatprep.subr.bf16.mxu1 %v13024_v9 }
 0x49d   : > { %3055 = vmatpush1.bf16.msra.mxu1 %v14113_v24 }
 0x49e   : > { %3056 = vmatprep.subr.bf16.mxu1 %v13024_v9 }
 0x4a1   : > { %3057 = vmatpush1.bf16.msra.mxu1 %v14120_v25 }
 0x4a2   : > { %3058 = vmatprep.subr.bf16.mxu1 %v13024_v9 }
 0x4a5   : > { %3059 = vmatpush1.bf16.msra.mxu1 %v14127_v26 }
 0x4a6   : > { %3060 = vmatprep.subr.bf16.mxu1 %v13024_v9 }
 0x4a9   : > { %3061 = vmatpush1.bf16.msra.mxu1 %v14134_v27  ;;  %v14374_v40 = vpop.f32.mrb[44].mxu0 }
 0x4aa   : > { %3062 = vmatprep.subr.bf16.mxu1 %v13024_v9  ;;  %v3024_v41 = vpop.f32.mrb[45].mxu0 }
 0x4ab   : > { %v14376_v8 = vpop.f32.mrb[46].mxu0  ;;  %v12513_v41 = vld [vmem:[%s17698_s6 + $0x150] sm:$0xff]  }
 0x4ac   : > { %v3027_v11 = vpop.f32.mrb[47].mxu0 }
 0x4ad   : > { %3063 = vmatpush1.bf16.msra.mxu1 %v14143_v42  ;;  %v12516_v11 = vld [vmem:[%s17698_s6 + $0x168] sm:$0xff]  }
 0x4ae   : > { %3064 = vmatprep.subr.bf16.mxu1 %v13024_v9 }
 0x4b1   : > { %3065 = vmatpush1.bf16.msra.mxu1 %v13666_v21 }
 0x4b2   : > { %3217 = vmatprep.subr.bf16.mxu1 %v13024_v9 }
 0x4b4   : > { %3079 = vmatmul.mubr.bf16.vlgmr.msra.gmra.mrb[44].mxu1 %v12490_v35 }
 0x4b5   : > { %3218 = vmatpush1.bf16.msra.mxu1 %v13935_v28  ;;  %10669 = vmatprep.mubr.msk.bf16.mxu1 %vm1496_vm0, %v12499_v20 }
 0x4b6   : > { %3219 = vmatprep.subr.bf16.mxu1 %v13024_v9 }
 0x4b9   : > { %3220 = vmatpush1.bf16.msra.mxu1 %v14034_v36 }
 0x4ba   : > { %3221 = vmatprep.subr.bf16.mxu1 %v13024_v9 }
 0x4bd   : > { %3222 = vmatpush1.bf16.msra.mxu1 %v14041_v5 }
 0x4be   : > { %3223 = vmatprep.subr.bf16.mxu1 %v13024_v9 }
 0x4c1   : > { %3224 = vmatpush1.bf16.msra.mxu1 %v14048_v6 }
 0x4c2   : > { %3225 = vmatprep.subr.bf16.mxu1 %v13024_v9 }
 0x4c5   : > { %3226 = vmatpush1.bf16.msra.mxu1 %v14113_v24 }
 0x4c6   : > { %3227 = vmatprep.subr.bf16.mxu1 %v13024_v9 }
 0x4c9   : > { %3228 = vmatpush1.bf16.msra.mxu1 %v14120_v25 }
 0x4ca   : > { %3229 = vmatprep.subr.bf16.mxu1 %v13024_v9 }
 0x4cd   : > { %3230 = vmatpush1.bf16.msra.mxu1 %v14127_v26 }
 0x4ce   : > { %3231 = vmatprep.subr.bf16.mxu1 %v13024_v9 }
 0x4d1   : > { %3232 = vmatpush1.bf16.msra.mxu1 %v14134_v27 }
 0x4d2   : > { %3233 = vmatprep.subr.bf16.mxu1 %v13024_v9 }
 0x4d5   : > { %3234 = vmatpush1.bf16.msra.mxu1 %v14143_v42 }
 0x4d6   : > { %3235 = vmatprep.subr.bf16.mxu1 %v13024_v9 }
 0x4d9   : > { %3236 = vmatpush1.bf16.msra.mxu1 %v13666_v21 }
 0x4da   : > { %3331 = vmatprep.subr.bf16.mxu1 %v13024_v9 }
 0x4dc   : > { %3250 = vmatmul.mubr.bf16.vlgmr.msra.gmra.mrb[48].mxu1 %v12501_v22 }
 0x4dd   : > { %3332 = vmatpush1.bf16.msra.mxu1 %v13935_v28  ;;  %10679 = vmatprep.mubr.msk.bf16.mxu1 %vm1496_vm0, %v12505_v32 }
 0x4de   : > { %3333 = vmatprep.subr.bf16.mxu1 %v13024_v9 }
 0x4e1   : > { %3334 = vmatpush1.bf16.msra.mxu1 %v14034_v36 }
 0x4e2   : > { %3335 = vmatprep.subr.bf16.mxu1 %v13024_v9 }
 0x4e5   : > { %3336 = vmatpush1.bf16.msra.mxu1 %v14041_v5 }
 0x4e6   : > { %3337 = vmatprep.subr.bf16.mxu1 %v13024_v9 }
 0x4e9   : > { %3338 = vmatpush1.bf16.msra.mxu1 %v14048_v6 }
 0x4ea   : > { %3339 = vmatprep.subr.bf16.mxu1 %v13024_v9 }
 0x4ed   : > { %3340 = vmatpush1.bf16.msra.mxu1 %v14113_v24 }
 0x4ee   : > { %3341 = vmatprep.subr.bf16.mxu1 %v13024_v9 }
 0x4f1   : > { %3342 = vmatpush1.bf16.msra.mxu1 %v14120_v25 }
 0x4f2   : > { %3343 = vmatprep.subr.bf16.mxu1 %v13024_v9 }
 0x4f5   : > { %3344 = vmatpush1.bf16.msra.mxu1 %v14127_v26 }
 0x4f6   : > { %3345 = vmatprep.subr.bf16.mxu1 %v13024_v9 }
 0x4f9   : > { %3346 = vmatpush1.bf16.msra.mxu1 %v14134_v27 }
 0x4fa   : > { %3347 = vmatprep.subr.bf16.mxu1 %v13024_v9 }
 0x4fd   : > { %3348 = vmatpush1.bf16.msra.mxu1 %v14143_v42 }
 0x4fe   : > { %3349 = vmatprep.subr.bf16.mxu1 %v13024_v9 }
 0x501   : > { %3350 = vmatpush1.bf16.msra.mxu1 %v13666_v21 }
 0x502   : > { %11917 = vmatprep.subr.bf16.mxu1 %v13025_v45 }
 0x504   : > { %3364 = vmatmul.mubr.bf16.vlgmr.msra.gmra.mrb[52].mxu1 %v12507_v47 }
 0x505   : > { %11933 = vmatprep.mubr.msk.bf16.mxu1 %vm13026_vm2, %v13025_v45 }
 0x537   : > { %v2850_v28 = vpop.f32.mrb[36].mxu1 }
 0x538   : > { %v14432_v23 = vadd.f32 %v2850_v28, %v14286_v33  ;;  %v11895_v29 = vpop.f32.mrb[37].mxu1  ;;  %v12525_v28 = vld [vmem:[%s13613_s29 + $0x64] ss:$8 sps:$4 sm:$0xff]  }
 0x539   : > { %v2853_v30 = vpop.f32.mrb[38].mxu1 }
 0x53a   : > { %v14436_v43 = vadd.f32 %v2853_v30, %v14290_v48  ;;  %v11896_v44 = vpop.f32.mrb[39].mxu1 }
 0x55f   : > { %v2964_v33 = vpop.f32.mrb[40].mxu1 }
 0x560   : > { %v2971_v49 = vmax.f32 %v14353_v7, %v2964_v33  ;;  %v2966_v50 = vpop.f32.mrb[41].mxu1 }
 0x561   : > { %v2967_v31 = vpop.f32.mrb[42].mxu1 }
 0x562   : > { %v2972_v48 = vmax.f32 %v14356_v38, %v2967_v31  ;;  %v3029_v51 = vmax.f32 %v2971_v49, %v14374_v40  ;;  %v2969_v52 = vpop.f32.mrb[43].mxu1  ;;  %v12511_v38 = vld [vmem:[%s17698_s6 + $0x140] sm:$0xff]   ;;  %v12512_v40 = vld [vmem:[%s17698_s6 + $0x148] sm:$0xff]  }
 0x563   : > { %11918 = vmatpush3.bf16.msra.mxu1 %v12511_v38  ;;  %v12532_v38 = vld [vmem:[%s17698_s6 + $0x188] sm:$0xff]  }
 0x564   : > { %v3030_v53 = vmax.f32 %v2972_v48, %v14376_v8  ;;  %11919 = vmatprep.subr.bf16.mxu1 %v13025_v45  ;;  %v12514_v8 = vld [vmem:[%s17698_s6 + $0x158] sm:$0xff]  }
 0x567   : > { %11920 = vmatpush3.bf16.msra.mxu1 %v12512_v40  ;;  %v12534_v40 = vld [vmem:[%s17698_s6 + $0x198] sm:$0xff]  }
 0x568   : > { %11921 = vmatprep.subr.bf16.mxu1 %v13025_v45 }
 0x56b   : > { %11922 = vmatpush3.bf16.msra.mxu1 %v12513_v41  ;;  %v12535_v41 = vld [vmem:[%s17698_s6 + $0x1a0] sm:$0xff]  }
 0x56c   : > { %11923 = vmatprep.subr.bf16.mxu1 %v13025_v45 }
 0x56f   : > { %11924 = vmatpush3.bf16.msra.mxu1 %v12514_v8  ;;  %v12536_v8 = vld [vmem:[%s17698_s6 + $0x1a8] sm:$0xff]  }
 0x570   : > { %11925 = vmatprep.subr.bf16.mxu1 %v13025_v45 }
 0x573   : > { %11926 = vmatpush3.bf16.msra.mxu1 %v12515_v10  ;;  %v12537_v10 = vld [vmem:[%s17698_s6 + $0x1b0] sm:$0xff]  }
 0x574   : > { %11927 = vmatprep.subr.bf16.mxu1 %v13025_v45 }
 0x577   : > { %11928 = vmatpush3.bf16.msra.mxu1 %v12516_v11  ;;  %v12538_v11 = vld [vmem:[%s17698_s6 + $0x1b8] sm:$0xff]  }
 0x578   : > { %11929 = vmatprep.subr.bf16.mxu1 %v13025_v45 }
 0x57b   : > { %11930 = vmatpush3.bf16.msra.mxu1 %v12517_v12  ;;  %v12539_v12 = vld [vmem:[%s13597_s14 + $0x74] ss:$8 sps:$4 sm:$0xff]  }
 0x57c   : > { %11931 = vmatprep.subr.bf16.mxu1 %v13025_v45 }
 0x57f   : > { %11932 = vmatpush3.bf16.msra.mxu1 %v12518_v14  ;;  %v12541_v14 = vld [vmem:[%s13597_s14 + $0x70] ss:$8 sps:$4 sm:$0xff]  }
 0x580   : > { %3616 = vmatprep.subr.bf16.mxu1 %v13024_v9 }
 0x587   : > { %v3080_v46 = vpop.f32.mrb[44].mxu1 }
 0x588   : > { %v3087_v54 = vmax.f32 %v3029_v51, %v3080_v46  ;;  %v3082_v55 = vpop.f32.mrb[45].mxu1 }
 0x589   : > { %v3083_v56 = vpop.f32.mrb[46].mxu1 }
 0x58a   : > { %v3089_v58 = vadd.f32 %v14451_v57, %v3087_v54  ;;  %v3088_v59 = vmax.f32 %v3030_v53, %v3083_v56  ;;  %v3085_v60 = vpop.f32.mrb[47].mxu1  ;;  %v12522_v56 = vld [vmem:[%s13609_s16 + $0x64] ss:$8 sps:$4 sm:$0xff]  }
 0x58b   : > { %v14641_v60 = vld [vmem:[%s17696_s4 + $0x28] sm:$0xff]  }
 0x58c   : > { %v3090_v61 = vadd.f32 %v14451_v57, %v3088_v59  ;;  %v3091_v62 = vmax.f32 %v3089_v58, 0.0  ;;  %v14634_v59 = vld [vmem:[%s17696_s4 + $0x20] sm:$0xff]  }
 0x58e   : > { %v3092_v63 = vmax.f32 %v3090_v61, 0.0  ;;  %v14648_v61 = vld [vmem:[%s17696_s4 + $0x30] sm:$0xff]  }
 0x590   : > { %v3093_v1 = vpack.c.bf16 %v3092_v63, %v3091_v62  ;;  %v14655_v62 = vld [vmem:[%s17696_s4 + $0x38] sm:$0xff]   ;;  %v14662_v63 = vld [vmem:[%s17696_s4 + $0x40] sm:$0xff]  }
 0x592   : > { %11914 = vmatmul.mubr.bf16.vlgmr.msra.gmra.mrb[48].mxu0 %v3093_v1  ;;  %v12528_v1 = vld [vmem:[%s13615_s17 + $0x64] ss:$8 sps:$4 sm:$0xff]  }
 0x593   : > { %3274 = vmatpush1.bf16.msra.mxu0 %v14459_v2  ;;  %10674 = vmatprep.mubr.msk.bf16.mxu0 %vm1496_vm0, %v12502_v0  ;;  %v12524_v0 = vld [vmem:[%s13609_s16 + $0x60] ss:$8 sps:$4 sm:$0xff]  }
 0x594   : > { %3275 = vmatprep.subr.bf16.mxu0 %v13024_v9 }
 0x597   : > { %3276 = vmatpush1.bf16.msra.mxu0 %v14034_v36 }
 0x598   : > { %3277 = vmatprep.subr.bf16.mxu0 %v13024_v9 }
 0x59b   : > { %3278 = vmatpush1.bf16.msra.mxu0 %v14041_v5 }
 0x59c   : > { %3279 = vmatprep.subr.bf16.mxu0 %v13024_v9 }
 0x59f   : > { %3280 = vmatpush1.bf16.msra.mxu0 %v14048_v6 }
 0x5a0   : > { %3281 = vmatprep.subr.bf16.mxu0 %v13024_v9 }
 0x5a3   : > { %3282 = vmatpush1.bf16.msra.mxu0 %v14113_v24 }
 0x5a4   : > { %3283 = vmatprep.subr.bf16.mxu0 %v13024_v9 }
 0x5a7   : > { %3284 = vmatpush1.bf16.msra.mxu0 %v14120_v25 }
 0x5a8   : > { %3285 = vmatprep.subr.bf16.mxu0 %v13024_v9 }
 0x5ab   : > { %3286 = vmatpush1.bf16.msra.mxu0 %v14127_v26 }
 0x5ac   : > { %3287 = vmatprep.subr.bf16.mxu0 %v13024_v9 }
 0x5af   : > { %3288 = vmatpush1.bf16.msra.mxu0 %v14134_v27  ;;  %v14509_v34 = vpop.f32.mrb[48].mxu1 }
 0x5b0   : > { %3289 = vmatprep.subr.bf16.mxu0 %v13024_v9  ;;  %v3253_v35 = vpop.f32.mrb[49].mxu1 }
 0x5b1   : > { %v14512_v7 = vpop.f32.mrb[50].mxu1 }
 0x5b2   : > { %v3256_v37 = vpop.f32.mrb[51].mxu1 }
 0x5b3   : > { %3290 = vmatpush1.bf16.msra.mxu0 %v14143_v42 }
 0x5b4   : > { %3291 = vmatprep.subr.bf16.mxu0 %v13024_v9 }
 0x5b7   : > { %3292 = vmatpush1.bf16.msra.mxu0 %v13666_v21 }
 0x5b8   : > { %3389 = vmatprep.subr.bf16.mxu0 %v13024_v9 }
 0x5ba   : > { %3306 = vmatmul.mubr.bf16.vlgmr.msra.gmra.mrb[52].mxu0 %v12504_v3  ;;  %v12530_v3 = vld [vmem:[%s13615_s17 + $0x60] ss:$8 sps:$4 sm:$0xff]  }
 0x5bb   : > { %3390 = vmatpush1.bf16.msra.mxu0 %v14459_v2  ;;  %10684 = vmatprep.mubr.msk.bf16.mxu0 %vm1496_vm0, %v12508_v4 }
 0x5bc   : > { %3391 = vmatprep.subr.bf16.mxu0 %v13024_v9 }
 0x5bf   : > { %3392 = vmatpush1.bf16.msra.mxu0 %v14034_v36 }
 0x5c0   : > { %3393 = vmatprep.subr.bf16.mxu0 %v13024_v9 }
 0x5c3   : > { %3394 = vmatpush1.bf16.msra.mxu0 %v14041_v5 }
 0x5c4   : > { %3395 = vmatprep.subr.bf16.mxu0 %v13024_v9 }
 0x5c7   : > { %3396 = vmatpush1.bf16.msra.mxu0 %v14048_v6 }
 0x5c8   : > { %3397 = vmatprep.subr.bf16.mxu0 %v13024_v9 }
 0x5cb   : > { %3398 = vmatpush1.bf16.msra.mxu0 %v14113_v24 }
 0x5cc   : > { %3399 = vmatprep.subr.bf16.mxu0 %v13024_v9 }
 0x5cf   : > { %3400 = vmatpush1.bf16.msra.mxu0 %v14120_v25 }
 0x5d0   : > { %3401 = vmatprep.subr.bf16.mxu0 %v13024_v9 }
 0x5d3   : > { %3402 = vmatpush1.bf16.msra.mxu0 %v14127_v26 }
 0x5d4   : > { %3403 = vmatprep.subr.bf16.mxu0 %v13024_v9 }
 0x5d7   : > { %3404 = vmatpush1.bf16.msra.mxu0 %v14134_v27 }
 0x5d8   : > { %3405 = vmatprep.subr.bf16.mxu0 %v13024_v9 }
 0x5db   : > { %3406 = vmatpush1.bf16.msra.mxu0 %v14143_v42 }
 0x5dc   : > { %3407 = vmatprep.subr.bf16.mxu0 %v13024_v9 }
 0x5df   : > { %3408 = vmatpush1.bf16.msra.mxu0 %v13666_v21 }
 0x5e0   : > { %3560 = vmatprep.subr.bf16.mxu0 %v13024_v9 }
 0x5e2   : > { %3422 = vmatmul.mubr.bf16.vlgmr.msra.gmra.mrb[56].mxu0 %v12510_v13 }
 0x5e3   : > { %3561 = vmatpush1.bf16.msra.mxu0 %v14459_v2  ;;  %10713 = vmatprep.mubr.msk.bf16.mxu0 %vm1496_vm0, %v12519_v15 }
 0x5e4   : > { %3562 = vmatprep.subr.bf16.mxu0 %v13024_v9 }
 0x5e7   : > { %3563 = vmatpush1.bf16.msra.mxu0 %v14034_v36  ;;  %v14530_v36 = vpop.f32.mrb[52].mxu1 }
 0x5e8   : > { %3564 = vmatprep.subr.bf16.mxu0 %v13024_v9 }
 0x5eb   : > { %3565 = vmatpush1.bf16.msra.mxu0 %v14041_v5  ;;  %v3367_v5 = vpop.f32.mrb[53].mxu1 }
 0x5ec   : > { %3566 = vmatprep.subr.bf16.mxu0 %v13024_v9  ;;  %v12531_v5 = vld [vmem:[%s17698_s6 + $0x180] sm:$0xff]  }
 0x5ef   : > { %3567 = vmatpush1.bf16.msra.mxu0 %v14048_v6  ;;  %v14532_v6 = vpop.f32.mrb[54].mxu1 }
 0x5f0   : > { %3568 = vmatprep.subr.bf16.mxu0 %v13024_v9  ;;  %v3370_v39 = vpop.f32.mrb[55].mxu1 }
 0x5f1   : > { %v12533_v39 = vld [vmem:[%s17698_s6 + $0x190] sm:$0xff]  }
 0x5f3   : > { %3569 = vmatpush1.bf16.msra.mxu0 %v14113_v24 }
 0x5f4   : > { %3570 = vmatprep.subr.bf16.mxu0 %v13024_v9 }
 0x5f7   : > { %3571 = vmatpush1.bf16.msra.mxu0 %v14120_v25 }
 0x5f8   : > { %3572 = vmatprep.subr.bf16.mxu0 %v13024_v9 }
 0x5fb   : > { %3573 = vmatpush1.bf16.msra.mxu0 %v14127_v26 }
 0x5fc   : > { %3574 = vmatprep.subr.bf16.mxu0 %v13024_v9 }
 0x5ff   : > { %3575 = vmatpush1.bf16.msra.mxu0 %v14134_v27 }
 0x600   : > { %3576 = vmatprep.subr.bf16.mxu0 %v13024_v9 }
 0x603   : > { %3577 = vmatpush1.bf16.msra.mxu0 %v14143_v42 }
 0x604   : > { %3578 = vmatprep.subr.bf16.mxu0 %v13024_v9 }
 0x607   : > { %3579 = vmatpush1.bf16.msra.mxu0 %v13666_v21 }
 0x608   : > { %3674 = vmatprep.subr.bf16.mxu0 %v13024_v9 }
 0x60a   : > { %3593 = vmatmul.mubr.bf16.vlgmr.msra.gmra.mrb[60].mxu0 %v12521_v16 }
 0x60b   : > { %3675 = vmatpush1.bf16.msra.mxu0 %v14459_v2  ;;  %10723 = vmatprep.mubr.msk.bf16.mxu0 %vm1496_vm0, %v12525_v28 }
 0x60c   : > { %3676 = vmatprep.subr.bf16.mxu0 %v13024_v9 }
 0x60f   : > { %3677 = vmatpush1.bf16.msra.mxu0 %v14574_v17 }
 0x610   : > { %3678 = vmatprep.subr.bf16.mxu0 %v13024_v9 }
 0x613   : > { %3679 = vmatpush1.bf16.msra.mxu0 %v14581_v18 }
 0x614   : > { %3680 = vmatprep.subr.bf16.mxu0 %v13024_v9 }
 0x617   : > { %3681 = vmatpush1.bf16.msra.mxu0 %v14588_v19 }
 0x618   : > { %3682 = vmatprep.subr.bf16.mxu0 %v13024_v9 }
 0x61b   : > { %3683 = vmatpush1.bf16.msra.mxu0 %v14113_v24 }
 0x61c   : > { %3684 = vmatprep.subr.bf16.mxu0 %v13024_v9 }
 0x61f   : > { %3685 = vmatpush1.bf16.msra.mxu0 %v14120_v25 }
 0x620   : > { %3686 = vmatprep.subr.bf16.mxu0 %v13024_v9 }
 0x623   : > { %3687 = vmatpush1.bf16.msra.mxu0 %v14127_v26 }
 0x624   : > { %3688 = vmatprep.subr.bf16.mxu0 %v13024_v9 }
 0x627   : > { %3689 = vmatpush1.bf16.msra.mxu0 %v14134_v27  ;;  %v12527_v27 = vld [vmem:[%s13613_s29 + $0x60] ss:$8 sps:$4 sm:$0xff]  }
 0x628   : > { %3690 = vmatprep.subr.bf16.mxu0 %v13024_v9 }
 0x62b   : > { %3691 = vmatpush1.bf16.msra.mxu0 %v14143_v42 }
 0x62c   : > { %3692 = vmatprep.subr.bf16.mxu0 %v13024_v9 }
 0x62f   : > { %3693 = vmatpush1.bf16.msra.mxu0 %v13666_v21 }
 0x630   : > { %11937 = vmatprep.subr.bf16.mxu0 %v13025_v45 }
 0x632   : > { %3707 = vmatmul.mubr.bf16.vlgmr.msra.gmra.mrb[64].mxu0 %v12527_v27  ;;  %v12547_v27 = vld [vmem:[%s13613_s29 + $0x70] ss:$8 sps:$4 sm:$0xff]  }
 0x633   : > { %11953 = vmatprep.mubr.msk.bf16.mxu0 %vm13026_vm2, %v13025_v45  ;;  %11938 = vmatpush3.bf16.msra.mxu0 %v12531_v5  ;;  %v12552_v5 = vld [vmem:[%s17698_s6 + $0x1c8] sm:$0xff]  }
 0x634   : > { %11939 = vmatprep.subr.bf16.mxu0 %v13025_v45 }
 0x637   : > { %11940 = vmatpush3.bf16.msra.mxu0 %v12532_v38  ;;  %v12554_v38 = vld [vmem:[%s17698_s6 + $0x1d8] sm:$0xff]  }
 0x638   : > { %11941 = vmatprep.subr.bf16.mxu0 %v13025_v45 }
 0x63b   : > { %11942 = vmatpush3.bf16.msra.mxu0 %v12533_v39  ;;  %v12555_v39 = vld [vmem:[%s17698_s6 + $0x1e0] sm:$0xff]  }
 0x63c   : > { %11943 = vmatprep.subr.bf16.mxu0 %v13025_v45 }
 0x63f   : > { %11944 = vmatpush3.bf16.msra.mxu0 %v12534_v40  ;;  %v12556_v40 = vld [vmem:[%s17698_s6 + $0x1e8] sm:$0xff]  }
 0x640   : > { %11945 = vmatprep.subr.bf16.mxu0 %v13025_v45 }
 0x643   : > { %11946 = vmatpush3.bf16.msra.mxu0 %v12535_v41  ;;  %v12557_v41 = vld [vmem:[%s17698_s6 + $0x1f0] sm:$0xff]  }
 0x644   : > { %11947 = vmatprep.subr.bf16.mxu0 %v13025_v45 }
 0x647   : > { %11948 = vmatpush3.bf16.msra.mxu0 %v12536_v8  ;;  %v12558_v8 = vld [vmem:[%s17698_s6 + $0x1f8] sm:$0xff]  }
 0x648   : > { %11949 = vmatprep.subr.bf16.mxu0 %v13025_v45 }
 0x64b   : > { %11950 = vmatpush3.bf16.msra.mxu0 %v12537_v10  ;;  %v12559_v10 = vld [vmem:[%s13597_s14 + $0x84] ss:$8 sps:$4 sm:$0xff]  }
 0x64c   : > { %11951 = vmatprep.subr.bf16.mxu0 %v13025_v45 }
 0x64f   : > { %11952 = vmatpush3.bf16.msra.mxu0 %v12538_v11  ;;  %v12561_v11 = vld [vmem:[%s13597_s14 + $0x80] ss:$8 sps:$4 sm:$0xff]  }
 0x650   : > { %3959 = vmatprep.subr.bf16.mxu0 %v13024_v9 }
 0x665   : > { %v3193_v20 = vpop.f32.mrb[48].mxu0 }
 0x666   : > { %v14603_v24 = vadd.f32 %v3193_v20, %v14432_v23  ;;  %v11915_v25 = vpop.f32.mrb[49].mxu0 }
 0x667   : > { %v3196_v22 = vpop.f32.mrb[50].mxu0 }
 0x668   : > { %v14607_v29 = vadd.f32 %v3196_v22, %v14436_v43  ;;  %v11916_v26 = vpop.f32.mrb[51].mxu0  ;;  %v12545_v22 = vld [vmem:[%s13613_s29 + $0x74] ss:$8 sps:$4 sm:$0xff]  }
 0x68d   : > { %v3307_v42 = vpop.f32.mrb[52].mxu0 }
 0x68e   : > { %v3314_v23 = vmax.f32 %v14509_v34, %v3307_v42  ;;  %v3309_v30 = vpop.f32.mrb[53].mxu0 }
 0x68f   : > { %v3310_v32 = vpop.f32.mrb[54].mxu0 }
 0x690   : > { %v3315_v43 = vmax.f32 %v14512_v7, %v3310_v32  ;;  %v3372_v44 = vmax.f32 %v3314_v23, %v14530_v36  ;;  %v3312_v47 = vpop.f32.mrb[55].mxu0 }
 0x692   : > { %v3373_v33 = vmax.f32 %v3315_v43, %v14532_v6 }
 0x6b5   : > { %v3423_v49 = vpop.f32.mrb[56].mxu0 }
 0x6b6   : > { %v3430_v50 = vmax.f32 %v3372_v44, %v3423_v49  ;;  %v3425_v31 = vpop.f32.mrb[57].mxu0 }
 0x6b7   : > { %v3426_v48 = vpop.f32.mrb[58].mxu0 }
 0x6b8   : > { %v3432_v51 = vadd.f32 %v14451_v57, %v3430_v50  ;;  %v3431_v52 = vmax.f32 %v3373_v33, %v3426_v48  ;;  %v3428_v53 = vpop.f32.mrb[59].mxu0 }
 0x6ba   : > { %v3433_v46 = vadd.f32 %v14451_v57, %v3431_v52  ;;  %v3434_v54 = vmax.f32 %v3432_v51, 0.0 }
 0x6bc   : > { %v3435_v55 = vmax.f32 %v3433_v46, 0.0 }
 0x6be   : > { %v3436_v58 = vpack.c.bf16 %v3435_v55, %v3434_v54  ;;  %v12542_v54 = vld [vmem:[%s13609_s16 + $0x74] ss:$8 sps:$4 sm:$0xff]  }
 0x6c0   : > { %11934 = vmatmul.mubr.bf16.vlgmr.msra.gmra.mrb[56].mxu1 %v3436_v58  ;;  %v12548_v58 = vld [vmem:[%s13615_s17 + $0x74] ss:$8 sps:$4 sm:$0xff]  }
 0x6c1   : > { %3617 = vmatpush1.bf16.msra.mxu1 %v14459_v2  ;;  %10718 = vmatprep.mubr.msk.bf16.mxu1 %vm1496_vm0, %v12522_v56  ;;  %v12544_v56 = vld [vmem:[%s13609_s16 + $0x70] ss:$8 sps:$4 sm:$0xff]  }
 0x6c2   : > { %3618 = vmatprep.subr.bf16.mxu1 %v13024_v9 }
 0x6c5   : > { %3619 = vmatpush1.bf16.msra.mxu1 %v14574_v17 }
 0x6c6   : > { %3620 = vmatprep.subr.bf16.mxu1 %v13024_v9 }
 0x6c9   : > { %3621 = vmatpush1.bf16.msra.mxu1 %v14581_v18 }
 0x6ca   : > { %3622 = vmatprep.subr.bf16.mxu1 %v13024_v9 }
 0x6cd   : > { %3623 = vmatpush1.bf16.msra.mxu1 %v14588_v19 }
 0x6ce   : > { %3624 = vmatprep.subr.bf16.mxu1 %v13024_v9 }
 0x6d1   : > { %3625 = vmatpush1.bf16.msra.mxu1 %v14634_v59 }
 0x6d2   : > { %3626 = vmatprep.subr.bf16.mxu1 %v13024_v9 }
 0x6d5   : > { %3627 = vmatpush1.bf16.msra.mxu1 %v14641_v60 }
 0x6d6   : > { %3628 = vmatprep.subr.bf16.mxu1 %v13024_v9 }
 0x6d9   : > { %3629 = vmatpush1.bf16.msra.mxu1 %v14648_v61 }
 0x6da   : > { %3630 = vmatprep.subr.bf16.mxu1 %v13024_v9 }
 0x6dd   : > { %3631 = vmatpush1.bf16.msra.mxu1 %v14655_v62  ;;  %v14695_v4 = vpop.f32.mrb[60].mxu0 }
 0x6de   : > { %3632 = vmatprep.subr.bf16.mxu1 %v13024_v9  ;;  %v3596_v13 = vpop.f32.mrb[61].mxu0 }
 0x6df   : > { %v14698_v34 = vpop.f32.mrb[62].mxu0 }
 0x6e0   : > { %v3599_v35 = vpop.f32.mrb[63].mxu0 }
 0x6e1   : > { %3633 = vmatpush1.bf16.msra.mxu1 %v14662_v63 }
 0x6e2   : > { %3634 = vmatprep.subr.bf16.mxu1 %v13024_v9 }
 0x6e5   : > { %3635 = vmatpush1.bf16.msra.mxu1 %v13666_v21 }
 0x6e6   : > { %3732 = vmatprep.subr.bf16.mxu1 %v13024_v9 }
 0x6e8   : > { %3649 = vmatmul.mubr.bf16.vlgmr.msra.gmra.mrb[60].mxu1 %v12524_v0  ;;  %v12550_v0 = vld [vmem:[%s13615_s17 + $0x70] ss:$8 sps:$4 sm:$0xff]  }
 0x6e9   : > { %3733 = vmatpush1.bf16.msra.mxu1 %v14459_v2  ;;  %10728 = vmatprep.mubr.msk.bf16.mxu1 %vm1496_vm0, %v12528_v1 }
 0x6ea   : > { %3734 = vmatprep.subr.bf16.mxu1 %v13024_v9 }
 0x6ed   : > { %3735 = vmatpush1.bf16.msra.mxu1 %v14574_v17 }
 0x6ee   : > { %3736 = vmatprep.subr.bf16.mxu1 %v13024_v9 }
 0x6f1   : > { %3737 = vmatpush1.bf16.msra.mxu1 %v14581_v18 }
 0x6f2   : > { %3738 = vmatprep.subr.bf16.mxu1 %v13024_v9 }
 0x6f5   : > { %3739 = vmatpush1.bf16.msra.mxu1 %v14588_v19 }
 0x6f6   : > { %3740 = vmatprep.subr.bf16.mxu1 %v13024_v9 }
 0x6f9   : > { %3741 = vmatpush1.bf16.msra.mxu1 %v14634_v59 }
 0x6fa   : > { %3742 = vmatprep.subr.bf16.mxu1 %v13024_v9 }
 0x6fd   : > { %3743 = vmatpush1.bf16.msra.mxu1 %v14641_v60 }
 0x6fe   : > { %3744 = vmatprep.subr.bf16.mxu1 %v13024_v9 }
 0x701   : > { %3745 = vmatpush1.bf16.msra.mxu1 %v14648_v61 }
 0x702   : > { %3746 = vmatprep.subr.bf16.mxu1 %v13024_v9 }
 0x705   : > { %3747 = vmatpush1.bf16.msra.mxu1 %v14655_v62  ;;  %v14716_v7 = vpop.f32.mrb[64].mxu0 }
 0x706   : > { %3748 = vmatprep.subr.bf16.mxu1 %v13024_v9  ;;  %v3710_v37 = vpop.f32.mrb[65].mxu0 }
 0x707   : > { %v14718_v36 = vpop.f32.mrb[66].mxu0  ;;  %v12551_v37 = vld [vmem:[%s17698_s6 + $0x1c0] sm:$0xff]  }
 0x708   : > { %v3713_v6 = vpop.f32.mrb[67].mxu0 }
 0x709   : > { %3749 = vmatpush1.bf16.msra.mxu1 %v14662_v63  ;;  %v12553_v6 = vld [vmem:[%s17698_s6 + $0x1d0] sm:$0xff]  }
 0x70a   : > { %3750 = vmatprep.subr.bf16.mxu1 %v13024_v9 }
 0x70d   : > { %3751 = vmatpush1.bf16.msra.mxu1 %v13666_v21 }
 0x70e   : > { %3903 = vmatprep.subr.bf16.mxu1 %v13024_v9 }
 0x710   : > { %3765 = vmatmul.mubr.bf16.vlgmr.msra.gmra.mrb[64].mxu1 %v12530_v3 }
 0x711   : > { %3904 = vmatpush1.bf16.msra.mxu1 %v14459_v2  ;;  %10757 = vmatprep.mubr.msk.bf16.mxu1 %vm1496_vm0, %v12539_v12 }
 0x712   : > { %3905 = vmatprep.subr.bf16.mxu1 %v13024_v9 }
 0x715   : > { %3906 = vmatpush1.bf16.msra.mxu1 %v14574_v17 }
 0x716   : > { %3907 = vmatprep.subr.bf16.mxu1 %v13024_v9 }
 0x719   : > { %3908 = vmatpush1.bf16.msra.mxu1 %v14581_v18 }
 0x71a   : > { %3909 = vmatprep.subr.bf16.mxu1 %v13024_v9 }
 0x71d   : > { %3910 = vmatpush1.bf16.msra.mxu1 %v14588_v19 }
 0x71e   : > { %3911 = vmatprep.subr.bf16.mxu1 %v13024_v9 }
 0x721   : > { %3912 = vmatpush1.bf16.msra.mxu1 %v14634_v59 }
 0x722   : > { %3913 = vmatprep.subr.bf16.mxu1 %v13024_v9 }
 0x725   : > { %3914 = vmatpush1.bf16.msra.mxu1 %v14641_v60 }
 0x726   : > { %3915 = vmatprep.subr.bf16.mxu1 %v13024_v9 }
 0x729   : > { %3916 = vmatpush1.bf16.msra.mxu1 %v14648_v61 }
 0x72a   : > { %3917 = vmatprep.subr.bf16.mxu1 %v13024_v9 }
 0x72d   : > { %3918 = vmatpush1.bf16.msra.mxu1 %v14655_v62 }
 0x72e   : > { %3919 = vmatprep.subr.bf16.mxu1 %v13024_v9 }
 0x731   : > { %3920 = vmatpush1.bf16.msra.mxu1 %v14662_v63 }
 0x732   : > { %3921 = vmatprep.subr.bf16.mxu1 %v13024_v9 }
 0x735   : > { %3922 = vmatpush1.bf16.msra.mxu1 %v13666_v21 }
 0x736   : > { %4017 = vmatprep.subr.bf16.mxu1 %v13024_v9 }
 0x738   : > { %3936 = vmatmul.mubr.bf16.vlgmr.msra.gmra.mrb[68].mxu1 %v12541_v14 }
 0x739   : > { %4018 = vmatpush1.bf16.msra.mxu1 %v14459_v2  ;;  %10767 = vmatprep.mubr.msk.bf16.mxu1 %vm1496_vm0, %v12545_v22 }
 0x73a   : > { %4019 = vmatprep.subr.bf16.mxu1 %v13024_v9 }
 0x73d   : > { %4020 = vmatpush1.bf16.msra.mxu1 %v14574_v17 }
 0x73e   : > { %4021 = vmatprep.subr.bf16.mxu1 %v13024_v9 }
 0x741   : > { %4022 = vmatpush1.bf16.msra.mxu1 %v14581_v18 }
 0x742   : > { %4023 = vmatprep.subr.bf16.mxu1 %v13024_v9 }
 0x745   : > { %4024 = vmatpush1.bf16.msra.mxu1 %v14588_v19 }
 0x746   : > { %4025 = vmatprep.subr.bf16.mxu1 %v13024_v9 }
 0x749   : > { %4026 = vmatpush1.bf16.msra.mxu1 %v14634_v59 }
 0x74a   : > { %4027 = vmatprep.subr.bf16.mxu1 %v13024_v9 }
 0x74d   : > { %4028 = vmatpush1.bf16.msra.mxu1 %v14641_v60 }
 0x74e   : > { %4029 = vmatprep.subr.bf16.mxu1 %v13024_v9 }
 0x751   : > { %4030 = vmatpush1.bf16.msra.mxu1 %v14648_v61 }
 0x752   : > { %4031 = vmatprep.subr.bf16.mxu1 %v13024_v9 }
 0x755   : > { %4032 = vmatpush1.bf16.msra.mxu1 %v14655_v62 }
 0x756   : > { %4033 = vmatprep.subr.bf16.mxu1 %v13024_v9 }
 0x759   : > { %4034 = vmatpush1.bf16.msra.mxu1 %v14662_v63 }
 0x75a   : > { %4035 = vmatprep.subr.bf16.mxu1 %v13024_v9 }
 0x75d   : > { %4036 = vmatpush1.bf16.msra.mxu1 %v13666_v21 }
 0x75e   : > { %11957 = vmatprep.subr.bf16.mxu1 %v13025_v45 }
 0x760   : > { %4050 = vmatmul.mubr.bf16.vlgmr.msra.gmra.mrb[72].mxu1 %v12547_v27  ;;  %v12567_v27 = vld [vmem:[%s13613_s29 + $0x80] ss:$8 sps:$4 sm:$0xff]  }
 0x761   : > { %11973 = vmatprep.mubr.msk.bf16.mxu1 %vm13026_vm2, %v13025_v45  ;;  %11958 = vmatpush3.bf16.msra.mxu1 %v12551_v37  ;;  %v12573_v37 = vld [vmem:[%s17698_s6 + $0x210] sm:$0xff]  }
 0x762   : > { %11959 = vmatprep.subr.bf16.mxu1 %v13025_v45 }
 0x765   : > { %11960 = vmatpush3.bf16.msra.mxu1 %v12552_v5  ;;  %v12575_v5 = vld [vmem:[%s17698_s6 + $0x220] sm:$0xff]  }
 0x766   : > { %11961 = vmatprep.subr.bf16.mxu1 %v13025_v45 }
 0x769   : > { %11962 = vmatpush3.bf16.msra.mxu1 %v12553_v6  ;;  %v12576_v6 = vld [vmem:[%s17698_s6 + $0x228] sm:$0xff]  }
 0x76a   : > { %11963 = vmatprep.subr.bf16.mxu1 %v13025_v45 }
 0x76d   : > { %11964 = vmatpush3.bf16.msra.mxu1 %v12554_v38  ;;  %v12577_v38 = vld [vmem:[%s17698_s6 + $0x230] sm:$0xff]  }
 0x76e   : > { %11965 = vmatprep.subr.bf16.mxu1 %v13025_v45 }
 0x771   : > { %11966 = vmatpush3.bf16.msra.mxu1 %v12555_v39  ;;  %v12578_v39 = vld [vmem:[%s17698_s6 + $0x238] sm:$0xff]  }
 0x772   : > { %11967 = vmatprep.subr.bf16.mxu1 %v13025_v45 }
 0x775   : > { %11968 = vmatpush3.bf16.msra.mxu1 %v12556_v40  ;;  %v12579_v40 = vld [vmem:[%s13597_s14 + $0x94] ss:$8 sps:$4 sm:$0xff]  }
 0x776   : > { %11969 = vmatprep.subr.bf16.mxu1 %v13025_v45 }
 0x779   : > { %11970 = vmatpush3.bf16.msra.mxu1 %v12557_v41  ;;  %v12581_v41 = vld [vmem:[%s13597_s14 + $0x90] ss:$8 sps:$4 sm:$0xff]  }
 0x77a   : > { %11971 = vmatprep.subr.bf16.mxu1 %v13025_v45 }
 0x77d   : > { %11972 = vmatpush3.bf16.msra.mxu1 %v12558_v8 }
 0x77e   : > { %4302 = vmatprep.subr.bf16.mxu1 %v13024_v9 }
 0x793   : > { %v3536_v15 = vpop.f32.mrb[56].mxu1 }
 0x794   : > { %v14774_v16 = vadd.f32 %v3536_v15, %v14603_v24  ;;  %v11935_v20 = vpop.f32.mrb[57].mxu1 }
 0x795   : > { %v3539_v25 = vpop.f32.mrb[58].mxu1 }
 0x796   : > { %v14778_v28 = vadd.f32 %v3539_v25, %v14607_v29  ;;  %v11936_v26 = vpop.f32.mrb[59].mxu1  ;;  %v12565_v25 = vld [vmem:[%s13613_s29 + $0x84] ss:$8 sps:$4 sm:$0xff]  }
 0x7bb   : > { %v3650_v24 = vpop.f32.mrb[60].mxu1 }
 0x7bc   : > { %v3657_v42 = vmax.f32 %v14695_v4, %v3650_v24  ;;  %v3652_v23 = vpop.f32.mrb[61].mxu1 }
 0x7bd   : > { %v3653_v30 = vpop.f32.mrb[62].mxu1 }
 0x7be   : > { %v3658_v29 = vmax.f32 %v14698_v34, %v3653_v30  ;;  %v3715_v32 = vmax.f32 %v3657_v42, %v14716_v7  ;;  %v3655_v43 = vpop.f32.mrb[63].mxu1 }
 0x7c0   : > { %v3716_v44 = vmax.f32 %v3658_v29, %v14718_v36 }
 0x7e3   : > { %v3766_v47 = vpop.f32.mrb[64].mxu1 }
 0x7e4   : > { %v3773_v33 = vmax.f32 %v3715_v32, %v3766_v47  ;;  %v3768_v49 = vpop.f32.mrb[65].mxu1 }
 0x7e5   : > { %v3769_v50 = vpop.f32.mrb[66].mxu1 }
 0x7e6   : > { %v3775_v31 = vadd.f32 %v14451_v57, %v3773_v33  ;;  %v3774_v48 = vmax.f32 %v3716_v44, %v3769_v50  ;;  %v3771_v51 = vpop.f32.mrb[67].mxu1 }
 0x7e8   : > { %v3776_v52 = vadd.f32 %v14451_v57, %v3774_v48  ;;  %v3777_v53 = vmax.f32 %v3775_v31, 0.0 }
 0x7ea   : > { %v3778_v46 = vmax.f32 %v3776_v52, 0.0 }
 0x7ec   : > { %v3779_v55 = vpack.c.bf16 %v3778_v46, %v3777_v53  ;;  %v12562_v53 = vld [vmem:[%s13609_s16 + $0x84] ss:$8 sps:$4 sm:$0xff]  }
 0x7ee   : > { %11954 = vmatmul.mubr.bf16.vlgmr.msra.gmra.mrb[68].mxu0 %v3779_v55  ;;  %v14987_v55 = vld [vmem:[%s17696_s4] sm:$0xff]  }
 0x7ef   : > { %3960 = vmatpush1.bf16.msra.mxu0 %v14459_v2  ;;  %10762 = vmatprep.mubr.msk.bf16.mxu0 %vm1496_vm0, %v12542_v54  ;;  %v12568_v54 = vld [vmem:[%s13615_s17 + $0x84] ss:$8 sps:$4 sm:$0xff]  }
 0x7f0   : > { %3961 = vmatprep.subr.bf16.mxu0 %v13024_v9 }
 0x7f3   : > { %3962 = vmatpush1.bf16.msra.mxu0 %v14574_v17 }
 0x7f4   : > { %3963 = vmatprep.subr.bf16.mxu0 %v13024_v9 }
 0x7f7   : > { %3964 = vmatpush1.bf16.msra.mxu0 %v14581_v18 }
 0x7f8   : > { %3965 = vmatprep.subr.bf16.mxu0 %v13024_v9 }
 0x7fb   : > { %3966 = vmatpush1.bf16.msra.mxu0 %v14588_v19 }
 0x7fc   : > { %3967 = vmatprep.subr.bf16.mxu0 %v13024_v9 }
 0x7ff   : > { %3968 = vmatpush1.bf16.msra.mxu0 %v14634_v59 }
 0x800   : > { %3969 = vmatprep.subr.bf16.mxu0 %v13024_v9 }
 0x803   : > { %3970 = vmatpush1.bf16.msra.mxu0 %v14641_v60 }
 0x804   : > { %3971 = vmatprep.subr.bf16.mxu0 %v13024_v9 }
 0x807   : > { %3972 = vmatpush1.bf16.msra.mxu0 %v14648_v61 }
 0x808   : > { %3973 = vmatprep.subr.bf16.mxu0 %v13024_v9 }
 0x80b   : > { %3974 = vmatpush1.bf16.msra.mxu0 %v14655_v62  ;;  %v14841_v1 = vpop.f32.mrb[68].mxu1 }
 0x80c   : > { %3975 = vmatprep.subr.bf16.mxu0 %v13024_v9  ;;  %v3939_v3 = vpop.f32.mrb[69].mxu1 }
 0x80d   : > { %v14844_v4 = vpop.f32.mrb[70].mxu1 }
 0x80e   : > { %v3942_v13 = vpop.f32.mrb[71].mxu1 }
 0x80f   : > { %3976 = vmatpush1.bf16.msra.mxu0 %v14662_v63 }
 0x810   : > { %3977 = vmatprep.subr.bf16.mxu0 %v13024_v9 }
 0x813   : > { %3978 = vmatpush1.bf16.msra.mxu0 %v13666_v21 }
 0x814   : > { %4075 = vmatprep.subr.bf16.mxu0 %v13024_v9 }
 0x816   : > { %3992 = vmatmul.mubr.bf16.vlgmr.msra.gmra.mrb[72].mxu0 %v12544_v56 }
 0x817   : > { %4076 = vmatpush1.bf16.msra.mxu0 %v14459_v2  ;;  %10772 = vmatprep.mubr.msk.bf16.mxu0 %vm1496_vm0, %v12548_v58 }
 0x818   : > { %4077 = vmatprep.subr.bf16.mxu0 %v13024_v9 }
 0x81b   : > { %4078 = vmatpush1.bf16.msra.mxu0 %v14574_v17 }
 0x81c   : > { %4079 = vmatprep.subr.bf16.mxu0 %v13024_v9 }
 0x81f   : > { %4080 = vmatpush1.bf16.msra.mxu0 %v14581_v18 }
 0x820   : > { %4081 = vmatprep.subr.bf16.mxu0 %v13024_v9 }
 0x823   : > { %4082 = vmatpush1.bf16.msra.mxu0 %v14588_v19 }
 0x824   : > { %4083 = vmatprep.subr.bf16.mxu0 %v13024_v9 }
 0x827   : > { %4084 = vmatpush1.bf16.msra.mxu0 %v14634_v59 }
 0x828   : > { %4085 = vmatprep.subr.bf16.mxu0 %v13024_v9 }
 0x82b   : > { %4086 = vmatpush1.bf16.msra.mxu0 %v14641_v60 }
 0x82c   : > { %4087 = vmatprep.subr.bf16.mxu0 %v13024_v9 }
 0x82f   : > { %4088 = vmatpush1.bf16.msra.mxu0 %v14648_v61 }
 0x830   : > { %4089 = vmatprep.subr.bf16.mxu0 %v13024_v9 }
 0x833   : > { %4090 = vmatpush1.bf16.msra.mxu0 %v14655_v62  ;;  %v14862_v34 = vpop.f32.mrb[72].mxu1 }
 0x834   : > { %4091 = vmatprep.subr.bf16.mxu0 %v13024_v9  ;;  %v4053_v35 = vpop.f32.mrb[73].mxu1 }
 0x835   : > { %v14864_v7 = vpop.f32.mrb[74].mxu1 }
 0x836   : > { %v4056_v36 = vpop.f32.mrb[75].mxu1 }
 0x837   : > { %4092 = vmatpush1.bf16.msra.mxu0 %v14662_v63  ;;  %v12574_v36 = vld [vmem:[%s17698_s6 + $0x218] sm:$0xff]  }
 0x838   : > { %4093 = vmatprep.subr.bf16.mxu0 %v13024_v9 }
 0x83b   : > { %4094 = vmatpush1.bf16.msra.mxu0 %v13666_v21 }
 0x83c   : > { %4246 = vmatprep.subr.bf16.mxu0 %v13024_v9 }
 0x83e   : > { %4108 = vmatmul.mubr.bf16.vlgmr.msra.gmra.mrb[76].mxu0 %v12550_v0 }
 0x83f   : > { %4247 = vmatpush1.bf16.msra.mxu0 %v14459_v2  ;;  %10801 = vmatprep.mubr.msk.bf16.mxu0 %vm1496_vm0, %v12559_v10  ;;  %v12585_v10 = vld [vmem:[%s13613_s29 + $0x94] ss:$8 sps:$4 sm:$0xff]  }
 0x840   : > { %4248 = vmatprep.subr.bf16.mxu0 %v13024_v9 }
 0x843   : > { %4249 = vmatpush1.bf16.msra.mxu0 %v14574_v17 }
 0x844   : > { %4250 = vmatprep.subr.bf16.mxu0 %v13024_v9 }
 0x847   : > { %4251 = vmatpush1.bf16.msra.mxu0 %v14581_v18 }
 0x848   : > { %4252 = vmatprep.subr.bf16.mxu0 %v13024_v9 }
 0x84b   : > { %4253 = vmatpush1.bf16.msra.mxu0 %v14588_v19 }
 0x84c   : > { %4254 = vmatprep.subr.bf16.mxu0 %v13024_v9 }
 0x84f   : > { %4255 = vmatpush1.bf16.msra.mxu0 %v14634_v59 }
 0x850   : > { %4256 = vmatprep.subr.bf16.mxu0 %v13024_v9 }
 0x853   : > { %4257 = vmatpush1.bf16.msra.mxu0 %v14641_v60 }
 0x854   : > { %4258 = vmatprep.subr.bf16.mxu0 %v13024_v9 }
 0x857   : > { %4259 = vmatpush1.bf16.msra.mxu0 %v14648_v61 }
 0x858   : > { %4260 = vmatprep.subr.bf16.mxu0 %v13024_v9 }
 0x85b   : > { %4261 = vmatpush1.bf16.msra.mxu0 %v14655_v62 }
 0x85c   : > { %4262 = vmatprep.subr.bf16.mxu0 %v13024_v9 }
 0x85f   : > { %4263 = vmatpush1.bf16.msra.mxu0 %v14662_v63 }
 0x860   : > { %4264 = vmatprep.subr.bf16.mxu0 %v13024_v9 }
 0x863   : > { %4265 = vmatpush1.bf16.msra.mxu0 %v13666_v21 }
 0x864   : > { %4360 = vmatprep.subr.bf16.mxu0 %v13024_v9 }
 0x866   : > { %4279 = vmatmul.mubr.bf16.vlgmr.msra.gmra.mrb[80].mxu0 %v12561_v11 }
 0x867   : > { %4361 = vmatpush1.bf16.msra.mxu0 %v14459_v2  ;;  %10811 = vmatprep.mubr.msk.bf16.mxu0 %vm1496_vm0, %v12565_v25 }
 0x868   : > { %4362 = vmatprep.subr.bf16.mxu0 %v13024_v9 }
 0x86b   : > { %4363 = vmatpush1.bf16.msra.mxu0 %v14574_v17 }
 0x86c   : > { %4364 = vmatprep.subr.bf16.mxu0 %v13024_v9 }
 0x86f   : > { %4365 = vmatpush1.bf16.msra.mxu0 %v14581_v18 }
 0x870   : > { %4366 = vmatprep.subr.bf16.mxu0 %v13024_v9 }
 0x873   : > { %4367 = vmatpush1.bf16.msra.mxu0 %v14588_v19 }
 0x874   : > { %4368 = vmatprep.subr.bf16.mxu0 %v13024_v9 }
 0x877   : > { %4369 = vmatpush1.bf16.msra.mxu0 %v14634_v59 }
 0x878   : > { %4370 = vmatprep.subr.bf16.mxu0 %v13024_v9 }
 0x87b   : > { %4371 = vmatpush1.bf16.msra.mxu0 %v14641_v60 }
 0x87c   : > { %4372 = vmatprep.subr.bf16.mxu0 %v13024_v9 }
 0x87f   : > { %4373 = vmatpush1.bf16.msra.mxu0 %v14648_v61 }
 0x880   : > { %4374 = vmatprep.subr.bf16.mxu0 %v13024_v9 }
 0x883   : > { %4375 = vmatpush1.bf16.msra.mxu0 %v14655_v62 }
 0x884   : > { %4376 = vmatprep.subr.bf16.mxu0 %v13024_v9 }
 0x887   : > { %4377 = vmatpush1.bf16.msra.mxu0 %v14662_v63 }
 0x888   : > { %4378 = vmatprep.subr.bf16.mxu0 %v13024_v9 }
 0x88b   : > { %4379 = vmatpush1.bf16.msra.mxu0 %v13666_v21 }
 0x88c   : > { %11977 = vmatprep.subr.bf16.mxu0 %v13025_v45 }
 0x88e   : > { %4393 = vmatmul.mubr.bf16.vlgmr.msra.gmra.mrb[84].mxu0 %v12567_v27 }
 0x88f   : > { %11993 = vmatprep.mubr.msk.bf16.mxu0 %vm13026_vm2, %v13025_v45 }
 0x8c1   : > { %v3879_v12 = vpop.f32.mrb[68].mxu0 }
 0x8c2   : > { %v14920_v14 = vadd.f32 %v3879_v12, %v14774_v16  ;;  %v11955_v15 = vpop.f32.mrb[69].mxu0 }
 0x8c3   : > { %v3882_v20 = vpop.f32.mrb[70].mxu0  ;;  %v12587_v15 = vld [vmem:[%s13613_s29 + $0x90] ss:$8 sps:$4 sm:$0xff]  }
 0x8c4   : > { %v14924_v22 = vadd.f32 %v3882_v20, %v14778_v28  ;;  %v11956_v26 = vpop.f32.mrb[71].mxu0 }
 0x8e9   : > { %v3993_v16 = vpop.f32.mrb[72].mxu0 }
 0x8ea   : > { %v4000_v24 = vmax.f32 %v14841_v1, %v3993_v16  ;;  %v3995_v42 = vpop.f32.mrb[73].mxu0 }
 0x8eb   : > { %v3996_v23 = vpop.f32.mrb[74].mxu0 }
 0x8ec   : > { %v4001_v28 = vmax.f32 %v14844_v4, %v3996_v23  ;;  %v4058_v30 = vmax.f32 %v4000_v24, %v14862_v34  ;;  %v3998_v29 = vpop.f32.mrb[75].mxu0  ;;  %v12571_v34 = vld [vmem:[%s17698_s6 + $0x200] sm:$0xff]  }
 0x8ed   : > { %11978 = vmatpush3.bf16.msra.mxu0 %v12571_v34  ;;  %v15090_v29 = vld [vmem:[%s17697_s5] ss:$0 sm:$0xff]  ;;  %v12592_v34 = vld [vmem:[%s17698_s6 + $0x248] sm:$0xff]  }
 0x8ee   : > { %v4059_v32 = vmax.f32 %v4001_v28, %v14864_v7  ;;  %v12572_v7 = vld [vmem:[%s17698_s6 + $0x208] sm:$0xff]   ;;  %11979 = vmatprep.subr.bf16.mxu0 %v13025_v45 }
 0x8f1   : > { %11980 = vmatpush3.bf16.msra.mxu0 %v12572_v7  ;;  %v12594_v7 = vld [vmem:[%s17698_s6 + $0x258] sm:$0xff]  }
 0x8f2   : > { %11981 = vmatprep.subr.bf16.mxu0 %v13025_v45 }
 0x8f5   : > { %11982 = vmatpush3.bf16.msra.mxu0 %v12573_v37  ;;  %v12595_v37 = vld [vmem:[%s17698_s6 + $0x260] sm:$0xff]  }
 0x8f6   : > { %11983 = vmatprep.subr.bf16.mxu0 %v13025_v45 }
 0x8f9   : > { %11984 = vmatpush3.bf16.msra.mxu0 %v12574_v36  ;;  %v12596_v36 = vld [vmem:[%s17698_s6 + $0x268] sm:$0xff]  }
 0x8fa   : > { %11985 = vmatprep.subr.bf16.mxu0 %v13025_v45 }
 0x8fd   : > { %11986 = vmatpush3.bf16.msra.mxu0 %v12575_v5  ;;  %v12597_v5 = vld [vmem:[%s17698_s6 + $0x270] sm:$0xff]  }
 0x8fe   : > { %11987 = vmatprep.subr.bf16.mxu0 %v13025_v45 }
 0x901   : > { %11988 = vmatpush3.bf16.msra.mxu0 %v12576_v6  ;;  %v12598_v6 = vld [vmem:[%s17698_s6 + $0x278] sm:$0xff]  }
 0x902   : > { %11989 = vmatprep.subr.bf16.mxu0 %v13025_v45 }
 0x905   : > { %11990 = vmatpush3.bf16.msra.mxu0 %v12577_v38  ;;  %v12599_v38 = vld [vmem:[%s13597_s14 + $0xa4] ss:$8 sps:$4 sm:$0xff]  }
 0x906   : > { %11991 = vmatprep.subr.bf16.mxu0 %v13025_v45 }
 0x909   : > { %11992 = vmatpush3.bf16.msra.mxu0 %v12578_v39  ;;  %v12601_v39 = vld [vmem:[%s13597_s14 + $0xa0] ss:$8 sps:$4 sm:$0xff]  }
 0x90a   : > { %4645 = vmatprep.subr.bf16.mxu0 %v13024_v9 }
 0x911   : > { %v4109_v43 = vpop.f32.mrb[76].mxu0 }
 0x912   : > { %v4116_v44 = vmax.f32 %v4058_v30, %v4109_v43  ;;  %v4111_v47 = vpop.f32.mrb[77].mxu0 }
 0x913   : > { %v4112_v33 = vpop.f32.mrb[78].mxu0 }
 0x914   : > { %v4118_v49 = vadd.f32 %v14451_v57, %v4116_v44  ;;  %v4117_v50 = vmax.f32 %v4059_v32, %v4112_v33  ;;  %v4114_v31 = vpop.f32.mrb[79].mxu0 }
 0x916   : > { %v4119_v48 = vadd.f32 %v14451_v57, %v4117_v50  ;;  %v4120_v51 = vmax.f32 %v4118_v49, 0.0  ;;  %v12564_v57 = vld [vmem:[%s13609_s16 + $0x80] ss:$8 sps:$4 sm:$0xff]   ;;  %v12582_v50 = vld [vmem:[%s13609_s16 + $0x94] ss:$8 sps:$4 sm:$0xff]  }
 0x918   : > { %v4121_v52 = vmax.f32 %v4119_v48, 0.0  ;;  %v15101_v48 = vld [vmem:[%s17696_s4 + $0x8] sm:$0xff]  }
 0x91a   : > { %v4122_v46 = vpack.c.bf16 %v4121_v52, %v4120_v51  ;;  %v15108_v51 = vld [vmem:[%s17696_s4 + $0x10] sm:$0xff]   ;;  %v15115_v52 = vld [vmem:[%s17696_s4 + $0x18] sm:$0xff]  }
 0x91c   : > { %11974 = vmatmul.mubr.bf16.vlgmr.msra.gmra.mrb[76].mxu1 %v4122_v46  ;;  %v12588_v46 = vld [vmem:[%s13615_s17 + $0x94] ss:$8 sps:$4 sm:$0xff]  }
 0x91d   : > { %4303 = vmatpush1.bf16.msra.mxu1 %v14459_v2  ;;  %10806 = vmatprep.mubr.msk.bf16.mxu1 %vm1496_vm0, %v12562_v53  ;;  %v12584_v53 = vld [vmem:[%s13609_s16 + $0x90] ss:$8 sps:$4 sm:$0xff]  }
 0x91e   : > { %4304 = vmatprep.subr.bf16.mxu1 %v13024_v9 }
 0x921   : > { %4305 = vmatpush1.bf16.msra.mxu1 %v14574_v17 }
 0x922   : > { %4306 = vmatprep.subr.bf16.mxu1 %v13024_v9 }
 0x925   : > { %4307 = vmatpush1.bf16.msra.mxu1 %v14581_v18 }
 0x926   : > { %4308 = vmatprep.subr.bf16.mxu1 %v13024_v9 }
 0x929   : > { %4309 = vmatpush1.bf16.msra.mxu1 %v14588_v19 }
 0x92a   : > { %4310 = vmatprep.subr.bf16.mxu1 %v13024_v9 }
 0x92d   : > { %4311 = vmatpush1.bf16.msra.mxu1 %v14634_v59 }
 0x92e   : > { %4312 = vmatprep.subr.bf16.mxu1 %v13024_v9 }
 0x931   : > { %4313 = vmatpush1.bf16.msra.mxu1 %v14641_v60 }
 0x932   : > { %4314 = vmatprep.subr.bf16.mxu1 %v13024_v9 }
 0x935   : > { %4315 = vmatpush1.bf16.msra.mxu1 %v14648_v61 }
 0x936   : > { %4316 = vmatprep.subr.bf16.mxu1 %v13024_v9 }
 0x939   : > { %4317 = vmatpush1.bf16.msra.mxu1 %v14655_v62  ;;  %v14992_v56 = vpop.f32.mrb[80].mxu0 }
 0x93a   : > { %4318 = vmatprep.subr.bf16.mxu1 %v13024_v9  ;;  %v4282_v58 = vpop.f32.mrb[81].mxu0 }
 0x93b   : > { %v14995_v0 = vpop.f32.mrb[82].mxu0  ;;  %v15198_v58 = vld [vmem:[%s17696_s4 + $0x40] sm:$0xff]  }
 0x93c   : > { %v4285_v1 = vpop.f32.mrb[83].mxu0 }
 0x93d   : > { %4319 = vmatpush1.bf16.msra.mxu1 %v14662_v63 }
 0x93e   : > { %4320 = vmatprep.subr.bf16.mxu1 %v13024_v9 }
 0x941   : > { %4321 = vmatpush1.bf16.msra.mxu1 %v13666_v21 }
 0x942   : > { %4418 = vmatprep.subr.bf16.mxu1 %v13024_v9 }
 0x944   : > { %4335 = vmatmul.mubr.bf16.vlgmr.msra.gmra.mrb[80].mxu1 %v12564_v57  ;;  %v12590_v57 = vld [vmem:[%s13615_s17 + $0x90] ss:$8 sps:$4 sm:$0xff]  }
 0x945   : > { %4419 = vmatpush1.bf16.msra.mxu1 %v14459_v2  ;;  %10816 = vmatprep.mubr.msk.bf16.mxu1 %vm1496_vm0, %v12568_v54  ;;  %v12570_v2 = vld [vmem:[%s13615_s17 + $0x80] ss:$8 sps:$4 sm:$0xff]  }
 0x946   : > { %4420 = vmatprep.subr.bf16.mxu1 %v13024_v9  ;;  %v15177_v54 = vld [vmem:[%s17696_s4 + $0x28] sm:$0xff]  }
 0x949   : > { %4421 = vmatpush1.bf16.msra.mxu1 %v14574_v17 }
 0x94a   : > { %4422 = vmatprep.subr.bf16.mxu1 %v13024_v9 }
 0x94d   : > { %4423 = vmatpush1.bf16.msra.mxu1 %v14581_v18 }
 0x94e   : > { %4424 = vmatprep.subr.bf16.mxu1 %v13024_v9 }
 0x951   : > { %4425 = vmatpush1.bf16.msra.mxu1 %v14588_v19 }
 0x952   : > { %4426 = vmatprep.subr.bf16.mxu1 %v13024_v9 }
 0x955   : > { %4427 = vmatpush1.bf16.msra.mxu1 %v14634_v59 }
 0x956   : > { %4428 = vmatprep.subr.bf16.mxu1 %v13024_v9 }
 0x959   : > { %4429 = vmatpush1.bf16.msra.mxu1 %v14641_v60 }
 0x95a   : > { %4430 = vmatprep.subr.bf16.mxu1 %v13024_v9 }
 0x95d   : > { %4431 = vmatpush1.bf16.msra.mxu1 %v14648_v61 }
 0x95e   : > { %4432 = vmatprep.subr.bf16.mxu1 %v13024_v9 }
 0x961   : > { %4433 = vmatpush1.bf16.msra.mxu1 %v14655_v62  ;;  %v15013_v3 = vpop.f32.mrb[84].mxu0 }
 0x962   : > { %4434 = vmatprep.subr.bf16.mxu1 %v13024_v9  ;;  %v4396_v4 = vpop.f32.mrb[85].mxu0 }
 0x963   : > { %v15015_v13 = vpop.f32.mrb[86].mxu0  ;;  %v12591_v4 = vld [vmem:[%s17698_s6 + $0x240] sm:$0xff]  }
 0x964   : > { %v4399_v35 = vpop.f32.mrb[87].mxu0 }
 0x965   : > { %4435 = vmatpush1.bf16.msra.mxu1 %v14662_v63  ;;  %v12593_v35 = vld [vmem:[%s17698_s6 + $0x250] sm:$0xff]  }
 0x966   : > { %4436 = vmatprep.subr.bf16.mxu1 %v13024_v9 }
 0x969   : > { %4437 = vmatpush1.bf16.msra.mxu1 %v13666_v21 }
 0x96a   : > { %4589 = vmatprep.subr.bf16.mxu1 %v13024_v9 }
 0x96c   : > { %4451 = vmatmul.mubr.bf16.vlgmr.msra.gmra.mrb[84].mxu1 %v12570_v2  ;;  %v15184_v2 = vld [vmem:[%s17696_s4 + $0x30] sm:$0xff]  }
 0x96d   : > { %4590 = vmatpush1.bf16.msra.mxu1 %v14987_v55  ;;  %10845 = vmatprep.mubr.msk.bf16.mxu1 %vm1496_vm0, %v12579_v40 }
 0x96e   : > { %4591 = vmatprep.subr.bf16.mxu1 %v13024_v9 }
 0x971   : > { %4592 = vmatpush1.bf16.msra.mxu1 %v14574_v17 }
 0x972   : > { %4593 = vmatprep.subr.bf16.mxu1 %v13024_v9 }
 0x975   : > { %4594 = vmatpush1.bf16.msra.mxu1 %v14581_v18 }
 0x976   : > { %4595 = vmatprep.subr.bf16.mxu1 %v13024_v9 }
 0x979   : > { %4596 = vmatpush1.bf16.msra.mxu1 %v14588_v19 }
 0x97a   : > { %4597 = vmatprep.subr.bf16.mxu1 %v13024_v9 }
 0x97d   : > { %4598 = vmatpush1.bf16.msra.mxu1 %v14634_v59 }
 0x97e   : > { %4599 = vmatprep.subr.bf16.mxu1 %v13024_v9 }
 0x981   : > { %4600 = vmatpush1.bf16.msra.mxu1 %v14641_v60 }
 0x982   : > { %4601 = vmatprep.subr.bf16.mxu1 %v13024_v9 }
 0x985   : > { %4602 = vmatpush1.bf16.msra.mxu1 %v14648_v61 }
 0x986   : > { %4603 = vmatprep.subr.bf16.mxu1 %v13024_v9 }
 0x989   : > { %4604 = vmatpush1.bf16.msra.mxu1 %v14655_v62 }
 0x98a   : > { %4605 = vmatprep.subr.bf16.mxu1 %v13024_v9 }
 0x98d   : > { %4606 = vmatpush1.bf16.msra.mxu1 %v14662_v63 }
 0x98e   : > { %4607 = vmatprep.subr.bf16.mxu1 %v13024_v9 }
 0x991   : > { %4608 = vmatpush1.bf16.msra.mxu1 %v13666_v21 }
 0x992   : > { %4703 = vmatprep.subr.bf16.mxu1 %v13024_v9 }
 0x994   : > { %4622 = vmatmul.mubr.bf16.vlgmr.msra.gmra.mrb[88].mxu1 %v12581_v41 }
 0x995   : > { %4704 = vmatpush1.bf16.msra.mxu1 %v14987_v55  ;;  %10855 = vmatprep.mubr.msk.bf16.mxu1 %vm1496_vm0, %v12585_v10 }
 0x996   : > { %4705 = vmatprep.subr.bf16.mxu1 %v13024_v9 }
 0x999   : > { %4706 = vmatpush1.bf16.msra.mxu1 %v14574_v17 }
 0x99a   : > { %4707 = vmatprep.subr.bf16.mxu1 %v13024_v9 }
 0x99d   : > { %4708 = vmatpush1.bf16.msra.mxu1 %v14581_v18 }
 0x99e   : > { %4709 = vmatprep.subr.bf16.mxu1 %v13024_v9 }
 0x9a1   : > { %4710 = vmatpush1.bf16.msra.mxu1 %v14588_v19 }
 0x9a2   : > { %4711 = vmatprep.subr.bf16.mxu1 %v13024_v9 }
 0x9a5   : > { %4712 = vmatpush1.bf16.msra.mxu1 %v14634_v59 }
 0x9a6   : > { %4713 = vmatprep.subr.bf16.mxu1 %v13024_v9 }
 0x9a9   : > { %4714 = vmatpush1.bf16.msra.mxu1 %v14641_v60 }
 0x9aa   : > { %4715 = vmatprep.subr.bf16.mxu1 %v13024_v9 }
 0x9ad   : > { %4716 = vmatpush1.bf16.msra.mxu1 %v14648_v61 }
 0x9ae   : > { %4717 = vmatprep.subr.bf16.mxu1 %v13024_v9 }
 0x9b1   : > { %4718 = vmatpush1.bf16.msra.mxu1 %v14655_v62 }
 0x9b2   : > { %4719 = vmatprep.subr.bf16.mxu1 %v13024_v9 }
 0x9b5   : > { %4720 = vmatpush1.bf16.msra.mxu1 %v14662_v63 }
 0x9b6   : > { %4721 = vmatprep.subr.bf16.mxu1 %v13024_v9 }
 0x9b9   : > { %4722 = vmatpush1.bf16.msra.mxu1 %v13666_v21 }
 0x9ba   : > { %11997 = vmatprep.subr.bf16.mxu1 %v13025_v45 }
 0x9bc   : > { %4736 = vmatmul.mubr.bf16.vlgmr.msra.gmra.mrb[92].mxu1 %v12587_v15  ;;  %v12607_v15 = vld [vmem:[%s13613_s29 + $0xa0] ss:$8 sps:$4 sm:$0xff]  }
 0x9bd   : > { %12013 = vmatprep.mubr.msk.bf16.mxu1 %vm13026_vm2, %v13025_v45  ;;  %11998 = vmatpush3.bf16.msra.mxu1 %v12591_v4  ;;  %v12612_v4 = vld [vmem:[%s17698_s6 + $0x288] sm:$0xff]  }
 0x9be   : > { %11999 = vmatprep.subr.bf16.mxu1 %v13025_v45 }
 0x9c1   : > { %12000 = vmatpush3.bf16.msra.mxu1 %v12592_v34  ;;  %v12614_v34 = vld [vmem:[%s17698_s6 + $0x298] sm:$0xff]  }
 0x9c2   : > { %12001 = vmatprep.subr.bf16.mxu1 %v13025_v45 }
 0x9c5   : > { %12002 = vmatpush3.bf16.msra.mxu1 %v12593_v35  ;;  %v12615_v35 = vld [vmem:[%s17698_s6 + $0x2a0] sm:$0xff]  }
 0x9c6   : > { %12003 = vmatprep.subr.bf16.mxu1 %v13025_v45 }
 0x9c9   : > { %12004 = vmatpush3.bf16.msra.mxu1 %v12594_v7  ;;  %v12616_v7 = vld [vmem:[%s17698_s6 + $0x2a8] sm:$0xff]  }
 0x9ca   : > { %12005 = vmatprep.subr.bf16.mxu1 %v13025_v45 }
 0x9cd   : > { %12006 = vmatpush3.bf16.msra.mxu1 %v12595_v37  ;;  %v12617_v37 = vld [vmem:[%s17698_s6 + $0x2b0] sm:$0xff]  }
 0x9ce   : > { %12007 = vmatprep.subr.bf16.mxu1 %v13025_v45 }
 0x9d1   : > { %12008 = vmatpush3.bf16.msra.mxu1 %v12596_v36  ;;  %v12618_v36 = vld [vmem:[%s17698_s6 + $0x2b8] sm:$0xff]  }
 0x9d2   : > { %12009 = vmatprep.subr.bf16.mxu1 %v13025_v45 }
 0x9d5   : > { %12010 = vmatpush3.bf16.msra.mxu1 %v12597_v5  ;;  %v12619_v5 = vld [vmem:[%s13597_s14 + $0xb4] ss:$8 sps:$4 sm:$0xff]  }
 0x9d6   : > { %12011 = vmatprep.subr.bf16.mxu1 %v13025_v45 }
 0x9d9   : > { %12012 = vmatpush3.bf16.msra.mxu1 %v12598_v6  ;;  %v12621_v6 = vld [vmem:[%s13597_s14 + $0xb0] ss:$8 sps:$4 sm:$0xff]  }
 0x9da   : > { %4988 = vmatprep.subr.bf16.mxu1 %v13024_v9 }
 0x9ef   : > { %v4222_v17 = vpop.f32.mrb[76].mxu1 }
 0x9f0   : > { %v15071_v18 = vadd.f32 %v4222_v17, %v14920_v14  ;;  %v11975_v19 = vpop.f32.mrb[77].mxu1 }
 0x9f1   : > { %v4225_v8 = vpop.f32.mrb[78].mxu1 }
 0x9f2   : > { %v15075_v11 = vadd.f32 %v4225_v8, %v14924_v22  ;;  %v11976_v12 = vpop.f32.mrb[79].mxu1  ;;  %v12605_v8 = vld [vmem:[%s13613_s29 + $0xa4] ss:$8 sps:$4 sm:$0xff]  }
 0xa17   : > { %v4336_v14 = vpop.f32.mrb[80].mxu1 }
 0xa18   : > { %v4343_v20 = vmax.f32 %v14992_v56, %v4336_v14  ;;  %v4338_v25 = vpop.f32.mrb[81].mxu1  ;;  %v15191_v56 = vld [vmem:[%s17696_s4 + $0x38] sm:$0xff]  }
 0xa19   : > { %v4339_v26 = vpop.f32.mrb[82].mxu1 }
 0xa1a   : > { %v4344_v22 = vmax.f32 %v14995_v0, %v4339_v26  ;;  %v4401_v27 = vmax.f32 %v4343_v20, %v15013_v3  ;;  %v4341_v16 = vpop.f32.mrb[83].mxu1 }
 0xa1c   : > { %v4402_v24 = vmax.f32 %v4344_v22, %v15015_v13 }
 0xa3f   : > { %v4452_v42 = vpop.f32.mrb[84].mxu1 }
 0xa40   : > { %v4459_v23 = vmax.f32 %v4401_v27, %v4452_v42  ;;  %v4454_v28 = vpop.f32.mrb[85].mxu1 }
 0xa41   : > { %v4455_v30 = vpop.f32.mrb[86].mxu1 }
 0xa42   : > { %v4461_v32 = vadd.f32 %v15090_v29, %v4459_v23  ;;  %v4460_v43 = vmax.f32 %v4402_v24, %v4455_v30  ;;  %v4457_v44 = vpop.f32.mrb[87].mxu1 }
 0xa44   : > { %v4462_v47 = vadd.f32 %v15090_v29, %v4460_v43  ;;  %v4463_v33 = vmax.f32 %v4461_v32, 0.0 }
 0xa46   : > { %v4464_v49 = vmax.f32 %v4462_v47, 0.0 }
 0xa48   : > { %v4465_v31 = vpack.c.bf16 %v4464_v49, %v4463_v33  ;;  %v12602_v33 = vld [vmem:[%s13609_s16 + $0xa4] ss:$8 sps:$4 sm:$0xff]  }
 0xa4a   : > { %11994 = vmatmul.mubr.bf16.vlgmr.msra.gmra.mrb[88].mxu0 %v4465_v31  ;;  %v12608_v31 = vld [vmem:[%s13615_s17 + $0xa4] ss:$8 sps:$4 sm:$0xff]  }
 0xa4b   : > { %4646 = vmatpush1.bf16.msra.mxu0 %v14987_v55  ;;  %10850 = vmatprep.mubr.msk.bf16.mxu0 %vm1496_vm0, %v12582_v50  ;;  %v12604_v50 = vld [vmem:[%s13609_s16 + $0xa0] ss:$8 sps:$4 sm:$0xff]  }
 0xa4c   : > { %4647 = vmatprep.subr.bf16.mxu0 %v13024_v9 }
 0xa4f   : > { %4648 = vmatpush1.bf16.msra.mxu0 %v15101_v48 }
 0xa50   : > { %4649 = vmatprep.subr.bf16.mxu0 %v13024_v9 }
 0xa53   : > { %4650 = vmatpush1.bf16.msra.mxu0 %v15108_v51 }
 0xa54   : > { %4651 = vmatprep.subr.bf16.mxu0 %v13024_v9 }
 0xa57   : > { %4652 = vmatpush1.bf16.msra.mxu0 %v15115_v52 }
 0xa58   : > { %4653 = vmatprep.subr.bf16.mxu0 %v13024_v9 }
 0xa5b   : > { %4654 = vmatpush1.bf16.msra.mxu0 %v14634_v59 }
 0xa5c   : > { %4655 = vmatprep.subr.bf16.mxu0 %v13024_v9 }
 0xa5f   : > { %4656 = vmatpush1.bf16.msra.mxu0 %v14641_v60 }
 0xa60   : > { %4657 = vmatprep.subr.bf16.mxu0 %v13024_v9 }
 0xa63   : > { %4658 = vmatpush1.bf16.msra.mxu0 %v14648_v61 }
 0xa64   : > { %4659 = vmatprep.subr.bf16.mxu0 %v13024_v9 }
 0xa67   : > { %4660 = vmatpush1.bf16.msra.mxu0 %v14655_v62 }
 0xa68   : > { %4661 = vmatprep.subr.bf16.mxu0 %v13024_v9 }
 0xa6b   : > { %4662 = vmatpush1.bf16.msra.mxu0 %v14662_v63 }
 0xa6c   : > { %4663 = vmatprep.subr.bf16.mxu0 %v13024_v9 }
 0xa6f   : > { %4664 = vmatpush1.bf16.msra.mxu0 %v13666_v21 }
 0xa70   : > { %4761 = vmatprep.subr.bf16.mxu0 %v13024_v9 }
 0xa72   : > { %4678 = vmatmul.mubr.bf16.vlgmr.msra.gmra.mrb[92].mxu0 %v12584_v53  ;;  %v12610_v53 = vld [vmem:[%s13615_s17 + $0xa0] ss:$8 sps:$4 sm:$0xff]  }
 0xa73   : > { %4762 = vmatpush1.bf16.msra.mxu0 %v14987_v55  ;;  %10860 = vmatprep.mubr.msk.bf16.mxu0 %vm1496_vm0, %v12588_v46 }
 0xa74   : > { %4763 = vmatprep.subr.bf16.mxu0 %v13024_v9 }
 0xa77   : > { %4764 = vmatpush1.bf16.msra.mxu0 %v15101_v48 }
 0xa78   : > { %4765 = vmatprep.subr.bf16.mxu0 %v13024_v9 }
 0xa7b   : > { %4766 = vmatpush1.bf16.msra.mxu0 %v15108_v51 }
 0xa7c   : > { %4767 = vmatprep.subr.bf16.mxu0 %v13024_v9 }
 0xa7f   : > { %4768 = vmatpush1.bf16.msra.mxu0 %v15115_v52 }
 0xa80   : > { %4769 = vmatprep.subr.bf16.mxu0 %v13024_v9 }
 0xa83   : > { %4770 = vmatpush1.bf16.msra.mxu0 %v14634_v59  ;;  %v15158_v59 = vpop.f32.mrb[88].mxu1 }
 0xa84   : > { %4771 = vmatprep.subr.bf16.mxu0 %v13024_v9 }
 0xa87   : > { %4772 = vmatpush1.bf16.msra.mxu0 %v14641_v60  ;;  %v4625_v60 = vpop.f32.mrb[89].mxu1 }
 0xa88   : > { %4773 = vmatprep.subr.bf16.mxu0 %v13024_v9 }
 0xa8b   : > { %4774 = vmatpush1.bf16.msra.mxu0 %v14648_v61  ;;  %v15161_v61 = vpop.f32.mrb[90].mxu1 }
 0xa8c   : > { %4775 = vmatprep.subr.bf16.mxu0 %v13024_v9 }
 0xa8f   : > { %4776 = vmatpush1.bf16.msra.mxu0 %v14655_v62  ;;  %v4628_v62 = vpop.f32.mrb[91].mxu1 }
 0xa90   : > { %4777 = vmatprep.subr.bf16.mxu0 %v13024_v9  ;;  %v15204_v0 = vpop.f32.mrb[92].mxu1 }
 0xa91   : > { %v4739_v1 = vpop.f32.mrb[93].mxu1 }
 0xa92   : > { %v15206_v3 = vpop.f32.mrb[94].mxu1  ;;  %v12611_v1 = vld [vmem:[%s17698_s6 + $0x280] sm:$0xff]  }
 0xa93   : > { %4778 = vmatpush1.bf16.msra.mxu0 %v14662_v63  ;;  %v15170_v63 = vld [vmem:[%s17696_s4 + $0x20] sm:$0xff]   ;;  %v4742_v13 = vpop.f32.mrb[95].mxu1 }
 0xa94   : > { %4779 = vmatprep.subr.bf16.mxu0 %v13024_v9  ;;  %v12613_v13 = vld [vmem:[%s17698_s6 + $0x290] sm:$0xff]  }
 0xa97   : > { %4780 = vmatpush1.bf16.msra.mxu0 %v13666_v21 }
 0xa98   : > { %4932 = vmatprep.subr.bf16.mxu0 %v13024_v9 }
 0xa9a   : > { %4794 = vmatmul.mubr.bf16.vlgmr.msra.gmra.mrb[96].mxu0 %v12590_v57 }
 0xa9b   : > { %4933 = vmatpush1.bf16.msra.mxu0 %v14987_v55  ;;  %10889 = vmatprep.mubr.msk.bf16.mxu0 %vm1496_vm0, %v12599_v38 }
 0xa9c   : > { %4934 = vmatprep.subr.bf16.mxu0 %v13024_v9 }
 0xa9f   : > { %4935 = vmatpush1.bf16.msra.mxu0 %v15101_v48 }
 0xaa0   : > { %4936 = vmatprep.subr.bf16.mxu0 %v13024_v9 }
 0xaa3   : > { %4937 = vmatpush1.bf16.msra.mxu0 %v15108_v51 }
 0xaa4   : > { %4938 = vmatprep.subr.bf16.mxu0 %v13024_v9 }
 0xaa7   : > { %4939 = vmatpush1.bf16.msra.mxu0 %v15115_v52 }
 0xaa8   : > { %4940 = vmatprep.subr.bf16.mxu0 %v13024_v9 }
 0xaab   : > { %4941 = vmatpush1.bf16.msra.mxu0 %v15170_v63 }
 0xaac   : > { %4942 = vmatprep.subr.bf16.mxu0 %v13024_v9 }
 0xaaf   : > { %4943 = vmatpush1.bf16.msra.mxu0 %v15177_v54 }
 0xab0   : > { %4944 = vmatprep.subr.bf16.mxu0 %v13024_v9 }
 0xab3   : > { %4945 = vmatpush1.bf16.msra.mxu0 %v15184_v2 }
 0xab4   : > { %4946 = vmatprep.subr.bf16.mxu0 %v13024_v9 }
 0xab7   : > { %4947 = vmatpush1.bf16.msra.mxu0 %v15191_v56 }
 0xab8   : > { %4948 = vmatprep.subr.bf16.mxu0 %v13024_v9 }
 0xabb   : > { %4949 = vmatpush1.bf16.msra.mxu0 %v15198_v58 }
 0xabc   : > { %4950 = vmatprep.subr.bf16.mxu0 %v13024_v9 }
 0xabf   : > { %4951 = vmatpush1.bf16.msra.mxu0 %v13666_v21 }
 0xac0   : > { %5046 = vmatprep.subr.bf16.mxu0 %v13024_v9 }
 0xac2   : > { %4965 = vmatmul.mubr.bf16.vlgmr.msra.gmra.mrb[100].mxu0 %v12601_v39 }
 0xac3   : > { %5047 = vmatpush1.bf16.msra.mxu0 %v14987_v55  ;;  %10899 = vmatprep.mubr.msk.bf16.mxu0 %vm1496_vm0, %v12605_v8 }
 0xac4   : > { %5048 = vmatprep.subr.bf16.mxu0 %v13024_v9 }
 0xac7   : > { %5049 = vmatpush1.bf16.msra.mxu0 %v15101_v48 }
 0xac8   : > { %5050 = vmatprep.subr.bf16.mxu0 %v13024_v9 }
 0xacb   : > { %5051 = vmatpush1.bf16.msra.mxu0 %v15108_v51 }
 0xacc   : > { %5052 = vmatprep.subr.bf16.mxu0 %v13024_v9 }
 0xacf   : > { %5053 = vmatpush1.bf16.msra.mxu0 %v15115_v52 }
 0xad0   : > { %5054 = vmatprep.subr.bf16.mxu0 %v13024_v9 }
 0xad3   : > { %5055 = vmatpush1.bf16.msra.mxu0 %v15170_v63 }
 0xad4   : > { %5056 = vmatprep.subr.bf16.mxu0 %v13024_v9 }
 0xad7   : > { %5057 = vmatpush1.bf16.msra.mxu0 %v15177_v54 }
 0xad8   : > { %5058 = vmatprep.subr.bf16.mxu0 %v13024_v9 }
 0xadb   : > { %5059 = vmatpush1.bf16.msra.mxu0 %v15184_v2 }
 0xadc   : > { %5060 = vmatprep.subr.bf16.mxu0 %v13024_v9 }
 0xadf   : > { %5061 = vmatpush1.bf16.msra.mxu0 %v15191_v56 }
 0xae0   : > { %5062 = vmatprep.subr.bf16.mxu0 %v13024_v9 }
 0xae3   : > { %5063 = vmatpush1.bf16.msra.mxu0 %v15198_v58 }
 0xae4   : > { %5064 = vmatprep.subr.bf16.mxu0 %v13024_v9 }
 0xae7   : > { %5065 = vmatpush1.bf16.msra.mxu0 %v13666_v21 }
 0xae8   : > { %12017 = vmatprep.subr.bf16.mxu0 %v13025_v45 }
 0xaea   : > { %5079 = vmatmul.mubr.bf16.vlgmr.msra.gmra.mrb[104].mxu0 %v12607_v15  ;;  %v12627_v15 = vld [vmem:[%s13613_s29 + $0xb0] ss:$8 sps:$4 sm:$0xff]  }
 0xaeb   : > { %12033 = vmatprep.mubr.msk.bf16.mxu0 %vm13026_vm2, %v13025_v45  ;;  %12018 = vmatpush3.bf16.msra.mxu0 %v12611_v1  ;;  %v12633_v1 = vld [vmem:[%s17698_s6 + $0x2d0] sm:$0xff]  }
 0xaec   : > { %12019 = vmatprep.subr.bf16.mxu0 %v13025_v45 }
 0xaef   : > { %12020 = vmatpush3.bf16.msra.mxu0 %v12612_v4  ;;  %v12635_v4 = vld [vmem:[%s17698_s6 + $0x2e0] sm:$0xff]  }
 0xaf0   : > { %12021 = vmatprep.subr.bf16.mxu0 %v13025_v45 }
 0xaf3   : > { %12022 = vmatpush3.bf16.msra.mxu0 %v12613_v13  ;;  %v12636_v13 = vld [vmem:[%s17698_s6 + $0x2e8] sm:$0xff]  }
 0xaf4   : > { %12023 = vmatprep.subr.bf16.mxu0 %v13025_v45 }
 0xaf7   : > { %12024 = vmatpush3.bf16.msra.mxu0 %v12614_v34  ;;  %v12637_v34 = vld [vmem:[%s17698_s6 + $0x2f0] sm:$0xff]  }
 0xaf8   : > { %12025 = vmatprep.subr.bf16.mxu0 %v13025_v45 }
 0xafb   : > { %12026 = vmatpush3.bf16.msra.mxu0 %v12615_v35  ;;  %v12638_v35 = vld [vmem:[%s17698_s6 + $0x2f8] sm:$0xff]  }
 0xafc   : > { %12027 = vmatprep.subr.bf16.mxu0 %v13025_v45 }
 0xaff   : > { %12028 = vmatpush3.bf16.msra.mxu0 %v12616_v7  ;;  %v12639_v7 = vld [vmem:[%s13597_s14 + $0xc4] ss:$8 sps:$4 sm:$0xff]  }
 0xb00   : > { %12029 = vmatprep.subr.bf16.mxu0 %v13025_v45 }
 0xb03   : > { %12030 = vmatpush3.bf16.msra.mxu0 %v12617_v37  ;;  %v12641_v37 = vld [vmem:[%s13597_s14 + $0xc0] ss:$8 sps:$4 sm:$0xff]  }
 0xb04   : > { %12031 = vmatprep.subr.bf16.mxu0 %v13025_v45 }
 0xb07   : > { %12032 = vmatpush3.bf16.msra.mxu0 %v12618_v36  ;;  %v15538_v36 = vld [vmem:[%s17696_s4] sm:$0xff]  }
 0xb08   : > { %5331 = vmatprep.subr.bf16.mxu0 %v13024_v9 }
 0xb1d   : > { %v4565_v40 = vpop.f32.mrb[88].mxu0 }
 0xb1e   : > { %v15262_v41 = vadd.f32 %v4565_v40, %v15071_v18  ;;  %v11995_v17 = vpop.f32.mrb[89].mxu0 }
 0xb1f   : > { %v4568_v19 = vpop.f32.mrb[90].mxu0 }
 0xb20   : > { %v15266_v10 = vadd.f32 %v4568_v19, %v15075_v11  ;;  %v11996_v12 = vpop.f32.mrb[91].mxu0  ;;  %v12625_v19 = vld [vmem:[%s13613_s29 + $0xb4] ss:$8 sps:$4 sm:$0xff]  }
 0xb45   : > { %v4679_v18 = vpop.f32.mrb[92].mxu0 }
 0xb46   : > { %v4686_v14 = vmax.f32 %v15158_v59, %v4679_v18  ;;  %v4681_v20 = vpop.f32.mrb[93].mxu0 }
 0xb47   : > { %v4682_v25 = vpop.f32.mrb[94].mxu0 }
 0xb48   : > { %v4687_v11 = vmax.f32 %v15161_v61, %v4682_v25  ;;  %v4744_v26 = vmax.f32 %v4686_v14, %v15204_v0  ;;  %v4684_v22 = vpop.f32.mrb[95].mxu0 }
 0xb4a   : > { %v4745_v27 = vmax.f32 %v4687_v11, %v15206_v3 }
 0xb6d   : > { %v4795_v16 = vpop.f32.mrb[96].mxu0 }
 0xb6e   : > { %v4802_v24 = vmax.f32 %v4744_v26, %v4795_v16  ;;  %v4797_v42 = vpop.f32.mrb[97].mxu0 }
 0xb6f   : > { %v4798_v23 = vpop.f32.mrb[98].mxu0 }
 0xb70   : > { %v4804_v28 = vadd.f32 %v15090_v29, %v4802_v24  ;;  %v4803_v30 = vmax.f32 %v4745_v27, %v4798_v23  ;;  %v4800_v32 = vpop.f32.mrb[99].mxu0 }
 0xb72   : > { %v4805_v43 = vadd.f32 %v15090_v29, %v4803_v30  ;;  %v4806_v44 = vmax.f32 %v4804_v28, 0.0 }
 0xb74   : > { %v4807_v47 = vmax.f32 %v4805_v43, 0.0 }
 0xb76   : > { %v4808_v49 = vpack.c.bf16 %v4807_v47, %v4806_v44  ;;  %v12622_v44 = vld [vmem:[%s13609_s16 + $0xb4] ss:$8 sps:$4 sm:$0xff]  }
 0xb78   : > { %12014 = vmatmul.mubr.bf16.vlgmr.msra.gmra.mrb[96].mxu1 %v4808_v49  ;;  %v12628_v49 = vld [vmem:[%s13615_s17 + $0xb4] ss:$8 sps:$4 sm:$0xff]  }
 0xb79   : > { %4989 = vmatpush1.bf16.msra.mxu1 %v14987_v55  ;;  %10894 = vmatprep.mubr.msk.bf16.mxu1 %vm1496_vm0, %v12602_v33  ;;  %v12624_v33 = vld [vmem:[%s13609_s16 + $0xb0] ss:$8 sps:$4 sm:$0xff]  }
 0xb7a   : > { %4990 = vmatprep.subr.bf16.mxu1 %v13024_v9 }
 0xb7d   : > { %4991 = vmatpush1.bf16.msra.mxu1 %v15101_v48 }
 0xb7e   : > { %4992 = vmatprep.subr.bf16.mxu1 %v13024_v9 }
 0xb81   : > { %4993 = vmatpush1.bf16.msra.mxu1 %v15108_v51 }
 0xb82   : > { %4994 = vmatprep.subr.bf16.mxu1 %v13024_v9 }
 0xb85   : > { %4995 = vmatpush1.bf16.msra.mxu1 %v15115_v52 }
 0xb86   : > { %4996 = vmatprep.subr.bf16.mxu1 %v13024_v9 }
 0xb89   : > { %4997 = vmatpush1.bf16.msra.mxu1 %v15170_v63 }
 0xb8a   : > { %4998 = vmatprep.subr.bf16.mxu1 %v13024_v9 }
 0xb8d   : > { %4999 = vmatpush1.bf16.msra.mxu1 %v15177_v54 }
 0xb8e   : > { %5000 = vmatprep.subr.bf16.mxu1 %v13024_v9 }
 0xb91   : > { %5001 = vmatpush1.bf16.msra.mxu1 %v15184_v2 }
 0xb92   : > { %5002 = vmatprep.subr.bf16.mxu1 %v13024_v9 }
 0xb95   : > { %5003 = vmatpush1.bf16.msra.mxu1 %v15191_v56  ;;  %v15329_v46 = vpop.f32.mrb[100].mxu0 }
 0xb96   : > { %5004 = vmatprep.subr.bf16.mxu1 %v13024_v9  ;;  %v4968_v57 = vpop.f32.mrb[101].mxu0 }
 0xb97   : > { %v15332_v59 = vpop.f32.mrb[102].mxu0 }
 0xb98   : > { %v4971_v60 = vpop.f32.mrb[103].mxu0 }
 0xb99   : > { %5005 = vmatpush1.bf16.msra.mxu1 %v15198_v58 }
 0xb9a   : > { %5006 = vmatprep.subr.bf16.mxu1 %v13024_v9 }
 0xb9d   : > { %5007 = vmatpush1.bf16.msra.mxu1 %v13666_v21 }
 0xb9e   : > { %5104 = vmatprep.subr.bf16.mxu1 %v13024_v9 }
 0xba0   : > { %5021 = vmatmul.mubr.bf16.vlgmr.msra.gmra.mrb[100].mxu1 %v12604_v50  ;;  %v12630_v50 = vld [vmem:[%s13615_s17 + $0xb0] ss:$8 sps:$4 sm:$0xff]  }
 0xba1   : > { %5105 = vmatpush1.bf16.msra.mxu1 %v14987_v55  ;;  %10904 = vmatprep.mubr.msk.bf16.mxu1 %vm1496_vm0, %v12608_v31 }
 0xba2   : > { %5106 = vmatprep.subr.bf16.mxu1 %v13024_v9 }
 0xba5   : > { %5107 = vmatpush1.bf16.msra.mxu1 %v15101_v48 }
 0xba6   : > { %5108 = vmatprep.subr.bf16.mxu1 %v13024_v9 }
 0xba9   : > { %5109 = vmatpush1.bf16.msra.mxu1 %v15108_v51 }
 0xbaa   : > { %5110 = vmatprep.subr.bf16.mxu1 %v13024_v9 }
 0xbad   : > { %5111 = vmatpush1.bf16.msra.mxu1 %v15115_v52 }
 0xbae   : > { %5112 = vmatprep.subr.bf16.mxu1 %v13024_v9 }
 0xbb1   : > { %5113 = vmatpush1.bf16.msra.mxu1 %v15170_v63 }
 0xbb2   : > { %5114 = vmatprep.subr.bf16.mxu1 %v13024_v9 }
 0xbb5   : > { %5115 = vmatpush1.bf16.msra.mxu1 %v15177_v54 }
 0xbb6   : > { %5116 = vmatprep.subr.bf16.mxu1 %v13024_v9 }
 0xbb9   : > { %5117 = vmatpush1.bf16.msra.mxu1 %v15184_v2 }
 0xbba   : > { %5118 = vmatprep.subr.bf16.mxu1 %v13024_v9 }
 0xbbd   : > { %5119 = vmatpush1.bf16.msra.mxu1 %v15191_v56  ;;  %v15350_v61 = vpop.f32.mrb[104].mxu0 }
 0xbbe   : > { %5120 = vmatprep.subr.bf16.mxu1 %v13024_v9  ;;  %v5082_v62 = vpop.f32.mrb[105].mxu0 }
 0xbbf   : > { %v15352_v0 = vpop.f32.mrb[106].mxu0 }
 0xbc0   : > { %v5085_v3 = vpop.f32.mrb[107].mxu0 }
 0xbc1   : > { %5121 = vmatpush1.bf16.msra.mxu1 %v15198_v58  ;;  %v12634_v3 = vld [vmem:[%s17698_s6 + $0x2d8] sm:$0xff]  }
 0xbc2   : > { %5122 = vmatprep.subr.bf16.mxu1 %v13024_v9 }
 0xbc5   : > { %5123 = vmatpush1.bf16.msra.mxu1 %v13666_v21 }
 0xbc6   : > { %5275 = vmatprep.subr.bf16.mxu1 %v13024_v9 }
 0xbc8   : > { %5137 = vmatmul.mubr.bf16.vlgmr.msra.gmra.mrb[104].mxu1 %v12610_v53 }
 0xbc9   : > { %5276 = vmatpush1.bf16.msra.mxu1 %v14987_v55  ;;  %10933 = vmatprep.mubr.msk.bf16.mxu1 %vm1496_vm0, %v12619_v5 }
 0xbca   : > { %5277 = vmatprep.subr.bf16.mxu1 %v13024_v9 }
 0xbcd   : > { %5278 = vmatpush1.bf16.msra.mxu1 %v15101_v48 }
 0xbce   : > { %5279 = vmatprep.subr.bf16.mxu1 %v13024_v9 }
 0xbd1   : > { %5280 = vmatpush1.bf16.msra.mxu1 %v15108_v51 }
 0xbd2   : > { %5281 = vmatprep.subr.bf16.mxu1 %v13024_v9 }
 0xbd5   : > { %5282 = vmatpush1.bf16.msra.mxu1 %v15115_v52 }
 0xbd6   : > { %5283 = vmatprep.subr.bf16.mxu1 %v13024_v9 }
 0xbd9   : > { %5284 = vmatpush1.bf16.msra.mxu1 %v15170_v63 }
 0xbda   : > { %5285 = vmatprep.subr.bf16.mxu1 %v13024_v9 }
 0xbdd   : > { %5286 = vmatpush1.bf16.msra.mxu1 %v15177_v54 }
 0xbde   : > { %5287 = vmatprep.subr.bf16.mxu1 %v13024_v9 }
 0xbe1   : > { %5288 = vmatpush1.bf16.msra.mxu1 %v15184_v2 }
 0xbe2   : > { %5289 = vmatprep.subr.bf16.mxu1 %v13024_v9 }
 0xbe5   : > { %5290 = vmatpush1.bf16.msra.mxu1 %v15191_v56 }
 0xbe6   : > { %5291 = vmatprep.subr.bf16.mxu1 %v13024_v9 }
 0xbe9   : > { %5292 = vmatpush1.bf16.msra.mxu1 %v15198_v58 }
 0xbea   : > { %5293 = vmatprep.subr.bf16.mxu1 %v13024_v9 }
 0xbed   : > { %5294 = vmatpush1.bf16.msra.mxu1 %v13666_v21 }
 0xbee   : > { %5389 = vmatprep.subr.bf16.mxu1 %v13024_v9 }
 0xbf0   : > { %5308 = vmatmul.mubr.bf16.vlgmr.msra.gmra.mrb[108].mxu1 %v12621_v6 }
 0xbf1   : > { %5390 = vmatpush1.bf16.msra.mxu1 %v14987_v55  ;;  %10943 = vmatprep.mubr.msk.bf16.mxu1 %vm1496_vm0, %v12625_v19 }
 0xbf2   : > { %5391 = vmatprep.subr.bf16.mxu1 %v13024_v9 }
 0xbf5   : > { %5392 = vmatpush1.bf16.msra.mxu1 %v15101_v48 }
 0xbf6   : > { %5393 = vmatprep.subr.bf16.mxu1 %v13024_v9 }
 0xbf9   : > { %5394 = vmatpush1.bf16.msra.mxu1 %v15108_v51 }
 0xbfa   : > { %5395 = vmatprep.subr.bf16.mxu1 %v13024_v9 }
 0xbfd   : > { %5396 = vmatpush1.bf16.msra.mxu1 %v15115_v52 }
 0xbfe   : > { %5397 = vmatprep.subr.bf16.mxu1 %v13024_v9 }
 0xc01   : > { %5398 = vmatpush1.bf16.msra.mxu1 %v15170_v63 }
 0xc02   : > { %5399 = vmatprep.subr.bf16.mxu1 %v13024_v9 }
 0xc05   : > { %5400 = vmatpush1.bf16.msra.mxu1 %v15177_v54 }
 0xc06   : > { %5401 = vmatprep.subr.bf16.mxu1 %v13024_v9 }
 0xc09   : > { %5402 = vmatpush1.bf16.msra.mxu1 %v15184_v2 }
 0xc0a   : > { %5403 = vmatprep.subr.bf16.mxu1 %v13024_v9 }
 0xc0d   : > { %5404 = vmatpush1.bf16.msra.mxu1 %v15191_v56 }
 0xc0e   : > { %5405 = vmatprep.subr.bf16.mxu1 %v13024_v9 }
 0xc11   : > { %5406 = vmatpush1.bf16.msra.mxu1 %v15198_v58 }
 0xc12   : > { %5407 = vmatprep.subr.bf16.mxu1 %v13024_v9 }
 0xc15   : > { %5408 = vmatpush1.bf16.msra.mxu1 %v13666_v21 }
 0xc16   : > { %12037 = vmatprep.subr.bf16.mxu1 %v13025_v45 }
 0xc18   : > { %5422 = vmatmul.mubr.bf16.vlgmr.msra.gmra.mrb[112].mxu1 %v12627_v15  ;;  %v12647_v15 = vld [vmem:[%s13613_s29 + $0xc0] ss:$8 sps:$4 sm:$0xff]  }
 0xc19   : > { %12053 = vmatprep.mubr.msk.bf16.mxu1 %vm13026_vm2, %v13025_v45 }
 0xc4b   : > { %v4908_v38 = vpop.f32.mrb[96].mxu1 }
 0xc4c   : > { %v15408_v39 = vadd.f32 %v4908_v38, %v15262_v41  ;;  %v12015_v40 = vpop.f32.mrb[97].mxu1 }
 0xc4d   : > { %v4911_v17 = vpop.f32.mrb[98].mxu1 }
 0xc4e   : > { %v15412_v8 = vadd.f32 %v4911_v17, %v15266_v10  ;;  %v12016_v12 = vpop.f32.mrb[99].mxu1  ;;  %v12645_v17 = vld [vmem:[%s13613_s29 + $0xc4] ss:$8 sps:$4 sm:$0xff]  }
 0xc73   : > { %v5022_v41 = vpop.f32.mrb[100].mxu1 }
 0xc74   : > { %v5029_v18 = vmax.f32 %v15329_v46, %v5022_v41  ;;  %v5024_v14 = vpop.f32.mrb[101].mxu1 }
 0xc75   : > { %v5025_v20 = vpop.f32.mrb[102].mxu1 }
 0xc76   : > { %v5030_v10 = vmax.f32 %v15332_v59, %v5025_v20  ;;  %v5087_v25 = vmax.f32 %v5029_v18, %v15350_v61  ;;  %v5027_v11 = vpop.f32.mrb[103].mxu1  ;;  %v12631_v61 = vld [vmem:[%s17698_s6 + $0x2c0] sm:$0xff]  }
 0xc77   : > { %12038 = vmatpush3.bf16.msra.mxu1 %v12631_v61  ;;  %v12659_v61 = vld [vmem:[%s13597_s14 + $0xd4] ss:$8 sps:$4 sm:$0xff]  }
 0xc78   : > { %v5088_v26 = vmax.f32 %v5030_v10, %v15352_v0  ;;  %v12632_v0 = vld [vmem:[%s17698_s6 + $0x2c8] sm:$0xff]   ;;  %12039 = vmatprep.subr.bf16.mxu1 %v13025_v45 }
 0xc7b   : > { %12040 = vmatpush3.bf16.msra.mxu1 %v12632_v0  ;;  %v15701_v0 = vld [vmem:[%s17696_s4 + $0x8] sm:$0xff]  }
 0xc7c   : > { %12041 = vmatprep.subr.bf16.mxu1 %v13025_v45 }
 0xc7f   : > { %12042 = vmatpush3.bf16.msra.mxu1 %v12633_v1  ;;  %v15712_v1 = vld [vmem:[%s17696_s4 + $0x20] sm:$0xff]  }
 0xc80   : > { %12043 = vmatprep.subr.bf16.mxu1 %v13025_v45 }
 0xc83   : > { %12044 = vmatpush3.bf16.msra.mxu1 %v12634_v3  ;;  %v15719_v3 = vld [vmem:[%s17696_s4 + $0x28] sm:$0xff]  }
 0xc84   : > { %12045 = vmatprep.subr.bf16.mxu1 %v13025_v45 }
 0xc87   : > { %12046 = vmatpush3.bf16.msra.mxu1 %v12635_v4  ;;  %v15726_v4 = vld [vmem:[%s17696_s4 + $0x30] sm:$0xff]  }
 0xc88   : > { %12047 = vmatprep.subr.bf16.mxu1 %v13025_v45 }
 0xc8b   : > { %12048 = vmatpush3.bf16.msra.mxu1 %v12636_v13  ;;  %v15733_v13 = vld [vmem:[%s17696_s4 + $0x38] sm:$0xff]  }
 0xc8c   : > { %12049 = vmatprep.subr.bf16.mxu1 %v13025_v45 }
 0xc8f   : > { %12050 = vmatpush3.bf16.msra.mxu1 %v12637_v34  ;;  %v15740_v34 = vld [vmem:[%s17696_s4 + $0x40] sm:$0xff]  }
 0xc90   : > { %12051 = vmatprep.subr.bf16.mxu1 %v13025_v45 }
 0xc93   : > { %12052 = vmatpush3.bf16.msra.mxu1 %v12638_v35 }
 0xc94   : > { %5674 = vmatprep.subr.bf16.mxu1 %v13024_v9 }
 0xc9b   : > { %v5138_v22 = vpop.f32.mrb[104].mxu1 }
 0xc9c   : > { %v5145_v27 = vmax.f32 %v5087_v25, %v5138_v22  ;;  %v5140_v16 = vpop.f32.mrb[105].mxu1 }
 0xc9d   : > { %v5141_v24 = vpop.f32.mrb[106].mxu1 }
 0xc9e   : > { %v5147_v42 = vadd.f32 %v15090_v29, %v5145_v27  ;;  %v5146_v23 = vmax.f32 %v5088_v26, %v5141_v24  ;;  %v5143_v28 = vpop.f32.mrb[107].mxu1 }
 0xca0   : > { %v5148_v30 = vadd.f32 %v15090_v29, %v5146_v23  ;;  %v5149_v32 = vmax.f32 %v5147_v42, 0.0 }
 0xca2   : > { %v5150_v43 = vmax.f32 %v5148_v30, 0.0 }
 0xca4   : > { %v5151_v47 = vpack.c.bf16 %v5150_v43, %v5149_v32  ;;  %v12642_v32 = vld [vmem:[%s13609_s16 + $0xc4] ss:$8 sps:$4 sm:$0xff]  }
 0xca6   : > { %12034 = vmatmul.mubr.bf16.vlgmr.msra.gmra.mrb[108].mxu0 %v5151_v47 }
 0xca7   : > { %5332 = vmatpush1.bf16.msra.mxu0 %v14987_v55  ;;  %10938 = vmatprep.mubr.msk.bf16.mxu0 %vm1496_vm0, %v12622_v44  ;;  %v12648_v44 = vld [vmem:[%s13615_s17 + $0xc4] ss:$8 sps:$4 sm:$0xff]  }
 0xca8   : > { %5333 = vmatprep.subr.bf16.mxu0 %v13024_v9 }
 0xcab   : > { %5334 = vmatpush1.bf16.msra.mxu0 %v15101_v48 }
 0xcac   : > { %5335 = vmatprep.subr.bf16.mxu0 %v13024_v9 }
 0xcaf   : > { %5336 = vmatpush1.bf16.msra.mxu0 %v15108_v51 }
 0xcb0   : > { %5337 = vmatprep.subr.bf16.mxu0 %v13024_v9 }
 0xcb3   : > { %5338 = vmatpush1.bf16.msra.mxu0 %v15115_v52 }
 0xcb4   : > { %5339 = vmatprep.subr.bf16.mxu0 %v13024_v9 }
 0xcb7   : > { %5340 = vmatpush1.bf16.msra.mxu0 %v15170_v63 }
 0xcb8   : > { %5341 = vmatprep.subr.bf16.mxu0 %v13024_v9 }
 0xcbb   : > { %5342 = vmatpush1.bf16.msra.mxu0 %v15177_v54 }
 0xcbc   : > { %5343 = vmatprep.subr.bf16.mxu0 %v13024_v9 }
 0xcbf   : > { %5344 = vmatpush1.bf16.msra.mxu0 %v15184_v2 }
 0xcc0   : > { %5345 = vmatprep.subr.bf16.mxu0 %v13024_v9 }
 0xcc3   : > { %5346 = vmatpush1.bf16.msra.mxu0 %v15191_v56  ;;  %v15475_v31 = vpop.f32.mrb[108].mxu1 }
 0xcc4   : > { %5347 = vmatprep.subr.bf16.mxu0 %v13024_v9  ;;  %v5311_v53 = vpop.f32.mrb[109].mxu1 }
 0xcc5   : > { %v15478_v46 = vpop.f32.mrb[110].mxu1  ;;  %v12653_v53 = vld [vmem:[%s17698_s6 + $0x310] sm:$0xff]  }
 0xcc6   : > { %v5314_v57 = vpop.f32.mrb[111].mxu1 }
 0xcc7   : > { %5348 = vmatpush1.bf16.msra.mxu0 %v15198_v58  ;;  %v12655_v57 = vld [vmem:[%s17698_s6 + $0x320] sm:$0xff]  }
 0xcc8   : > { %5349 = vmatprep.subr.bf16.mxu0 %v13024_v9 }
 0xccb   : > { %5350 = vmatpush1.bf16.msra.mxu0 %v13666_v21 }
 0xccc   : > { %5447 = vmatprep.subr.bf16.mxu0 %v13024_v9 }
 0xcce   : > { %5364 = vmatmul.mubr.bf16.vlgmr.msra.gmra.mrb[112].mxu0 %v12624_v33 }
 0xccf   : > { %5448 = vmatpush1.bf16.msra.mxu0 %v14987_v55  ;;  %10948 = vmatprep.mubr.msk.bf16.mxu0 %vm1496_vm0, %v12628_v49 }
 0xcd0   : > { %5449 = vmatprep.subr.bf16.mxu0 %v13024_v9 }
 0xcd3   : > { %5450 = vmatpush1.bf16.msra.mxu0 %v15101_v48 }
 0xcd4   : > { %5451 = vmatprep.subr.bf16.mxu0 %v13024_v9 }
 0xcd7   : > { %5452 = vmatpush1.bf16.msra.mxu0 %v15108_v51 }
 0xcd8   : > { %5453 = vmatprep.subr.bf16.mxu0 %v13024_v9 }
 0xcdb   : > { %5454 = vmatpush1.bf16.msra.mxu0 %v15115_v52 }
 0xcdc   : > { %5455 = vmatprep.subr.bf16.mxu0 %v13024_v9 }
 0xcdf   : > { %5456 = vmatpush1.bf16.msra.mxu0 %v15170_v63 }
 0xce0   : > { %5457 = vmatprep.subr.bf16.mxu0 %v13024_v9 }
 0xce3   : > { %5458 = vmatpush1.bf16.msra.mxu0 %v15177_v54 }
 0xce4   : > { %5459 = vmatprep.subr.bf16.mxu0 %v13024_v9 }
 0xce7   : > { %5460 = vmatpush1.bf16.msra.mxu0 %v15184_v2 }
 0xce8   : > { %5461 = vmatprep.subr.bf16.mxu0 %v13024_v9 }
 0xceb   : > { %5462 = vmatpush1.bf16.msra.mxu0 %v15191_v56 }
 0xcec   : > { %5463 = vmatprep.subr.bf16.mxu0 %v13024_v9 }
 0xcef   : > { %5464 = vmatpush1.bf16.msra.mxu0 %v15198_v58 }
 0xcf0   : > { %5465 = vmatprep.subr.bf16.mxu0 %v13024_v9 }
 0xcf3   : > { %5466 = vmatpush1.bf16.msra.mxu0 %v13666_v21 }
 0xcf4   : > { %5618 = vmatprep.subr.bf16.mxu0 %v13024_v9 }
 0xcf6   : > { %5480 = vmatmul.mubr.bf16.vlgmr.msra.gmra.mrb[116].mxu0 %v12630_v50  ;;  %v15634_v50 = vld [vmem:[%s17696_s4 + $0x10] sm:$0xff]  }
 0xcf7   : > { %5619 = vmatpush1.bf16.msra.mxu0 %v14987_v55  ;;  %v15496_v55 = vpop.f32.mrb[112].mxu1  ;;  %10977 = vmatprep.mubr.msk.bf16.mxu0 %vm1496_vm0, %v12639_v7 }
 0xcf8   : > { %5620 = vmatprep.subr.bf16.mxu0 %v13024_v9  ;;  %v5425_v59 = vpop.f32.mrb[113].mxu1 }
 0xcf9   : > { %v15498_v60 = vpop.f32.mrb[114].mxu1  ;;  %v12657_v59 = vld [vmem:[%s17698_s6 + $0x330] sm:$0xff]  }
 0xcfa   : > { %v5428_v62 = vpop.f32.mrb[115].mxu1 }
 0xcfb   : > { %5621 = vmatpush1.bf16.msra.mxu0 %v15101_v48  ;;  %v12661_v62 = vld [vmem:[%s13597_s14 + $0xd0] ss:$8 sps:$4 sm:$0xff]  }
 0xcfc   : > { %5622 = vmatprep.subr.bf16.mxu0 %v13024_v9 }
 0xcff   : > { %5623 = vmatpush1.bf16.msra.mxu0 %v15108_v51 }
 0xd00   : > { %5624 = vmatprep.subr.bf16.mxu0 %v13024_v9 }
 0xd03   : > { %5625 = vmatpush1.bf16.msra.mxu0 %v15115_v52 }
 0xd04   : > { %5626 = vmatprep.subr.bf16.mxu0 %v13024_v9 }
 0xd07   : > { %5627 = vmatpush1.bf16.msra.mxu0 %v15170_v63 }
 0xd08   : > { %5628 = vmatprep.subr.bf16.mxu0 %v13024_v9 }
 0xd0b   : > { %5629 = vmatpush1.bf16.msra.mxu0 %v15177_v54 }
 0xd0c   : > { %5630 = vmatprep.subr.bf16.mxu0 %v13024_v9 }
 0xd0f   : > { %5631 = vmatpush1.bf16.msra.mxu0 %v15184_v2 }
 0xd10   : > { %5632 = vmatprep.subr.bf16.mxu0 %v13024_v9 }
 0xd13   : > { %5633 = vmatpush1.bf16.msra.mxu0 %v15191_v56 }
 0xd14   : > { %5634 = vmatprep.subr.bf16.mxu0 %v13024_v9 }
 0xd17   : > { %5635 = vmatpush1.bf16.msra.mxu0 %v15198_v58 }
 0xd18   : > { %5636 = vmatprep.subr.bf16.mxu0 %v13024_v9 }
 0xd1b   : > { %5637 = vmatpush1.bf16.msra.mxu0 %v13666_v21 }
 0xd1c   : > { %5732 = vmatprep.subr.bf16.mxu0 %v13024_v9 }
 0xd1e   : > { %5651 = vmatmul.mubr.bf16.vlgmr.msra.gmra.mrb[120].mxu0 %v12641_v37 }
 0xd1f   : > { %5733 = vmatpush1.bf16.msra.mxu0 %v15538_v36  ;;  %10987 = vmatprep.mubr.msk.bf16.mxu0 %vm1496_vm0, %v12645_v17 }
 0xd20   : > { %5734 = vmatprep.subr.bf16.mxu0 %v13024_v9 }
 0xd23   : > { %5735 = vmatpush1.bf16.msra.mxu0 %v15101_v48 }
 0xd24   : > { %5736 = vmatprep.subr.bf16.mxu0 %v13024_v9 }
 0xd27   : > { %5737 = vmatpush1.bf16.msra.mxu0 %v15108_v51 }
 0xd28   : > { %5738 = vmatprep.subr.bf16.mxu0 %v13024_v9 }
 0xd2b   : > { %5739 = vmatpush1.bf16.msra.mxu0 %v15115_v52 }
 0xd2c   : > { %5740 = vmatprep.subr.bf16.mxu0 %v13024_v9 }
 0xd2f   : > { %5741 = vmatpush1.bf16.msra.mxu0 %v15170_v63 }
 0xd30   : > { %5742 = vmatprep.subr.bf16.mxu0 %v13024_v9 }
 0xd33   : > { %5743 = vmatpush1.bf16.msra.mxu0 %v15177_v54 }
 0xd34   : > { %5744 = vmatprep.subr.bf16.mxu0 %v13024_v9 }
 0xd37   : > { %5745 = vmatpush1.bf16.msra.mxu0 %v15184_v2 }
 0xd38   : > { %5746 = vmatprep.subr.bf16.mxu0 %v13024_v9 }
 0xd3b   : > { %5747 = vmatpush1.bf16.msra.mxu0 %v15191_v56 }
 0xd3c   : > { %5748 = vmatprep.subr.bf16.mxu0 %v13024_v9 }
 0xd3f   : > { %5749 = vmatpush1.bf16.msra.mxu0 %v15198_v58 }
 0xd40   : > { %5750 = vmatprep.subr.bf16.mxu0 %v13024_v9 }
 0xd43   : > { %5751 = vmatpush1.bf16.msra.mxu0 %v13666_v21 }
 0xd44   : > { %12057 = vmatprep.subr.bf16.mxu0 %v13025_v45 }
 0xd46   : > { %5765 = vmatmul.mubr.bf16.vlgmr.msra.gmra.mrb[124].mxu0 %v12647_v15 }
 0xd47   : > { %12073 = vmatprep.mubr.msk.bf16.mxu0 %vm13026_vm2, %v13025_v45 }
 0xd79   : > { %v5251_v5 = vpop.f32.mrb[108].mxu0 }
 0xd7a   : > { %v15559_v6 = vadd.f32 %v5251_v5, %v15408_v39  ;;  %v12035_v38 = vpop.f32.mrb[109].mxu0 }
 0xd7b   : > { %v5254_v40 = vpop.f32.mrb[110].mxu0  ;;  %v12665_v38 = vld [vmem:[%s13613_s29 + $0xd4] ss:$8 sps:$4 sm:$0xff]  }
 0xd7c   : > { %v15563_v19 = vadd.f32 %v5254_v40, %v15412_v8  ;;  %v12036_v12 = vpop.f32.mrb[111].mxu0 }
 0xd7d   : > { %v12667_v12 = vld [vmem:[%s13613_s29 + $0xd0] ss:$8 sps:$4 sm:$0xff]  }
 0xda1   : > { %v5365_v39 = vpop.f32.mrb[112].mxu0 }
 0xda2   : > { %v5372_v41 = vmax.f32 %v15475_v31, %v5365_v39  ;;  %v5367_v18 = vpop.f32.mrb[113].mxu0 }
 0xda3   : > { %v5368_v14 = vpop.f32.mrb[114].mxu0 }
 0xda4   : > { %v5373_v8 = vmax.f32 %v15478_v46, %v5368_v14  ;;  %v5430_v20 = vmax.f32 %v5372_v41, %v15496_v55  ;;  %v5370_v10 = vpop.f32.mrb[115].mxu0  ;;  %v12654_v46 = vld [vmem:[%s17698_s6 + $0x318] sm:$0xff]   ;;  %v12656_v55 = vld [vmem:[%s17698_s6 + $0x328] sm:$0xff]  }
 0xda6   : > { %v5431_v25 = vmax.f32 %v5373_v8, %v15498_v60  ;;  %v12658_v60 = vld [vmem:[%s17698_s6 + $0x338] sm:$0xff]  }
 0xdc9   : > { %v5481_v11 = vpop.f32.mrb[116].mxu0 }
 0xdca   : > { %v5488_v26 = vmax.f32 %v5430_v20, %v5481_v11  ;;  %v5483_v22 = vpop.f32.mrb[117].mxu0 }
 0xdcb   : > { %v5484_v27 = vpop.f32.mrb[118].mxu0 }
 0xdcc   : > { %v5490_v16 = vadd.f32 %v15090_v29, %v5488_v26  ;;  %v5489_v24 = vmax.f32 %v5431_v25, %v5484_v27  ;;  %v5486_v42 = vpop.f32.mrb[119].mxu0  ;;  %v15764_v26 = vld [vmem:[%s17697_s5] ss:$0 sm:$0xff] }
 0xdce   : > { %v5491_v23 = vadd.f32 %v15090_v29, %v5489_v24  ;;  %v5492_v28 = vmax.f32 %v5490_v16, 0.0  ;;  %v12644_v29 = vld [vmem:[%s13609_s16 + $0xc0] ss:$8 sps:$4 sm:$0xff]  }
 0xdd0   : > { %v5493_v30 = vmax.f32 %v5491_v23, 0.0 }
 0xdd2   : > { %v5494_v43 = vpack.c.bf16 %v5493_v30, %v5492_v28  ;;  %v12662_v28 = vld [vmem:[%s13609_s16 + $0xd4] ss:$8 sps:$4 sm:$0xff]  }
 0xdd4   : > { %12054 = vmatmul.mubr.bf16.vlgmr.msra.gmra.mrb[116].mxu1 %v5494_v43  ;;  %v12668_v43 = vld [vmem:[%s13615_s17 + $0xd4] ss:$8 sps:$4 sm:$0xff]  }
 0xdd5   : > { %5675 = vmatpush1.bf16.msra.mxu1 %v15538_v36  ;;  %10982 = vmatprep.mubr.msk.bf16.mxu1 %vm1496_vm0, %v12642_v32  ;;  %v12664_v32 = vld [vmem:[%s13609_s16 + $0xd0] ss:$8 sps:$4 sm:$0xff]  }
 0xdd6   : > { %5676 = vmatprep.subr.bf16.mxu1 %v13024_v9 }
 0xdd9   : > { %5677 = vmatpush1.bf16.msra.mxu1 %v15101_v48 }
 0xdda   : > { %5678 = vmatprep.subr.bf16.mxu1 %v13024_v9 }
 0xddd   : > { %5679 = vmatpush1.bf16.msra.mxu1 %v15108_v51 }
 0xdde   : > { %5680 = vmatprep.subr.bf16.mxu1 %v13024_v9 }
 0xde1   : > { %5681 = vmatpush1.bf16.msra.mxu1 %v15115_v52 }
 0xde2   : > { %5682 = vmatprep.subr.bf16.mxu1 %v13024_v9 }
 0xde5   : > { %5683 = vmatpush1.bf16.msra.mxu1 %v15170_v63 }
 0xde6   : > { %5684 = vmatprep.subr.bf16.mxu1 %v13024_v9 }
 0xde9   : > { %5685 = vmatpush1.bf16.msra.mxu1 %v15177_v54 }
 0xdea   : > { %5686 = vmatprep.subr.bf16.mxu1 %v13024_v9 }
 0xded   : > { %5687 = vmatpush1.bf16.msra.mxu1 %v15184_v2 }
 0xdee   : > { %5688 = vmatprep.subr.bf16.mxu1 %v13024_v9 }
 0xdf1   : > { %5689 = vmatpush1.bf16.msra.mxu1 %v15191_v56 }
 0xdf2   : > { %5690 = vmatprep.subr.bf16.mxu1 %v13024_v9 }
 0xdf5   : > { %5691 = vmatpush1.bf16.msra.mxu1 %v15198_v58 }
 0xdf6   : > { %5692 = vmatprep.subr.bf16.mxu1 %v13024_v9 }
 0xdf9   : > { %5693 = vmatpush1.bf16.msra.mxu1 %v13666_v21 }
 0xdfa   : > { %5790 = vmatprep.subr.bf16.mxu1 %v13024_v9 }
 0xdfc   : > { %5707 = vmatmul.mubr.bf16.vlgmr.msra.gmra.mrb[120].mxu1 %v12644_v29  ;;  %v12670_v29 = vld [vmem:[%s13615_s17 + $0xd0] ss:$8 sps:$4 sm:$0xff]  }
 0xdfd   : > { %5791 = vmatpush1.bf16.msra.mxu1 %v15538_v36  ;;  %10992 = vmatprep.mubr.msk.bf16.mxu1 %vm1496_vm0, %v12648_v44 }
 0xdfe   : > { %5792 = vmatprep.subr.bf16.mxu1 %v13024_v9 }
 0xe01   : > { %5793 = vmatpush1.bf16.msra.mxu1 %v15101_v48 }
 0xe02   : > { %5794 = vmatprep.subr.bf16.mxu1 %v13024_v9 }
 0xe05   : > { %5795 = vmatpush1.bf16.msra.mxu1 %v15108_v51  ;;  %v12650_v51 = vld [vmem:[%s13615_s17 + $0xc0] ss:$8 sps:$4 sm:$0xff]  }
 0xe06   : > { %5796 = vmatprep.subr.bf16.mxu1 %v13024_v9 }
 0xe09   : > { %5797 = vmatpush1.bf16.msra.mxu1 %v15115_v52  ;;  %v15626_v52 = vpop.f32.mrb[120].mxu0 }
 0xe0a   : > { %5798 = vmatprep.subr.bf16.mxu1 %v13024_v9  ;;  %v5654_v47 = vpop.f32.mrb[121].mxu0 }
 0xe0b   : > { %v15629_v33 = vpop.f32.mrb[122].mxu0 }
 0xe0c   : > { %v5657_v49 = vpop.f32.mrb[123].mxu0 }
 0xe0d   : > { %5799 = vmatpush1.bf16.msra.mxu1 %v15170_v63 }
 0xe0e   : > { %5800 = vmatprep.subr.bf16.mxu1 %v13024_v9 }
 0xe11   : > { %5801 = vmatpush1.bf16.msra.mxu1 %v15177_v54 }
 0xe12   : > { %5802 = vmatprep.subr.bf16.mxu1 %v13024_v9 }
 0xe15   : > { %5803 = vmatpush1.bf16.msra.mxu1 %v15184_v2 }
 0xe16   : > { %5804 = vmatprep.subr.bf16.mxu1 %v13024_v9 }
 0xe19   : > { %5805 = vmatpush1.bf16.msra.mxu1 %v15191_v56 }
 0xe1a   : > { %5806 = vmatprep.subr.bf16.mxu1 %v13024_v9 }
 0xe1d   : > { %5807 = vmatpush1.bf16.msra.mxu1 %v15198_v58 }
 0xe1e   : > { %5808 = vmatprep.subr.bf16.mxu1 %v13024_v9 }
 0xe21   : > { %5809 = vmatpush1.bf16.msra.mxu1 %v13666_v21 }
 0xe22   : > { %5961 = vmatprep.subr.bf16.mxu1 %v13024_v9 }
 0xe24   : > { %5823 = vmatmul.mubr.bf16.vlgmr.msra.gmra.mrb[124].mxu1 %v12650_v51 }
 0xe25   : > { %5962 = vmatpush1.bf16.msra.mxu1 %v15538_v36  ;;  %11021 = vmatprep.mubr.msk.bf16.mxu1 %vm1496_vm0, %v12659_v61 }
 0xe26   : > { %5963 = vmatprep.subr.bf16.mxu1 %v13024_v9 }
 0xe29   : > { %5964 = vmatpush1.bf16.msra.mxu1 %v15101_v48  ;;  %v15641_v48 = vld [vmem:[%s17696_s4 + $0x18] sm:$0xff]  }
 0xe2a   : > { %5965 = vmatprep.subr.bf16.mxu1 %v13024_v9 }
 0xe2d   : > { %5966 = vmatpush1.bf16.msra.mxu1 %v15634_v50 }
 0xe2e   : > { %5967 = vmatprep.subr.bf16.mxu1 %v13024_v9 }
 0xe31   : > { %5968 = vmatpush1.bf16.msra.mxu1 %v15641_v48 }
 0xe32   : > { %5969 = vmatprep.subr.bf16.mxu1 %v13024_v9 }
 0xe35   : > { %5970 = vmatpush1.bf16.msra.mxu1 %v15170_v63  ;;  %v15657_v63 = vpop.f32.mrb[124].mxu0 }
 0xe36   : > { %5971 = vmatprep.subr.bf16.mxu1 %v13024_v9 }
 0xe39   : > { %5972 = vmatpush1.bf16.msra.mxu1 %v15177_v54  ;;  %v5768_v54 = vpop.f32.mrb[125].mxu0 }
 0xe3a   : > { %5973 = vmatprep.subr.bf16.mxu1 %v13024_v9  ;;  %v15659_v31 = vpop.f32.mrb[126].mxu0  ;;  %v12671_v54 = vld [vmem:[%s17698_s6 + $0x340] sm:$0xff]  }
 0xe3d   : > { %5974 = vmatpush1.bf16.msra.mxu1 %v15184_v2  ;;  %v12651_v2 = vld [vmem:[%s17698_s6 + $0x300] sm:$0xff]  }
 0xe3e   : > { %5975 = vmatprep.subr.bf16.mxu1 %v13024_v9  ;;  %12058 = vmatpush3.bf16.msra.mxu0 %v12651_v2  ;;  %v12672_v2 = vld [vmem:[%s17698_s6 + $0x348] sm:$0xff]  }
 0xe3f   : > { %12059 = vmatprep.subr.bf16.mxu0 %v13025_v45 }
 0xe41   : > { %5976 = vmatpush1.bf16.msra.mxu1 %v15191_v56  ;;  %v5771_v56 = vpop.f32.mrb[127].mxu0 }
 0xe42   : > { %5977 = vmatprep.subr.bf16.mxu1 %v13024_v9  ;;  %v12673_v56 = vld [vmem:[%s17698_s6 + $0x350] sm:$0xff]  }
 0xe45   : > { %5978 = vmatpush1.bf16.msra.mxu1 %v15198_v58  ;;  %v12652_v58 = vld [vmem:[%s17698_s6 + $0x308] sm:$0xff]  }
 0xe46   : > { %5979 = vmatprep.subr.bf16.mxu1 %v13024_v9  ;;  %12060 = vmatpush3.bf16.msra.mxu0 %v12652_v58  ;;  %v12674_v58 = vld [vmem:[%s17698_s6 + $0x358] sm:$0xff]  }
 0xe47   : > { %12061 = vmatprep.subr.bf16.mxu0 %v13025_v45 }
 0xe49   : > { %5980 = vmatpush1.bf16.msra.mxu1 %v13666_v21 }
 0xe4a   : > { %6075 = vmatprep.subr.bf16.mxu1 %v13024_v9  ;;  %12062 = vmatpush3.bf16.msra.mxu0 %v12653_v53  ;;  %v12675_v53 = vld [vmem:[%s17698_s6 + $0x360] sm:$0xff]  }
 0xe4b   : > { %12063 = vmatprep.subr.bf16.mxu0 %v13025_v45 }
 0xe4c   : > { %5994 = vmatmul.mubr.bf16.vlgmr.msra.gmra.mrb[128].mxu1 %v12661_v62 }
 0xe4d   : > { %6076 = vmatpush1.bf16.msra.mxu1 %v15538_v36  ;;  %11031 = vmatprep.mubr.msk.bf16.mxu1 %vm1496_vm0, %v12665_v38 }
 0xe4e   : > { %12064 = vmatpush3.bf16.msra.mxu0 %v12654_v46  ;;  %6077 = vmatprep.subr.bf16.mxu1 %v13024_v9  ;;  %v12676_v46 = vld [vmem:[%s17698_s6 + $0x368] sm:$0xff]  }
 0xe4f   : > { %12065 = vmatprep.subr.bf16.mxu0 %v13025_v45 }
 0xe51   : > { %6078 = vmatpush1.bf16.msra.mxu1 %v15701_v0 }
 0xe52   : > { %12066 = vmatpush3.bf16.msra.mxu0 %v12655_v57  ;;  %6079 = vmatprep.subr.bf16.mxu1 %v13024_v9  ;;  %v12677_v57 = vld [vmem:[%s17698_s6 + $0x370] sm:$0xff]  }
 0xe53   : > { %12067 = vmatprep.subr.bf16.mxu0 %v13025_v45 }
 0xe55   : > { %6080 = vmatpush1.bf16.msra.mxu1 %v15634_v50 }
 0xe56   : > { %12068 = vmatpush3.bf16.msra.mxu0 %v12656_v55  ;;  %6081 = vmatprep.subr.bf16.mxu1 %v13024_v9  ;;  %v12678_v55 = vld [vmem:[%s17698_s6 + $0x378] sm:$0xff]  }
 0xe57   : > { %12069 = vmatprep.subr.bf16.mxu0 %v13025_v45 }
 0xe59   : > { %6082 = vmatpush1.bf16.msra.mxu1 %v15641_v48 }
 0xe5a   : > { %12070 = vmatpush3.bf16.msra.mxu0 %v12657_v59  ;;  %6083 = vmatprep.subr.bf16.mxu1 %v13024_v9  ;;  %v12679_v59 = vld [vmem:[%s13597_s14 + $0xe4] ss:$8 sps:$4 sm:$0xff]  }
 0xe5b   : > { %12071 = vmatprep.subr.bf16.mxu0 %v13025_v45 }
 0xe5d   : > { %6084 = vmatpush1.bf16.msra.mxu1 %v15712_v1 }
 0xe5e   : > { %12072 = vmatpush3.bf16.msra.mxu0 %v12658_v60  ;;  %6085 = vmatprep.subr.bf16.mxu1 %v13024_v9  ;;  %v12681_v60 = vld [vmem:[%s13597_s14 + $0xe0] ss:$8 sps:$4 sm:$0xff]  }
 0xe5f   : > { %6017 = vmatprep.subr.bf16.mxu0 %v13024_v9 }
 0xe61   : > { %6086 = vmatpush1.bf16.msra.mxu1 %v15719_v3 }
 0xe62   : > { %6087 = vmatprep.subr.bf16.mxu1 %v13024_v9 }
 0xe65   : > { %6088 = vmatpush1.bf16.msra.mxu1 %v15726_v4 }
 0xe66   : > { %6089 = vmatprep.subr.bf16.mxu1 %v13024_v9 }
 0xe69   : > { %6090 = vmatpush1.bf16.msra.mxu1 %v15733_v13 }
 0xe6a   : > { %6091 = vmatprep.subr.bf16.mxu1 %v13024_v9 }
 0xe6d   : > { %6092 = vmatpush1.bf16.msra.mxu1 %v15740_v34 }
 0xe6e   : > { %6093 = vmatprep.subr.bf16.mxu1 %v13024_v9 }
 0xe71   : > { %6094 = vmatpush1.bf16.msra.mxu1 %v13666_v21 }
 0xe72   : > { %12077 = vmatprep.subr.bf16.mxu1 %v13025_v45 }
 0xe74   : > { %6108 = vmatmul.mubr.bf16.vlgmr.msra.gmra.mrb[132].mxu1 %v12667_v12  ;;  %v12687_v12 = vld [vmem:[%s13613_s29 + $0xe0] ss:$8 sps:$4 sm:$0xff]  }
 0xe75   : > { %12093 = vmatprep.mubr.msk.bf16.mxu1 %vm13026_vm2, %v13025_v45  ;;  %12078 = vmatpush3.bf16.msra.mxu1 %v12671_v54  ;;  %v12692_v54 = vld [vmem:[%s17698_s6 + $0x388] sm:$0xff]  }
 0xe76   : > { %12079 = vmatprep.subr.bf16.mxu1 %v13025_v45 }
 0xe79   : > { %12080 = vmatpush3.bf16.msra.mxu1 %v12672_v2  ;;  %v12694_v2 = vld [vmem:[%s17698_s6 + $0x398] sm:$0xff]  }
 0xe7a   : > { %12081 = vmatprep.subr.bf16.mxu1 %v13025_v45 }
 0xe7d   : > { %12082 = vmatpush3.bf16.msra.mxu1 %v12673_v56  ;;  %v12695_v56 = vld [vmem:[%s17698_s6 + $0x3a0] sm:$0xff]  }
 0xe7e   : > { %12083 = vmatprep.subr.bf16.mxu1 %v13025_v45 }
 0xe81   : > { %12084 = vmatpush3.bf16.msra.mxu1 %v12674_v58  ;;  %v12696_v58 = vld [vmem:[%s17698_s6 + $0x3a8] sm:$0xff]  }
 0xe82   : > { %12085 = vmatprep.subr.bf16.mxu1 %v13025_v45 }
 0xe85   : > { %12086 = vmatpush3.bf16.msra.mxu1 %v12675_v53  ;;  %v12697_v53 = vld [vmem:[%s17698_s6 + $0x3b0] sm:$0xff]  }
 0xe86   : > { %12087 = vmatprep.subr.bf16.mxu1 %v13025_v45 }
 0xe89   : > { %12088 = vmatpush3.bf16.msra.mxu1 %v12676_v46  ;;  %v12698_v46 = vld [vmem:[%s17698_s6 + $0x3b8] sm:$0xff]  }
 0xe8a   : > { %12089 = vmatprep.subr.bf16.mxu1 %v13025_v45 }
 0xe8d   : > { %12090 = vmatpush3.bf16.msra.mxu1 %v12677_v57  ;;  %v12699_v57 = vld [vmem:[%s13597_s14 + $0xf4] ss:$8 sps:$4 sm:$0xff]  }
 0xe8e   : > { %12091 = vmatprep.subr.bf16.mxu1 %v13025_v45 }
 0xe91   : > { %12092 = vmatpush3.bf16.msra.mxu1 %v12678_v55  ;;  %v12701_v55 = vld [vmem:[%s13597_s14 + $0xf0] ss:$8 sps:$4 sm:$0xff]  }
 0xe92   : > { %6360 = vmatprep.subr.bf16.mxu1 %v13024_v9 }
 0xea7   : > { %v5594_v35 = vpop.f32.mrb[116].mxu1 }
 0xea8   : > { %v15745_v7 = vadd.f32 %v5594_v35, %v15559_v6  ;;  %v12055_v37 = vpop.f32.mrb[117].mxu1 }
 0xea9   : > { %v5597_v5 = vpop.f32.mrb[118].mxu1 }
 0xeaa   : > { %v15749_v40 = vadd.f32 %v5597_v5, %v15563_v19  ;;  %v12056_v17 = vpop.f32.mrb[119].mxu1  ;;  %v12685_v5 = vld [vmem:[%s13613_s29 + $0xe4] ss:$8 sps:$4 sm:$0xff]  }
 0xecf   : > { %v5708_v6 = vpop.f32.mrb[120].mxu1 }
 0xed0   : > { %v5715_v15 = vmax.f32 %v15626_v52, %v5708_v6  ;;  %v5710_v39 = vpop.f32.mrb[121].mxu1 }
 0xed1   : > { %v5711_v41 = vpop.f32.mrb[122].mxu1 }
 0xed2   : > { %v5716_v19 = vmax.f32 %v15629_v33, %v5711_v41  ;;  %v5773_v18 = vmax.f32 %v5715_v15, %v15657_v63  ;;  %v5713_v14 = vpop.f32.mrb[123].mxu1 }
 0xed4   : > { %v5774_v8 = vmax.f32 %v5716_v19, %v15659_v31 }
 0xef7   : > { %v5824_v20 = vpop.f32.mrb[124].mxu1 }
 0xef8   : > { %v5831_v10 = vmax.f32 %v5773_v18, %v5824_v20  ;;  %v5826_v25 = vpop.f32.mrb[125].mxu1 }
 0xef9   : > { %v5827_v11 = vpop.f32.mrb[126].mxu1 }
 0xefa   : > { %v5833_v22 = vadd.f32 %v15764_v26, %v5831_v10  ;;  %v5832_v27 = vmax.f32 %v5774_v8, %v5827_v11  ;;  %v5829_v16 = vpop.f32.mrb[127].mxu1 }
 0xefc   : > { %v5834_v24 = vadd.f32 %v15764_v26, %v5832_v27  ;;  %v5835_v42 = vmax.f32 %v5833_v22, 0.0 }
 0xefe   : > { %v5836_v23 = vmax.f32 %v5834_v24, 0.0 }
 0xf00   : > { %v5837_v30 = vpack.c.bf16 %v5836_v23, %v5835_v42  ;;  %v12682_v42 = vld [vmem:[%s13609_s16 + $0xe4] ss:$8 sps:$4 sm:$0xff]  }
 0xf02   : > { %12074 = vmatmul.mubr.bf16.vlgmr.msra.gmra.mrb[128].mxu0 %v5837_v30  ;;  %v12688_v30 = vld [vmem:[%s13615_s17 + $0xe4] ss:$8 sps:$4 sm:$0xff]  }
 0xf03   : > { %6018 = vmatpush1.bf16.msra.mxu0 %v15538_v36  ;;  %11026 = vmatprep.mubr.msk.bf16.mxu0 %vm1496_vm0, %v12662_v28  ;;  %v12684_v28 = vld [vmem:[%s13609_s16 + $0xe0] ss:$8 sps:$4 sm:$0xff]  }
 0xf04   : > { %6019 = vmatprep.subr.bf16.mxu0 %v13024_v9 }
 0xf07   : > { %6020 = vmatpush1.bf16.msra.mxu0 %v15701_v0 }
 0xf08   : > { %6021 = vmatprep.subr.bf16.mxu0 %v13024_v9 }
 0xf0b   : > { %6022 = vmatpush1.bf16.msra.mxu0 %v15634_v50 }
 0xf0c   : > { %6023 = vmatprep.subr.bf16.mxu0 %v13024_v9 }
 0xf0f   : > { %6024 = vmatpush1.bf16.msra.mxu0 %v15641_v48 }
 0xf10   : > { %6025 = vmatprep.subr.bf16.mxu0 %v13024_v9 }
 0xf13   : > { %6026 = vmatpush1.bf16.msra.mxu0 %v15712_v1 }
 0xf14   : > { %6027 = vmatprep.subr.bf16.mxu0 %v13024_v9 }
 0xf17   : > { %6028 = vmatpush1.bf16.msra.mxu0 %v15719_v3 }
 0xf18   : > { %6029 = vmatprep.subr.bf16.mxu0 %v13024_v9 }
 0xf1b   : > { %6030 = vmatpush1.bf16.msra.mxu0 %v15726_v4 }
 0xf1c   : > { %6031 = vmatprep.subr.bf16.mxu0 %v13024_v9 }
 0xf1f   : > { %6032 = vmatpush1.bf16.msra.mxu0 %v15733_v13  ;;  %v15817_v44 = vpop.f32.mrb[128].mxu1 }
 0xf20   : > { %6033 = vmatprep.subr.bf16.mxu0 %v13024_v9  ;;  %v5997_v51 = vpop.f32.mrb[129].mxu1 }
 0xf21   : > { %v15820_v52 = vpop.f32.mrb[130].mxu1 }
 0xf22   : > { %v6000_v47 = vpop.f32.mrb[131].mxu1 }
 0xf23   : > { %6034 = vmatpush1.bf16.msra.mxu0 %v15740_v34 }
 0xf24   : > { %6035 = vmatprep.subr.bf16.mxu0 %v13024_v9 }
 0xf27   : > { %6036 = vmatpush1.bf16.msra.mxu0 %v13666_v21 }
 0xf28   : > { %6133 = vmatprep.subr.bf16.mxu0 %v13024_v9 }
 0xf2a   : > { %6050 = vmatmul.mubr.bf16.vlgmr.msra.gmra.mrb[132].mxu0 %v12664_v32  ;;  %v12690_v32 = vld [vmem:[%s13615_s17 + $0xe0] ss:$8 sps:$4 sm:$0xff]  }
 0xf2b   : > { %6134 = vmatpush1.bf16.msra.mxu0 %v15538_v36  ;;  %11036 = vmatprep.mubr.msk.bf16.mxu0 %vm1496_vm0, %v12668_v43 }
 0xf2c   : > { %6135 = vmatprep.subr.bf16.mxu0 %v13024_v9 }
 0xf2f   : > { %6136 = vmatpush1.bf16.msra.mxu0 %v15701_v0 }
 0xf30   : > { %6137 = vmatprep.subr.bf16.mxu0 %v13024_v9 }
 0xf33   : > { %6138 = vmatpush1.bf16.msra.mxu0 %v15634_v50 }
 0xf34   : > { %6139 = vmatprep.subr.bf16.mxu0 %v13024_v9 }
 0xf37   : > { %6140 = vmatpush1.bf16.msra.mxu0 %v15641_v48 }
 0xf38   : > { %6141 = vmatprep.subr.bf16.mxu0 %v13024_v9 }
 0xf3b   : > { %6142 = vmatpush1.bf16.msra.mxu0 %v15712_v1 }
 0xf3c   : > { %6143 = vmatprep.subr.bf16.mxu0 %v13024_v9 }
 0xf3f   : > { %6144 = vmatpush1.bf16.msra.mxu0 %v15719_v3 }
 0xf40   : > { %6145 = vmatprep.subr.bf16.mxu0 %v13024_v9 }
 0xf43   : > { %6146 = vmatpush1.bf16.msra.mxu0 %v15726_v4 }
 0xf44   : > { %6147 = vmatprep.subr.bf16.mxu0 %v13024_v9 }
 0xf47   : > { %6148 = vmatpush1.bf16.msra.mxu0 %v15733_v13  ;;  %v15838_v33 = vpop.f32.mrb[132].mxu1 }
 0xf48   : > { %6149 = vmatprep.subr.bf16.mxu0 %v13024_v9  ;;  %v6111_v49 = vpop.f32.mrb[133].mxu1 }
 0xf49   : > { %v15840_v63 = vpop.f32.mrb[134].mxu1  ;;  %v12691_v49 = vld [vmem:[%s17698_s6 + $0x380] sm:$0xff]  }
 0xf4a   : > { %v6114_v31 = vpop.f32.mrb[135].mxu1 }
 0xf4b   : > { %6150 = vmatpush1.bf16.msra.mxu0 %v15740_v34  ;;  %v12693_v31 = vld [vmem:[%s17698_s6 + $0x390] sm:$0xff]  }
 0xf4c   : > { %6151 = vmatprep.subr.bf16.mxu0 %v13024_v9 }
 0xf4f   : > { %6152 = vmatpush1.bf16.msra.mxu0 %v13666_v21 }
 0xf50   : > { %6304 = vmatprep.subr.bf16.mxu0 %v13024_v9 }
 0xf52   : > { %6166 = vmatmul.mubr.bf16.vlgmr.msra.gmra.mrb[136].mxu0 %v12670_v29 }
 0xf53   : > { %6305 = vmatpush1.bf16.msra.mxu0 %v15538_v36  ;;  %11065 = vmatprep.mubr.msk.bf16.mxu0 %vm1496_vm0, %v12679_v59 }
 0xf54   : > { %6306 = vmatprep.subr.bf16.mxu0 %v13024_v9 }
 0xf57   : > { %6307 = vmatpush1.bf16.msra.mxu0 %v15701_v0 }
 0xf58   : > { %6308 = vmatprep.subr.bf16.mxu0 %v13024_v9 }
 0xf5b   : > { %6309 = vmatpush1.bf16.msra.mxu0 %v15634_v50 }
 0xf5c   : > { %6310 = vmatprep.subr.bf16.mxu0 %v13024_v9 }
 0xf5f   : > { %6311 = vmatpush1.bf16.msra.mxu0 %v15641_v48 }
 0xf60   : > { %6312 = vmatprep.subr.bf16.mxu0 %v13024_v9 }
 0xf63   : > { %6313 = vmatpush1.bf16.msra.mxu0 %v15712_v1 }
 0xf64   : > { %6314 = vmatprep.subr.bf16.mxu0 %v13024_v9 }
 0xf67   : > { %6315 = vmatpush1.bf16.msra.mxu0 %v15719_v3 }
 0xf68   : > { %6316 = vmatprep.subr.bf16.mxu0 %v13024_v9 }
 0xf6b   : > { %6317 = vmatpush1.bf16.msra.mxu0 %v15726_v4 }
 0xf6c   : > { %6318 = vmatprep.subr.bf16.mxu0 %v13024_v9 }
 0xf6f   : > { %6319 = vmatpush1.bf16.msra.mxu0 %v15733_v13 }
 0xf70   : > { %6320 = vmatprep.subr.bf16.mxu0 %v13024_v9 }
 0xf73   : > { %6321 = vmatpush1.bf16.msra.mxu0 %v15740_v34 }
 0xf74   : > { %6322 = vmatprep.subr.bf16.mxu0 %v13024_v9 }
 0xf77   : > { %6323 = vmatpush1.bf16.msra.mxu0 %v13666_v21 }
 0xf78   : > { %6418 = vmatprep.subr.bf16.mxu0 %v13024_v9 }
 0xf7a   : > { %6337 = vmatmul.mubr.bf16.vlgmr.msra.gmra.mrb[140].mxu0 %v12681_v60 }
 0xf7b   : > { %6419 = vmatpush1.bf16.msra.mxu0 %v15538_v36  ;;  %11075 = vmatprep.mubr.msk.bf16.mxu0 %vm1496_vm0, %v12685_v5 }
 0xf7c   : > { %6420 = vmatprep.subr.bf16.mxu0 %v13024_v9 }
 0xf7f   : > { %6421 = vmatpush1.bf16.msra.mxu0 %v15701_v0 }
 0xf80   : > { %6422 = vmatprep.subr.bf16.mxu0 %v13024_v9 }
 0xf83   : > { %6423 = vmatpush1.bf16.msra.mxu0 %v15634_v50 }
 0xf84   : > { %6424 = vmatprep.subr.bf16.mxu0 %v13024_v9 }
 0xf87   : > { %6425 = vmatpush1.bf16.msra.mxu0 %v15641_v48 }
 0xf88   : > { %6426 = vmatprep.subr.bf16.mxu0 %v13024_v9 }
 0xf8b   : > { %6427 = vmatpush1.bf16.msra.mxu0 %v15712_v1 }
 0xf8c   : > { %6428 = vmatprep.subr.bf16.mxu0 %v13024_v9 }
 0xf8f   : > { %6429 = vmatpush1.bf16.msra.mxu0 %v15719_v3 }
 0xf90   : > { %6430 = vmatprep.subr.bf16.mxu0 %v13024_v9 }
 0xf93   : > { %6431 = vmatpush1.bf16.msra.mxu0 %v15726_v4 }
 0xf94   : > { %6432 = vmatprep.subr.bf16.mxu0 %v13024_v9 }
 0xf97   : > { %6433 = vmatpush1.bf16.msra.mxu0 %v15733_v13 }
 0xf98   : > { %6434 = vmatprep.subr.bf16.mxu0 %v13024_v9 }
 0xf9b   : > { %6435 = vmatpush1.bf16.msra.mxu0 %v15740_v34 }
 0xf9c   : > { %6436 = vmatprep.subr.bf16.mxu0 %v13024_v9 }
 0xf9f   : > { %6437 = vmatpush1.bf16.msra.mxu0 %v13666_v21 }
 0xfa0   : > { %12097 = vmatprep.subr.bf16.mxu0 %v13025_v45 }
 0xfa2   : > { %6451 = vmatmul.mubr.bf16.vlgmr.msra.gmra.mrb[144].mxu0 %v12687_v12 }
 0xfa3   : > { %12113 = vmatprep.mubr.msk.bf16.mxu0 %vm13026_vm2, %v13025_v45  ;;  %12098 = vmatpush3.bf16.msra.mxu0 %v12691_v49  ;;  %v12714_v49 = vld [vmem:[%s17698_s6 + $0x3d8] sm:$0xff]  }
 0xfa4   : > { %12099 = vmatprep.subr.bf16.mxu0 %v13025_v45 }
 0xfa7   : > { %12100 = vmatpush3.bf16.msra.mxu0 %v12692_v54  ;;  %v12716_v54 = vld [vmem:[%s17698_s6 + $0x3e8] sm:$0xff]  }
 0xfa8   : > { %12101 = vmatprep.subr.bf16.mxu0 %v13025_v45 }
 0xfab   : > { %12102 = vmatpush3.bf16.msra.mxu0 %v12693_v31  ;;  %v12717_v31 = vld [vmem:[%s17698_s6 + $0x3f0] sm:$0xff]  }
 0xfac   : > { %12103 = vmatprep.subr.bf16.mxu0 %v13025_v45 }
 0xfaf   : > { %12104 = vmatpush3.bf16.msra.mxu0 %v12694_v2  ;;  %v12718_v2 = vld [vmem:[%s17698_s6 + $0x3f8] sm:$0xff]  }
 0xfb0   : > { %12105 = vmatprep.subr.bf16.mxu0 %v13025_v45 }
 0xfb3   : > { %12106 = vmatpush3.bf16.msra.mxu0 %v12695_v56  ;;  %v12719_v56 = vld [vmem:[%s13597_s14 + $0x104] ss:$8 sps:$4 sm:$0xff]  }
 0xfb4   : > { %12107 = vmatprep.subr.bf16.mxu0 %v13025_v45 }
 0xfb7   : > { %12108 = vmatpush3.bf16.msra.mxu0 %v12696_v58  ;;  %v12721_v58 = vld [vmem:[%s13597_s14 + $0x100] ss:$8 sps:$4 sm:$0xff]  }
 0xfb8   : > { %12109 = vmatprep.subr.bf16.mxu0 %v13025_v45 }
 0xfbb   : > { %12110 = vmatpush3.bf16.msra.mxu0 %v12697_v53  ;;  %v16181_v53 = vld [vmem:[%s17696_s4 + $0x10] sm:$0xff]  }
 0xfbc   : > { %12111 = vmatprep.subr.bf16.mxu0 %v13025_v45 }
 0xfbf   : > { %12112 = vmatpush3.bf16.msra.mxu0 %v12698_v46  ;;  %v16188_v46 = vld [vmem:[%s17696_s4 + $0x18] sm:$0xff]  }
 0xfc0   : > { %6703 = vmatprep.subr.bf16.mxu0 %v13024_v9 }
 0xfd5   : > { %v5937_v61 = vpop.f32.mrb[128].mxu0 }
 0xfd6   : > { %v15896_v62 = vadd.f32 %v5937_v61, %v15745_v7  ;;  %v12075_v35 = vpop.f32.mrb[129].mxu0 }
 0xfd7   : > { %v5940_v37 = vpop.f32.mrb[130].mxu0  ;;  %v12705_v35 = vld [vmem:[%s13613_s29 + $0xf4] ss:$8 sps:$4 sm:$0xff]  }
 0xfd8   : > { %v15900_v38 = vadd.f32 %v5940_v37, %v15749_v40  ;;  %v12076_v17 = vpop.f32.mrb[131].mxu0 }
 0xfd9   : > { %v12707_v17 = vld [vmem:[%s13613_s29 + $0xf0] ss:$8 sps:$4 sm:$0xff]  }
 0xffd   : > { %v6051_v7 = vpop.f32.mrb[132].mxu0 }
 0xffe   : > { %v6058_v6 = vmax.f32 %v15817_v44, %v6051_v7  ;;  %v6053_v15 = vpop.f32.mrb[133].mxu0 }
 0xfff   : > { %v6054_v39 = vpop.f32.mrb[134].mxu0 }
0x1000   : > { %v6059_v40 = vmax.f32 %v15820_v52, %v6054_v39  ;;  %v6116_v41 = vmax.f32 %v6058_v6, %v15838_v33  ;;  %v6056_v19 = vpop.f32.mrb[135].mxu0 }
0x1002   : > { %v6117_v18 = vmax.f32 %v6059_v40, %v15840_v63 }
0x1025   : > { %v6167_v14 = vpop.f32.mrb[136].mxu0 }
0x1026   : > { %v6174_v8 = vmax.f32 %v6116_v41, %v6167_v14  ;;  %v6169_v20 = vpop.f32.mrb[137].mxu0 }
0x1027   : > { %v6170_v10 = vpop.f32.mrb[138].mxu0 }
0x1028   : > { %v6176_v25 = vadd.f32 %v15764_v26, %v6174_v8  ;;  %v6175_v11 = vmax.f32 %v6117_v18, %v6170_v10  ;;  %v6172_v22 = vpop.f32.mrb[139].mxu0 }
0x102a   : > { %v6177_v27 = vadd.f32 %v15764_v26, %v6175_v11  ;;  %v6178_v16 = vmax.f32 %v6176_v25, 0.0 }
0x102c   : > { %v6179_v24 = vmax.f32 %v6177_v27, 0.0  ;;  %v12702_v27 = vld [vmem:[%s13609_s16 + $0xf4] ss:$8 sps:$4 sm:$0xff]  }
0x102e   : > { %v6180_v23 = vpack.c.bf16 %v6179_v24, %v6178_v16  ;;  %v16064_v24 = vld [vmem:[%s17696_s4] sm:$0xff]  }
0x1030   : > { %12094 = vmatmul.mubr.bf16.vlgmr.msra.gmra.mrb[136].mxu1 %v6180_v23  ;;  %v12708_v23 = vld [vmem:[%s13615_s17 + $0xf4] ss:$8 sps:$4 sm:$0xff]  }
0x1031   : > { %6361 = vmatpush1.bf16.msra.mxu1 %v15538_v36  ;;  %11070 = vmatprep.mubr.msk.bf16.mxu1 %vm1496_vm0, %v12682_v42  ;;  %v12704_v42 = vld [vmem:[%s13609_s16 + $0xf0] ss:$8 sps:$4 sm:$0xff]  }
0x1032   : > { %6362 = vmatprep.subr.bf16.mxu1 %v13024_v9 }
0x1035   : > { %6363 = vmatpush1.bf16.msra.mxu1 %v15701_v0 }
0x1036   : > { %6364 = vmatprep.subr.bf16.mxu1 %v13024_v9 }
0x1039   : > { %6365 = vmatpush1.bf16.msra.mxu1 %v15634_v50 }
0x103a   : > { %6366 = vmatprep.subr.bf16.mxu1 %v13024_v9 }
0x103d   : > { %6367 = vmatpush1.bf16.msra.mxu1 %v15641_v48 }
0x103e   : > { %6368 = vmatprep.subr.bf16.mxu1 %v13024_v9 }
0x1041   : > { %6369 = vmatpush1.bf16.msra.mxu1 %v15712_v1 }
0x1042   : > { %6370 = vmatprep.subr.bf16.mxu1 %v13024_v9 }
0x1045   : > { %6371 = vmatpush1.bf16.msra.mxu1 %v15719_v3 }
0x1046   : > { %6372 = vmatprep.subr.bf16.mxu1 %v13024_v9 }
0x1049   : > { %6373 = vmatpush1.bf16.msra.mxu1 %v15726_v4 }
0x104a   : > { %6374 = vmatprep.subr.bf16.mxu1 %v13024_v9 }
0x104d   : > { %6375 = vmatpush1.bf16.msra.mxu1 %v15733_v13  ;;  %v15963_v43 = vpop.f32.mrb[140].mxu0 }
0x104e   : > { %6376 = vmatprep.subr.bf16.mxu1 %v13024_v9  ;;  %v6340_v29 = vpop.f32.mrb[141].mxu0 }
0x104f   : > { %v15966_v44 = vpop.f32.mrb[142].mxu0 }
0x1050   : > { %v6343_v51 = vpop.f32.mrb[143].mxu0 }
0x1051   : > { %6377 = vmatpush1.bf16.msra.mxu1 %v15740_v34  ;;  %v12711_v51 = vld [vmem:[%s17698_s6 + $0x3c0] sm:$0xff]  }
0x1052   : > { %6378 = vmatprep.subr.bf16.mxu1 %v13024_v9 }
0x1055   : > { %6379 = vmatpush1.bf16.msra.mxu1 %v13666_v21 }
0x1056   : > { %6476 = vmatprep.subr.bf16.mxu1 %v13024_v9 }
0x1058   : > { %6393 = vmatmul.mubr.bf16.vlgmr.msra.gmra.mrb[140].mxu1 %v12684_v28  ;;  %v12710_v28 = vld [vmem:[%s13615_s17 + $0xf0] ss:$8 sps:$4 sm:$0xff]  }
0x1059   : > { %6477 = vmatpush1.bf16.msra.mxu1 %v15538_v36  ;;  %11080 = vmatprep.mubr.msk.bf16.mxu1 %vm1496_vm0, %v12688_v30 }
0x105a   : > { %6478 = vmatprep.subr.bf16.mxu1 %v13024_v9 }
0x105d   : > { %6479 = vmatpush1.bf16.msra.mxu1 %v15701_v0 }
0x105e   : > { %6480 = vmatprep.subr.bf16.mxu1 %v13024_v9 }
0x1061   : > { %6481 = vmatpush1.bf16.msra.mxu1 %v15634_v50 }
0x1062   : > { %6482 = vmatprep.subr.bf16.mxu1 %v13024_v9 }
0x1065   : > { %6483 = vmatpush1.bf16.msra.mxu1 %v15641_v48 }
0x1066   : > { %6484 = vmatprep.subr.bf16.mxu1 %v13024_v9 }
0x1069   : > { %6485 = vmatpush1.bf16.msra.mxu1 %v15712_v1 }
0x106a   : > { %6486 = vmatprep.subr.bf16.mxu1 %v13024_v9 }
0x106d   : > { %6487 = vmatpush1.bf16.msra.mxu1 %v15719_v3 }
0x106e   : > { %6488 = vmatprep.subr.bf16.mxu1 %v13024_v9 }
0x1071   : > { %6489 = vmatpush1.bf16.msra.mxu1 %v15726_v4 }
0x1072   : > { %6490 = vmatprep.subr.bf16.mxu1 %v13024_v9 }
0x1075   : > { %6491 = vmatpush1.bf16.msra.mxu1 %v15733_v13  ;;  %v15984_v52 = vpop.f32.mrb[144].mxu0 }
0x1076   : > { %6492 = vmatprep.subr.bf16.mxu1 %v13024_v9  ;;  %v6454_v47 = vpop.f32.mrb[145].mxu0 }
0x1077   : > { %v15986_v33 = vpop.f32.mrb[146].mxu0  ;;  %v12712_v47 = vld [vmem:[%s17698_s6 + $0x3c8] sm:$0xff]  }
0x1078   : > { %v6457_v63 = vpop.f32.mrb[147].mxu0 }
0x1079   : > { %6493 = vmatpush1.bf16.msra.mxu1 %v15740_v34  ;;  %v12715_v63 = vld [vmem:[%s17698_s6 + $0x3e0] sm:$0xff]  }
0x107a   : > { %6494 = vmatprep.subr.bf16.mxu1 %v13024_v9 }
0x107d   : > { %6495 = vmatpush1.bf16.msra.mxu1 %v13666_v21 }
0x107e   : > { %6647 = vmatprep.subr.bf16.mxu1 %v13024_v9 }
0x1080   : > { %6509 = vmatmul.mubr.bf16.vlgmr.msra.gmra.mrb[144].mxu1 %v12690_v32 }
0x1081   : > { %6648 = vmatpush1.bf16.msra.mxu1 %v15538_v36  ;;  %11109 = vmatprep.mubr.msk.bf16.mxu1 %vm1496_vm0, %v12699_v57 }
0x1082   : > { %6649 = vmatprep.subr.bf16.mxu1 %v13024_v9 }
0x1085   : > { %6650 = vmatpush1.bf16.msra.mxu1 %v15701_v0 }
0x1086   : > { %6651 = vmatprep.subr.bf16.mxu1 %v13024_v9 }
0x1089   : > { %6652 = vmatpush1.bf16.msra.mxu1 %v15634_v50 }
0x108a   : > { %6653 = vmatprep.subr.bf16.mxu1 %v13024_v9 }
0x108d   : > { %6654 = vmatpush1.bf16.msra.mxu1 %v15641_v48 }
0x108e   : > { %6655 = vmatprep.subr.bf16.mxu1 %v13024_v9 }
0x1091   : > { %6656 = vmatpush1.bf16.msra.mxu1 %v15712_v1 }
0x1092   : > { %6657 = vmatprep.subr.bf16.mxu1 %v13024_v9 }
0x1095   : > { %6658 = vmatpush1.bf16.msra.mxu1 %v15719_v3 }
0x1096   : > { %6659 = vmatprep.subr.bf16.mxu1 %v13024_v9 }
0x1099   : > { %6660 = vmatpush1.bf16.msra.mxu1 %v15726_v4 }
0x109a   : > { %6661 = vmatprep.subr.bf16.mxu1 %v13024_v9 }
0x109d   : > { %6662 = vmatpush1.bf16.msra.mxu1 %v15733_v13 }
0x109e   : > { %6663 = vmatprep.subr.bf16.mxu1 %v13024_v9 }
0x10a1   : > { %6664 = vmatpush1.bf16.msra.mxu1 %v15740_v34 }
0x10a2   : > { %6665 = vmatprep.subr.bf16.mxu1 %v13024_v9 }
0x10a5   : > { %6666 = vmatpush1.bf16.msra.mxu1 %v13666_v21 }
0x10a6   : > { %6761 = vmatprep.subr.bf16.mxu1 %v13024_v9 }
0x10a8   : > { %6680 = vmatmul.mubr.bf16.vlgmr.msra.gmra.mrb[148].mxu1 %v12701_v55  ;;  %v12725_v55 = vld [vmem:[%s13613_s29 + $0x104] ss:$8 sps:$4 sm:$0xff]  }
0x10a9   : > { %6762 = vmatpush1.bf16.msra.mxu1 %v15538_v36  ;;  %11119 = vmatprep.mubr.msk.bf16.mxu1 %vm1496_vm0, %v12705_v35 }
0x10aa   : > { %6763 = vmatprep.subr.bf16.mxu1 %v13024_v9 }
0x10ad   : > { %6764 = vmatpush1.bf16.msra.mxu1 %v15701_v0 }
0x10ae   : > { %6765 = vmatprep.subr.bf16.mxu1 %v13024_v9 }
0x10b1   : > { %6766 = vmatpush1.bf16.msra.mxu1 %v15634_v50 }
0x10b2   : > { %6767 = vmatprep.subr.bf16.mxu1 %v13024_v9 }
0x10b5   : > { %6768 = vmatpush1.bf16.msra.mxu1 %v15641_v48 }
0x10b6   : > { %6769 = vmatprep.subr.bf16.mxu1 %v13024_v9 }
0x10b9   : > { %6770 = vmatpush1.bf16.msra.mxu1 %v15712_v1 }
0x10ba   : > { %6771 = vmatprep.subr.bf16.mxu1 %v13024_v9 }
0x10bd   : > { %6772 = vmatpush1.bf16.msra.mxu1 %v15719_v3 }
0x10be   : > { %6773 = vmatprep.subr.bf16.mxu1 %v13024_v9 }
0x10c1   : > { %6774 = vmatpush1.bf16.msra.mxu1 %v15726_v4 }
0x10c2   : > { %6775 = vmatprep.subr.bf16.mxu1 %v13024_v9 }
0x10c5   : > { %6776 = vmatpush1.bf16.msra.mxu1 %v15733_v13 }
0x10c6   : > { %6777 = vmatprep.subr.bf16.mxu1 %v13024_v9 }
0x10c9   : > { %6778 = vmatpush1.bf16.msra.mxu1 %v15740_v34 }
0x10ca   : > { %6779 = vmatprep.subr.bf16.mxu1 %v13024_v9 }
0x10cd   : > { %6780 = vmatpush1.bf16.msra.mxu1 %v13666_v21 }
0x10ce   : > { %12117 = vmatprep.subr.bf16.mxu1 %v13025_v45 }
0x10d0   : > { %6794 = vmatmul.mubr.bf16.vlgmr.msra.gmra.mrb[152].mxu1 %v12707_v17 }
0x10d1   : > { %12133 = vmatprep.mubr.msk.bf16.mxu1 %vm13026_vm2, %v13025_v45  ;;  %12118 = vmatpush3.bf16.msra.mxu1 %v12711_v51  ;;  %v12733_v51 = vld [vmem:[%s17698_s6 + $0x410] sm:$0xff]  }
0x10d2   : > { %12119 = vmatprep.subr.bf16.mxu1 %v13025_v45 }
0x10d5   : > { %12120 = vmatpush3.bf16.msra.mxu1 %v12712_v47  ;;  %v12735_v47 = vld [vmem:[%s17698_s6 + $0x420] sm:$0xff]  }
0x10d6   : > { %12121 = vmatprep.subr.bf16.mxu1 %v13025_v45 }
0x1103   : > { %v6280_v36 = vpop.f32.mrb[136].mxu1 }
0x1104   : > { %v16042_v59 = vadd.f32 %v6280_v36, %v15896_v62  ;;  %v12095_v60 = vpop.f32.mrb[137].mxu1 }
0x1105   : > { %v6283_v61 = vpop.f32.mrb[138].mxu1 }
0x1106   : > { %v16046_v37 = vadd.f32 %v6283_v61, %v15900_v38  ;;  %v12096_v5 = vpop.f32.mrb[139].mxu1 }
0x112b   : > { %v6394_v62 = vpop.f32.mrb[140].mxu1 }
0x112c   : > { %v6401_v12 = vmax.f32 %v15963_v43, %v6394_v62  ;;  %v6396_v7 = vpop.f32.mrb[141].mxu1 }
0x112d   : > { %v6397_v6 = vpop.f32.mrb[142].mxu1 }
0x112e   : > { %v6402_v38 = vmax.f32 %v15966_v44, %v6397_v6  ;;  %v6459_v15 = vmax.f32 %v6401_v12, %v15984_v52  ;;  %v6399_v39 = vpop.f32.mrb[143].mxu1 }
0x1130   : > { %v6460_v40 = vmax.f32 %v6402_v38, %v15986_v33  ;;  %v12713_v33 = vld [vmem:[%s17698_s6 + $0x3d0] sm:$0xff]  }
0x1131   : > { %12122 = vmatpush3.bf16.msra.mxu1 %v12713_v33  ;;  %v12736_v33 = vld [vmem:[%s17698_s6 + $0x428] sm:$0xff]  }
0x1132   : > { %12123 = vmatprep.subr.bf16.mxu1 %v13025_v45 }
0x1135   : > { %12124 = vmatpush3.bf16.msra.mxu1 %v12714_v49  ;;  %v12737_v49 = vld [vmem:[%s17698_s6 + $0x430] sm:$0xff]  }
0x1136   : > { %12125 = vmatprep.subr.bf16.mxu1 %v13025_v45 }
0x1139   : > { %12126 = vmatpush3.bf16.msra.mxu1 %v12715_v63  ;;  %v12738_v63 = vld [vmem:[%s17698_s6 + $0x438] sm:$0xff]  }
0x113a   : > { %12127 = vmatprep.subr.bf16.mxu1 %v13025_v45 }
0x113d   : > { %12128 = vmatpush3.bf16.msra.mxu1 %v12716_v54  ;;  %v12739_v54 = vld [vmem:[%s13597_s14 + $0x114] ss:$8 sps:$4 sm:$0xff]  }
0x113e   : > { %12129 = vmatprep.subr.bf16.mxu1 %v13025_v45 }
0x1141   : > { %12130 = vmatpush3.bf16.msra.mxu1 %v12717_v31  ;;  %v12741_v31 = vld [vmem:[%s13597_s14 + $0x110] ss:$8 sps:$4 sm:$0xff]  }
0x1142   : > { %12131 = vmatprep.subr.bf16.mxu1 %v13025_v45 }
0x1145   : > { %12132 = vmatpush3.bf16.msra.mxu1 %v12718_v2 }
0x1146   : > { %7046 = vmatprep.subr.bf16.mxu1 %v13024_v9 }
0x1153   : > { %v6510_v41 = vpop.f32.mrb[144].mxu1 }
0x1154   : > { %v6517_v19 = vmax.f32 %v6459_v15, %v6510_v41  ;;  %v6512_v18 = vpop.f32.mrb[145].mxu1 }
0x1155   : > { %v6513_v14 = vpop.f32.mrb[146].mxu1  ;;  %v12722_v18 = vld [vmem:[%s13609_s16 + $0x104] ss:$8 sps:$4 sm:$0xff]  }
0x1156   : > { %v6519_v8 = vadd.f32 %v15764_v26, %v6517_v19  ;;  %v6518_v20 = vmax.f32 %v6460_v40, %v6513_v14  ;;  %v6515_v10 = vpop.f32.mrb[147].mxu1 }
0x1157   : > { %v16253_v10 = vld [vmem:[%s17696_s4 + $0x30] sm:$0xff]  }
0x1158   : > { %v6520_v25 = vadd.f32 %v15764_v26, %v6518_v20  ;;  %v6521_v11 = vmax.f32 %v6519_v8, 0.0  ;;  %v16228_v8 = vld [vmem:[%s17696_s4 + $0x8] sm:$0xff]  }
0x1159   : > { %v16246_v20 = vld [vmem:[%s17696_s4 + $0x28] sm:$0xff]  }
0x115a   : > { %v6522_v22 = vmax.f32 %v6520_v25, 0.0  ;;  %v16260_v25 = vld [vmem:[%s17696_s4 + $0x38] sm:$0xff]  }
0x115c   : > { %v6523_v16 = vpack.c.bf16 %v6522_v22, %v6521_v11  ;;  %v16267_v11 = vld [vmem:[%s17696_s4 + $0x40] sm:$0xff]  }
0x115d   : > { %v12724_v22 = vld [vmem:[%s13609_s16 + $0x100] ss:$8 sps:$4 sm:$0xff]  }
0x115e   : > { %12114 = vmatmul.mubr.bf16.vlgmr.msra.gmra.mrb[148].mxu0 %v6523_v16  ;;  %v12730_v16 = vld [vmem:[%s13615_s17 + $0x100] ss:$8 sps:$4 sm:$0xff]  }
0x115f   : > { %6704 = vmatpush1.bf16.msra.mxu0 %v16064_v24  ;;  %11114 = vmatprep.mubr.msk.bf16.mxu0 %vm1496_vm0, %v12702_v27  ;;  %v12728_v27 = vld [vmem:[%s13615_s17 + $0x104] ss:$8 sps:$4 sm:$0xff]  }
0x1160   : > { %6705 = vmatprep.subr.bf16.mxu0 %v13024_v9 }
0x1163   : > { %6706 = vmatpush1.bf16.msra.mxu0 %v15701_v0 }
0x1164   : > { %6707 = vmatprep.subr.bf16.mxu0 %v13024_v9 }
0x1167   : > { %6708 = vmatpush1.bf16.msra.mxu0 %v15634_v50 }
0x1168   : > { %6709 = vmatprep.subr.bf16.mxu0 %v13024_v9 }
0x116b   : > { %6710 = vmatpush1.bf16.msra.mxu0 %v15641_v48 }
0x116c   : > { %6711 = vmatprep.subr.bf16.mxu0 %v13024_v9 }
0x116f   : > { %6712 = vmatpush1.bf16.msra.mxu0 %v15712_v1 }
0x1170   : > { %6713 = vmatprep.subr.bf16.mxu0 %v13024_v9 }
0x1173   : > { %6714 = vmatpush1.bf16.msra.mxu0 %v15719_v3 }
0x1174   : > { %6715 = vmatprep.subr.bf16.mxu0 %v13024_v9 }
0x1177   : > { %6716 = vmatpush1.bf16.msra.mxu0 %v15726_v4 }
0x1178   : > { %6717 = vmatprep.subr.bf16.mxu0 %v13024_v9 }
0x117b   : > { %6718 = vmatpush1.bf16.msra.mxu0 %v15733_v13  ;;  %v16114_v30 = vpop.f32.mrb[148].mxu1 }
0x117c   : > { %6719 = vmatprep.subr.bf16.mxu0 %v13024_v9  ;;  %v6683_v32 = vpop.f32.mrb[149].mxu1 }
0x117d   : > { %v16117_v43 = vpop.f32.mrb[150].mxu1 }
0x117e   : > { %v6686_v29 = vpop.f32.mrb[151].mxu1 }
0x117f   : > { %6720 = vmatpush1.bf16.msra.mxu0 %v15740_v34 }
0x1180   : > { %6721 = vmatprep.subr.bf16.mxu0 %v13024_v9 }
0x1183   : > { %6722 = vmatpush1.bf16.msra.mxu0 %v13666_v21 }
0x1184   : > { %6819 = vmatprep.subr.bf16.mxu0 %v13024_v9 }
0x1186   : > { %6736 = vmatmul.mubr.bf16.vlgmr.msra.gmra.mrb[152].mxu0 %v12704_v42 }
0x1187   : > { %6820 = vmatpush1.bf16.msra.mxu0 %v16064_v24  ;;  %11124 = vmatprep.mubr.msk.bf16.mxu0 %vm1496_vm0, %v12708_v23 }
0x1188   : > { %6821 = vmatprep.subr.bf16.mxu0 %v13024_v9 }
0x118b   : > { %6822 = vmatpush1.bf16.msra.mxu0 %v15701_v0 }
0x118c   : > { %6823 = vmatprep.subr.bf16.mxu0 %v13024_v9 }
0x118f   : > { %6824 = vmatpush1.bf16.msra.mxu0 %v15634_v50 }
0x1190   : > { %6825 = vmatprep.subr.bf16.mxu0 %v13024_v9 }
0x1193   : > { %6826 = vmatpush1.bf16.msra.mxu0 %v15641_v48 }
0x1194   : > { %6827 = vmatprep.subr.bf16.mxu0 %v13024_v9 }
0x1197   : > { %6828 = vmatpush1.bf16.msra.mxu0 %v15712_v1 }
0x1198   : > { %6829 = vmatprep.subr.bf16.mxu0 %v13024_v9 }
0x119b   : > { %6830 = vmatpush1.bf16.msra.mxu0 %v15719_v3 }
0x119c   : > { %6831 = vmatprep.subr.bf16.mxu0 %v13024_v9 }
0x119f   : > { %6832 = vmatpush1.bf16.msra.mxu0 %v15726_v4 }
0x11a0   : > { %6833 = vmatprep.subr.bf16.mxu0 %v13024_v9 }
0x11a3   : > { %6834 = vmatpush1.bf16.msra.mxu0 %v15733_v13 }
0x11a4   : > { %6835 = vmatprep.subr.bf16.mxu0 %v13024_v9 }
0x11a7   : > { %6836 = vmatpush1.bf16.msra.mxu0 %v15740_v34 }
0x11a8   : > { %6837 = vmatprep.subr.bf16.mxu0 %v13024_v9 }
0x11ab   : > { %6838 = vmatpush1.bf16.msra.mxu0 %v13666_v21 }
0x11ac   : > { %6990 = vmatprep.subr.bf16.mxu0 %v13024_v9 }
0x11ae   : > { %6852 = vmatmul.mubr.bf16.vlgmr.msra.gmra.mrb[156].mxu0 %v12710_v28 }
0x11af   : > { %6991 = vmatpush1.bf16.msra.mxu0 %v16064_v24  ;;  %11153 = vmatprep.mubr.msk.bf16.mxu0 %vm1496_vm0, %v12719_v56 }
0x11b0   : > { %6992 = vmatprep.subr.bf16.mxu0 %v13024_v9 }
0x11b3   : > { %6993 = vmatpush1.bf16.msra.mxu0 %v15701_v0 }
0x11b4   : > { %6994 = vmatprep.subr.bf16.mxu0 %v13024_v9 }
0x11b7   : > { %6995 = vmatpush1.bf16.msra.mxu0 %v15634_v50  ;;  %v16135_v50 = vpop.f32.mrb[152].mxu1 }
0x11b8   : > { %6996 = vmatprep.subr.bf16.mxu0 %v13024_v9 }
0x11bb   : > { %6997 = vmatpush1.bf16.msra.mxu0 %v15641_v48  ;;  %v6797_v48 = vpop.f32.mrb[153].mxu1 }
0x11bc   : > { %6998 = vmatprep.subr.bf16.mxu0 %v13024_v9  ;;  %v16137_v44 = vpop.f32.mrb[154].mxu1 }
0x11bd   : > { %v6800_v52 = vpop.f32.mrb[155].mxu1 }
0x11be   : > { %v12734_v52 = vld [vmem:[%s17698_s6 + $0x418] sm:$0xff]  }
0x11bf   : > { %6999 = vmatpush1.bf16.msra.mxu0 %v15712_v1 }
0x11c0   : > { %7000 = vmatprep.subr.bf16.mxu0 %v13024_v9 }
0x11c3   : > { %7001 = vmatpush1.bf16.msra.mxu0 %v15719_v3 }
0x11c4   : > { %7002 = vmatprep.subr.bf16.mxu0 %v13024_v9 }
0x11c7   : > { %7003 = vmatpush1.bf16.msra.mxu0 %v15726_v4 }
0x11c8   : > { %7004 = vmatprep.subr.bf16.mxu0 %v13024_v9 }
0x11cb   : > { %7005 = vmatpush1.bf16.msra.mxu0 %v15733_v13 }
0x11cc   : > { %7006 = vmatprep.subr.bf16.mxu0 %v13024_v9 }
0x11cf   : > { %7007 = vmatpush1.bf16.msra.mxu0 %v15740_v34 }
0x11d0   : > { %7008 = vmatprep.subr.bf16.mxu0 %v13024_v9 }
0x11d3   : > { %7009 = vmatpush1.bf16.msra.mxu0 %v13666_v21 }
0x11d4   : > { %7104 = vmatprep.subr.bf16.mxu0 %v13024_v9 }
0x11d6   : > { %7023 = vmatmul.mubr.bf16.vlgmr.msra.gmra.mrb[160].mxu0 %v12721_v58 }
0x11d7   : > { %7105 = vmatpush1.bf16.msra.mxu0 %v16064_v24  ;;  %11163 = vmatprep.mubr.msk.bf16.mxu0 %vm1496_vm0, %v12725_v55 }
0x11d8   : > { %7106 = vmatprep.subr.bf16.mxu0 %v13024_v9 }
0x11db   : > { %7107 = vmatpush1.bf16.msra.mxu0 %v15701_v0 }
0x11dc   : > { %7108 = vmatprep.subr.bf16.mxu0 %v13024_v9 }
0x11df   : > { %7109 = vmatpush1.bf16.msra.mxu0 %v16181_v53 }
0x11e0   : > { %7110 = vmatprep.subr.bf16.mxu0 %v13024_v9 }
0x11e3   : > { %7111 = vmatpush1.bf16.msra.mxu0 %v16188_v46 }
0x11e4   : > { %7112 = vmatprep.subr.bf16.mxu0 %v13024_v9 }
0x11e7   : > { %7113 = vmatpush1.bf16.msra.mxu0 %v15712_v1 }
0x11e8   : > { %7114 = vmatprep.subr.bf16.mxu0 %v13024_v9 }
0x11eb   : > { %7115 = vmatpush1.bf16.msra.mxu0 %v15719_v3 }
0x11ec   : > { %7116 = vmatprep.subr.bf16.mxu0 %v13024_v9 }
0x11ef   : > { %7117 = vmatpush1.bf16.msra.mxu0 %v15726_v4 }
0x11f0   : > { %7118 = vmatprep.subr.bf16.mxu0 %v13024_v9 }
0x11f3   : > { %7119 = vmatpush1.bf16.msra.mxu0 %v15733_v13  ;;  %v12727_v13 = vld [vmem:[%s13613_s29 + $0x100] ss:$8 sps:$4 sm:$0xff]  }
0x11f4   : > { %7120 = vmatprep.subr.bf16.mxu0 %v13024_v9 }
0x11f7   : > { %7121 = vmatpush1.bf16.msra.mxu0 %v15740_v34 }
0x11f8   : > { %7122 = vmatprep.subr.bf16.mxu0 %v13024_v9 }
0x11fb   : > { %7123 = vmatpush1.bf16.msra.mxu0 %v13666_v21 }
0x11fc   : > { %12137 = vmatprep.subr.bf16.mxu0 %v13025_v45 }
0x11fe   : > { %7137 = vmatmul.mubr.bf16.vlgmr.msra.gmra.mrb[164].mxu0 %v12727_v13 }
0x11ff   : > { %12153 = vmatprep.mubr.msk.bf16.mxu0 %vm13026_vm2, %v13025_v45 }
0x1231   : > { %v6623_v0 = vpop.f32.mrb[148].mxu0 }
0x1232   : > { %v16203_v1 = vadd.f32 %v6623_v0, %v16042_v59  ;;  %v12115_v3 = vpop.f32.mrb[149].mxu0 }
0x1233   : > { %v6626_v57 = vpop.f32.mrb[150].mxu0  ;;  %v12745_v3 = vld [vmem:[%s13613_s29 + $0x114] ss:$8 sps:$4 sm:$0xff]  }
0x1234   : > { %v16207_v36 = vadd.f32 %v6626_v57, %v16046_v37  ;;  %v12116_v4 = vpop.f32.mrb[151].mxu0 }
0x1235   : > { %v12747_v4 = vld [vmem:[%s13613_s29 + $0x110] ss:$8 sps:$4 sm:$0xff]  }
0x1259   : > { %v6737_v34 = vpop.f32.mrb[152].mxu0 }
0x125a   : > { %v6744_v59 = vmax.f32 %v16114_v30, %v6737_v34  ;;  %v6739_v60 = vpop.f32.mrb[153].mxu0 }
0x125b   : > { %v6740_v61 = vpop.f32.mrb[154].mxu0 }
0x125c   : > { %v6745_v35 = vmax.f32 %v16117_v43, %v6740_v61  ;;  %v6802_v37 = vmax.f32 %v6744_v59, %v16135_v50  ;;  %v6742_v5 = vpop.f32.mrb[155].mxu0  ;;  %v12731_v50 = vld [vmem:[%s17698_s6 + $0x400] sm:$0xff]  }
0x125d   : > { %12138 = vmatpush3.bf16.msra.mxu0 %v12731_v50  ;;  %v12752_v50 = vld [vmem:[%s17698_s6 + $0x448] sm:$0xff]  }
0x125e   : > { %v6803_v17 = vmax.f32 %v6745_v35, %v16137_v44  ;;  %v12732_v44 = vld [vmem:[%s17698_s6 + $0x408] sm:$0xff]   ;;  %12139 = vmatprep.subr.bf16.mxu0 %v13025_v45 }
0x1261   : > { %12140 = vmatpush3.bf16.msra.mxu0 %v12732_v44  ;;  %v12754_v44 = vld [vmem:[%s17698_s6 + $0x458] sm:$0xff]  }
0x1262   : > { %12141 = vmatprep.subr.bf16.mxu0 %v13025_v45 }
0x1265   : > { %12142 = vmatpush3.bf16.msra.mxu0 %v12733_v51  ;;  %v12755_v51 = vld [vmem:[%s17698_s6 + $0x460] sm:$0xff]  }
0x1266   : > { %12143 = vmatprep.subr.bf16.mxu0 %v13025_v45 }
0x1269   : > { %12144 = vmatpush3.bf16.msra.mxu0 %v12734_v52  ;;  %v12756_v52 = vld [vmem:[%s17698_s6 + $0x468] sm:$0xff]  }
0x126a   : > { %12145 = vmatprep.subr.bf16.mxu0 %v13025_v45 }
0x126d   : > { %12146 = vmatpush3.bf16.msra.mxu0 %v12735_v47  ;;  %v12757_v47 = vld [vmem:[%s17698_s6 + $0x470] sm:$0xff]  }
0x126e   : > { %12147 = vmatprep.subr.bf16.mxu0 %v13025_v45 }
0x1271   : > { %12148 = vmatpush3.bf16.msra.mxu0 %v12736_v33  ;;  %v12758_v33 = vld [vmem:[%s17698_s6 + $0x478] sm:$0xff]  }
0x1272   : > { %12149 = vmatprep.subr.bf16.mxu0 %v13025_v45 }
0x1275   : > { %12150 = vmatpush3.bf16.msra.mxu0 %v12737_v49  ;;  %v12759_v49 = vld [vmem:[%s13597_s14 + $0x124] ss:$8 sps:$4 sm:$0xff]  }
0x1276   : > { %12151 = vmatprep.subr.bf16.mxu0 %v13025_v45 }
0x1279   : > { %12152 = vmatpush3.bf16.msra.mxu0 %v12738_v63  ;;  %v12761_v63 = vld [vmem:[%s13597_s14 + $0x120] ss:$8 sps:$4 sm:$0xff]  }
0x127a   : > { %7389 = vmatprep.subr.bf16.mxu0 %v13024_v9 }
0x1281   : > { %v6853_v62 = vpop.f32.mrb[156].mxu0 }
0x1282   : > { %v6860_v12 = vmax.f32 %v6802_v37, %v6853_v62  ;;  %v6855_v7 = vpop.f32.mrb[157].mxu0 }
0x1283   : > { %v6856_v6 = vpop.f32.mrb[158].mxu0 }
0x1284   : > { %v6862_v38 = vadd.f32 %v15764_v26, %v6860_v12  ;;  %v6861_v15 = vmax.f32 %v6803_v17, %v6856_v6  ;;  %v6858_v39 = vpop.f32.mrb[159].mxu0  ;;  %v16398_v12 = vld [vmem:[%s17697_s5] ss:$0 sm:$0xff] }
0x1286   : > { %v6863_v40 = vadd.f32 %v15764_v26, %v6861_v15  ;;  %v6864_v41 = vmax.f32 %v6862_v38, 0.0  ;;  %v16239_v26 = vld [vmem:[%s17696_s4 + $0x20] sm:$0xff]  }
0x1288   : > { %v6865_v19 = vmax.f32 %v6863_v40, 0.0 }
0x128a   : > { %v6866_v14 = vpack.c.bf16 %v6865_v19, %v6864_v41  ;;  %v12742_v41 = vld [vmem:[%s13609_s16 + $0x114] ss:$8 sps:$4 sm:$0xff]  }
0x128c   : > { %12134 = vmatmul.mubr.bf16.vlgmr.msra.gmra.mrb[156].mxu1 %v6866_v14  ;;  %v12748_v14 = vld [vmem:[%s13615_s17 + $0x114] ss:$8 sps:$4 sm:$0xff]  }
0x128d   : > { %7047 = vmatpush1.bf16.msra.mxu1 %v16064_v24  ;;  %11158 = vmatprep.mubr.msk.bf16.mxu1 %vm1496_vm0, %v12722_v18  ;;  %v12744_v18 = vld [vmem:[%s13609_s16 + $0x110] ss:$8 sps:$4 sm:$0xff]  }
0x128e   : > { %7048 = vmatprep.subr.bf16.mxu1 %v13024_v9 }
0x1291   : > { %7049 = vmatpush1.bf16.msra.mxu1 %v16228_v8 }
0x1292   : > { %7050 = vmatprep.subr.bf16.mxu1 %v13024_v9 }
0x1295   : > { %7051 = vmatpush1.bf16.msra.mxu1 %v16181_v53 }
0x1296   : > { %7052 = vmatprep.subr.bf16.mxu1 %v13024_v9 }
0x1299   : > { %7053 = vmatpush1.bf16.msra.mxu1 %v16188_v46 }
0x129a   : > { %7054 = vmatprep.subr.bf16.mxu1 %v13024_v9 }
0x129d   : > { %7055 = vmatpush1.bf16.msra.mxu1 %v16239_v26 }
0x129e   : > { %7056 = vmatprep.subr.bf16.mxu1 %v13024_v9 }
0x12a1   : > { %7057 = vmatpush1.bf16.msra.mxu1 %v16246_v20 }
0x12a2   : > { %7058 = vmatprep.subr.bf16.mxu1 %v13024_v9 }
0x12a5   : > { %7059 = vmatpush1.bf16.msra.mxu1 %v16253_v10 }
0x12a6   : > { %7060 = vmatprep.subr.bf16.mxu1 %v13024_v9 }
0x12a9   : > { %7061 = vmatpush1.bf16.msra.mxu1 %v16260_v25  ;;  %v16300_v42 = vpop.f32.mrb[160].mxu0 }
0x12aa   : > { %7062 = vmatprep.subr.bf16.mxu1 %v13024_v9  ;;  %v7026_v23 = vpop.f32.mrb[161].mxu0 }
0x12ab   : > { %v16303_v28 = vpop.f32.mrb[162].mxu0 }
0x12ac   : > { %v7029_v30 = vpop.f32.mrb[163].mxu0 }
0x12ad   : > { %7063 = vmatpush1.bf16.msra.mxu1 %v16267_v11 }
0x12ae   : > { %7064 = vmatprep.subr.bf16.mxu1 %v13024_v9 }
0x12b1   : > { %7065 = vmatpush1.bf16.msra.mxu1 %v13666_v21 }
0x12b2   : > { %7162 = vmatprep.subr.bf16.mxu1 %v13024_v9 }
0x12b4   : > { %7079 = vmatmul.mubr.bf16.vlgmr.msra.gmra.mrb[160].mxu1 %v12724_v22  ;;  %v12750_v22 = vld [vmem:[%s13615_s17 + $0x110] ss:$8 sps:$4 sm:$0xff]  }
0x12b5   : > { %7163 = vmatpush1.bf16.msra.mxu1 %v16064_v24  ;;  %11168 = vmatprep.mubr.msk.bf16.mxu1 %vm1496_vm0, %v12728_v27 }
0x12b6   : > { %7164 = vmatprep.subr.bf16.mxu1 %v13024_v9 }
0x12b9   : > { %7165 = vmatpush1.bf16.msra.mxu1 %v16228_v8 }
0x12ba   : > { %7166 = vmatprep.subr.bf16.mxu1 %v13024_v9 }
0x12bd   : > { %7167 = vmatpush1.bf16.msra.mxu1 %v16181_v53 }
0x12be   : > { %7168 = vmatprep.subr.bf16.mxu1 %v13024_v9 }
0x12c1   : > { %7169 = vmatpush1.bf16.msra.mxu1 %v16188_v46 }
0x12c2   : > { %7170 = vmatprep.subr.bf16.mxu1 %v13024_v9 }
0x12c5   : > { %7171 = vmatpush1.bf16.msra.mxu1 %v16239_v26 }
0x12c6   : > { %7172 = vmatprep.subr.bf16.mxu1 %v13024_v9 }
0x12c9   : > { %7173 = vmatpush1.bf16.msra.mxu1 %v16246_v20 }
0x12ca   : > { %7174 = vmatprep.subr.bf16.mxu1 %v13024_v9 }
0x12cd   : > { %7175 = vmatpush1.bf16.msra.mxu1 %v16253_v10 }
0x12ce   : > { %7176 = vmatprep.subr.bf16.mxu1 %v13024_v9 }
0x12d1   : > { %7177 = vmatpush1.bf16.msra.mxu1 %v16260_v25  ;;  %v16321_v32 = vpop.f32.mrb[164].mxu0 }
0x12d2   : > { %7178 = vmatprep.subr.bf16.mxu1 %v13024_v9  ;;  %v7140_v43 = vpop.f32.mrb[165].mxu0 }
0x12d3   : > { %v16323_v29 = vpop.f32.mrb[166].mxu0  ;;  %v12751_v43 = vld [vmem:[%s17698_s6 + $0x440] sm:$0xff]  }
0x12d4   : > { %v7143_v48 = vpop.f32.mrb[167].mxu0 }
0x12d5   : > { %7179 = vmatpush1.bf16.msra.mxu1 %v16267_v11  ;;  %v12753_v48 = vld [vmem:[%s17698_s6 + $0x450] sm:$0xff]  }
0x12d6   : > { %7180 = vmatprep.subr.bf16.mxu1 %v13024_v9 }
0x12d9   : > { %7181 = vmatpush1.bf16.msra.mxu1 %v13666_v21 }
0x12da   : > { %7333 = vmatprep.subr.bf16.mxu1 %v13024_v9 }
0x12dc   : > { %7195 = vmatmul.mubr.bf16.vlgmr.msra.gmra.mrb[164].mxu1 %v12730_v16 }
0x12dd   : > { %7334 = vmatpush1.bf16.msra.mxu1 %v16064_v24  ;;  %11197 = vmatprep.mubr.msk.bf16.mxu1 %vm1496_vm0, %v12739_v54 }
0x12de   : > { %7335 = vmatprep.subr.bf16.mxu1 %v13024_v9 }
0x12e1   : > { %7336 = vmatpush1.bf16.msra.mxu1 %v16228_v8 }
0x12e2   : > { %7337 = vmatprep.subr.bf16.mxu1 %v13024_v9 }
0x12e5   : > { %7338 = vmatpush1.bf16.msra.mxu1 %v16181_v53 }
0x12e6   : > { %7339 = vmatprep.subr.bf16.mxu1 %v13024_v9 }
0x12e9   : > { %7340 = vmatpush1.bf16.msra.mxu1 %v16188_v46 }
0x12ea   : > { %7341 = vmatprep.subr.bf16.mxu1 %v13024_v9 }
0x12ed   : > { %7342 = vmatpush1.bf16.msra.mxu1 %v16239_v26 }
0x12ee   : > { %7343 = vmatprep.subr.bf16.mxu1 %v13024_v9 }
0x12f1   : > { %7344 = vmatpush1.bf16.msra.mxu1 %v16246_v20 }
0x12f2   : > { %7345 = vmatprep.subr.bf16.mxu1 %v13024_v9 }
0x12f5   : > { %7346 = vmatpush1.bf16.msra.mxu1 %v16253_v10 }
0x12f6   : > { %7347 = vmatprep.subr.bf16.mxu1 %v13024_v9 }
0x12f9   : > { %7348 = vmatpush1.bf16.msra.mxu1 %v16260_v25 }
0x12fa   : > { %7349 = vmatprep.subr.bf16.mxu1 %v13024_v9 }
0x12fd   : > { %7350 = vmatpush1.bf16.msra.mxu1 %v16267_v11 }
0x12fe   : > { %7351 = vmatprep.subr.bf16.mxu1 %v13024_v9 }
0x1301   : > { %7352 = vmatpush1.bf16.msra.mxu1 %v13666_v21 }
0x1302   : > { %7447 = vmatprep.subr.bf16.mxu1 %v13024_v9 }
0x1304   : > { %7366 = vmatmul.mubr.bf16.vlgmr.msra.gmra.mrb[168].mxu1 %v12741_v31 }
0x1305   : > { %7448 = vmatpush1.bf16.msra.mxu1 %v16064_v24  ;;  %11207 = vmatprep.mubr.msk.bf16.mxu1 %vm1496_vm0, %v12745_v3 }
0x1306   : > { %7449 = vmatprep.subr.bf16.mxu1 %v13024_v9 }
0x1309   : > { %7450 = vmatpush1.bf16.msra.mxu1 %v16228_v8 }
0x130a   : > { %7451 = vmatprep.subr.bf16.mxu1 %v13024_v9 }
0x130d   : > { %7452 = vmatpush1.bf16.msra.mxu1 %v16181_v53 }
0x130e   : > { %7453 = vmatprep.subr.bf16.mxu1 %v13024_v9 }
0x1311   : > { %7454 = vmatpush1.bf16.msra.mxu1 %v16188_v46 }
0x1312   : > { %7455 = vmatprep.subr.bf16.mxu1 %v13024_v9 }
0x1315   : > { %7456 = vmatpush1.bf16.msra.mxu1 %v16239_v26 }
0x1316   : > { %7457 = vmatprep.subr.bf16.mxu1 %v13024_v9 }
0x1319   : > { %7458 = vmatpush1.bf16.msra.mxu1 %v16246_v20 }
0x131a   : > { %7459 = vmatprep.subr.bf16.mxu1 %v13024_v9 }
0x131d   : > { %7460 = vmatpush1.bf16.msra.mxu1 %v16253_v10 }
0x131e   : > { %7461 = vmatprep.subr.bf16.mxu1 %v13024_v9 }
0x1321   : > { %7462 = vmatpush1.bf16.msra.mxu1 %v16260_v25 }
0x1322   : > { %7463 = vmatprep.subr.bf16.mxu1 %v13024_v9 }
0x1325   : > { %7464 = vmatpush1.bf16.msra.mxu1 %v16267_v11 }
0x1326   : > { %7465 = vmatprep.subr.bf16.mxu1 %v13024_v9 }
0x1329   : > { %7466 = vmatpush1.bf16.msra.mxu1 %v13666_v21 }
0x132a   : > { %12157 = vmatprep.subr.bf16.mxu1 %v13025_v45 }
0x132c   : > { %7480 = vmatmul.mubr.bf16.vlgmr.msra.gmra.mrb[172].mxu1 %v12747_v4  ;;  %v12767_v4 = vld [vmem:[%s13613_s29 + $0x120] ss:$8 sps:$4 sm:$0xff]  }
0x132d   : > { %12173 = vmatprep.mubr.msk.bf16.mxu1 %vm13026_vm2, %v13025_v45  ;;  %12158 = vmatpush3.bf16.msra.mxu1 %v12751_v43  ;;  %v12772_v43 = vld [vmem:[%s17698_s6 + $0x488] sm:$0xff]  }
0x132e   : > { %12159 = vmatprep.subr.bf16.mxu1 %v13025_v45 }
0x1331   : > { %12160 = vmatpush3.bf16.msra.mxu1 %v12752_v50  ;;  %v12774_v50 = vld [vmem:[%s17698_s6 + $0x498] sm:$0xff]  }
0x1332   : > { %12161 = vmatprep.subr.bf16.mxu1 %v13025_v45 }
0x1335   : > { %12162 = vmatpush3.bf16.msra.mxu1 %v12753_v48  ;;  %v12775_v48 = vld [vmem:[%s17698_s6 + $0x4a0] sm:$0xff]  }
0x1336   : > { %12163 = vmatprep.subr.bf16.mxu1 %v13025_v45 }
0x1339   : > { %12164 = vmatpush3.bf16.msra.mxu1 %v12754_v44  ;;  %v12776_v44 = vld [vmem:[%s17698_s6 + $0x4a8] sm:$0xff]  }
0x133a   : > { %12165 = vmatprep.subr.bf16.mxu1 %v13025_v45 }
0x133d   : > { %12166 = vmatpush3.bf16.msra.mxu1 %v12755_v51  ;;  %v12777_v51 = vld [vmem:[%s17698_s6 + $0x4b0] sm:$0xff]  }
0x133e   : > { %12167 = vmatprep.subr.bf16.mxu1 %v13025_v45 }
0x1341   : > { %12168 = vmatpush3.bf16.msra.mxu1 %v12756_v52  ;;  %v12778_v52 = vld [vmem:[%s17698_s6 + $0x4b8] sm:$0xff]  }
0x1342   : > { %12169 = vmatprep.subr.bf16.mxu1 %v13025_v45 }
0x1345   : > { %12170 = vmatpush3.bf16.msra.mxu1 %v12757_v47  ;;  %v12779_v47 = vld [vmem:[%s13597_s14 + $0x134] ss:$8 sps:$4 sm:$0xff]  }
0x1346   : > { %12171 = vmatprep.subr.bf16.mxu1 %v13025_v45 }
0x1349   : > { %12172 = vmatpush3.bf16.msra.mxu1 %v12758_v33  ;;  %v12781_v33 = vld [vmem:[%s13597_s14 + $0x130] ss:$8 sps:$4 sm:$0xff]  }
0x134a   : > { %7732 = vmatprep.subr.bf16.mxu1 %v13024_v9 }
0x135f   : > { %v6966_v2 = vpop.f32.mrb[156].mxu1 }
0x1360   : > { %v16379_v56 = vadd.f32 %v6966_v2, %v16203_v1  ;;  %v12135_v58 = vpop.f32.mrb[157].mxu1 }
0x1361   : > { %v6969_v0 = vpop.f32.mrb[158].mxu1 }
0x1362   : > { %v16383_v57 = vadd.f32 %v6969_v0, %v16207_v36  ;;  %v12136_v55 = vpop.f32.mrb[159].mxu1  ;;  %v12765_v0 = vld [vmem:[%s13613_s29 + $0x124] ss:$8 sps:$4 sm:$0xff]  }
0x1387   : > { %v7080_v1 = vpop.f32.mrb[160].mxu1 }
0x1388   : > { %v7087_v13 = vmax.f32 %v16300_v42, %v7080_v1  ;;  %v7082_v34 = vpop.f32.mrb[161].mxu1 }
0x1389   : > { %v7083_v59 = vpop.f32.mrb[162].mxu1 }
0x138a   : > { %v7088_v36 = vmax.f32 %v16303_v28, %v7083_v59  ;;  %v7145_v60 = vmax.f32 %v7087_v13, %v16321_v32  ;;  %v7085_v61 = vpop.f32.mrb[163].mxu1 }
0x138c   : > { %v7146_v35 = vmax.f32 %v7088_v36, %v16323_v29 }
0x13af   : > { %v7196_v37 = vpop.f32.mrb[164].mxu1 }
0x13b0   : > { %v7203_v5 = vmax.f32 %v7145_v60, %v7196_v37  ;;  %v7198_v17 = vpop.f32.mrb[165].mxu1 }
0x13b1   : > { %v7199_v62 = vpop.f32.mrb[166].mxu1 }
0x13b2   : > { %v7205_v7 = vadd.f32 %v16398_v12, %v7203_v5  ;;  %v7204_v6 = vmax.f32 %v7146_v35, %v7199_v62  ;;  %v7201_v38 = vpop.f32.mrb[167].mxu1 }
0x13b4   : > { %v7206_v15 = vadd.f32 %v16398_v12, %v7204_v6  ;;  %v7207_v39 = vmax.f32 %v7205_v7, 0.0 }
0x13b6   : > { %v7208_v40 = vmax.f32 %v7206_v15, 0.0 }
0x13b8   : > { %v7209_v19 = vpack.c.bf16 %v7208_v40, %v7207_v39  ;;  %v12762_v39 = vld [vmem:[%s13609_s16 + $0x124] ss:$8 sps:$4 sm:$0xff]  }
0x13ba   : > { %12154 = vmatmul.mubr.bf16.vlgmr.msra.gmra.mrb[168].mxu0 %v7209_v19  ;;  %v12768_v19 = vld [vmem:[%s13615_s17 + $0x124] ss:$8 sps:$4 sm:$0xff]  }
0x13bb   : > { %7390 = vmatpush1.bf16.msra.mxu0 %v16064_v24  ;;  %11202 = vmatprep.mubr.msk.bf16.mxu0 %vm1496_vm0, %v12742_v41  ;;  %v12764_v41 = vld [vmem:[%s13609_s16 + $0x120] ss:$8 sps:$4 sm:$0xff]  }
0x13bc   : > { %7391 = vmatprep.subr.bf16.mxu0 %v13024_v9 }
0x13bf   : > { %7392 = vmatpush1.bf16.msra.mxu0 %v16228_v8 }
0x13c0   : > { %7393 = vmatprep.subr.bf16.mxu0 %v13024_v9 }
0x13c3   : > { %7394 = vmatpush1.bf16.msra.mxu0 %v16181_v53 }
0x13c4   : > { %7395 = vmatprep.subr.bf16.mxu0 %v13024_v9 }
0x13c7   : > { %7396 = vmatpush1.bf16.msra.mxu0 %v16188_v46 }
0x13c8   : > { %7397 = vmatprep.subr.bf16.mxu0 %v13024_v9 }
0x13cb   : > { %7398 = vmatpush1.bf16.msra.mxu0 %v16239_v26 }
0x13cc   : > { %7399 = vmatprep.subr.bf16.mxu0 %v13024_v9 }
0x13cf   : > { %7400 = vmatpush1.bf16.msra.mxu0 %v16246_v20 }
0x13d0   : > { %7401 = vmatprep.subr.bf16.mxu0 %v13024_v9 }
0x13d3   : > { %7402 = vmatpush1.bf16.msra.mxu0 %v16253_v10 }
0x13d4   : > { %7403 = vmatprep.subr.bf16.mxu0 %v13024_v9 }
0x13d7   : > { %7404 = vmatpush1.bf16.msra.mxu0 %v16260_v25  ;;  %v16451_v27 = vpop.f32.mrb[168].mxu1 }
0x13d8   : > { %7405 = vmatprep.subr.bf16.mxu0 %v13024_v9  ;;  %v7369_v16 = vpop.f32.mrb[169].mxu1 }
0x13d9   : > { %v16454_v42 = vpop.f32.mrb[170].mxu1 }
0x13da   : > { %v7372_v23 = vpop.f32.mrb[171].mxu1 }
0x13db   : > { %7406 = vmatpush1.bf16.msra.mxu0 %v16267_v11 }
0x13dc   : > { %7407 = vmatprep.subr.bf16.mxu0 %v13024_v9 }
0x13df   : > { %7408 = vmatpush1.bf16.msra.mxu0 %v13666_v21 }
0x13e0   : > { %7505 = vmatprep.subr.bf16.mxu0 %v13024_v9 }
0x13e2   : > { %7422 = vmatmul.mubr.bf16.vlgmr.msra.gmra.mrb[172].mxu0 %v12744_v18  ;;  %v16597_v18 = vld [vmem:[%s17696_s4] sm:$0xff]  }
0x13e3   : > { %7506 = vmatpush1.bf16.msra.mxu0 %v16064_v24  ;;  %11212 = vmatprep.mubr.msk.bf16.mxu0 %vm1496_vm0, %v12748_v14 }
0x13e4   : > { %7507 = vmatprep.subr.bf16.mxu0 %v13024_v9 }
0x13e7   : > { %7508 = vmatpush1.bf16.msra.mxu0 %v16228_v8 }
0x13e8   : > { %7509 = vmatprep.subr.bf16.mxu0 %v13024_v9 }
0x13eb   : > { %7510 = vmatpush1.bf16.msra.mxu0 %v16181_v53 }
0x13ec   : > { %7511 = vmatprep.subr.bf16.mxu0 %v13024_v9 }
0x13ef   : > { %7512 = vmatpush1.bf16.msra.mxu0 %v16188_v46 }
0x13f0   : > { %7513 = vmatprep.subr.bf16.mxu0 %v13024_v9 }
0x13f3   : > { %7514 = vmatpush1.bf16.msra.mxu0 %v16239_v26 }
0x13f4   : > { %7515 = vmatprep.subr.bf16.mxu0 %v13024_v9 }
0x13f7   : > { %7516 = vmatpush1.bf16.msra.mxu0 %v16246_v20 }
0x13f8   : > { %7517 = vmatprep.subr.bf16.mxu0 %v13024_v9 }
0x13fb   : > { %7518 = vmatpush1.bf16.msra.mxu0 %v16253_v10 }
0x13fc   : > { %7519 = vmatprep.subr.bf16.mxu0 %v13024_v9 }
0x13ff   : > { %7520 = vmatpush1.bf16.msra.mxu0 %v16260_v25  ;;  %v16472_v28 = vpop.f32.mrb[172].mxu1 }
0x1400   : > { %7521 = vmatprep.subr.bf16.mxu0 %v13024_v9  ;;  %v7483_v30 = vpop.f32.mrb[173].mxu1 }
0x1401   : > { %v16474_v32 = vpop.f32.mrb[174].mxu1  ;;  %v12771_v30 = vld [vmem:[%s17698_s6 + $0x480] sm:$0xff]  }
0x1402   : > { %v7486_v29 = vpop.f32.mrb[175].mxu1 }
0x1403   : > { %7522 = vmatpush1.bf16.msra.mxu0 %v16267_v11  ;;  %v12773_v29 = vld [vmem:[%s17698_s6 + $0x490] sm:$0xff]  }
0x1404   : > { %7523 = vmatprep.subr.bf16.mxu0 %v13024_v9 }
0x1407   : > { %7524 = vmatpush1.bf16.msra.mxu0 %v13666_v21 }
0x1408   : > { %7676 = vmatprep.subr.bf16.mxu0 %v13024_v9 }
0x140a   : > { %7538 = vmatmul.mubr.bf16.vlgmr.msra.gmra.mrb[176].mxu0 %v12750_v22 }
0x140b   : > { %7677 = vmatpush1.bf16.msra.mxu0 %v16064_v24  ;;  %11241 = vmatprep.mubr.msk.bf16.mxu0 %vm1496_vm0, %v12759_v49 }
0x140c   : > { %7678 = vmatprep.subr.bf16.mxu0 %v13024_v9 }
0x140f   : > { %7679 = vmatpush1.bf16.msra.mxu0 %v16228_v8 }
0x1410   : > { %7680 = vmatprep.subr.bf16.mxu0 %v13024_v9 }
0x1413   : > { %7681 = vmatpush1.bf16.msra.mxu0 %v16181_v53 }
0x1414   : > { %7682 = vmatprep.subr.bf16.mxu0 %v13024_v9 }
0x1417   : > { %7683 = vmatpush1.bf16.msra.mxu0 %v16188_v46 }
0x1418   : > { %7684 = vmatprep.subr.bf16.mxu0 %v13024_v9 }
0x141b   : > { %7685 = vmatpush1.bf16.msra.mxu0 %v16239_v26 }
0x141c   : > { %7686 = vmatprep.subr.bf16.mxu0 %v13024_v9 }
0x141f   : > { %7687 = vmatpush1.bf16.msra.mxu0 %v16246_v20 }
0x1420   : > { %7688 = vmatprep.subr.bf16.mxu0 %v13024_v9 }
0x1423   : > { %7689 = vmatpush1.bf16.msra.mxu0 %v16253_v10 }
0x1424   : > { %7690 = vmatprep.subr.bf16.mxu0 %v13024_v9 }
0x1427   : > { %7691 = vmatpush1.bf16.msra.mxu0 %v16260_v25 }
0x1428   : > { %7692 = vmatprep.subr.bf16.mxu0 %v13024_v9 }
0x142b   : > { %7693 = vmatpush1.bf16.msra.mxu0 %v16267_v11 }
0x142c   : > { %7694 = vmatprep.subr.bf16.mxu0 %v13024_v9 }
0x142f   : > { %7695 = vmatpush1.bf16.msra.mxu0 %v13666_v21 }
0x1430   : > { %7790 = vmatprep.subr.bf16.mxu0 %v13024_v9 }
0x1432   : > { %7709 = vmatmul.mubr.bf16.vlgmr.msra.gmra.mrb[180].mxu0 %v12761_v63 }
0x1433   : > { %7791 = vmatpush1.bf16.msra.mxu0 %v16064_v24  ;;  %11251 = vmatprep.mubr.msk.bf16.mxu0 %vm1496_vm0, %v12765_v0  ;;  %v12787_v0 = vld [vmem:[%s13613_s29 + $0x130] ss:$8 sps:$4 sm:$0xff]  }
0x1434   : > { %7792 = vmatprep.subr.bf16.mxu0 %v13024_v9 }
0x1437   : > { %7793 = vmatpush1.bf16.msra.mxu0 %v16228_v8 }
0x1438   : > { %7794 = vmatprep.subr.bf16.mxu0 %v13024_v9 }
0x143b   : > { %7795 = vmatpush1.bf16.msra.mxu0 %v16181_v53 }
0x143c   : > { %7796 = vmatprep.subr.bf16.mxu0 %v13024_v9 }
0x143f   : > { %7797 = vmatpush1.bf16.msra.mxu0 %v16188_v46 }
0x1440   : > { %7798 = vmatprep.subr.bf16.mxu0 %v13024_v9 }
0x1443   : > { %7799 = vmatpush1.bf16.msra.mxu0 %v16239_v26 }
0x1444   : > { %7800 = vmatprep.subr.bf16.mxu0 %v13024_v9 }
0x1447   : > { %7801 = vmatpush1.bf16.msra.mxu0 %v16246_v20 }
0x1448   : > { %7802 = vmatprep.subr.bf16.mxu0 %v13024_v9 }
0x144b   : > { %7803 = vmatpush1.bf16.msra.mxu0 %v16253_v10 }
0x144c   : > { %7804 = vmatprep.subr.bf16.mxu0 %v13024_v9 }
0x144f   : > { %7805 = vmatpush1.bf16.msra.mxu0 %v16260_v25 }
0x1450   : > { %7806 = vmatprep.subr.bf16.mxu0 %v13024_v9 }
0x1453   : > { %7807 = vmatpush1.bf16.msra.mxu0 %v16267_v11 }
0x1454   : > { %7808 = vmatprep.subr.bf16.mxu0 %v13024_v9 }
0x1457   : > { %7809 = vmatpush1.bf16.msra.mxu0 %v13666_v21 }
0x1458   : > { %12177 = vmatprep.subr.bf16.mxu0 %v13025_v45 }
0x145a   : > { %7823 = vmatmul.mubr.bf16.vlgmr.msra.gmra.mrb[184].mxu0 %v12767_v4 }
0x145b   : > { %12193 = vmatprep.mubr.msk.bf16.mxu0 %vm13026_vm2, %v13025_v45  ;;  %12178 = vmatpush3.bf16.msra.mxu0 %v12771_v30  ;;  %v12793_v30 = vld [vmem:[%s17698_s6 + $0x4d0] sm:$0xff]  }
0x145c   : > { %12179 = vmatprep.subr.bf16.mxu0 %v13025_v45 }
0x145f   : > { %12180 = vmatpush3.bf16.msra.mxu0 %v12772_v43  ;;  %v12795_v43 = vld [vmem:[%s17698_s6 + $0x4e0] sm:$0xff]  }
0x1460   : > { %12181 = vmatprep.subr.bf16.mxu0 %v13025_v45 }
0x1463   : > { %12182 = vmatpush3.bf16.msra.mxu0 %v12773_v29  ;;  %v12796_v29 = vld [vmem:[%s17698_s6 + $0x4e8] sm:$0xff]  }
0x1464   : > { %12183 = vmatprep.subr.bf16.mxu0 %v13025_v45 }
0x1467   : > { %12184 = vmatpush3.bf16.msra.mxu0 %v12774_v50  ;;  %v12797_v50 = vld [vmem:[%s17698_s6 + $0x4f0] sm:$0xff]  }
0x1468   : > { %12185 = vmatprep.subr.bf16.mxu0 %v13025_v45 }
0x146b   : > { %12186 = vmatpush3.bf16.msra.mxu0 %v12775_v48  ;;  %v12798_v48 = vld [vmem:[%s17698_s6 + $0x4f8] sm:$0xff]  }
0x146c   : > { %12187 = vmatprep.subr.bf16.mxu0 %v13025_v45 }
0x146f   : > { %12188 = vmatpush3.bf16.msra.mxu0 %v12776_v44  ;;  %v12799_v44 = vld [vmem:[%s13597_s14 + $0x144] ss:$8 sps:$4 sm:$0xff]  }
0x1470   : > { %12189 = vmatprep.subr.bf16.mxu0 %v13025_v45 }
0x1473   : > { %12190 = vmatpush3.bf16.msra.mxu0 %v12777_v51  ;;  %v12801_v51 = vld [vmem:[%s13597_s14 + $0x140] ss:$8 sps:$4 sm:$0xff]  }
0x1474   : > { %12191 = vmatprep.subr.bf16.mxu0 %v13025_v45 }
0x1477   : > { %12192 = vmatpush3.bf16.msra.mxu0 %v12778_v52  ;;  %v16848_v52 = vld [vmem:[%s17696_s4 + $0x8] sm:$0xff]  }
0x1478   : > { %8075 = vmatprep.subr.bf16.mxu0 %v13024_v9 }
0x148d   : > { %v7309_v54 = vpop.f32.mrb[168].mxu0 }
0x148e   : > { %v16530_v31 = vadd.f32 %v7309_v54, %v16379_v56  ;;  %v12155_v2 = vpop.f32.mrb[169].mxu0  ;;  %v12785_v54 = vld [vmem:[%s13613_s29 + $0x134] ss:$8 sps:$4 sm:$0xff]  }
0x148f   : > { %v7312_v58 = vpop.f32.mrb[170].mxu0 }
0x1490   : > { %v16534_v3 = vadd.f32 %v7312_v58, %v16383_v57  ;;  %v12156_v55 = vpop.f32.mrb[171].mxu0 }
0x14b5   : > { %v7423_v56 = vpop.f32.mrb[172].mxu0 }
0x14b6   : > { %v7430_v1 = vmax.f32 %v16451_v27, %v7423_v56  ;;  %v7425_v13 = vpop.f32.mrb[173].mxu0 }
0x14b7   : > { %v7426_v34 = vpop.f32.mrb[174].mxu0 }
0x14b8   : > { %v7431_v57 = vmax.f32 %v16454_v42, %v7426_v34  ;;  %v7488_v59 = vmax.f32 %v7430_v1, %v16472_v28  ;;  %v7428_v36 = vpop.f32.mrb[175].mxu0 }
0x14ba   : > { %v7489_v60 = vmax.f32 %v7431_v57, %v16474_v32 }
0x14dd   : > { %v7539_v61 = vpop.f32.mrb[176].mxu0 }
0x14de   : > { %v7546_v35 = vmax.f32 %v7488_v59, %v7539_v61  ;;  %v7541_v37 = vpop.f32.mrb[177].mxu0 }
0x14df   : > { %v7542_v5 = vpop.f32.mrb[178].mxu0 }
0x14e0   : > { %v7548_v17 = vadd.f32 %v16398_v12, %v7546_v35  ;;  %v7547_v62 = vmax.f32 %v7489_v60, %v7542_v5  ;;  %v7544_v7 = vpop.f32.mrb[179].mxu0 }
0x14e1   : > { %v12782_v7 = vld [vmem:[%s13609_s16 + $0x134] ss:$8 sps:$4 sm:$0xff]  }
0x14e2   : > { %v7549_v6 = vadd.f32 %v16398_v12, %v7547_v62  ;;  %v7550_v38 = vmax.f32 %v7548_v17, 0.0 }
0x14e4   : > { %v7551_v15 = vmax.f32 %v7549_v6, 0.0 }
0x14e6   : > { %v7552_v40 = vpack.c.bf16 %v7551_v15, %v7550_v38  ;;  %v16708_v38 = vld [vmem:[%s17696_s4 + $0x10] sm:$0xff]   ;;  %v16715_v15 = vld [vmem:[%s17696_s4 + $0x18] sm:$0xff]  }
0x14e8   : > { %12174 = vmatmul.mubr.bf16.vlgmr.msra.gmra.mrb[176].mxu1 %v7552_v40  ;;  %v12788_v40 = vld [vmem:[%s13615_s17 + $0x134] ss:$8 sps:$4 sm:$0xff]  }
0x14e9   : > { %7733 = vmatpush1.bf16.msra.mxu1 %v16064_v24  ;;  %11246 = vmatprep.mubr.msk.bf16.mxu1 %vm1496_vm0, %v12762_v39  ;;  %v12784_v39 = vld [vmem:[%s13609_s16 + $0x130] ss:$8 sps:$4 sm:$0xff]  }
0x14ea   : > { %7734 = vmatprep.subr.bf16.mxu1 %v13024_v9 }
0x14ed   : > { %7735 = vmatpush1.bf16.msra.mxu1 %v16228_v8 }
0x14ee   : > { %7736 = vmatprep.subr.bf16.mxu1 %v13024_v9 }
0x14f1   : > { %7737 = vmatpush1.bf16.msra.mxu1 %v16181_v53 }
0x14f2   : > { %7738 = vmatprep.subr.bf16.mxu1 %v13024_v9 }
0x14f5   : > { %7739 = vmatpush1.bf16.msra.mxu1 %v16188_v46 }
0x14f6   : > { %7740 = vmatprep.subr.bf16.mxu1 %v13024_v9 }
0x14f9   : > { %7741 = vmatpush1.bf16.msra.mxu1 %v16239_v26 }
0x14fa   : > { %7742 = vmatprep.subr.bf16.mxu1 %v13024_v9 }
0x14fd   : > { %7743 = vmatpush1.bf16.msra.mxu1 %v16246_v20 }
0x14fe   : > { %7744 = vmatprep.subr.bf16.mxu1 %v13024_v9 }
0x1501   : > { %7745 = vmatpush1.bf16.msra.mxu1 %v16253_v10 }
0x1502   : > { %7746 = vmatprep.subr.bf16.mxu1 %v13024_v9 }
0x1505   : > { %7747 = vmatpush1.bf16.msra.mxu1 %v16260_v25  ;;  %v16602_v14 = vpop.f32.mrb[180].mxu0 }
0x1506   : > { %7748 = vmatprep.subr.bf16.mxu1 %v13024_v9  ;;  %v7712_v22 = vpop.f32.mrb[181].mxu0 }
0x1507   : > { %v16605_v27 = vpop.f32.mrb[182].mxu0 }
0x1508   : > { %v7715_v16 = vpop.f32.mrb[183].mxu0 }
0x1509   : > { %7749 = vmatpush1.bf16.msra.mxu1 %v16267_v11 }
0x150a   : > { %7750 = vmatprep.subr.bf16.mxu1 %v13024_v9 }
0x150d   : > { %7751 = vmatpush1.bf16.msra.mxu1 %v13666_v21 }
0x150e   : > { %7848 = vmatprep.subr.bf16.mxu1 %v13024_v9 }
0x1510   : > { %7765 = vmatmul.mubr.bf16.vlgmr.msra.gmra.mrb[180].mxu1 %v12764_v41  ;;  %v12790_v41 = vld [vmem:[%s13615_s17 + $0x130] ss:$8 sps:$4 sm:$0xff]  }
0x1511   : > { %7849 = vmatpush1.bf16.msra.mxu1 %v16064_v24  ;;  %11256 = vmatprep.mubr.msk.bf16.mxu1 %vm1496_vm0, %v12768_v19  ;;  %v12770_v24 = vld [vmem:[%s13615_s17 + $0x120] ss:$8 sps:$4 sm:$0xff]  }
0x1512   : > { %7850 = vmatprep.subr.bf16.mxu1 %v13024_v9  ;;  %v16784_v19 = vld [vmem:[%s17696_s4 + $0x30] sm:$0xff]  }
0x1515   : > { %7851 = vmatpush1.bf16.msra.mxu1 %v16228_v8 }
0x1516   : > { %7852 = vmatprep.subr.bf16.mxu1 %v13024_v9 }
0x1519   : > { %7853 = vmatpush1.bf16.msra.mxu1 %v16181_v53 }
0x151a   : > { %7854 = vmatprep.subr.bf16.mxu1 %v13024_v9 }
0x151d   : > { %7855 = vmatpush1.bf16.msra.mxu1 %v16188_v46 }
0x151e   : > { %7856 = vmatprep.subr.bf16.mxu1 %v13024_v9 }
0x1521   : > { %7857 = vmatpush1.bf16.msra.mxu1 %v16239_v26 }
0x1522   : > { %7858 = vmatprep.subr.bf16.mxu1 %v13024_v9 }
0x1525   : > { %7859 = vmatpush1.bf16.msra.mxu1 %v16246_v20 }
0x1526   : > { %7860 = vmatprep.subr.bf16.mxu1 %v13024_v9 }
0x1529   : > { %7861 = vmatpush1.bf16.msra.mxu1 %v16253_v10 }
0x152a   : > { %7862 = vmatprep.subr.bf16.mxu1 %v13024_v9 }
0x152d   : > { %7863 = vmatpush1.bf16.msra.mxu1 %v16260_v25  ;;  %v16623_v42 = vpop.f32.mrb[184].mxu0 }
0x152e   : > { %7864 = vmatprep.subr.bf16.mxu1 %v13024_v9  ;;  %v7826_v23 = vpop.f32.mrb[185].mxu0 }
0x152f   : > { %v16625_v28 = vpop.f32.mrb[186].mxu0 }
0x1530   : > { %v7829_v32 = vpop.f32.mrb[187].mxu0 }
0x1531   : > { %7865 = vmatpush1.bf16.msra.mxu1 %v16267_v11  ;;  %v12794_v32 = vld [vmem:[%s17698_s6 + $0x4d8] sm:$0xff]  }
0x1532   : > { %7866 = vmatprep.subr.bf16.mxu1 %v13024_v9 }
0x1535   : > { %7867 = vmatpush1.bf16.msra.mxu1 %v13666_v21 }
0x1536   : > { %8019 = vmatprep.subr.bf16.mxu1 %v13024_v9 }
0x1538   : > { %7881 = vmatmul.mubr.bf16.vlgmr.msra.gmra.mrb[184].mxu1 %v12770_v24  ;;  %v16791_v24 = vld [vmem:[%s17696_s4 + $0x38] sm:$0xff]  }
0x1539   : > { %8020 = vmatpush1.bf16.msra.mxu1 %v16597_v18  ;;  %11285 = vmatprep.mubr.msk.bf16.mxu1 %vm1496_vm0, %v12779_v47 }
0x153a   : > { %8021 = vmatprep.subr.bf16.mxu1 %v13024_v9 }
0x153d   : > { %8022 = vmatpush1.bf16.msra.mxu1 %v16228_v8 }
0x153e   : > { %8023 = vmatprep.subr.bf16.mxu1 %v13024_v9 }
0x1541   : > { %8024 = vmatpush1.bf16.msra.mxu1 %v16181_v53 }
0x1542   : > { %8025 = vmatprep.subr.bf16.mxu1 %v13024_v9 }
0x1545   : > { %8026 = vmatpush1.bf16.msra.mxu1 %v16188_v46 }
0x1546   : > { %8027 = vmatprep.subr.bf16.mxu1 %v13024_v9 }
0x1549   : > { %8028 = vmatpush1.bf16.msra.mxu1 %v16239_v26 }
0x154a   : > { %8029 = vmatprep.subr.bf16.mxu1 %v13024_v9 }
0x154d   : > { %8030 = vmatpush1.bf16.msra.mxu1 %v16246_v20 }
0x154e   : > { %8031 = vmatprep.subr.bf16.mxu1 %v13024_v9 }
0x1551   : > { %8032 = vmatpush1.bf16.msra.mxu1 %v16253_v10 }
0x1552   : > { %8033 = vmatprep.subr.bf16.mxu1 %v13024_v9 }
0x1555   : > { %8034 = vmatpush1.bf16.msra.mxu1 %v16260_v25 }
0x1556   : > { %8035 = vmatprep.subr.bf16.mxu1 %v13024_v9 }
0x1559   : > { %8036 = vmatpush1.bf16.msra.mxu1 %v16267_v11 }
0x155a   : > { %8037 = vmatprep.subr.bf16.mxu1 %v13024_v9 }
0x155d   : > { %8038 = vmatpush1.bf16.msra.mxu1 %v13666_v21 }
0x155e   : > { %8133 = vmatprep.subr.bf16.mxu1 %v13024_v9 }
0x1560   : > { %8052 = vmatmul.mubr.bf16.vlgmr.msra.gmra.mrb[188].mxu1 %v12781_v33 }
0x1561   : > { %8134 = vmatpush1.bf16.msra.mxu1 %v16597_v18  ;;  %11295 = vmatprep.mubr.msk.bf16.mxu1 %vm1496_vm0, %v12785_v54 }
0x1562   : > { %8135 = vmatprep.subr.bf16.mxu1 %v13024_v9 }
0x1565   : > { %8136 = vmatpush1.bf16.msra.mxu1 %v16228_v8 }
0x1566   : > { %8137 = vmatprep.subr.bf16.mxu1 %v13024_v9 }
0x1569   : > { %8138 = vmatpush1.bf16.msra.mxu1 %v16181_v53 }
0x156a   : > { %8139 = vmatprep.subr.bf16.mxu1 %v13024_v9 }
0x156d   : > { %8140 = vmatpush1.bf16.msra.mxu1 %v16188_v46 }
0x156e   : > { %8141 = vmatprep.subr.bf16.mxu1 %v13024_v9 }
0x1571   : > { %8142 = vmatpush1.bf16.msra.mxu1 %v16239_v26 }
0x1572   : > { %8143 = vmatprep.subr.bf16.mxu1 %v13024_v9 }
0x1575   : > { %8144 = vmatpush1.bf16.msra.mxu1 %v16246_v20 }
0x1576   : > { %8145 = vmatprep.subr.bf16.mxu1 %v13024_v9 }
0x1579   : > { %8146 = vmatpush1.bf16.msra.mxu1 %v16253_v10 }
0x157a   : > { %8147 = vmatprep.subr.bf16.mxu1 %v13024_v9 }
0x157d   : > { %8148 = vmatpush1.bf16.msra.mxu1 %v16260_v25 }
0x157e   : > { %8149 = vmatprep.subr.bf16.mxu1 %v13024_v9 }
0x1581   : > { %8150 = vmatpush1.bf16.msra.mxu1 %v16267_v11 }
0x1582   : > { %8151 = vmatprep.subr.bf16.mxu1 %v13024_v9 }
0x1585   : > { %8152 = vmatpush1.bf16.msra.mxu1 %v13666_v21 }
0x1586   : > { %12197 = vmatprep.subr.bf16.mxu1 %v13025_v45 }
0x1588   : > { %8166 = vmatmul.mubr.bf16.vlgmr.msra.gmra.mrb[192].mxu1 %v12787_v0  ;;  %v12807_v0 = vld [vmem:[%s13613_s29 + $0x140] ss:$8 sps:$4 sm:$0xff]  }
0x1589   : > { %12213 = vmatprep.mubr.msk.bf16.mxu1 %vm13026_vm2, %v13025_v45 }
0x15bb   : > { %v7652_v53 = vpop.f32.mrb[176].mxu1 }
0x15bc   : > { %v16681_v46 = vadd.f32 %v7652_v53, %v16530_v31  ;;  %v12175_v49 = vpop.f32.mrb[177].mxu1 }
0x15bd   : > { %v7655_v63 = vpop.f32.mrb[178].mxu1 }
0x15be   : > { %v16685_v2 = vadd.f32 %v7655_v63, %v16534_v3  ;;  %v12176_v58 = vpop.f32.mrb[179].mxu1  ;;  %v12805_v63 = vld [vmem:[%s13613_s29 + $0x144] ss:$8 sps:$4 sm:$0xff]  }
0x15e3   : > { %v7766_v31 = vpop.f32.mrb[180].mxu1 }
0x15e4   : > { %v7773_v55 = vmax.f32 %v16602_v14, %v7766_v31  ;;  %v7768_v4 = vpop.f32.mrb[181].mxu1  ;;  %v16798_v14 = vld [vmem:[%s17696_s4 + $0x40] sm:$0xff]  }
0x15e5   : > { %v7769_v56 = vpop.f32.mrb[182].mxu1 }
0x15e6   : > { %v7774_v3 = vmax.f32 %v16605_v27, %v7769_v56  ;;  %v7831_v1 = vmax.f32 %v7773_v55, %v16623_v42  ;;  %v7771_v13 = vpop.f32.mrb[183].mxu1  ;;  %v12791_v42 = vld [vmem:[%s17698_s6 + $0x4c0] sm:$0xff]  }
0x15e7   : > { %12198 = vmatpush3.bf16.msra.mxu1 %v12791_v42  ;;  %v12813_v42 = vld [vmem:[%s17698_s6 + $0x510] sm:$0xff]  }
0x15e8   : > { %v7832_v34 = vmax.f32 %v7774_v3, %v16625_v28  ;;  %v12792_v28 = vld [vmem:[%s17698_s6 + $0x4c8] sm:$0xff]   ;;  %12199 = vmatprep.subr.bf16.mxu1 %v13025_v45 }
0x15eb   : > { %12200 = vmatpush3.bf16.msra.mxu1 %v12792_v28  ;;  %v12815_v28 = vld [vmem:[%s17698_s6 + $0x520] sm:$0xff]  }
0x15ec   : > { %12201 = vmatprep.subr.bf16.mxu1 %v13025_v45 }
0x15ef   : > { %12202 = vmatpush3.bf16.msra.mxu1 %v12793_v30  ;;  %v12816_v30 = vld [vmem:[%s17698_s6 + $0x528] sm:$0xff]  }
0x15f0   : > { %12203 = vmatprep.subr.bf16.mxu1 %v13025_v45 }
0x15f3   : > { %12204 = vmatpush3.bf16.msra.mxu1 %v12794_v32  ;;  %v12817_v32 = vld [vmem:[%s17698_s6 + $0x530] sm:$0xff]  }
0x15f4   : > { %12205 = vmatprep.subr.bf16.mxu1 %v13025_v45 }
0x15f7   : > { %12206 = vmatpush3.bf16.msra.mxu1 %v12795_v43  ;;  %v12818_v43 = vld [vmem:[%s17698_s6 + $0x538] sm:$0xff]  }
0x15f8   : > { %12207 = vmatprep.subr.bf16.mxu1 %v13025_v45 }
0x15fb   : > { %12208 = vmatpush3.bf16.msra.mxu1 %v12796_v29  ;;  %v12819_v29 = vld [vmem:[%s13597_s14 + $0x154] ss:$8 sps:$4 sm:$0xff]  }
0x15fc   : > { %12209 = vmatprep.subr.bf16.mxu1 %v13025_v45 }
0x15ff   : > { %12210 = vmatpush3.bf16.msra.mxu1 %v12797_v50  ;;  %v12821_v50 = vld [vmem:[%s13597_s14 + $0x150] ss:$8 sps:$4 sm:$0xff]  }
0x1600   : > { %12211 = vmatprep.subr.bf16.mxu1 %v13025_v45 }
0x1603   : > { %12212 = vmatpush3.bf16.msra.mxu1 %v12798_v48 }
0x1604   : > { %8418 = vmatprep.subr.bf16.mxu1 %v13024_v9 }
0x160b   : > { %v7882_v57 = vpop.f32.mrb[184].mxu1 }
0x160c   : > { %v7889_v59 = vmax.f32 %v7831_v1, %v7882_v57  ;;  %v7884_v36 = vpop.f32.mrb[185].mxu1 }
0x160d   : > { %v7885_v60 = vpop.f32.mrb[186].mxu1 }
0x160e   : > { %v7891_v61 = vadd.f32 %v16398_v12, %v7889_v59  ;;  %v7890_v35 = vmax.f32 %v7832_v34, %v7885_v60  ;;  %v7887_v37 = vpop.f32.mrb[187].mxu1 }
0x1610   : > { %v7892_v5 = vadd.f32 %v16398_v12, %v7890_v35  ;;  %v7893_v17 = vmax.f32 %v7891_v61, 0.0 }
0x1612   : > { %v7894_v62 = vmax.f32 %v7892_v5, 0.0 }
0x1614   : > { %v7895_v6 = vpack.c.bf16 %v7894_v62, %v7893_v17  ;;  %v12802_v17 = vld [vmem:[%s13609_s16 + $0x144] ss:$8 sps:$4 sm:$0xff]  }
0x1616   : > { %12194 = vmatmul.mubr.bf16.vlgmr.msra.gmra.mrb[188].mxu0 %v7895_v6  ;;  %v12810_v6 = vld [vmem:[%s13615_s17 + $0x140] ss:$8 sps:$4 sm:$0xff]  }
0x1617   : > { %8076 = vmatpush1.bf16.msra.mxu0 %v16597_v18  ;;  %11290 = vmatprep.mubr.msk.bf16.mxu0 %vm1496_vm0, %v12782_v7  ;;  %v12808_v7 = vld [vmem:[%s13615_s17 + $0x144] ss:$8 sps:$4 sm:$0xff]  }
0x1618   : > { %8077 = vmatprep.subr.bf16.mxu0 %v13024_v9 }
0x161b   : > { %8078 = vmatpush1.bf16.msra.mxu0 %v16228_v8 }
0x161c   : > { %8079 = vmatprep.subr.bf16.mxu0 %v13024_v9 }
0x161f   : > { %8080 = vmatpush1.bf16.msra.mxu0 %v16708_v38 }
0x1620   : > { %8081 = vmatprep.subr.bf16.mxu0 %v13024_v9 }
0x1623   : > { %8082 = vmatpush1.bf16.msra.mxu0 %v16715_v15 }
0x1624   : > { %8083 = vmatprep.subr.bf16.mxu0 %v13024_v9 }
0x1627   : > { %8084 = vmatpush1.bf16.msra.mxu0 %v16239_v26 }
0x1628   : > { %8085 = vmatprep.subr.bf16.mxu0 %v13024_v9 }
0x162b   : > { %8086 = vmatpush1.bf16.msra.mxu0 %v16246_v20 }
0x162c   : > { %8087 = vmatprep.subr.bf16.mxu0 %v13024_v9 }
0x162f   : > { %8088 = vmatpush1.bf16.msra.mxu0 %v16253_v10 }
0x1630   : > { %8089 = vmatprep.subr.bf16.mxu0 %v13024_v9 }
0x1633   : > { %8090 = vmatpush1.bf16.msra.mxu0 %v16260_v25 }
0x1634   : > { %8091 = vmatprep.subr.bf16.mxu0 %v13024_v9 }
0x1637   : > { %8092 = vmatpush1.bf16.msra.mxu0 %v16267_v11 }
0x1638   : > { %8093 = vmatprep.subr.bf16.mxu0 %v13024_v9 }
0x163b   : > { %8094 = vmatpush1.bf16.msra.mxu0 %v13666_v21 }
0x163c   : > { %8191 = vmatprep.subr.bf16.mxu0 %v13024_v9 }
0x163e   : > { %8108 = vmatmul.mubr.bf16.vlgmr.msra.gmra.mrb[192].mxu0 %v12784_v39 }
0x163f   : > { %8192 = vmatpush1.bf16.msra.mxu0 %v16597_v18  ;;  %11300 = vmatprep.mubr.msk.bf16.mxu0 %vm1496_vm0, %v12788_v40 }
0x1640   : > { %8193 = vmatprep.subr.bf16.mxu0 %v13024_v9 }
0x1643   : > { %8194 = vmatpush1.bf16.msra.mxu0 %v16228_v8 }
0x1644   : > { %8195 = vmatprep.subr.bf16.mxu0 %v13024_v9 }
0x1647   : > { %8196 = vmatpush1.bf16.msra.mxu0 %v16708_v38 }
0x1648   : > { %8197 = vmatprep.subr.bf16.mxu0 %v13024_v9 }
0x164b   : > { %8198 = vmatpush1.bf16.msra.mxu0 %v16715_v15 }
0x164c   : > { %8199 = vmatprep.subr.bf16.mxu0 %v13024_v9 }
0x164f   : > { %8200 = vmatpush1.bf16.msra.mxu0 %v16239_v26  ;;  %v16758_v26 = vpop.f32.mrb[188].mxu1 }
0x1650   : > { %8201 = vmatprep.subr.bf16.mxu0 %v13024_v9 }
0x1653   : > { %8202 = vmatpush1.bf16.msra.mxu0 %v16246_v20  ;;  %v8055_v20 = vpop.f32.mrb[189].mxu1 }
0x1654   : > { %8203 = vmatprep.subr.bf16.mxu0 %v13024_v9 }
0x1657   : > { %8204 = vmatpush1.bf16.msra.mxu0 %v16253_v10  ;;  %v16761_v10 = vpop.f32.mrb[190].mxu1 }
0x1658   : > { %8205 = vmatprep.subr.bf16.mxu0 %v13024_v9 }
0x165b   : > { %8206 = vmatpush1.bf16.msra.mxu0 %v16260_v25  ;;  %v8058_v25 = vpop.f32.mrb[191].mxu1 }
0x165c   : > { %8207 = vmatprep.subr.bf16.mxu0 %v13024_v9  ;;  %v16804_v22 = vpop.f32.mrb[192].mxu1 }
0x165d   : > { %v8169_v27 = vpop.f32.mrb[193].mxu1 }
0x165e   : > { %v16806_v16 = vpop.f32.mrb[194].mxu1 }
0x165f   : > { %8208 = vmatpush1.bf16.msra.mxu0 %v16267_v11  ;;  %v16777_v11 = vld [vmem:[%s17696_s4 + $0x28] sm:$0xff]   ;;  %v8172_v23 = vpop.f32.mrb[195].mxu1 }
0x1660   : > { %8209 = vmatprep.subr.bf16.mxu0 %v13024_v9  ;;  %v12814_v23 = vld [vmem:[%s17698_s6 + $0x518] sm:$0xff]  }
0x1663   : > { %8210 = vmatpush1.bf16.msra.mxu0 %v13666_v21 }
0x1664   : > { %8362 = vmatprep.subr.bf16.mxu0 %v13024_v9 }
0x1666   : > { %8224 = vmatmul.mubr.bf16.vlgmr.msra.gmra.mrb[196].mxu0 %v12790_v41 }
0x1667   : > { %8363 = vmatpush1.bf16.msra.mxu0 %v16597_v18  ;;  %11329 = vmatprep.mubr.msk.bf16.mxu0 %vm1496_vm0, %v12799_v44 }
0x1668   : > { %8364 = vmatprep.subr.bf16.mxu0 %v13024_v9 }
0x166b   : > { %8365 = vmatpush1.bf16.msra.mxu0 %v16228_v8  ;;  %v16770_v8 = vld [vmem:[%s17696_s4 + $0x20] sm:$0xff]  }
0x166c   : > { %8366 = vmatprep.subr.bf16.mxu0 %v13024_v9 }
0x166f   : > { %8367 = vmatpush1.bf16.msra.mxu0 %v16708_v38 }
0x1670   : > { %8368 = vmatprep.subr.bf16.mxu0 %v13024_v9 }
0x1673   : > { %8369 = vmatpush1.bf16.msra.mxu0 %v16715_v15 }
0x1674   : > { %8370 = vmatprep.subr.bf16.mxu0 %v13024_v9 }
0x1677   : > { %8371 = vmatpush1.bf16.msra.mxu0 %v16770_v8 }
0x1678   : > { %8372 = vmatprep.subr.bf16.mxu0 %v13024_v9 }
0x167b   : > { %8373 = vmatpush1.bf16.msra.mxu0 %v16777_v11 }
0x167c   : > { %8374 = vmatprep.subr.bf16.mxu0 %v13024_v9 }
0x167f   : > { %8375 = vmatpush1.bf16.msra.mxu0 %v16784_v19 }
0x1680   : > { %8376 = vmatprep.subr.bf16.mxu0 %v13024_v9 }
0x1683   : > { %8377 = vmatpush1.bf16.msra.mxu0 %v16791_v24 }
0x1684   : > { %8378 = vmatprep.subr.bf16.mxu0 %v13024_v9 }
0x1687   : > { %8379 = vmatpush1.bf16.msra.mxu0 %v16798_v14 }
0x1688   : > { %8380 = vmatprep.subr.bf16.mxu0 %v13024_v9 }
0x168b   : > { %8381 = vmatpush1.bf16.msra.mxu0 %v13666_v21 }
0x168c   : > { %8476 = vmatprep.subr.bf16.mxu0 %v13024_v9 }
0x168e   : > { %8395 = vmatmul.mubr.bf16.vlgmr.msra.gmra.mrb[200].mxu0 %v12801_v51 }
0x168f   : > { %8477 = vmatpush1.bf16.msra.mxu0 %v16597_v18  ;;  %11339 = vmatprep.mubr.msk.bf16.mxu0 %vm1496_vm0, %v12805_v63 }
0x1690   : > { %8478 = vmatprep.subr.bf16.mxu0 %v13024_v9 }
0x1693   : > { %8479 = vmatpush1.bf16.msra.mxu0 %v16848_v52 }
0x1694   : > { %8480 = vmatprep.subr.bf16.mxu0 %v13024_v9 }
0x1697   : > { %8481 = vmatpush1.bf16.msra.mxu0 %v16708_v38 }
0x1698   : > { %8482 = vmatprep.subr.bf16.mxu0 %v13024_v9 }
0x169b   : > { %8483 = vmatpush1.bf16.msra.mxu0 %v16715_v15 }
0x169c   : > { %8484 = vmatprep.subr.bf16.mxu0 %v13024_v9 }
0x169f   : > { %8485 = vmatpush1.bf16.msra.mxu0 %v16770_v8 }
0x16a0   : > { %8486 = vmatprep.subr.bf16.mxu0 %v13024_v9 }
0x16a3   : > { %8487 = vmatpush1.bf16.msra.mxu0 %v16777_v11 }
0x16a4   : > { %8488 = vmatprep.subr.bf16.mxu0 %v13024_v9 }
0x16a7   : > { %8489 = vmatpush1.bf16.msra.mxu0 %v16784_v19 }
0x16a8   : > { %8490 = vmatprep.subr.bf16.mxu0 %v13024_v9 }
0x16ab   : > { %8491 = vmatpush1.bf16.msra.mxu0 %v16791_v24 }
0x16ac   : > { %8492 = vmatprep.subr.bf16.mxu0 %v13024_v9 }
0x16af   : > { %8493 = vmatpush1.bf16.msra.mxu0 %v16798_v14 }
0x16b0   : > { %8494 = vmatprep.subr.bf16.mxu0 %v13024_v9 }
0x16b3   : > { %8495 = vmatpush1.bf16.msra.mxu0 %v13666_v21 }
0x16b4   : > { %12217 = vmatprep.subr.bf16.mxu0 %v13025_v45 }
0x16b6   : > { %8509 = vmatmul.mubr.bf16.vlgmr.msra.gmra.mrb[204].mxu0 %v12807_v0 }
0x16b7   : > { %12233 = vmatprep.mubr.msk.bf16.mxu0 %vm13026_vm2, %v13025_v45 }
0x16e9   : > { %v7995_v47 = vpop.f32.mrb[188].mxu0 }
0x16ea   : > { %v16867_v33 = vadd.f32 %v7995_v47, %v16681_v46  ;;  %v12195_v53 = vpop.f32.mrb[189].mxu0 }
0x16eb   : > { %v7998_v49 = vpop.f32.mrb[190].mxu0  ;;  %v12825_v53 = vld [vmem:[%s13613_s29 + $0x154] ss:$8 sps:$4 sm:$0xff]  }
0x16ec   : > { %v16871_v54 = vadd.f32 %v7998_v49, %v16685_v2  ;;  %v12196_v58 = vpop.f32.mrb[191].mxu0 }
0x16ed   : > { %v12827_v58 = vld [vmem:[%s13613_s29 + $0x150] ss:$8 sps:$4 sm:$0xff]  }
0x1711   : > { %v8109_v46 = vpop.f32.mrb[192].mxu0 }
0x1712   : > { %v8116_v31 = vmax.f32 %v16758_v26, %v8109_v46  ;;  %v8111_v55 = vpop.f32.mrb[193].mxu0 }
0x1713   : > { %v8112_v4 = vpop.f32.mrb[194].mxu0 }
0x1714   : > { %v8117_v2 = vmax.f32 %v16761_v10, %v8112_v4  ;;  %v8174_v56 = vmax.f32 %v8116_v31, %v16804_v22  ;;  %v8114_v3 = vpop.f32.mrb[195].mxu0  ;;  %v12811_v22 = vld [vmem:[%s17698_s6 + $0x500] sm:$0xff]  }
0x1715   : > { %12218 = vmatpush3.bf16.msra.mxu0 %v12811_v22  ;;  %v12833_v22 = vld [vmem:[%s17698_s6 + $0x550] sm:$0xff]  }
0x1716   : > { %v8175_v1 = vmax.f32 %v8117_v2, %v16806_v16  ;;  %v12812_v16 = vld [vmem:[%s17698_s6 + $0x508] sm:$0xff]   ;;  %12219 = vmatprep.subr.bf16.mxu0 %v13025_v45 }
0x1719   : > { %12220 = vmatpush3.bf16.msra.mxu0 %v12812_v16  ;;  %v12835_v16 = vld [vmem:[%s17698_s6 + $0x560] sm:$0xff]  }
0x171a   : > { %12221 = vmatprep.subr.bf16.mxu0 %v13025_v45 }
0x171d   : > { %12222 = vmatpush3.bf16.msra.mxu0 %v12813_v42  ;;  %v12836_v42 = vld [vmem:[%s17698_s6 + $0x568] sm:$0xff]  }
0x171e   : > { %12223 = vmatprep.subr.bf16.mxu0 %v13025_v45 }
0x1721   : > { %12224 = vmatpush3.bf16.msra.mxu0 %v12814_v23  ;;  %v12837_v23 = vld [vmem:[%s17698_s6 + $0x570] sm:$0xff]  }
0x1722   : > { %12225 = vmatprep.subr.bf16.mxu0 %v13025_v45 }
0x1725   : > { %12226 = vmatpush3.bf16.msra.mxu0 %v12815_v28  ;;  %v12838_v28 = vld [vmem:[%s17698_s6 + $0x578] sm:$0xff]  }
0x1726   : > { %12227 = vmatprep.subr.bf16.mxu0 %v13025_v45 }
0x1729   : > { %12228 = vmatpush3.bf16.msra.mxu0 %v12816_v30  ;;  %v12839_v30 = vld [vmem:[%s13597_s14 + $0x164] ss:$8 sps:$4 sm:$0xff]  }
0x172a   : > { %12229 = vmatprep.subr.bf16.mxu0 %v13025_v45 }
0x172d   : > { %12230 = vmatpush3.bf16.msra.mxu0 %v12817_v32  ;;  %v12841_v32 = vld [vmem:[%s13597_s14 + $0x160] ss:$8 sps:$4 sm:$0xff]  }
0x172e   : > { %12231 = vmatprep.subr.bf16.mxu0 %v13025_v45 }
0x1731   : > { %12232 = vmatpush3.bf16.msra.mxu0 %v12818_v43  ;;  %v17148_v43 = vld [vmem:[%s17696_s4] sm:$0xff]  }
0x1732   : > { %8761 = vmatprep.subr.bf16.mxu0 %v13024_v9 }
0x1739   : > { %v8225_v13 = vpop.f32.mrb[196].mxu0 }
0x173a   : > { %v8232_v34 = vmax.f32 %v8174_v56, %v8225_v13  ;;  %v8227_v57 = vpop.f32.mrb[197].mxu0 }
0x173b   : > { %v8228_v59 = vpop.f32.mrb[198].mxu0 }
0x173c   : > { %v8234_v36 = vadd.f32 %v16398_v12, %v8232_v34  ;;  %v8233_v60 = vmax.f32 %v8175_v1, %v8228_v59  ;;  %v8230_v61 = vpop.f32.mrb[199].mxu0  ;;  %v17032_v34 = vld [vmem:[%s17697_s5] ss:$0 sm:$0xff] }
0x173e   : > { %v8235_v35 = vadd.f32 %v16398_v12, %v8233_v60  ;;  %v8236_v37 = vmax.f32 %v8234_v36, 0.0  ;;  %v12804_v12 = vld [vmem:[%s13609_s16 + $0x140] ss:$8 sps:$4 sm:$0xff]  }
0x1740   : > { %v8237_v5 = vmax.f32 %v8235_v35, 0.0 }
0x1742   : > { %v8238_v62 = vpack.c.bf16 %v8237_v5, %v8236_v37  ;;  %v12822_v37 = vld [vmem:[%s13609_s16 + $0x154] ss:$8 sps:$4 sm:$0xff]  }
0x1744   : > { %12214 = vmatmul.mubr.bf16.vlgmr.msra.gmra.mrb[196].mxu1 %v8238_v62  ;;  %v12828_v62 = vld [vmem:[%s13615_s17 + $0x154] ss:$8 sps:$4 sm:$0xff]  }
0x1745   : > { %8419 = vmatpush1.bf16.msra.mxu1 %v16597_v18  ;;  %11334 = vmatprep.mubr.msk.bf16.mxu1 %vm1496_vm0, %v12802_v17  ;;  %v12824_v17 = vld [vmem:[%s13609_s16 + $0x150] ss:$8 sps:$4 sm:$0xff]  }
0x1746   : > { %8420 = vmatprep.subr.bf16.mxu1 %v13024_v9 }
0x1749   : > { %8421 = vmatpush1.bf16.msra.mxu1 %v16848_v52 }
0x174a   : > { %8422 = vmatprep.subr.bf16.mxu1 %v13024_v9 }
0x174d   : > { %8423 = vmatpush1.bf16.msra.mxu1 %v16708_v38 }
0x174e   : > { %8424 = vmatprep.subr.bf16.mxu1 %v13024_v9 }
0x1751   : > { %8425 = vmatpush1.bf16.msra.mxu1 %v16715_v15 }
0x1752   : > { %8426 = vmatprep.subr.bf16.mxu1 %v13024_v9 }
0x1755   : > { %8427 = vmatpush1.bf16.msra.mxu1 %v16770_v8 }
0x1756   : > { %8428 = vmatprep.subr.bf16.mxu1 %v13024_v9 }
0x1759   : > { %8429 = vmatpush1.bf16.msra.mxu1 %v16777_v11 }
0x175a   : > { %8430 = vmatprep.subr.bf16.mxu1 %v13024_v9 }
0x175d   : > { %8431 = vmatpush1.bf16.msra.mxu1 %v16784_v19 }
0x175e   : > { %8432 = vmatprep.subr.bf16.mxu1 %v13024_v9 }
0x1761   : > { %8433 = vmatpush1.bf16.msra.mxu1 %v16791_v24  ;;  %v16934_v39 = vpop.f32.mrb[200].mxu0 }
0x1762   : > { %8434 = vmatprep.subr.bf16.mxu1 %v13024_v9  ;;  %v8398_v40 = vpop.f32.mrb[201].mxu0 }
0x1763   : > { %v16937_v41 = vpop.f32.mrb[202].mxu0 }
0x1764   : > { %v8401_v26 = vpop.f32.mrb[203].mxu0 }
0x1765   : > { %8435 = vmatpush1.bf16.msra.mxu1 %v16798_v14 }
0x1766   : > { %8436 = vmatprep.subr.bf16.mxu1 %v13024_v9 }
0x1769   : > { %8437 = vmatpush1.bf16.msra.mxu1 %v13666_v21 }
0x176a   : > { %8534 = vmatprep.subr.bf16.mxu1 %v13024_v9 }
0x176c   : > { %8451 = vmatmul.mubr.bf16.vlgmr.msra.gmra.mrb[200].mxu1 %v12804_v12  ;;  %v12830_v12 = vld [vmem:[%s13615_s17 + $0x150] ss:$8 sps:$4 sm:$0xff]  }
0x176d   : > { %8535 = vmatpush1.bf16.msra.mxu1 %v16597_v18  ;;  %11344 = vmatprep.mubr.msk.bf16.mxu1 %vm1496_vm0, %v12808_v7 }
0x176e   : > { %8536 = vmatprep.subr.bf16.mxu1 %v13024_v9 }
0x1771   : > { %8537 = vmatpush1.bf16.msra.mxu1 %v16848_v52 }
0x1772   : > { %8538 = vmatprep.subr.bf16.mxu1 %v13024_v9 }
0x1775   : > { %8539 = vmatpush1.bf16.msra.mxu1 %v16708_v38 }
0x1776   : > { %8540 = vmatprep.subr.bf16.mxu1 %v13024_v9 }
0x1779   : > { %8541 = vmatpush1.bf16.msra.mxu1 %v16715_v15 }
0x177a   : > { %8542 = vmatprep.subr.bf16.mxu1 %v13024_v9 }
0x177d   : > { %8543 = vmatpush1.bf16.msra.mxu1 %v16770_v8 }
0x177e   : > { %8544 = vmatprep.subr.bf16.mxu1 %v13024_v9 }
0x1781   : > { %8545 = vmatpush1.bf16.msra.mxu1 %v16777_v11 }
0x1782   : > { %8546 = vmatprep.subr.bf16.mxu1 %v13024_v9 }
0x1785   : > { %8547 = vmatpush1.bf16.msra.mxu1 %v16784_v19 }
0x1786   : > { %8548 = vmatprep.subr.bf16.mxu1 %v13024_v9 }
0x1789   : > { %8549 = vmatpush1.bf16.msra.mxu1 %v16791_v24  ;;  %v16955_v20 = vpop.f32.mrb[204].mxu0 }
0x178a   : > { %8550 = vmatprep.subr.bf16.mxu1 %v13024_v9  ;;  %v8512_v10 = vpop.f32.mrb[205].mxu0 }
0x178b   : > { %v16957_v25 = vpop.f32.mrb[206].mxu0 }
0x178c   : > { %v8515_v27 = vpop.f32.mrb[207].mxu0 }
0x178d   : > { %8551 = vmatpush1.bf16.msra.mxu1 %v16798_v14  ;;  %v12834_v27 = vld [vmem:[%s17698_s6 + $0x558] sm:$0xff]  }
0x178e   : > { %8552 = vmatprep.subr.bf16.mxu1 %v13024_v9 }
0x1791   : > { %8553 = vmatpush1.bf16.msra.mxu1 %v13666_v21 }
0x1792   : > { %8705 = vmatprep.subr.bf16.mxu1 %v13024_v9 }
0x1794   : > { %8567 = vmatmul.mubr.bf16.vlgmr.msra.gmra.mrb[204].mxu1 %v12810_v6 }
0x1795   : > { %8706 = vmatpush1.bf16.msra.mxu1 %v16597_v18  ;;  %11373 = vmatprep.mubr.msk.bf16.mxu1 %vm1496_vm0, %v12819_v29 }
0x1796   : > { %8707 = vmatprep.subr.bf16.mxu1 %v13024_v9 }
0x1799   : > { %8708 = vmatpush1.bf16.msra.mxu1 %v16848_v52 }
0x179a   : > { %8709 = vmatprep.subr.bf16.mxu1 %v13024_v9 }
0x179d   : > { %8710 = vmatpush1.bf16.msra.mxu1 %v16708_v38 }
0x179e   : > { %8711 = vmatprep.subr.bf16.mxu1 %v13024_v9 }
0x17a1   : > { %8712 = vmatpush1.bf16.msra.mxu1 %v16715_v15 }
0x17a2   : > { %8713 = vmatprep.subr.bf16.mxu1 %v13024_v9 }
0x17a5   : > { %8714 = vmatpush1.bf16.msra.mxu1 %v16770_v8 }
0x17a6   : > { %8715 = vmatprep.subr.bf16.mxu1 %v13024_v9 }
0x17a9   : > { %8716 = vmatpush1.bf16.msra.mxu1 %v16777_v11 }
0x17aa   : > { %8717 = vmatprep.subr.bf16.mxu1 %v13024_v9 }
0x17ad   : > { %8718 = vmatpush1.bf16.msra.mxu1 %v16784_v19 }
0x17ae   : > { %8719 = vmatprep.subr.bf16.mxu1 %v13024_v9 }
0x17b1   : > { %8720 = vmatpush1.bf16.msra.mxu1 %v16791_v24 }
0x17b2   : > { %8721 = vmatprep.subr.bf16.mxu1 %v13024_v9 }
0x17b5   : > { %8722 = vmatpush1.bf16.msra.mxu1 %v16798_v14 }
0x17b6   : > { %8723 = vmatprep.subr.bf16.mxu1 %v13024_v9 }
0x17b9   : > { %8724 = vmatpush1.bf16.msra.mxu1 %v13666_v21 }
0x17ba   : > { %8819 = vmatprep.subr.bf16.mxu1 %v13024_v9 }
0x17bc   : > { %8738 = vmatmul.mubr.bf16.vlgmr.msra.gmra.mrb[208].mxu1 %v12821_v50 }
0x17bd   : > { %8820 = vmatpush1.bf16.msra.mxu1 %v16597_v18  ;;  %11383 = vmatprep.mubr.msk.bf16.mxu1 %vm1496_vm0, %v12825_v53 }
0x17be   : > { %8821 = vmatprep.subr.bf16.mxu1 %v13024_v9 }
0x17c1   : > { %8822 = vmatpush1.bf16.msra.mxu1 %v16848_v52 }
0x17c2   : > { %8823 = vmatprep.subr.bf16.mxu1 %v13024_v9 }
0x17c5   : > { %8824 = vmatpush1.bf16.msra.mxu1 %v16708_v38 }
0x17c6   : > { %8825 = vmatprep.subr.bf16.mxu1 %v13024_v9 }
0x17c9   : > { %8826 = vmatpush1.bf16.msra.mxu1 %v16715_v15 }
0x17ca   : > { %8827 = vmatprep.subr.bf16.mxu1 %v13024_v9 }
0x17cd   : > { %8828 = vmatpush1.bf16.msra.mxu1 %v16770_v8 }
0x17ce   : > { %8829 = vmatprep.subr.bf16.mxu1 %v13024_v9 }
0x17d1   : > { %8830 = vmatpush1.bf16.msra.mxu1 %v16777_v11 }
0x17d2   : > { %8831 = vmatprep.subr.bf16.mxu1 %v13024_v9 }
0x17d5   : > { %8832 = vmatpush1.bf16.msra.mxu1 %v16784_v19 }
0x17d6   : > { %8833 = vmatprep.subr.bf16.mxu1 %v13024_v9 }
0x17d9   : > { %8834 = vmatpush1.bf16.msra.mxu1 %v16791_v24 }
0x17da   : > { %8835 = vmatprep.subr.bf16.mxu1 %v13024_v9 }
0x17dd   : > { %8836 = vmatpush1.bf16.msra.mxu1 %v16798_v14 }
0x17de   : > { %8837 = vmatprep.subr.bf16.mxu1 %v13024_v9 }
0x17e1   : > { %8838 = vmatpush1.bf16.msra.mxu1 %v13666_v21 }
0x17e2   : > { %12237 = vmatprep.subr.bf16.mxu1 %v13025_v45 }
0x17e4   : > { %8852 = vmatmul.mubr.bf16.vlgmr.msra.gmra.mrb[212].mxu1 %v12827_v58  ;;  %v12847_v58 = vld [vmem:[%s13613_s29 + $0x160] ss:$8 sps:$4 sm:$0xff]  }
0x17e5   : > { %12253 = vmatprep.mubr.msk.bf16.mxu1 %vm13026_vm2, %v13025_v45 }
0x1817   : > { %v8338_v48 = vpop.f32.mrb[196].mxu1 }
0x1818   : > { %v17013_v44 = vadd.f32 %v8338_v48, %v16867_v33  ;;  %v12215_v51 = vpop.f32.mrb[197].mxu1 }
0x1819   : > { %v8341_v47 = vpop.f32.mrb[198].mxu1 }
0x181a   : > { %v17017_v49 = vadd.f32 %v8341_v47, %v16871_v54  ;;  %v12216_v63 = vpop.f32.mrb[199].mxu1  ;;  %v12845_v47 = vld [vmem:[%s13613_s29 + $0x164] ss:$8 sps:$4 sm:$0xff]  }
0x183f   : > { %v8452_v33 = vpop.f32.mrb[200].mxu1 }
0x1840   : > { %v8459_v0 = vmax.f32 %v16934_v39, %v8452_v33  ;;  %v8454_v46 = vpop.f32.mrb[201].mxu1 }
0x1841   : > { %v8455_v31 = vpop.f32.mrb[202].mxu1 }
0x1842   : > { %v8460_v54 = vmax.f32 %v16937_v41, %v8455_v31  ;;  %v8517_v55 = vmax.f32 %v8459_v0, %v16955_v20  ;;  %v8457_v4 = vpop.f32.mrb[203].mxu1  ;;  %v12831_v20 = vld [vmem:[%s17698_s6 + $0x540] sm:$0xff]  }
0x1843   : > { %12238 = vmatpush3.bf16.msra.mxu1 %v12831_v20  ;;  %v12857_v20 = vld [vmem:[%s17698_s6 + $0x5b0] sm:$0xff]  }
0x1844   : > { %v8518_v2 = vmax.f32 %v8460_v54, %v16957_v25  ;;  %v12832_v25 = vld [vmem:[%s17698_s6 + $0x548] sm:$0xff]   ;;  %12239 = vmatprep.subr.bf16.mxu1 %v13025_v45 }
0x1847   : > { %12240 = vmatpush3.bf16.msra.mxu1 %v12832_v25  ;;  %v12859_v25 = vld [vmem:[%s13597_s14 + $0x174] ss:$8 sps:$4 sm:$0xff]  }
0x1848   : > { %12241 = vmatprep.subr.bf16.mxu1 %v13025_v45 }
0x184b   : > { %12242 = vmatpush3.bf16.msra.mxu1 %v12833_v22  ;;  %v12861_v22 = vld [vmem:[%s13597_s14 + $0x170] ss:$8 sps:$4 sm:$0xff]  }
0x184c   : > { %12243 = vmatprep.subr.bf16.mxu1 %v13025_v45 }
0x184f   : > { %12244 = vmatpush3.bf16.msra.mxu1 %v12834_v27  ;;  %v17317_v27 = vld [vmem:[%s17696_s4 + $0x20] sm:$0xff]  }
0x1850   : > { %12245 = vmatprep.subr.bf16.mxu1 %v13025_v45 }
0x1853   : > { %12246 = vmatpush3.bf16.msra.mxu1 %v12835_v16  ;;  %v17331_v16 = vld [vmem:[%s17696_s4 + $0x30] sm:$0xff]  }
0x1854   : > { %12247 = vmatprep.subr.bf16.mxu1 %v13025_v45 }
0x1857   : > { %12248 = vmatpush3.bf16.msra.mxu1 %v12836_v42  ;;  %v17338_v42 = vld [vmem:[%s17696_s4 + $0x38] sm:$0xff]  }
0x1858   : > { %12249 = vmatprep.subr.bf16.mxu1 %v13025_v45 }
0x185b   : > { %12250 = vmatpush3.bf16.msra.mxu1 %v12837_v23  ;;  %v17345_v23 = vld [vmem:[%s17696_s4 + $0x40] sm:$0xff]  }
0x185c   : > { %12251 = vmatprep.subr.bf16.mxu1 %v13025_v45 }
0x185f   : > { %12252 = vmatpush3.bf16.msra.mxu1 %v12838_v28 }
0x1860   : > { %9104 = vmatprep.subr.bf16.mxu1 %v13024_v9 }
0x1867   : > { %v8568_v56 = vpop.f32.mrb[204].mxu1 }
0x1868   : > { %v8575_v3 = vmax.f32 %v8517_v55, %v8568_v56  ;;  %v8570_v1 = vpop.f32.mrb[205].mxu1 }
0x1869   : > { %v8571_v13 = vpop.f32.mrb[206].mxu1 }
0x186a   : > { %v8577_v57 = vadd.f32 %v17032_v34, %v8575_v3  ;;  %v8576_v59 = vmax.f32 %v8518_v2, %v8571_v13  ;;  %v8573_v36 = vpop.f32.mrb[207].mxu1 }
0x186c   : > { %v8578_v60 = vadd.f32 %v17032_v34, %v8576_v59  ;;  %v8579_v61 = vmax.f32 %v8577_v57, 0.0 }
0x186e   : > { %v8580_v35 = vmax.f32 %v8578_v60, 0.0 }
0x1870   : > { %v8581_v5 = vpack.c.bf16 %v8580_v35, %v8579_v61  ;;  %v12842_v61 = vld [vmem:[%s13609_s16 + $0x164] ss:$8 sps:$4 sm:$0xff]  }
0x1872   : > { %12234 = vmatmul.mubr.bf16.vlgmr.msra.gmra.mrb[208].mxu0 %v8581_v5  ;;  %v12848_v5 = vld [vmem:[%s13615_s17 + $0x164] ss:$8 sps:$4 sm:$0xff]  }
0x1873   : > { %8762 = vmatpush1.bf16.msra.mxu0 %v16597_v18  ;;  %11378 = vmatprep.mubr.msk.bf16.mxu0 %vm1496_vm0, %v12822_v37  ;;  %v12844_v37 = vld [vmem:[%s13609_s16 + $0x160] ss:$8 sps:$4 sm:$0xff]  }
0x1874   : > { %8763 = vmatprep.subr.bf16.mxu0 %v13024_v9 }
0x1877   : > { %8764 = vmatpush1.bf16.msra.mxu0 %v16848_v52 }
0x1878   : > { %8765 = vmatprep.subr.bf16.mxu0 %v13024_v9 }
0x187b   : > { %8766 = vmatpush1.bf16.msra.mxu0 %v16708_v38 }
0x187c   : > { %8767 = vmatprep.subr.bf16.mxu0 %v13024_v9 }
0x187f   : > { %8768 = vmatpush1.bf16.msra.mxu0 %v16715_v15 }
0x1880   : > { %8769 = vmatprep.subr.bf16.mxu0 %v13024_v9 }
0x1883   : > { %8770 = vmatpush1.bf16.msra.mxu0 %v16770_v8 }
0x1884   : > { %8771 = vmatprep.subr.bf16.mxu0 %v13024_v9 }
0x1887   : > { %8772 = vmatpush1.bf16.msra.mxu0 %v16777_v11 }
0x1888   : > { %8773 = vmatprep.subr.bf16.mxu0 %v13024_v9 }
0x188b   : > { %8774 = vmatpush1.bf16.msra.mxu0 %v16784_v19 }
0x188c   : > { %8775 = vmatprep.subr.bf16.mxu0 %v13024_v9 }
0x188f   : > { %8776 = vmatpush1.bf16.msra.mxu0 %v16791_v24  ;;  %v17085_v7 = vpop.f32.mrb[208].mxu1 }
0x1890   : > { %8777 = vmatprep.subr.bf16.mxu0 %v13024_v9  ;;  %v8741_v6 = vpop.f32.mrb[209].mxu1 }
0x1891   : > { %v17088_v39 = vpop.f32.mrb[210].mxu1  ;;  %v17251_v6 = vld [vmem:[%s17696_s4 + $0x18] sm:$0xff]  }
0x1892   : > { %v8744_v40 = vpop.f32.mrb[211].mxu1 }
0x1893   : > { %8778 = vmatpush1.bf16.msra.mxu0 %v16798_v14  ;;  %v12853_v40 = vld [vmem:[%s17698_s6 + $0x590] sm:$0xff]  }
0x1894   : > { %8779 = vmatprep.subr.bf16.mxu0 %v13024_v9 }
0x1897   : > { %8780 = vmatpush1.bf16.msra.mxu0 %v13666_v21 }
0x1898   : > { %8877 = vmatprep.subr.bf16.mxu0 %v13024_v9 }
0x189a   : > { %8794 = vmatmul.mubr.bf16.vlgmr.msra.gmra.mrb[212].mxu0 %v12824_v17 }
0x189b   : > { %8878 = vmatpush1.bf16.msra.mxu0 %v16597_v18  ;;  %11388 = vmatprep.mubr.msk.bf16.mxu0 %vm1496_vm0, %v12828_v62 }
0x189c   : > { %8879 = vmatprep.subr.bf16.mxu0 %v13024_v9 }
0x189f   : > { %8880 = vmatpush1.bf16.msra.mxu0 %v16848_v52 }
0x18a0   : > { %8881 = vmatprep.subr.bf16.mxu0 %v13024_v9 }
0x18a3   : > { %8882 = vmatpush1.bf16.msra.mxu0 %v16708_v38 }
0x18a4   : > { %8883 = vmatprep.subr.bf16.mxu0 %v13024_v9 }
0x18a7   : > { %8884 = vmatpush1.bf16.msra.mxu0 %v16715_v15 }
0x18a8   : > { %8885 = vmatprep.subr.bf16.mxu0 %v13024_v9 }
0x18ab   : > { %8886 = vmatpush1.bf16.msra.mxu0 %v16770_v8 }
0x18ac   : > { %8887 = vmatprep.subr.bf16.mxu0 %v13024_v9 }
0x18af   : > { %8888 = vmatpush1.bf16.msra.mxu0 %v16777_v11 }
0x18b0   : > { %8889 = vmatprep.subr.bf16.mxu0 %v13024_v9 }
0x18b3   : > { %8890 = vmatpush1.bf16.msra.mxu0 %v16784_v19 }
0x18b4   : > { %8891 = vmatprep.subr.bf16.mxu0 %v13024_v9 }
0x18b7   : > { %8892 = vmatpush1.bf16.msra.mxu0 %v16791_v24 }
0x18b8   : > { %8893 = vmatprep.subr.bf16.mxu0 %v13024_v9 }
0x18bb   : > { %8894 = vmatpush1.bf16.msra.mxu0 %v16798_v14 }
0x18bc   : > { %8895 = vmatprep.subr.bf16.mxu0 %v13024_v9 }
0x18bf   : > { %8896 = vmatpush1.bf16.msra.mxu0 %v13666_v21 }
0x18c0   : > { %9048 = vmatprep.subr.bf16.mxu0 %v13024_v9 }
0x18c2   : > { %8910 = vmatmul.mubr.bf16.vlgmr.msra.gmra.mrb[216].mxu0 %v12830_v12 }
0x18c3   : > { %9049 = vmatpush1.bf16.msra.mxu0 %v16597_v18  ;;  %v17106_v18 = vpop.f32.mrb[212].mxu1  ;;  %11417 = vmatprep.mubr.msk.bf16.mxu0 %vm1496_vm0, %v12839_v30 }
0x18c4   : > { %9050 = vmatprep.subr.bf16.mxu0 %v13024_v9  ;;  %v8855_v41 = vpop.f32.mrb[213].mxu1 }
0x18c5   : > { %v17108_v26 = vpop.f32.mrb[214].mxu1  ;;  %v12855_v41 = vld [vmem:[%s17698_s6 + $0x5a0] sm:$0xff]  }
0x18c6   : > { %v8858_v10 = vpop.f32.mrb[215].mxu1 }
0x18c7   : > { %9051 = vmatpush1.bf16.msra.mxu0 %v16848_v52  ;;  %v12858_v10 = vld [vmem:[%s17698_s6 + $0x5b8] sm:$0xff]  }
0x18c8   : > { %9052 = vmatprep.subr.bf16.mxu0 %v13024_v9 }
0x18cb   : > { %9053 = vmatpush1.bf16.msra.mxu0 %v16708_v38 }
0x18cc   : > { %9054 = vmatprep.subr.bf16.mxu0 %v13024_v9 }
0x18cf   : > { %9055 = vmatpush1.bf16.msra.mxu0 %v16715_v15 }
0x18d0   : > { %9056 = vmatprep.subr.bf16.mxu0 %v13024_v9 }
0x18d3   : > { %9057 = vmatpush1.bf16.msra.mxu0 %v16770_v8 }
0x18d4   : > { %9058 = vmatprep.subr.bf16.mxu0 %v13024_v9 }
0x18d7   : > { %9059 = vmatpush1.bf16.msra.mxu0 %v16777_v11 }
0x18d8   : > { %9060 = vmatprep.subr.bf16.mxu0 %v13024_v9 }
0x18db   : > { %9061 = vmatpush1.bf16.msra.mxu0 %v16784_v19 }
0x18dc   : > { %9062 = vmatprep.subr.bf16.mxu0 %v13024_v9 }
0x18df   : > { %9063 = vmatpush1.bf16.msra.mxu0 %v16791_v24 }
0x18e0   : > { %9064 = vmatprep.subr.bf16.mxu0 %v13024_v9 }
0x18e3   : > { %9065 = vmatpush1.bf16.msra.mxu0 %v16798_v14 }
0x18e4   : > { %9066 = vmatprep.subr.bf16.mxu0 %v13024_v9 }
0x18e7   : > { %9067 = vmatpush1.bf16.msra.mxu0 %v13666_v21 }
0x18e8   : > { %9162 = vmatprep.subr.bf16.mxu0 %v13024_v9 }
0x18ea   : > { %9081 = vmatmul.mubr.bf16.vlgmr.msra.gmra.mrb[220].mxu0 %v12841_v32 }
0x18eb   : > { %9163 = vmatpush1.bf16.msra.mxu0 %v17148_v43  ;;  %11427 = vmatprep.mubr.msk.bf16.mxu0 %vm1496_vm0, %v12845_v47 }
0x18ec   : > { %9164 = vmatprep.subr.bf16.mxu0 %v13024_v9 }
0x18ef   : > { %9165 = vmatpush1.bf16.msra.mxu0 %v16848_v52 }
0x18f0   : > { %9166 = vmatprep.subr.bf16.mxu0 %v13024_v9 }
0x18f3   : > { %9167 = vmatpush1.bf16.msra.mxu0 %v16708_v38 }
0x18f4   : > { %9168 = vmatprep.subr.bf16.mxu0 %v13024_v9 }
0x18f7   : > { %9169 = vmatpush1.bf16.msra.mxu0 %v16715_v15 }
0x18f8   : > { %9170 = vmatprep.subr.bf16.mxu0 %v13024_v9 }
0x18fb   : > { %9171 = vmatpush1.bf16.msra.mxu0 %v16770_v8 }
0x18fc   : > { %9172 = vmatprep.subr.bf16.mxu0 %v13024_v9 }
0x18ff   : > { %9173 = vmatpush1.bf16.msra.mxu0 %v16777_v11 }
0x1900   : > { %9174 = vmatprep.subr.bf16.mxu0 %v13024_v9 }
0x1903   : > { %9175 = vmatpush1.bf16.msra.mxu0 %v16784_v19 }
0x1904   : > { %9176 = vmatprep.subr.bf16.mxu0 %v13024_v9 }
0x1907   : > { %9177 = vmatpush1.bf16.msra.mxu0 %v16791_v24 }
0x1908   : > { %9178 = vmatprep.subr.bf16.mxu0 %v13024_v9 }
0x190b   : > { %9179 = vmatpush1.bf16.msra.mxu0 %v16798_v14 }
0x190c   : > { %9180 = vmatprep.subr.bf16.mxu0 %v13024_v9 }
0x190f   : > { %9181 = vmatpush1.bf16.msra.mxu0 %v13666_v21 }
0x1910   : > { %12257 = vmatprep.subr.bf16.mxu0 %v13025_v45 }
0x1912   : > { %9195 = vmatmul.mubr.bf16.vlgmr.msra.gmra.mrb[224].mxu0 %v12847_v58 }
0x1913   : > { %12273 = vmatprep.mubr.msk.bf16.mxu0 %vm13026_vm2, %v13025_v45 }
0x1945   : > { %v8681_v29 = vpop.f32.mrb[208].mxu0 }
0x1946   : > { %v17169_v50 = vadd.f32 %v8681_v29, %v17013_v44  ;;  %v12235_v48 = vpop.f32.mrb[209].mxu0 }
0x1947   : > { %v8684_v51 = vpop.f32.mrb[210].mxu0  ;;  %v12865_v48 = vld [vmem:[%s13613_s29 + $0x174] ss:$8 sps:$4 sm:$0xff]  }
0x1948   : > { %v17173_v53 = vadd.f32 %v8684_v51, %v17017_v49  ;;  %v12236_v63 = vpop.f32.mrb[211].mxu0 }
0x1949   : > { %v12867_v63 = vld [vmem:[%s13613_s29 + $0x170] ss:$8 sps:$4 sm:$0xff]  }
0x196d   : > { %v8795_v44 = vpop.f32.mrb[212].mxu0 }
0x196e   : > { %v8802_v33 = vmax.f32 %v17085_v7, %v8795_v44  ;;  %v8797_v0 = vpop.f32.mrb[213].mxu0  ;;  %v17244_v7 = vld [vmem:[%s17696_s4 + $0x10] sm:$0xff]  }
0x196f   : > { %v8798_v46 = vpop.f32.mrb[214].mxu0 }
0x1970   : > { %v8803_v49 = vmax.f32 %v17088_v39, %v8798_v46  ;;  %v8860_v31 = vmax.f32 %v8802_v33, %v17106_v18  ;;  %v8800_v54 = vpop.f32.mrb[215].mxu0  ;;  %v12854_v18 = vld [vmem:[%s17698_s6 + $0x598] sm:$0xff]  }
0x1972   : > { %v8861_v55 = vmax.f32 %v8803_v49, %v17108_v26  ;;  %v12856_v26 = vld [vmem:[%s17698_s6 + $0x5a8] sm:$0xff]  }
0x1995   : > { %v8911_v4 = vpop.f32.mrb[216].mxu0 }
0x1996   : > { %v8918_v2 = vmax.f32 %v8860_v31, %v8911_v4  ;;  %v8913_v56 = vpop.f32.mrb[217].mxu0 }
0x1997   : > { %v8914_v3 = vpop.f32.mrb[218].mxu0 }
0x1998   : > { %v8920_v1 = vadd.f32 %v17032_v34, %v8918_v2  ;;  %v8919_v13 = vmax.f32 %v8861_v55, %v8914_v3  ;;  %v8916_v57 = vpop.f32.mrb[219].mxu0 }
0x199a   : > { %v8921_v59 = vadd.f32 %v17032_v34, %v8919_v13  ;;  %v8922_v36 = vmax.f32 %v8920_v1, 0.0 }
0x199c   : > { %v8923_v60 = vmax.f32 %v8921_v59, 0.0  ;;  %v12862_v59 = vld [vmem:[%s13609_s16 + $0x174] ss:$8 sps:$4 sm:$0xff]  }
0x199e   : > { %v8924_v35 = vpack.c.bf16 %v8923_v60, %v8922_v36  ;;  %v17375_v60 = vld [vmem:[%s17696_s4 + $0x8] sm:$0xff]  }
0x19a0   : > { %12254 = vmatmul.mubr.bf16.vlgmr.msra.gmra.mrb[216].mxu1 %v8924_v35  ;;  %v12868_v35 = vld [vmem:[%s13615_s17 + $0x174] ss:$8 sps:$4 sm:$0xff]  }
0x19a1   : > { %9105 = vmatpush1.bf16.msra.mxu1 %v17148_v43  ;;  %11422 = vmatprep.mubr.msk.bf16.mxu1 %vm1496_vm0, %v12842_v61  ;;  %v12864_v61 = vld [vmem:[%s13609_s16 + $0x170] ss:$8 sps:$4 sm:$0xff]  }
0x19a2   : > { %9106 = vmatprep.subr.bf16.mxu1 %v13024_v9 }
0x19a5   : > { %9107 = vmatpush1.bf16.msra.mxu1 %v16848_v52 }
0x19a6   : > { %9108 = vmatprep.subr.bf16.mxu1 %v13024_v9 }
0x19a9   : > { %9109 = vmatpush1.bf16.msra.mxu1 %v16708_v38 }
0x19aa   : > { %9110 = vmatprep.subr.bf16.mxu1 %v13024_v9 }
0x19ad   : > { %9111 = vmatpush1.bf16.msra.mxu1 %v16715_v15 }
0x19ae   : > { %9112 = vmatprep.subr.bf16.mxu1 %v13024_v9 }
0x19b1   : > { %9113 = vmatpush1.bf16.msra.mxu1 %v16770_v8 }
0x19b2   : > { %9114 = vmatprep.subr.bf16.mxu1 %v13024_v9 }
0x19b5   : > { %9115 = vmatpush1.bf16.msra.mxu1 %v16777_v11 }
0x19b6   : > { %9116 = vmatprep.subr.bf16.mxu1 %v13024_v9 }
0x19b9   : > { %9117 = vmatpush1.bf16.msra.mxu1 %v16784_v19 }
0x19ba   : > { %9118 = vmatprep.subr.bf16.mxu1 %v13024_v9 }
0x19bd   : > { %9119 = vmatpush1.bf16.msra.mxu1 %v16791_v24 }
0x19be   : > { %9120 = vmatprep.subr.bf16.mxu1 %v13024_v9 }
0x19c1   : > { %9121 = vmatpush1.bf16.msra.mxu1 %v16798_v14 }
0x19c2   : > { %9122 = vmatprep.subr.bf16.mxu1 %v13024_v9 }
0x19c5   : > { %9123 = vmatpush1.bf16.msra.mxu1 %v13666_v21 }
0x19c6   : > { %9220 = vmatprep.subr.bf16.mxu1 %v13024_v9 }
0x19c8   : > { %9137 = vmatmul.mubr.bf16.vlgmr.msra.gmra.mrb[220].mxu1 %v12844_v37  ;;  %v12870_v37 = vld [vmem:[%s13615_s17 + $0x170] ss:$8 sps:$4 sm:$0xff]  }
0x19c9   : > { %9221 = vmatpush1.bf16.msra.mxu1 %v17148_v43  ;;  %11432 = vmatprep.mubr.msk.bf16.mxu1 %vm1496_vm0, %v12848_v5 }
0x19ca   : > { %9222 = vmatprep.subr.bf16.mxu1 %v13024_v9 }
0x19cd   : > { %9223 = vmatpush1.bf16.msra.mxu1 %v16848_v52 }
0x19ce   : > { %9224 = vmatprep.subr.bf16.mxu1 %v13024_v9 }
0x19d1   : > { %9225 = vmatpush1.bf16.msra.mxu1 %v16708_v38  ;;  %v12850_v38 = vld [vmem:[%s13615_s17 + $0x160] ss:$8 sps:$4 sm:$0xff]  }
0x19d2   : > { %9226 = vmatprep.subr.bf16.mxu1 %v13024_v9 }
0x19d5   : > { %9227 = vmatpush1.bf16.msra.mxu1 %v16715_v15  ;;  %v17236_v15 = vpop.f32.mrb[220].mxu0 }
0x19d6   : > { %9228 = vmatprep.subr.bf16.mxu1 %v13024_v9  ;;  %v9084_v17 = vpop.f32.mrb[221].mxu0 }
0x19d7   : > { %v17239_v62 = vpop.f32.mrb[222].mxu0 }
0x19d8   : > { %v9087_v12 = vpop.f32.mrb[223].mxu0 }
0x19d9   : > { %9229 = vmatpush1.bf16.msra.mxu1 %v16770_v8 }
0x19da   : > { %9230 = vmatprep.subr.bf16.mxu1 %v13024_v9 }
0x19dd   : > { %9231 = vmatpush1.bf16.msra.mxu1 %v16777_v11 }
0x19de   : > { %9232 = vmatprep.subr.bf16.mxu1 %v13024_v9 }
0x19e1   : > { %9233 = vmatpush1.bf16.msra.mxu1 %v16784_v19 }
0x19e2   : > { %9234 = vmatprep.subr.bf16.mxu1 %v13024_v9 }
0x19e5   : > { %9235 = vmatpush1.bf16.msra.mxu1 %v16791_v24 }
0x19e6   : > { %9236 = vmatprep.subr.bf16.mxu1 %v13024_v9 }
0x19e9   : > { %9237 = vmatpush1.bf16.msra.mxu1 %v16798_v14 }
0x19ea   : > { %9238 = vmatprep.subr.bf16.mxu1 %v13024_v9 }
0x19ed   : > { %9239 = vmatpush1.bf16.msra.mxu1 %v13666_v21 }
0x19ee   : > { %9391 = vmatprep.subr.bf16.mxu1 %v13024_v9 }
0x19f0   : > { %9253 = vmatmul.mubr.bf16.vlgmr.msra.gmra.mrb[224].mxu1 %v12850_v38 }
0x19f1   : > { %9392 = vmatpush1.bf16.msra.mxu1 %v17148_v43  ;;  %11461 = vmatprep.mubr.msk.bf16.mxu1 %vm1496_vm0, %v12859_v25 }
0x19f2   : > { %9393 = vmatprep.subr.bf16.mxu1 %v13024_v9 }
0x19f5   : > { %9394 = vmatpush1.bf16.msra.mxu1 %v16848_v52 }
0x19f6   : > { %9395 = vmatprep.subr.bf16.mxu1 %v13024_v9 }
0x19f9   : > { %9396 = vmatpush1.bf16.msra.mxu1 %v17244_v7 }
0x19fa   : > { %9397 = vmatprep.subr.bf16.mxu1 %v13024_v9 }
0x19fd   : > { %9398 = vmatpush1.bf16.msra.mxu1 %v17251_v6 }
0x19fe   : > { %9399 = vmatprep.subr.bf16.mxu1 %v13024_v9 }
0x1a01   : > { %9400 = vmatpush1.bf16.msra.mxu1 %v16770_v8  ;;  %v17267_v8 = vpop.f32.mrb[224].mxu0 }
0x1a02   : > { %9401 = vmatprep.subr.bf16.mxu1 %v13024_v9 }
0x1a05   : > { %9402 = vmatpush1.bf16.msra.mxu1 %v16777_v11  ;;  %v9198_v11 = vpop.f32.mrb[225].mxu0 }
0x1a06   : > { %9403 = vmatprep.subr.bf16.mxu1 %v13024_v9  ;;  %v17269_v39 = vpop.f32.mrb[226].mxu0  ;;  %v12871_v11 = vld [vmem:[%s17698_s6 + $0x5c0] sm:$0xff]  }
0x1a09   : > { %9404 = vmatpush1.bf16.msra.mxu1 %v16784_v19  ;;  %v12851_v19 = vld [vmem:[%s17698_s6 + $0x580] sm:$0xff]  }
0x1a0a   : > { %9405 = vmatprep.subr.bf16.mxu1 %v13024_v9  ;;  %12258 = vmatpush3.bf16.msra.mxu0 %v12851_v19  ;;  %v12872_v19 = vld [vmem:[%s17698_s6 + $0x5c8] sm:$0xff]  }
0x1a0b   : > { %12259 = vmatprep.subr.bf16.mxu0 %v13025_v45 }
0x1a0d   : > { %9406 = vmatpush1.bf16.msra.mxu1 %v16791_v24  ;;  %v9201_v24 = vpop.f32.mrb[227].mxu0 }
0x1a0e   : > { %9407 = vmatprep.subr.bf16.mxu1 %v13024_v9  ;;  %v12873_v24 = vld [vmem:[%s17698_s6 + $0x5d0] sm:$0xff]  }
0x1a11   : > { %9408 = vmatpush1.bf16.msra.mxu1 %v16798_v14  ;;  %v12852_v14 = vld [vmem:[%s17698_s6 + $0x588] sm:$0xff]  }
0x1a12   : > { %9409 = vmatprep.subr.bf16.mxu1 %v13024_v9  ;;  %12260 = vmatpush3.bf16.msra.mxu0 %v12852_v14  ;;  %v12874_v14 = vld [vmem:[%s17698_s6 + $0x5d8] sm:$0xff]  }
0x1a13   : > { %12261 = vmatprep.subr.bf16.mxu0 %v13025_v45 }
0x1a15   : > { %9410 = vmatpush1.bf16.msra.mxu1 %v13666_v21 }
0x1a16   : > { %9505 = vmatprep.subr.bf16.mxu1 %v13024_v9  ;;  %12262 = vmatpush3.bf16.msra.mxu0 %v12853_v40  ;;  %v12875_v40 = vld [vmem:[%s17698_s6 + $0x5e0] sm:$0xff]  }
0x1a17   : > { %12263 = vmatprep.subr.bf16.mxu0 %v13025_v45 }
0x1a18   : > { %9424 = vmatmul.mubr.bf16.vlgmr.msra.gmra.mrb[228].mxu1 %v12861_v22 }
0x1a19   : > { %9506 = vmatpush1.bf16.msra.mxu1 %v17148_v43  ;;  %11471 = vmatprep.mubr.msk.bf16.mxu1 %vm1496_vm0, %v12865_v48 }
0x1a1a   : > { %12264 = vmatpush3.bf16.msra.mxu0 %v12854_v18  ;;  %9507 = vmatprep.subr.bf16.mxu1 %v13024_v9  ;;  %v12876_v18 = vld [vmem:[%s17698_s6 + $0x5e8] sm:$0xff]  }
0x1a1b   : > { %12265 = vmatprep.subr.bf16.mxu0 %v13025_v45 }
0x1a1d   : > { %9508 = vmatpush1.bf16.msra.mxu1 %v16848_v52  ;;  %v17324_v52 = vld [vmem:[%s17696_s4 + $0x28] sm:$0xff]  }
0x1a1e   : > { %12266 = vmatpush3.bf16.msra.mxu0 %v12855_v41  ;;  %9509 = vmatprep.subr.bf16.mxu1 %v13024_v9  ;;  %v12877_v41 = vld [vmem:[%s17698_s6 + $0x5f0] sm:$0xff]  }
0x1a1f   : > { %12267 = vmatprep.subr.bf16.mxu0 %v13025_v45 }
0x1a21   : > { %9510 = vmatpush1.bf16.msra.mxu1 %v17244_v7 }
0x1a22   : > { %12268 = vmatpush3.bf16.msra.mxu0 %v12856_v26  ;;  %9511 = vmatprep.subr.bf16.mxu1 %v13024_v9  ;;  %v12878_v26 = vld [vmem:[%s17698_s6 + $0x5f8] sm:$0xff]  }
0x1a23   : > { %12269 = vmatprep.subr.bf16.mxu0 %v13025_v45 }
0x1a25   : > { %9512 = vmatpush1.bf16.msra.mxu1 %v17251_v6 }
0x1a26   : > { %12270 = vmatpush3.bf16.msra.mxu0 %v12857_v20  ;;  %9513 = vmatprep.subr.bf16.mxu1 %v13024_v9  ;;  %v12879_v20 = vld [vmem:[%s13597_s14 + $0x184] ss:$8 sps:$4 sm:$0xff]  }
0x1a27   : > { %12271 = vmatprep.subr.bf16.mxu0 %v13025_v45 }
0x1a29   : > { %9514 = vmatpush1.bf16.msra.mxu1 %v17317_v27 }
0x1a2a   : > { %12272 = vmatpush3.bf16.msra.mxu0 %v12858_v10  ;;  %9515 = vmatprep.subr.bf16.mxu1 %v13024_v9  ;;  %v12881_v10 = vld [vmem:[%s13597_s14 + $0x180] ss:$8 sps:$4 sm:$0xff]  }
0x1a2b   : > { %9447 = vmatprep.subr.bf16.mxu0 %v13024_v9 }
0x1a2d   : > { %9516 = vmatpush1.bf16.msra.mxu1 %v17324_v52 }
0x1a2e   : > { %9517 = vmatprep.subr.bf16.mxu1 %v13024_v9 }
0x1a31   : > { %9518 = vmatpush1.bf16.msra.mxu1 %v17331_v16 }
0x1a32   : > { %9519 = vmatprep.subr.bf16.mxu1 %v13024_v9 }
0x1a35   : > { %9520 = vmatpush1.bf16.msra.mxu1 %v17338_v42 }
0x1a36   : > { %9521 = vmatprep.subr.bf16.mxu1 %v13024_v9 }
0x1a39   : > { %9522 = vmatpush1.bf16.msra.mxu1 %v17345_v23 }
0x1a3a   : > { %9523 = vmatprep.subr.bf16.mxu1 %v13024_v9 }
0x1a3d   : > { %9524 = vmatpush1.bf16.msra.mxu1 %v13666_v21 }
0x1a3e   : > { %12277 = vmatprep.subr.bf16.mxu1 %v13025_v45 }
0x1a40   : > { %9538 = vmatmul.mubr.bf16.vlgmr.msra.gmra.mrb[232].mxu1 %v12867_v63  ;;  %v12887_v63 = vld [vmem:[%s13613_s29 + $0x180] ss:$8 sps:$4 sm:$0xff]  }
0x1a41   : > { %12293 = vmatprep.mubr.msk.bf16.mxu1 %vm13026_vm2, %v13025_v45  ;;  %12278 = vmatpush3.bf16.msra.mxu1 %v12871_v11 }
0x1a42   : > { %12279 = vmatprep.subr.bf16.mxu1 %v13025_v45 }
0x1a45   : > { %12280 = vmatpush3.bf16.msra.mxu1 %v12872_v19 }
0x1a46   : > { %12281 = vmatprep.subr.bf16.mxu1 %v13025_v45 }
0x1a49   : > { %12282 = vmatpush3.bf16.msra.mxu1 %v12873_v24 }
0x1a4a   : > { %12283 = vmatprep.subr.bf16.mxu1 %v13025_v45 }
0x1a4d   : > { %12284 = vmatpush3.bf16.msra.mxu1 %v12874_v14 }
0x1a4e   : > { %12285 = vmatprep.subr.bf16.mxu1 %v13025_v45 }
0x1a51   : > { %12286 = vmatpush3.bf16.msra.mxu1 %v12875_v40 }
0x1a52   : > { %12287 = vmatprep.subr.bf16.mxu1 %v13025_v45 }
0x1a55   : > { %12288 = vmatpush3.bf16.msra.mxu1 %v12876_v18 }
0x1a56   : > { %12289 = vmatprep.subr.bf16.mxu1 %v13025_v45 }
0x1a59   : > { %12290 = vmatpush3.bf16.msra.mxu1 %v12877_v41 }
0x1a5a   : > { %12291 = vmatprep.subr.bf16.mxu1 %v13025_v45 }
0x1a5d   : > { %12292 = vmatpush3.bf16.msra.mxu1 %v12878_v26 }
0x1a5e   : > { %9790 = vmatprep.subr.bf16.mxu1 %v13024_v9 }
0x1a73   : > { %v9024_v28 = vpop.f32.mrb[216].mxu1 }
0x1a74   : > { %v17350_v30 = vadd.f32 %v9024_v28, %v17169_v50  ;;  %v12255_v32 = vpop.f32.mrb[217].mxu1 }
0x1a75   : > { %v9027_v29 = vpop.f32.mrb[218].mxu1 }
0x1a76   : > { %v17354_v51 = vadd.f32 %v9027_v29, %v17173_v53  ;;  %v12256_v47 = vpop.f32.mrb[219].mxu1  ;;  %v12885_v29 = vld [vmem:[%s13613_s29 + $0x184] ss:$8 sps:$4 sm:$0xff]  }
0x1a9b   : > { %v9138_v50 = vpop.f32.mrb[220].mxu1 }
0x1a9c   : > { %v9145_v58 = vmax.f32 %v17236_v15, %v9138_v50  ;;  %v9140_v44 = vpop.f32.mrb[221].mxu1 }
0x1a9d   : > { %v9141_v33 = vpop.f32.mrb[222].mxu1 }
0x1a9e   : > { %v9146_v53 = vmax.f32 %v17239_v62, %v9141_v33  ;;  %v9203_v0 = vmax.f32 %v9145_v58, %v17267_v8  ;;  %v9143_v46 = vpop.f32.mrb[223].mxu1 }
0x1aa0   : > { %v9204_v49 = vmax.f32 %v9146_v53, %v17269_v39 }
0x1ac3   : > { %v9254_v31 = vpop.f32.mrb[224].mxu1 }
0x1ac4   : > { %v9261_v54 = vmax.f32 %v9203_v0, %v9254_v31  ;;  %v9256_v55 = vpop.f32.mrb[225].mxu1 }
0x1ac5   : > { %v9257_v4 = vpop.f32.mrb[226].mxu1 }
0x1ac6   : > { %v9263_v2 = vadd.f32 %v17032_v34, %v9261_v54  ;;  %v9262_v56 = vmax.f32 %v9204_v49, %v9257_v4  ;;  %v9259_v3 = vpop.f32.mrb[227].mxu1 }
0x1ac8   : > { %v9264_v1 = vadd.f32 %v17032_v34, %v9262_v56  ;;  %v9265_v13 = vmax.f32 %v9263_v2, 0.0 }
0x1aca   : > { %v9266_v57 = vmax.f32 %v9264_v1, 0.0 }
0x1acc   : > { %v9267_v36 = vpack.c.bf16 %v9266_v57, %v9265_v13  ;;  %v12882_v13 = vld [vmem:[%s13609_s16 + $0x184] ss:$8 sps:$4 sm:$0xff]  }
0x1ace   : > { %12274 = vmatmul.mubr.bf16.vlgmr.msra.gmra.mrb[228].mxu0 %v9267_v36 }
0x1acf   : > { %9448 = vmatpush1.bf16.msra.mxu0 %v17148_v43  ;;  %11466 = vmatprep.mubr.msk.bf16.mxu0 %vm1496_vm0, %v12862_v59  ;;  %v12888_v59 = vld [vmem:[%s13615_s17 + $0x184] ss:$8 sps:$4 sm:$0xff]  }
0x1ad0   : > { %9449 = vmatprep.subr.bf16.mxu0 %v13024_v9 }
0x1ad3   : > { %9450 = vmatpush1.bf16.msra.mxu0 %v17375_v60 }
0x1ad4   : > { %9451 = vmatprep.subr.bf16.mxu0 %v13024_v9 }
0x1ad7   : > { %9452 = vmatpush1.bf16.msra.mxu0 %v17244_v7 }
0x1ad8   : > { %9453 = vmatprep.subr.bf16.mxu0 %v13024_v9 }
0x1adb   : > { %9454 = vmatpush1.bf16.msra.mxu0 %v17251_v6 }
0x1adc   : > { %9455 = vmatprep.subr.bf16.mxu0 %v13024_v9 }
0x1adf   : > { %9456 = vmatpush1.bf16.msra.mxu0 %v17317_v27 }
0x1ae0   : > { %9457 = vmatprep.subr.bf16.mxu0 %v13024_v9 }
0x1ae3   : > { %9458 = vmatpush1.bf16.msra.mxu0 %v17324_v52 }
0x1ae4   : > { %9459 = vmatprep.subr.bf16.mxu0 %v13024_v9 }
0x1ae7   : > { %9460 = vmatpush1.bf16.msra.mxu0 %v17331_v16 }
0x1ae8   : > { %9461 = vmatprep.subr.bf16.mxu0 %v13024_v9 }
0x1aeb   : > { %9462 = vmatpush1.bf16.msra.mxu0 %v17338_v42  ;;  %v17422_v5 = vpop.f32.mrb[228].mxu1 }
0x1aec   : > { %9463 = vmatprep.subr.bf16.mxu0 %v13024_v9  ;;  %v9427_v38 = vpop.f32.mrb[229].mxu1 }
0x1aed   : > { %v17425_v15 = vpop.f32.mrb[230].mxu1  ;;  %v12898_v38 = vld [vmem:[%s17698_s6 + $0x638] sm:$0xff]  }
0x1aee   : > { %v9430_v17 = vpop.f32.mrb[231].mxu1 }
0x1aef   : > { %9464 = vmatpush1.bf16.msra.mxu0 %v17345_v23  ;;  %v12900_v17 = vld [vmem:[%s17700_s8 + $0x8] sm:$0xff]  }
0x1af0   : > { %9465 = vmatprep.subr.bf16.mxu0 %v13024_v9 }
0x1af3   : > { %9466 = vmatpush1.bf16.msra.mxu0 %v13666_v21 }
0x1af4   : > { %9563 = vmatprep.subr.bf16.mxu0 %v13024_v9 }
0x1af6   : > { %9480 = vmatmul.mubr.bf16.vlgmr.msra.gmra.mrb[232].mxu0 %v12864_v61  ;;  %v12894_v61 = vld [vmem:[%s17698_s6 + $0x618] sm:$0xff]  }
0x1af7   : > { %9564 = vmatpush1.bf16.msra.mxu0 %v17148_v43  ;;  %11476 = vmatprep.mubr.msk.bf16.mxu0 %vm1496_vm0, %v12868_v35  ;;  %v12895_v35 = vld [vmem:[%s17698_s6 + $0x620] sm:$0xff]  }
0x1af8   : > { %9565 = vmatprep.subr.bf16.mxu0 %v13024_v9 }
0x1afb   : > { %9566 = vmatpush1.bf16.msra.mxu0 %v17375_v60 }
0x1afc   : > { %9567 = vmatprep.subr.bf16.mxu0 %v13024_v9 }
0x1aff   : > { %9568 = vmatpush1.bf16.msra.mxu0 %v17244_v7 }
0x1b00   : > { %9569 = vmatprep.subr.bf16.mxu0 %v13024_v9 }
0x1b03   : > { %9570 = vmatpush1.bf16.msra.mxu0 %v17251_v6 }
0x1b04   : > { %9571 = vmatprep.subr.bf16.mxu0 %v13024_v9 }
0x1b07   : > { %9572 = vmatpush1.bf16.msra.mxu0 %v17317_v27 }
0x1b08   : > { %9573 = vmatprep.subr.bf16.mxu0 %v13024_v9 }
0x1b0b   : > { %9574 = vmatpush1.bf16.msra.mxu0 %v17324_v52 }
0x1b0c   : > { %9575 = vmatprep.subr.bf16.mxu0 %v13024_v9 }
0x1b0f   : > { %9576 = vmatpush1.bf16.msra.mxu0 %v17331_v16 }
0x1b10   : > { %9577 = vmatprep.subr.bf16.mxu0 %v13024_v9 }
0x1b13   : > { %9578 = vmatpush1.bf16.msra.mxu0 %v17338_v42  ;;  %v17443_v62 = vpop.f32.mrb[232].mxu1 }
0x1b14   : > { %9579 = vmatprep.subr.bf16.mxu0 %v13024_v9  ;;  %v9541_v12 = vpop.f32.mrb[233].mxu1 }
0x1b15   : > { %v17445_v8 = vpop.f32.mrb[234].mxu1  ;;  %v12902_v12 = vld [vmem:[%s17700_s8 + $0x18] sm:$0xff]  }
0x1b16   : > { %v9544_v39 = vpop.f32.mrb[235].mxu1 }
0x1b17   : > { %9580 = vmatpush1.bf16.msra.mxu0 %v17345_v23 }
0x1b18   : > { %9581 = vmatprep.subr.bf16.mxu0 %v13024_v9 }
0x1b1b   : > { %9582 = vmatpush1.bf16.msra.mxu0 %v13666_v21 }
0x1b1c   : > { %9734 = vmatprep.subr.bf16.mxu0 %v13024_v9 }
0x1b1e   : > { %9596 = vmatmul.mubr.bf16.vlgmr.msra.gmra.mrb[236].mxu0 %v12870_v37  ;;  %v12896_v37 = vld [vmem:[%s17698_s6 + $0x628] sm:$0xff]  }
0x1b1f   : > { %9735 = vmatpush1.bf16.msra.mxu0 %v17148_v43  ;;  %11505 = vmatprep.mubr.msk.bf16.mxu0 %vm1496_vm0, %v12879_v20 }
0x1b20   : > { %9736 = vmatprep.subr.bf16.mxu0 %v13024_v9 }
0x1b23   : > { %9737 = vmatpush1.bf16.msra.mxu0 %v17375_v60 }
0x1b24   : > { %9738 = vmatprep.subr.bf16.mxu0 %v13024_v9 }
0x1b27   : > { %9739 = vmatpush1.bf16.msra.mxu0 %v17244_v7 }
0x1b28   : > { %9740 = vmatprep.subr.bf16.mxu0 %v13024_v9 }
0x1b2b   : > { %9741 = vmatpush1.bf16.msra.mxu0 %v17251_v6 }
0x1b2c   : > { %9742 = vmatprep.subr.bf16.mxu0 %v13024_v9 }
0x1b2f   : > { %9743 = vmatpush1.bf16.msra.mxu0 %v17317_v27 }
0x1b30   : > { %9744 = vmatprep.subr.bf16.mxu0 %v13024_v9 }
0x1b33   : > { %9745 = vmatpush1.bf16.msra.mxu0 %v17324_v52 }
0x1b34   : > { %9746 = vmatprep.subr.bf16.mxu0 %v13024_v9 }
0x1b37   : > { %9747 = vmatpush1.bf16.msra.mxu0 %v17331_v16 }
0x1b38   : > { %9748 = vmatprep.subr.bf16.mxu0 %v13024_v9 }
0x1b3b   : > { %9749 = vmatpush1.bf16.msra.mxu0 %v17338_v42 }
0x1b3c   : > { %9750 = vmatprep.subr.bf16.mxu0 %v13024_v9 }
0x1b3f   : > { %9751 = vmatpush1.bf16.msra.mxu0 %v17345_v23 }
0x1b40   : > { %9752 = vmatprep.subr.bf16.mxu0 %v13024_v9 }
0x1b43   : > { %9753 = vmatpush1.bf16.msra.mxu0 %v13666_v21 }
0x1b44   : > { %9848 = vmatprep.subr.bf16.mxu0 %v13024_v9 }
0x1b46   : > { %9767 = vmatmul.mubr.bf16.vlgmr.msra.gmra.mrb[240].mxu0 %v12881_v10 }
0x1b47   : > { %9849 = vmatpush1.bf16.msra.mxu0 %v17148_v43  ;;  %11515 = vmatprep.mubr.msk.bf16.mxu0 %vm1496_vm0, %v12885_v29 }
0x1b48   : > { %9850 = vmatprep.subr.bf16.mxu0 %v13024_v9 }
0x1b4b   : > { %9851 = vmatpush1.bf16.msra.mxu0 %v17375_v60 }
0x1b4c   : > { %9852 = vmatprep.subr.bf16.mxu0 %v13024_v9 }
0x1b4f   : > { %9853 = vmatpush1.bf16.msra.mxu0 %v17244_v7 }
0x1b50   : > { %9854 = vmatprep.subr.bf16.mxu0 %v13024_v9 }
0x1b53   : > { %9855 = vmatpush1.bf16.msra.mxu0 %v17251_v6 }
0x1b54   : > { %9856 = vmatprep.subr.bf16.mxu0 %v13024_v9 }
0x1b57   : > { %9857 = vmatpush1.bf16.msra.mxu0 %v17317_v27 }
0x1b58   : > { %9858 = vmatprep.subr.bf16.mxu0 %v13024_v9 }
0x1b5b   : > { %9859 = vmatpush1.bf16.msra.mxu0 %v17324_v52 }
0x1b5c   : > { %9860 = vmatprep.subr.bf16.mxu0 %v13024_v9 }
0x1b5f   : > { %9861 = vmatpush1.bf16.msra.mxu0 %v17331_v16 }
0x1b60   : > { %9862 = vmatprep.subr.bf16.mxu0 %v13024_v9 }
0x1b63   : > { %9863 = vmatpush1.bf16.msra.mxu0 %v17338_v42 }
0x1b64   : > { %9864 = vmatprep.subr.bf16.mxu0 %v13024_v9 }
0x1b67   : > { %9865 = vmatpush1.bf16.msra.mxu0 %v17345_v23 }
0x1b68   : > { %9866 = vmatprep.subr.bf16.mxu0 %v13024_v9 }
0x1b6b   : > { %9867 = vmatpush1.bf16.msra.mxu0 %v13666_v21 }
0x1b6c   : > { %12297 = vmatprep.subr.bf16.mxu0 %v13025_v45 }
0x1b6e   : > { %9881 = vmatmul.mubr.bf16.vlgmr.msra.gmra.mrb[244].mxu0 %v12887_v63 }
0x1b6f   : > { %12313 = vmatprep.mubr.msk.bf16.mxu0 %vm13026_vm2, %v13025_v45 }
0x1ba1   : > { %v9367_v25 = vpop.f32.mrb[228].mxu0 }
0x1ba2   : > { %v17501_v22 = vadd.f32 %v9367_v25, %v17350_v30  ;;  %v12275_v28 = vpop.f32.mrb[229].mxu0 }
0x1ba3   : > { %v9370_v32 = vpop.f32.mrb[230].mxu0 }
0x1ba4   : > { %v17505_v48 = vadd.f32 %v9370_v32, %v17354_v51  ;;  %v12276_v47 = vpop.f32.mrb[231].mxu0 }
0x1bc9   : > { %v9481_v30 = vpop.f32.mrb[232].mxu0 }
0x1bca   : > { %v9488_v50 = vmax.f32 %v17422_v5, %v9481_v30  ;;  %v9483_v58 = vpop.f32.mrb[233].mxu0  ;;  %v12897_v5 = vld [vmem:[%s17698_s6 + $0x630] sm:$0xff]  }
0x1bcb   : > { %v9484_v44 = vpop.f32.mrb[234].mxu0 }
0x1bcc   : > { %v9489_v51 = vmax.f32 %v17425_v15, %v9484_v44  ;;  %v9546_v33 = vmax.f32 %v9488_v50, %v17443_v62  ;;  %v9486_v53 = vpop.f32.mrb[235].mxu0  ;;  %v12899_v15 = vld [vmem:[%s17700_s8] sm:$0xff]   ;;  %v12901_v62 = vld [vmem:[%s17700_s8 + $0x10] sm:$0xff]  }
0x1bce   : > { %v9547_v0 = vmax.f32 %v9489_v51, %v17445_v8  ;;  %v12903_v8 = vld [vmem:[%s17700_s8 + $0x20] sm:$0xff]  }
0x1bf1   : > { %v9597_v46 = vpop.f32.mrb[236].mxu0 }
0x1bf2   : > { %v9604_v49 = vmax.f32 %v9546_v33, %v9597_v46  ;;  %v9599_v31 = vpop.f32.mrb[237].mxu0  ;;  %v12905_v46 = vld [vmem:[%s17700_s8 + $0x30] sm:$0xff]  }
0x1bf3   : > { %v9600_v54 = vpop.f32.mrb[238].mxu0  ;;  %v12907_v31 = vld [vmem:[%s17702_s10] sm:$0xff]  }
0x1bf4   : > { %v9606_v55 = vadd.f32 %v17032_v34, %v9604_v49  ;;  %v9605_v4 = vmax.f32 %v9547_v0, %v9600_v54  ;;  %v9602_v2 = vpop.f32.mrb[239].mxu0  ;;  %v12904_v0 = vld [vmem:[%s17700_s8 + $0x28] sm:$0xff]   ;;  %v12906_v49 = vld [vmem:[%s17700_s8 + $0x38] sm:$0xff]  }
0x1bf5   : > { %v12908_v54 = vld [vmem:[%s17702_s10 + $0x8] sm:$0xff]   ;;  %v12911_v2 = vld [vmem:[%s17702_s10 + $0x20] sm:$0xff]  }
0x1bf6   : > { %v9607_v56 = vadd.f32 %v17032_v34, %v9605_v4  ;;  %v9608_v3 = vmax.f32 %v9606_v55, 0.0  ;;  %v12884_v34 = vld [vmem:[%s13609_s16 + $0x180] ss:$8 sps:$4 sm:$0xff]  }
0x1bf7   : > { %v12909_v55 = vld [vmem:[%s17702_s10 + $0x10] sm:$0xff]   ;;  %v12910_v4 = vld [vmem:[%s17702_s10 + $0x18] sm:$0xff]  }
0x1bf8   : > { %v9609_v1 = vmax.f32 %v9607_v56, 0.0  ;;  %v12912_v56 = vld [vmem:[%s17702_s10 + $0x28] sm:$0xff]  }
0x1bfa   : > { %v9610_v57 = vpack.c.bf16 %v9609_v1, %v9608_v3  ;;  %v11545_v1 = vld [vmem:[%s17699_s7] ss:$0 sm:$0xff] }
0x1bfc   : > { %12294 = vmatmul.mubr.bf16.vlgmr.msra.gmra.mrb[236].mxu1 %v9610_v57 }
0x1bfd   : > { %9791 = vmatpush1.bf16.msra.mxu1 %v17148_v43  ;;  %11510 = vmatprep.mubr.msk.bf16.mxu1 %vm1496_vm0, %v12882_v13 }
0x1bfe   : > { %9792 = vmatprep.subr.bf16.mxu1 %v13024_v9 }
0x1c01   : > { %9793 = vmatpush1.bf16.msra.mxu1 %v17375_v60 }
0x1c02   : > { %9794 = vmatprep.subr.bf16.mxu1 %v13024_v9 }
0x1c05   : > { %9795 = vmatpush1.bf16.msra.mxu1 %v17244_v7 }
0x1c06   : > { %9796 = vmatprep.subr.bf16.mxu1 %v13024_v9 }
0x1c09   : > { %9797 = vmatpush1.bf16.msra.mxu1 %v17251_v6 }
0x1c0a   : > { %9798 = vmatprep.subr.bf16.mxu1 %v13024_v9 }
0x1c0d   : > { %9799 = vmatpush1.bf16.msra.mxu1 %v17317_v27 }
0x1c0e   : > { %9800 = vmatprep.subr.bf16.mxu1 %v13024_v9 }
0x1c11   : > { %9801 = vmatpush1.bf16.msra.mxu1 %v17324_v52 }
0x1c12   : > { %9802 = vmatprep.subr.bf16.mxu1 %v13024_v9 }
0x1c15   : > { %9803 = vmatpush1.bf16.msra.mxu1 %v17331_v16 }
0x1c16   : > { %9804 = vmatprep.subr.bf16.mxu1 %v13024_v9 }
0x1c19   : > { %9805 = vmatpush1.bf16.msra.mxu1 %v17338_v42 }
0x1c1a   : > { %9806 = vmatprep.subr.bf16.mxu1 %v13024_v9 }
0x1c1d   : > { %9807 = vmatpush1.bf16.msra.mxu1 %v17345_v23 }
0x1c1e   : > { %9808 = vmatprep.subr.bf16.mxu1 %v13024_v9 }
0x1c21   : > { %9809 = vmatpush1.bf16.msra.mxu1 %v13666_v21 }
0x1c22   : > { %9906 = vmatprep.subr.bf16.mxu1 %v13024_v9 }
0x1c24   : > { %9823 = vmatmul.mubr.bf16.vlgmr.msra.gmra.mrb[240].mxu1 %v12884_v34 }
0x1c25   : > { %9907 = vmatpush1.bf16.msra.mxu1 %v17148_v43  ;;  %11520 = vmatprep.mubr.msk.bf16.mxu1 %vm1496_vm0, %v12888_v59  ;;  %v12890_v43 = vld [vmem:[%s13615_s17 + $0x180] ss:$8 sps:$4 sm:$0xff]  }
0x1c26   : > { %9908 = vmatprep.subr.bf16.mxu1 %v13024_v9 }
0x1c29   : > { %9909 = vmatpush1.bf16.msra.mxu1 %v17375_v60  ;;  %v12893_v60 = vld [vmem:[%s17698_s6 + $0x610] sm:$0xff]  }
0x1c2a   : > { %9910 = vmatprep.subr.bf16.mxu1 %v13024_v9 }
0x1c2d   : > { %9911 = vmatpush1.bf16.msra.mxu1 %v17244_v7  ;;  %v9768_v7 = vpop.f32.mrb[240].mxu0 }
0x1c2e   : > { %9912 = vmatprep.subr.bf16.mxu1 %v13024_v9 }
0x1c31   : > { %9913 = vmatpush1.bf16.msra.mxu1 %v17251_v6  ;;  %v9770_v6 = vpop.f32.mrb[241].mxu0 }
0x1c32   : > { %9914 = vmatprep.subr.bf16.mxu1 %v13024_v9 }
0x1c35   : > { %9915 = vmatpush1.bf16.msra.mxu1 %v17317_v27  ;;  %v9771_v27 = vpop.f32.mrb[242].mxu0 }
0x1c36   : > { %9916 = vmatprep.subr.bf16.mxu1 %v13024_v9 }
0x1c39   : > { %9917 = vmatpush1.bf16.msra.mxu1 %v17324_v52  ;;  %v9773_v52 = vpop.f32.mrb[243].mxu0 }
0x1c3a   : > { %9918 = vmatprep.subr.bf16.mxu1 %v13024_v9 }
0x1c3d   : > { %9919 = vmatpush1.bf16.msra.mxu1 %v17331_v16 }
0x1c3e   : > { %9920 = vmatprep.subr.bf16.mxu1 %v13024_v9 }
0x1c41   : > { %9921 = vmatpush1.bf16.msra.mxu1 %v17338_v42  ;;  %v9882_v16 = vpop.f32.mrb[244].mxu0 }
0x1c42   : > { %9922 = vmatprep.subr.bf16.mxu1 %v13024_v9  ;;  %v9884_v42 = vpop.f32.mrb[245].mxu0 }
0x1c43   : > { %v9885_v36 = vpop.f32.mrb[246].mxu0  ;;  %v12913_v42 = vld [vmem:[%s17702_s10 + $0x30] sm:$0xff]  }
0x1c45   : > { %9923 = vmatpush1.bf16.msra.mxu1 %v17345_v23  ;;  %v9887_v23 = vpop.f32.mrb[247].mxu0 }
0x1c46   : > { %9924 = vmatprep.subr.bf16.mxu1 %v13024_v9  ;;  %v12891_v9 = vld [vmem:[%s17698_s6 + $0x600] sm:$0xff]  }
0x1c47   : > { %12298 = vmatpush3.bf16.msra.mxu0 %v12891_v9  ;;  %v11546_v9 = vld [vmem:[%s17701_s9] ss:$0 sm:$0xff] }
0x1c48   : > { %12299 = vmatprep.subr.bf16.mxu0 %v13025_v45 }
0x1c49   : > { %9925 = vmatpush1.bf16.msra.mxu1 %v13666_v21  ;;  %v12892_v21 = vld [vmem:[%s17698_s6 + $0x608] sm:$0xff]  }
0x1c4a   : > { %12317 = vmatprep.subr.bf16.mxu1 %v13025_v45 }
0x1c4b   : > { %12300 = vmatpush3.bf16.msra.mxu0 %v12892_v21 }
0x1c4c   : > { %9939 = vmatmul.mubr.bf16.vlgmr.msra.gmra.mrb[244].mxu1 %v12890_v43  ;;  %12301 = vmatprep.subr.bf16.mxu0 %v13025_v45 }
0x1c4d   : > { %12333 = vmatprep.mubr.msk.bf16.mxu1 %vm13026_vm2, %v13025_v45  ;;  %12318 = vmatpush3.bf16.msra.mxu1 %v12899_v15 }
0x1c4e   : > { %12319 = vmatprep.subr.bf16.mxu1 %v13025_v45 }
0x1c4f   : > { %12302 = vmatpush3.bf16.msra.mxu0 %v12893_v60 }
0x1c50   : > { %12303 = vmatprep.subr.bf16.mxu0 %v13025_v45 }
0x1c51   : > { %12320 = vmatpush3.bf16.msra.mxu1 %v12900_v17 }
0x1c52   : > { %12321 = vmatprep.subr.bf16.mxu1 %v13025_v45 }
0x1c53   : > { %12304 = vmatpush3.bf16.msra.mxu0 %v12894_v61 }
0x1c54   : > { %12305 = vmatprep.subr.bf16.mxu0 %v13025_v45 }
0x1c55   : > { %12322 = vmatpush3.bf16.msra.mxu1 %v12901_v62 }
0x1c56   : > { %12323 = vmatprep.subr.bf16.mxu1 %v13025_v45 }
0x1c57   : > { %12306 = vmatpush3.bf16.msra.mxu0 %v12895_v35 }
0x1c58   : > { %12307 = vmatprep.subr.bf16.mxu0 %v13025_v45 }
0x1c59   : > { %12324 = vmatpush3.bf16.msra.mxu1 %v12902_v12 }
0x1c5a   : > { %12325 = vmatprep.subr.bf16.mxu1 %v13025_v45 }
0x1c5b   : > { %12308 = vmatpush3.bf16.msra.mxu0 %v12896_v37 }
0x1c5c   : > { %12309 = vmatprep.subr.bf16.mxu0 %v13025_v45 }
0x1c5d   : > { %12326 = vmatpush3.bf16.msra.mxu1 %v12903_v8 }
0x1c5e   : > { %12327 = vmatprep.subr.bf16.mxu1 %v13025_v45 }
0x1c5f   : > { %12310 = vmatpush3.bf16.msra.mxu0 %v12897_v5 }
0x1c60   : > { %12311 = vmatprep.subr.bf16.mxu0 %v13025_v45 }
0x1c61   : > { %12328 = vmatpush3.bf16.msra.mxu1 %v12904_v0 }
0x1c62   : > { %12329 = vmatprep.subr.bf16.mxu1 %v13025_v45 }
0x1c63   : > { %12312 = vmatpush3.bf16.msra.mxu0 %v12898_v38 }
0x1c64   : > { %12337 = vmatprep.subr.bf16.mxu0 %v13025_v45 }
0x1c65   : > { %12330 = vmatpush3.bf16.msra.mxu1 %v12905_v46 }
0x1c66   : > { %12331 = vmatprep.subr.bf16.mxu1 %v13025_v45 }
0x1c69   : > { %12332 = vmatpush3.bf16.msra.mxu1 %v12906_v49 }
0x1ccf   : > { %v9710_v11 = vpop.f32.mrb[236].mxu1 }
0x1cd0   : > { %v9717_v39 = vadd.f32 %v9710_v11, %v17501_v22  ;;  %v12295_v19 = vpop.f32.mrb[237].mxu1  ;;  %v12999_v22 = vld [vmem:[%s17697_s5] ss:$0 sm:$0xff] }
0x1cd1   : > { %v9713_v24 = vpop.f32.mrb[238].mxu1 }
0x1cd2   : > { %v9718_v14 = vadd.f32 %v9713_v24, %v17505_v48  ;;  %v12296_v40 = vpop.f32.mrb[239].mxu1 }
0x1cf7   : > { %v9824_v18 = vpop.f32.mrb[240].mxu1 }
0x1cf8   : > { %v9831_v41 = vmax.f32 %v9768_v7, %v9824_v18  ;;  %v9826_v26 = vpop.f32.mrb[241].mxu1 }
0x1cf9   : > { %v9827_v20 = vpop.f32.mrb[242].mxu1 }
0x1cfa   : > { %v9832_v10 = vmax.f32 %v9771_v27, %v9827_v20  ;;  %v9889_v25 = vmax.f32 %v9831_v41, %v9882_v16  ;;  %v9829_v28 = vpop.f32.mrb[243].mxu1 }
0x1cfc   : > { %v9890_v32 = vmax.f32 %v9832_v10, %v9885_v36  ;;  %v12914_v36 = vld [vmem:[%s17702_s10 + $0x38] sm:$0xff]  }
0x1d1f   : > { %v9940_v29 = vpop.f32.mrb[244].mxu1 }
0x1d20   : > { %v9947_v47 = vmax.f32 %v9889_v25, %v9940_v29  ;;  %v9942_v63 = vpop.f32.mrb[245].mxu1 }
0x1d21   : > { %v9943_v30 = vpop.f32.mrb[246].mxu1 }
0x1d22   : > { %v9949_v50 = vadd.f32 %v12999_v22, %v9947_v47  ;;  %v9948_v58 = vmax.f32 %v9890_v32, %v9943_v30  ;;  %v9945_v48 = vpop.f32.mrb[247].mxu1 }
0x1d24   : > { %v9950_v44 = vadd.f32 %v12999_v22, %v9948_v58  ;;  %v9951_v51 = vmax.f32 %v9949_v50, 0.0 }
0x1d26   : > { %v9952_v33 = vmax.f32 %v9950_v44, 0.0 }
0x1d28   : > { %v9953_v53 = vpack.c.bf16 %v9952_v33, %v9951_v51 }
0x1d2a   : > { %12314 = vmatmul.mubr.bf16.vlgmr.msra.gmra.mrb[248].mxu0 %v9953_v53 }
0x1d2b   : > { %12353 = vmatprep.mubr.msk.bf16.mxu0 %vm13026_vm2, %v13025_v45  ;;  %12338 = vmatpush3.bf16.msra.mxu0 %v12907_v31 }
0x1d2c   : > { %12339 = vmatprep.subr.bf16.mxu0 %v13025_v45 }
0x1d2f   : > { %12340 = vmatpush3.bf16.msra.mxu0 %v12908_v54 }
0x1d30   : > { %12341 = vmatprep.subr.bf16.mxu0 %v13025_v45 }
0x1d33   : > { %12342 = vmatpush3.bf16.msra.mxu0 %v12909_v55 }
0x1d34   : > { %12343 = vmatprep.subr.bf16.mxu0 %v13025_v45 }
0x1d37   : > { %12344 = vmatpush3.bf16.msra.mxu0 %v12910_v4 }
0x1d38   : > { %12345 = vmatprep.subr.bf16.mxu0 %v13025_v45 }
0x1d3b   : > { %12346 = vmatpush3.bf16.msra.mxu0 %v12911_v2 }
0x1d3c   : > { %12347 = vmatprep.subr.bf16.mxu0 %v13025_v45 }
0x1d3f   : > { %12348 = vmatpush3.bf16.msra.mxu0 %v12912_v56 }
0x1d40   : > { %12349 = vmatprep.subr.bf16.mxu0 %v13025_v45 }
0x1d43   : > { %12350 = vmatpush3.bf16.msra.mxu0 %v12913_v42 }
0x1d44   : > { %12351 = vmatprep.subr.bf16.mxu0 %v13025_v45  ;;  %v11555_v45 = vld [vmem:[%s17703_s11] ss:$0 sm:$0xff] }
0x1d47   : > { %12352 = vmatpush3.bf16.msra.mxu0 %v12914_v36 }
0x1dfd   : > { %v10053_v3 = vpop.f32.mrb[248].mxu0 }
0x1dfe   : > { %v10060_v13 = vadd.f32 %v10053_v3, %v9717_v39  ;;  %v12315_v57 = vpop.f32.mrb[249].mxu0 }
0x1dff   : > { %v10056_v34 = vpop.f32.mrb[250].mxu0 }
0x1e00   : > { %v10069_v59 = vadd.f32 %v11545_v1, %v10060_v13  ;;  %v10061_v43 = vadd.f32 %v10056_v34, %v9718_v14  ;;  %v12316_v7 = vpop.f32.mrb[251].mxu0 }
0x1e02   : > { %v10070_v6 = vadd.f32 %v11545_v1, %v10061_v43  ;;  %v10071_v27 = vmax.f32 %v10069_v59, 0.0 }
0x1e04   : > { %v10072_v52 = vmax.f32 %v10070_v6, 0.0 }
0x1e06   : > { %v10073_v16 = vpack.c.bf16 %v10072_v52, %v10071_v27 }
0x1e08   : > { %12334 = vmatmul.mubr.bf16.vlgmr.msra.gmra.mrb[248].mxu1 %v10073_v16 }
0x1edb   : > { %v10179_v23 = vpop.f32.mrb[248].mxu1 }
0x1edc   : > { %v10180_v21 = vadd.f32 %v11546_v9, %v10179_v23  ;;  %v12335_v60 = vpop.f32.mrb[249].mxu1 }
0x1edd   : > { %v10182_v61 = vpop.f32.mrb[250].mxu1 }
0x1ede   : > { %v10183_v35 = vadd.f32 %v11546_v9, %v10182_v61  ;;  %v12336_v37 = vpop.f32.mrb[251].mxu1  ;;  %v10186_v5 = vmax.f32 %v10180_v21, 0.0 }
0x1ee0   : > { %v10187_v38 = vmax.f32 %v10183_v35, 0.0 }
0x1ee2   : > { %v10188_v15 = vpack.c.bf16 %v10187_v38, %v10186_v5 }
0x1ee4   : > { %12354 = vmatmul.mubr.bf16.vlgmr.msra.gmra.mrb[252].mxu0 %v10188_v15 }
0x1fb7   : > { %v10294_v17 = vpop.f32.mrb[252].mxu0 }
0x1fb8   : > { %v10295_v62 = vadd.f32 %v11555_v45, %v10294_v17  ;;  %v12355_v12 = vpop.f32.mrb[253].mxu0 }
0x1fb9   : > { %v10297_v8 = vpop.f32.mrb[254].mxu0 }
0x1fba   : > { %10301 = vmax.xlane.f32.xlu0 %v10295_v62  ;;  %v12356_v11 = vpop.f32.mrb[255].mxu0  ;;  %v10298_v39 = vadd.f32 %v11555_v45, %v10297_v8 }
0x1fbe   : > { %10303 = vmax.xlane.f32.xlu0 %v10298_v39 }
0x2047   : > { %v10302_v19 = vpop.xlane.xlu0 %10301 }
0x2048   : > { %v10305_v24 = vsub.f32 %v10295_v62, %v10302_v19 }
0x204a   : > { %v10307_v14 = vmul.f32 1.442695, %v10305_v24 }
0x204b   : > { %v10304_v40 = vpop.xlane.xlu0 %10303 }
0x204c   : > { %v10306_v18 = vsub.f32 %v10298_v39, %v10304_v40  ;;  %12915 = vpow2.f32 %v10307_v14 }
0x204e   : > { %v10309_v41 = vmul.f32 1.442695, %v10306_v18 }
0x2050   : > { %12917 = vpow2.f32 %v10309_v41 }
0x2056   : > { %v12916_v26 = vpop.eup %12915 }
0x2057   : > { %10311 = vadd.xlane.f32.xlu1 %v12916_v26 }
0x205a   : > { %v12918_v20 = vpop.eup %12917 }
0x205b   : > { %10313 = vadd.xlane.f32.xlu1 %v12918_v20 }
0x20e4   : > { %v10312_v10 = vpop.xlane.xlu1 %10311 }
0x20e5   : > { %12919 = vlog2.f32 %v10312_v10 }
0x20e8   : > { %v10314_v25 = vpop.xlane.xlu1 %10313 }
0x20e9   : > { %12921 = vlog2.f32 %v10314_v25 }
0x20ef   : > { %v12920_v28 = vpop.eup %12919 }
0x20f0   : > { %v10316_v32 = vmul.f32 0.6931472, %v12920_v28 }
0x20f2   : > { %v10319_v29 = vsub.f32 %v10305_v24, %v10316_v32 }
0x20f3   : > { %v12922_v47 = vpop.eup %12921 }
0x20f4   : > { %10321 = vst [vmem:[%s1405_s30] sm:$0xff] %v10319_v29  ;;  %v10318_v63 = vmul.f32 0.6931472, %v12922_v47 }
0x20f6   : > { %v10320_v30 = vsub.f32 %v10306_v18, %v10318_v63 }
0x20f8   : > { %10322 = vst [vmem:[%s1405_s30 + $0x8] sm:$0xff] %v10320_v30 }
0x20f9 PF: > { %p19_p9 = scmp.ge.s32.totalorder %s13109_s25, 4   ;;  %s17706_s21 = smov %s13018_s22 }
0x20fa   : > { %s17707_s22 = smov %s13118_s28  ;;  %s17708_s23 = smov %s13109_s25 }
0x20fb   :  { %21 = sbr.rel (!%p19_p9) target bundleno = 2 (0x2), region = 399 }

</bundles_post_ra>
